<compile_context>
chip_gen: v6e
topology: v6e:2x2x1
jax: 0.10.0
libtpu: 0.0.40
codegen_flags: <defaults>
</compile_context>

<pallas_src>
import functools

import numpy as np
import jax
import jax.numpy as jnp
from jax.experimental import pallas as pl
from jax.experimental.pallas import tpu as pltpu


# ----------------------------------------------------------------------------
# Generic fused conv kernel (shared by Conv3d and phase-decomposed
# ConvTranspose3d).
#
# Per batch element:
#   x_ref : (1, R, S, L)        R = D + halo rows, S = H + halo rows,
#                               L = (W + halo) * Cin packed into lanes
#   w_ref : (9, L, Nout)        banded weight, one slab per (kd, kh) tap;
#                               kw taps and channels folded into (L, Nout)
#   b_ref : (1, Nout)           f32 bias (already tiled over the lane packing)
#   o_ref : (1, P, D*H, Nout)   P output row-phases (1 for conv, 4 = (d, h)
#                               parities for the transposed conv)
# ----------------------------------------------------------------------------
def _fused_conv_kernel(x_ref, w_ref, b_ref, o_ref, *, taps_by_phase, D, H, act):
    L = x_ref.shape[-1]
    for p, taps in enumerate(taps_by_phase):
        acc = None
        for (od, oh, t) in taps:                       # static python unroll
            a = x_ref[0, od:od + D, oh:oh + H, :].reshape(D * H, L)   # bf16
            c = jnp.dot(a, w_ref[t], preferred_element_type=jnp.float32)
            acc = c if acc is None else acc + c
        acc = acc + b_ref[...].astype(jnp.float32)
        if act == "relu":
            acc = jnp.maximum(acc, 0.0)
        elif act == "sigmoid":
            acc = jax.nn.sigmoid(acc)
        o_ref[0, p] = acc.astype(o_ref.dtype)


def _call_fused_conv(xp, band, bias, *, taps_by_phase, D, H, P, Nout, act,
                     out_dtype):
    n, R, S, L = xp.shape
    kern = functools.partial(_fused_conv_kernel, taps_by_phase=taps_by_phase,
                             D=D, H=H, act=act)
    return pl.pallas_call(
        kern,
        out_shape=jax.ShapeDtypeStruct((n, P, D * H, Nout), out_dtype),
        grid_spec=pltpu.PrefetchScalarGridSpec(
            num_scalar_prefetch=0,
            grid=(n,),                                   # one batch elem / step
            in_specs=[
                pl.BlockSpec((1, R, S, L), lambda i: (i, 0, 0, 0)),
                pl.BlockSpec((9, L, Nout), lambda i: (0, 0, 0)),   # resident
                pl.BlockSpec((1, Nout), lambda i: (0, 0)),         # resident
            ],
            out_specs=pl.BlockSpec((1, P, D * H, Nout), lambda i: (i, 0, 0, 0)),
        ),
        compiler_params=pltpu.CompilerParams(
            dimension_semantics=("parallel",),
            vmem_limit_bytes=32 * 1024 * 1024,           # safe on v5e/v6e/v7x
        ),
    )(xp.astype(jnp.bfloat16), band, bias)


# ----------------------------------------------------------------------------
# Banded weight construction (tiny, done once per forward in XLA)
# ----------------------------------------------------------------------------
def _conv_banded_weight(w, W):
    """w: (Cout, Cin, 3, 3, 3) torch layout -> (9, (W+2)*Cin, W*Cout) bf16."""
    Cout, Cin = w.shape[0], w.shape[1]
    wt = jnp.transpose(w, (2, 3, 4, 1, 0))               # (kd, kh, kw, ci, co)
    sel = np.zeros((3, W + 2, W), np.float32)            # [kw, w_in, w_out]
    for kw in range(3):
        for wo in range(W):
            sel[kw, wo + kw, wo] = 1.0
    band = jnp.einsum("kio,abkcf->abicof", jnp.asarray(sel), wt)
    return band.reshape(9, (W + 2) * Cin, W * Cout).astype(jnp.bfloat16)


def _deconv_banded_weight(w, W):
    """w: (Cin, Cout, 3, 3, 3) torch layout -> (9, (W+1)*Cin, 2W*Cout) bf16."""
    Cin, Cout = w.shape[0], w.shape[1]
    wt = jnp.transpose(w, (2, 3, 4, 0, 1))               # (kd, kh, kw, ci, co)
    sel = np.zeros((3, W + 1, 2 * W), np.float32)        # [kw, w_in, w_out]
    for wo in range(2 * W):
        mw, pw = wo // 2, wo % 2
        if pw == 0:                                      # even output col
            sel[1, mw, wo] = 1.0
        else:                                            # odd output col
            sel[2, mw, wo] = 1.0
            sel[0, mw + 1, wo] = 1.0
    band = jnp.einsum("kio,abkcf->abicof", jnp.asarray(sel), wt)
    return band.reshape(9, (W + 1) * Cin, 2 * W * Cout).astype(jnp.bfloat16)


# ----------------------------------------------------------------------------
# Layer wrappers
# ----------------------------------------------------------------------------
def conv3d_fused(x, w, b, act):
    """Conv3d(k=3, s=1, p=1) + bias + act. x: (N, D, H, W, Cin) channels-last."""
    n, D, H, W, Cin = x.shape
    Cout = w.shape[0]
    assert D % 8 == 0 and H % 8 == 0
    xp = jnp.pad(x, ((0, 0), (1, 1), (1, 1), (1, 1), (0, 0)))
    xp = xp.reshape(n, D + 2, H + 2, (W + 2) * Cin)
    band = _conv_banded_weight(w, W)
    bias = jnp.tile(b, W).reshape(1, W * Cout).astype(jnp.float32)
    taps = (tuple((kd, kh, kd * 3 + kh) for kd in range(3) for kh in range(3)),)
    out = _call_fused_conv(xp, band, bias, taps_by_phase=taps, D=D, H=H, P=1,
                           Nout=W * Cout, act=act, out_dtype=jnp.bfloat16)
    return out.reshape(n, D, H, W, Cout)


def conv_transpose3d_fused(x, w, b, act, out_dtype=jnp.bfloat16):
    """ConvTranspose3d(k=3, s=2, p=1, output_padding=1), phase-decomposed.

    x: (N, D, H, W, Cin); w: (Cin, Cout, 3, 3, 3); output spatial size = 2x.
    """
    n, D, H, W, Cin = x.shape
    Cout = w.shape[1]
    Dc, Hc = max(8, D), max(8, H)          # round row dims up to sublane tile
    xp = jnp.pad(x, ((0, 0), (0, Dc + 1 - D), (0, Hc + 1 - H), (0, 1), (0, 0)))
    xp = xp.reshape(n, Dc + 1, Hc + 1, (W + 1) * Cin)
    band = _deconv_banded_weight(w, W)
    bias = jnp.tile(b, 2 * W).reshape(1, 2 * W * Cout).astype(jnp.float32)

    def par(p):   # per-dim taps for output parity p: (input row offset, k idx)
        return ((0, 1),) if p == 0 else ((0, 2), (1, 0))

    taps = tuple(
        tuple((od, oh, kd * 3 + kh) for (od, kd) in par(pd) for (oh, kh) in par(ph))
        for pd in (0, 1) for ph in (0, 1))                 # 9 taps total
    out = _call_fused_conv(xp, band, bias, taps_by_phase=taps, D=Dc, H=Hc, P=4,
                           Nout=2 * W * Cout, act=act, out_dtype=out_dtype)
    # out[n, pd*2+ph, md*Hc+mh, wo*Cout+co] -> y[n, 2*md+pd, 2*mh+ph, wo, co]
    out = out.reshape(n, 2, 2, Dc, Hc, 2 * W, Cout)[:, :, :, :D, :H]
    y = out.transpose(0, 3, 1, 4, 2, 5, 6).reshape(n, 2 * D, 2 * H, 2 * W, Cout)
    return y


def maxpool3d_2x(x):
    """MaxPool3d(2, 2) on NDHWC — tiny XLA windowed max (see TODO above)."""
    n, d, h, w, c = x.shape
    return x.reshape(n, d // 2, 2, h // 2, 2, w // 2, 2, c).max(axis=(2, 4, 6))


# ----------------------------------------------------------------------------
# Model: parameters + forward
# ----------------------------------------------------------------------------
def init_params(key):
    def uniform(k, shape, fan_in):
        bound = 1.0 / jnp.sqrt(fan_in)
        return jax.random.uniform(k, shape, jnp.float32, -bound, bound)

    ks = jax.random.split(key, 8)
    return {
        # encoder (Conv3d weight layout: (Cout, Cin, 3, 3, 3))
        "enc1_w": uniform(ks[0], (16, 1, 3, 3, 3), 1 * 27),
        "enc1_b": uniform(ks[1], (16,), 1 * 27),
        "enc2_w": uniform(ks[2], (12, 16, 3, 3, 3), 16 * 27),
        "enc2_b": uniform(ks[3], (12,), 16 * 27),
        # decoder (ConvTranspose3d weight layout: (Cin, Cout, 3, 3, 3))
        "dec1_w": uniform(ks[4], (12, 16, 3, 3, 3), 12 * 27),
        "dec1_b": uniform(ks[5], (16,), 12 * 27),
        "dec2_w": uniform(ks[6], (16, 1, 3, 3, 3), 16 * 27),
        "dec2_b": uniform(ks[7], (1,), 16 * 27),
    }


def autoencoder_forward(x_ncdhw, params):
    # PyTorch NCDHW -> NDHWC (bf16 activations, f32 accumulation in-kernel).
    x = jnp.transpose(x_ncdhw, (0, 2, 3, 4, 1)).astype(jnp.bfloat16)
    # encoder
    x = conv3d_fused(x, params["enc1_w"], params["enc1_b"], "relu")
    x = maxpool3d_2x(x)
    x = conv3d_fused(x, params["enc2_w"], params["enc2_b"], "relu")
    x = maxpool3d_2x(x)
    # decoder
    x = conv_transpose3d_fused(x, params["dec1_w"], params["dec1_b"], "relu")
    x = conv_transpose3d_fused(x, params["dec2_w"], params["dec2_b"], "sigmoid",
                               out_dtype=jnp.float32)
    return jnp.transpose(x, (0, 4, 1, 2, 3))


if __name__ == "__main__":
    key = jax.random.PRNGKey(0)
    pkey, xkey = jax.random.split(key)
    params = init_params(pkey)

    # input: (batch=2, channels=1, D=16, H=16, W=16) matching Conv3d(1, ...)
    x = jax.random.normal(xkey, (2, 1, 16, 16, 16), dtype=jnp.float32)

    fwd = jax.jit(autoencoder_forward)
    y = fwd(x, params)
    y = jax.block_until_ready(y)

    assert y.shape == (2, 1, 16, 16, 16), y.shape
    assert y.dtype == jnp.float32
    assert bool(jnp.all(jnp.isfinite(y)))
    assert bool(jnp.all((y >= 0.0) & (y <= 1.0)))   # sigmoid output range
    print("KERNEL_OK")
</pallas_src>

<mosaic_0001>
module attributes {stable_mosaic.version = 11 : i64} {
  func.func @_fused_conv_kernel(%arg0: i32, %arg1: memref<1x18x18x18xbf16, #tpu.memory_space<vmem>>, %arg2: memref<9x18x256xbf16, #tpu.memory_space<vmem>>, %arg3: memref<1x256xf32, #tpu.memory_space<vmem>>, %arg4: memref<1x1x256x256xbf16, #tpu.memory_space<vmem>>) attributes {dimension_semantics = [#tpu.dimension_semantics<parallel>], iteration_bounds = array<i64: 2>, scalar_prefetch = 0 : i64, scratch_operands = 0 : i64, tpu.core_type = #tpu.core_type<tc>, window_params = [{transform_indices = @transform_0, window_bounds = array<i64: 1, 18, 18, 18>}, {pipeline_mode = #tpu.pipeline_mode<synchronous>, transform_indices = @transform_1, window_bounds = array<i64: 9, 18, 256>}, {pipeline_mode = #tpu.pipeline_mode<synchronous>, transform_indices = @transform_2, window_bounds = array<i64: 1, 256>}, {transform_indices = @transform_3, window_bounds = array<i64: 1, 1, 256, 256>}]} {
    %c0 = arith.constant 0 : index
    %c0_0 = arith.constant 0 : index
    %c0_1 = arith.constant 0 : index
    %c0_2 = arith.constant 0 : index
    %0 = vector.load %arg1[%c0, %c0_0, %c0_1, %c0_2] : memref<1x18x18x18xbf16, #tpu.memory_space<vmem>>, vector<1x16x16x18xbf16>
    %1 = vector.shape_cast %0 : vector<1x16x16x18xbf16> to vector<16x16x18xbf16>
    %2 = vector.shape_cast %1 : vector<16x16x18xbf16> to vector<256x18xbf16>
    %c0_3 = arith.constant 0 : index
    %c0_4 = arith.constant 0 : index
    %c0_5 = arith.constant 0 : index
    %3 = vector.load %arg2[%c0_3, %c0_4, %c0_5] : memref<9x18x256xbf16, #tpu.memory_space<vmem>>, vector<1x18x256xbf16>
    %4 = vector.shape_cast %3 : vector<1x18x256xbf16> to vector<18x256xbf16>
    %cst = arith.constant dense<0.000000e+00> : vector<256x256xf32>
    %5 = tpu.matmul %2, %4, %cst {dimension_numbers = #tpu.dot_dimension_numbers<[1], [0], [0], [1], [0, 0, 1, 1], [], []>} : vector<256x18xbf16>, vector<18x256xbf16>, vector<256x256xf32> -> vector<256x256xf32>
    %c0_6 = arith.constant 0 : index
    %c0_7 = arith.constant 0 : index
    %c1 = arith.constant 1 : index
    %c0_8 = arith.constant 0 : index
    %6 = vector.load %arg1[%c0_6, %c0_7, %c1, %c0_8] : memref<1x18x18x18xbf16, #tpu.memory_space<vmem>>, vector<1x16x16x18xbf16>
    %7 = vector.shape_cast %6 : vector<1x16x16x18xbf16> to vector<16x16x18xbf16>
    %8 = vector.shape_cast %7 : vector<16x16x18xbf16> to vector<256x18xbf16>
    %c1_9 = arith.constant 1 : index
    %c0_10 = arith.constant 0 : index
    %c0_11 = arith.constant 0 : index
    %9 = vector.load %arg2[%c1_9, %c0_10, %c0_11] : memref<9x18x256xbf16, #tpu.memory_space<vmem>>, vector<1x18x256xbf16>
    %10 = vector.shape_cast %9 : vector<1x18x256xbf16> to vector<18x256xbf16>
    %cst_12 = arith.constant dense<0.000000e+00> : vector<256x256xf32>
    %11 = tpu.matmul %8, %10, %cst_12 {dimension_numbers = #tpu.dot_dimension_numbers<[1], [0], [0], [1], [0, 0, 1, 1], [], []>} : vector<256x18xbf16>, vector<18x256xbf16>, vector<256x256xf32> -> vector<256x256xf32>
    %12 = arith.addf %5, %11 : vector<256x256xf32>
    %c0_13 = arith.constant 0 : index
    %c0_14 = arith.constant 0 : index
    %c2 = arith.constant 2 : index
    %c0_15 = arith.constant 0 : index
    %13 = vector.load %arg1[%c0_13, %c0_14, %c2, %c0_15] : memref<1x18x18x18xbf16, #tpu.memory_space<vmem>>, vector<1x16x16x18xbf16>
    %14 = vector.shape_cast %13 : vector<1x16x16x18xbf16> to vector<16x16x18xbf16>
    %15 = vector.shape_cast %14 : vector<16x16x18xbf16> to vector<256x18xbf16>
    %c2_16 = arith.constant 2 : index
    %c0_17 = arith.constant 0 : index
    %c0_18 = arith.constant 0 : index
    %16 = vector.load %arg2[%c2_16, %c0_17, %c0_18] : memref<9x18x256xbf16, #tpu.memory_space<vmem>>, vector<1x18x256xbf16>
    %17 = vector.shape_cast %16 : vector<1x18x256xbf16> to vector<18x256xbf16>
    %cst_19 = arith.constant dense<0.000000e+00> : vector<256x256xf32>
    %18 = tpu.matmul %15, %17, %cst_19 {dimension_numbers = #tpu.dot_dimension_numbers<[1], [0], [0], [1], [0, 0, 1, 1], [], []>} : vector<256x18xbf16>, vector<18x256xbf16>, vector<256x256xf32> -> vector<256x256xf32>
    %19 = arith.addf %12, %18 : vector<256x256xf32>
    %c0_20 = arith.constant 0 : index
    %c1_21 = arith.constant 1 : index
    %c0_22 = arith.constant 0 : index
    %c0_23 = arith.constant 0 : index
    %20 = vector.load %arg1[%c0_20, %c1_21, %c0_22, %c0_23] : memref<1x18x18x18xbf16, #tpu.memory_space<vmem>>, vector<1x16x16x18xbf16>
    %21 = vector.shape_cast %20 : vector<1x16x16x18xbf16> to vector<16x16x18xbf16>
    %22 = vector.shape_cast %21 : vector<16x16x18xbf16> to vector<256x18xbf16>
    %c3 = arith.constant 3 : index
    %c0_24 = arith.constant 0 : index
    %c0_25 = arith.constant 0 : index
    %23 = vector.load %arg2[%c3, %c0_24, %c0_25] : memref<9x18x256xbf16, #tpu.memory_space<vmem>>, vector<1x18x256xbf16>
    %24 = vector.shape_cast %23 : vector<1x18x256xbf16> to vector<18x256xbf16>
    %cst_26 = arith.constant dense<0.000000e+00> : vector<256x256xf32>
    %25 = tpu.matmul %22, %24, %cst_26 {dimension_numbers = #tpu.dot_dimension_numbers<[1], [0], [0], [1], [0, 0, 1, 1], [], []>} : vector<256x18xbf16>, vector<18x256xbf16>, vector<256x256xf32> -> vector<256x256xf32>
    %26 = arith.addf %19, %25 : vector<256x256xf32>
    %c0_27 = arith.constant 0 : index
    %c1_28 = arith.constant 1 : index
    %c1_29 = arith.constant 1 : index
    %c0_30 = arith.constant 0 : index
    %27 = vector.load %arg1[%c0_27, %c1_28, %c1_29, %c0_30] : memref<1x18x18x18xbf16, #tpu.memory_space<vmem>>, vector<1x16x16x18xbf16>
    %28 = vector.shape_cast %27 : vector<1x16x16x18xbf16> to vector<16x16x18xbf16>
    %29 = vector.shape_cast %28 : vector<16x16x18xbf16> to vector<256x18xbf16>
    %c4 = arith.constant 4 : index
    %c0_31 = arith.constant 0 : index
    %c0_32 = arith.constant 0 : index
    %30 = vector.load %arg2[%c4, %c0_31, %c0_32] : memref<9x18x256xbf16, #tpu.memory_space<vmem>>, vector<1x18x256xbf16>
    %31 = vector.shape_cast %30 : vector<1x18x256xbf16> to vector<18x256xbf16>
    %cst_33 = arith.constant dense<0.000000e+00> : vector<256x256xf32>
    %32 = tpu.matmul %29, %31, %cst_33 {dimension_numbers = #tpu.dot_dimension_numbers<[1], [0], [0], [1], [0, 0, 1, 1], [], []>} : vector<256x18xbf16>, vector<18x256xbf16>, vector<256x256xf32> -> vector<256x256xf32>
    %33 = arith.addf %26, %32 : vector<256x256xf32>
    %c0_34 = arith.constant 0 : index
    %c1_35 = arith.constant 1 : index
    %c2_36 = arith.constant 2 : index
    %c0_37 = arith.constant 0 : index
    %34 = vector.load %arg1[%c0_34, %c1_35, %c2_36, %c0_37] : memref<1x18x18x18xbf16, #tpu.memory_space<vmem>>, vector<1x16x16x18xbf16>
    %35 = vector.shape_cast %34 : vector<1x16x16x18xbf16> to vector<16x16x18xbf16>
    %36 = vector.shape_cast %35 : vector<16x16x18xbf16> to vector<256x18xbf16>
    %c5 = arith.constant 5 : index
    %c0_38 = arith.constant 0 : index
    %c0_39 = arith.constant 0 : index
    %37 = vector.load %arg2[%c5, %c0_38, %c0_39] : memref<9x18x256xbf16, #tpu.memory_space<vmem>>, vector<1x18x256xbf16>
    %38 = vector.shape_cast %37 : vector<1x18x256xbf16> to vector<18x256xbf16>
    %cst_40 = arith.constant dense<0.000000e+00> : vector<256x256xf32>
    %39 = tpu.matmul %36, %38, %cst_40 {dimension_numbers = #tpu.dot_dimension_numbers<[1], [0], [0], [1], [0, 0, 1, 1], [], []>} : vector<256x18xbf16>, vector<18x256xbf16>, vector<256x256xf32> -> vector<256x256xf32>
    %40 = arith.addf %33, %39 : vector<256x256xf32>
    %c0_41 = arith.constant 0 : index
    %c2_42 = arith.constant 2 : index
    %c0_43 = arith.constant 0 : index
    %c0_44 = arith.constant 0 : index
    %41 = vector.load %arg1[%c0_41, %c2_42, %c0_43, %c0_44] : memref<1x18x18x18xbf16, #tpu.memory_space<vmem>>, vector<1x16x16x18xbf16>
    %42 = vector.shape_cast %41 : vector<1x16x16x18xbf16> to vector<16x16x18xbf16>
    %43 = vector.shape_cast %42 : vector<16x16x18xbf16> to vector<256x18xbf16>
    %c6 = arith.constant 6 : index
    %c0_45 = arith.constant 0 : index
    %c0_46 = arith.constant 0 : index
    %44 = vector.load %arg2[%c6, %c0_45, %c0_46] : memref<9x18x256xbf16, #tpu.memory_space<vmem>>, vector<1x18x256xbf16>
    %45 = vector.shape_cast %44 : vector<1x18x256xbf16> to vector<18x256xbf16>
    %cst_47 = arith.constant dense<0.000000e+00> : vector<256x256xf32>
    %46 = tpu.matmul %43, %45, %cst_47 {dimension_numbers = #tpu.dot_dimension_numbers<[1], [0], [0], [1], [0, 0, 1, 1], [], []>} : vector<256x18xbf16>, vector<18x256xbf16>, vector<256x256xf32> -> vector<256x256xf32>
    %47 = arith.addf %40, %46 : vector<256x256xf32>
    %c0_48 = arith.constant 0 : index
    %c2_49 = arith.constant 2 : index
    %c1_50 = arith.constant 1 : index
    %c0_51 = arith.constant 0 : index
    %48 = vector.load %arg1[%c0_48, %c2_49, %c1_50, %c0_51] : memref<1x18x18x18xbf16, #tpu.memory_space<vmem>>, vector<1x16x16x18xbf16>
    %49 = vector.shape_cast %48 : vector<1x16x16x18xbf16> to vector<16x16x18xbf16>
    %50 = vector.shape_cast %49 : vector<16x16x18xbf16> to vector<256x18xbf16>
    %c7 = arith.constant 7 : index
    %c0_52 = arith.constant 0 : index
    %c0_53 = arith.constant 0 : index
    %51 = vector.load %arg2[%c7, %c0_52, %c0_53] : memref<9x18x256xbf16, #tpu.memory_space<vmem>>, vector<1x18x256xbf16>
    %52 = vector.shape_cast %51 : vector<1x18x256xbf16> to vector<18x256xbf16>
    %cst_54 = arith.constant dense<0.000000e+00> : vector<256x256xf32>
    %53 = tpu.matmul %50, %52, %cst_54 {dimension_numbers = #tpu.dot_dimension_numbers<[1], [0], [0], [1], [0, 0, 1, 1], [], []>} : vector<256x18xbf16>, vector<18x256xbf16>, vector<256x256xf32> -> vector<256x256xf32>
    %54 = arith.addf %47, %53 : vector<256x256xf32>
    %c0_55 = arith.constant 0 : index
    %c2_56 = arith.constant 2 : index
    %c2_57 = arith.constant 2 : index
    %c0_58 = arith.constant 0 : index
    %55 = vector.load %arg1[%c0_55, %c2_56, %c2_57, %c0_58] : memref<1x18x18x18xbf16, #tpu.memory_space<vmem>>, vector<1x16x16x18xbf16>
    %56 = vector.shape_cast %55 : vector<1x16x16x18xbf16> to vector<16x16x18xbf16>
    %57 = vector.shape_cast %56 : vector<16x16x18xbf16> to vector<256x18xbf16>
    %c8 = arith.constant 8 : index
    %c0_59 = arith.constant 0 : index
    %c0_60 = arith.constant 0 : index
    %58 = vector.load %arg2[%c8, %c0_59, %c0_60] : memref<9x18x256xbf16, #tpu.memory_space<vmem>>, vector<1x18x256xbf16>
    %59 = vector.shape_cast %58 : vector<1x18x256xbf16> to vector<18x256xbf16>
    %cst_61 = arith.constant dense<0.000000e+00> : vector<256x256xf32>
    %60 = tpu.matmul %57, %59, %cst_61 {dimension_numbers = #tpu.dot_dimension_numbers<[1], [0], [0], [1], [0, 0, 1, 1], [], []>} : vector<256x18xbf16>, vector<18x256xbf16>, vector<256x256xf32> -> vector<256x256xf32>
    %61 = arith.addf %54, %60 : vector<256x256xf32>
    %c0_62 = arith.constant 0 : index
    %c0_63 = arith.constant 0 : index
    %62 = vector.load %arg3[%c0_62, %c0_63] : memref<1x256xf32, #tpu.memory_space<vmem>>, vector<1x256xf32>
    %63 = vector.broadcast %62 : vector<1x256xf32> to vector<256x256xf32>
    %64 = arith.addf %61, %63 : vector<256x256xf32>
    %cst_64 = arith.constant 0.000000e+00 : f32
    %65 = vector.broadcast %cst_64 : f32 to vector<256x256xf32>
    %66 = arith.maximumf %64, %65 : vector<256x256xf32>
    %67 = arith.truncf %66 : vector<256x256xf32> to vector<256x256xbf16>
    %c0_65 = arith.constant 0 : index
    %c0_66 = arith.constant 0 : index
    %c0_67 = arith.constant 0 : index
    %c0_68 = arith.constant 0 : index
    %68 = vector.load %arg4[%c0_65, %c0_66, %c0_67, %c0_68] : memref<1x1x256x256xbf16, #tpu.memory_space<vmem>>, vector<1x1x256x256xbf16>
    %69 = vector.shape_cast %68 : vector<1x1x256x256xbf16> to vector<256x256xbf16>
    %70 = vector.shape_cast %67 : vector<256x256xbf16> to vector<1x1x256x256xbf16>
    tpu.vector_store %arg4[%c0_65, %c0_66, %c0_67, %c0_68], %70 {strides = array<i32>} : memref<1x1x256x256xbf16, #tpu.memory_space<vmem>>, vector<1x1x256x256xbf16>,
    return
  }
  func.func @transform_0(%arg0: i32) -> (i32, i32, i32, i32) {
    %c0_i32 = arith.constant 0 : i32
    %c0_i32_0 = arith.constant 0 : i32
    %c0_i32_1 = arith.constant 0 : i32
    %c0_i32_2 = arith.constant 0 : i32
    return %arg0, %c0_i32, %c0_i32_0, %c0_i32_1 : i32, i32, i32, i32
  }
  func.func @transform_1(%arg0: i32) -> (i32, i32, i32) {
    %c0_i32 = arith.constant 0 : i32
    %c0_i32_0 = arith.constant 0 : i32
    %c0_i32_1 = arith.constant 0 : i32
    %c0_i32_2 = arith.constant 0 : i32
    return %c0_i32, %c0_i32_0, %c0_i32_1 : i32, i32, i32
  }
  func.func @transform_2(%arg0: i32) -> (i32, i32) {
    %c0_i32 = arith.constant 0 : i32
    %c0_i32_0 = arith.constant 0 : i32
    %c0_i32_1 = arith.constant 0 : i32
    return %c0_i32, %c0_i32_0 : i32, i32
  }
  func.func @transform_3(%arg0: i32) -> (i32, i32, i32, i32) {
    %c0_i32 = arith.constant 0 : i32
    %c0_i32_0 = arith.constant 0 : i32
    %c0_i32_1 = arith.constant 0 : i32
    %c0_i32_2 = arith.constant 0 : i32
    return %arg0, %c0_i32, %c0_i32_0, %c0_i32_1 : i32, i32, i32, i32
  }
}

module attributes {stable_mosaic.version = 11 : i64} {
  func.func @_fused_conv_kernel(%arg0: i32, %arg1: memref<1x10x10x160xbf16, #tpu.memory_space<vmem>>, %arg2: memref<9x160x96xbf16, #tpu.memory_space<vmem>>, %arg3: memref<1x96xf32, #tpu.memory_space<vmem>>, %arg4: memref<1x1x64x96xbf16, #tpu.memory_space<vmem>>) attributes {dimension_semantics = [#tpu.dimension_semantics<parallel>], iteration_bounds = array<i64: 2>, scalar_prefetch = 0 : i64, scratch_operands = 0 : i64, tpu.core_type = #tpu.core_type<tc>, window_params = [{transform_indices = @transform_0, window_bounds = array<i64: 1, 10, 10, 160>}, {pipeline_mode = #tpu.pipeline_mode<synchronous>, transform_indices = @transform_1, window_bounds = array<i64: 9, 160, 96>}, {pipeline_mode = #tpu.pipeline_mode<synchronous>, transform_indices = @transform_2, window_bounds = array<i64: 1, 96>}, {transform_indices = @transform_3, window_bounds = array<i64: 1, 1, 64, 96>}]} {
    %c0 = arith.constant 0 : index
    %c0_0 = arith.constant 0 : index
    %c0_1 = arith.constant 0 : index
    %c0_2 = arith.constant 0 : index
    %0 = vector.load %arg1[%c0, %c0_0, %c0_1, %c0_2] : memref<1x10x10x160xbf16, #tpu.memory_space<vmem>>, vector<1x8x8x160xbf16>
    %1 = vector.shape_cast %0 : vector<1x8x8x160xbf16> to vector<8x8x160xbf16>
    %2 = vector.shape_cast %1 : vector<8x8x160xbf16> to vector<64x160xbf16>
    %c0_3 = arith.constant 0 : index
    %c0_4 = arith.constant 0 : index
    %c0_5 = arith.constant 0 : index
    %3 = vector.load %arg2[%c0_3, %c0_4, %c0_5] : memref<9x160x96xbf16, #tpu.memory_space<vmem>>, vector<1x160x96xbf16>
    %4 = vector.shape_cast %3 : vector<1x160x96xbf16> to vector<160x96xbf16>
    %cst = arith.constant dense<0.000000e+00> : vector<64x96xf32>
    %5 = tpu.matmul %2, %4, %cst {dimension_numbers = #tpu.dot_dimension_numbers<[1], [0], [0], [1], [0, 0, 1, 1], [], []>} : vector<64x160xbf16>, vector<160x96xbf16>, vector<64x96xf32> -> vector<64x96xf32>
    %c0_6 = arith.constant 0 : index
    %c0_7 = arith.constant 0 : index
    %c1 = arith.constant 1 : index
    %c0_8 = arith.constant 0 : index
    %6 = vector.load %arg1[%c0_6, %c0_7, %c1, %c0_8] : memref<1x10x10x160xbf16, #tpu.memory_space<vmem>>, vector<1x8x8x160xbf16>
    %7 = vector.shape_cast %6 : vector<1x8x8x160xbf16> to vector<8x8x160xbf16>
    %8 = vector.shape_cast %7 : vector<8x8x160xbf16> to vector<64x160xbf16>
    %c1_9 = arith.constant 1 : index
    %c0_10 = arith.constant 0 : index
    %c0_11 = arith.constant 0 : index
    %9 = vector.load %arg2[%c1_9, %c0_10, %c0_11] : memref<9x160x96xbf16, #tpu.memory_space<vmem>>, vector<1x160x96xbf16>
    %10 = vector.shape_cast %9 : vector<1x160x96xbf16> to vector<160x96xbf16>
    %cst_12 = arith.constant dense<0.000000e+00> : vector<64x96xf32>
    %11 = tpu.matmul %8, %10, %cst_12 {dimension_numbers = #tpu.dot_dimension_numbers<[1], [0], [0], [1], [0, 0, 1, 1], [], []>} : vector<64x160xbf16>, vector<160x96xbf16>, vector<64x96xf32> -> vector<64x96xf32>
    %12 = arith.addf %5, %11 : vector<64x96xf32>
    %c0_13 = arith.constant 0 : index
    %c0_14 = arith.constant 0 : index
    %c2 = arith.constant 2 : index
    %c0_15 = arith.constant 0 : index
    %13 = vector.load %arg1[%c0_13, %c0_14, %c2, %c0_15] : memref<1x10x10x160xbf16, #tpu.memory_space<vmem>>, vector<1x8x8x160xbf16>
    %14 = vector.shape_cast %13 : vector<1x8x8x160xbf16> to vector<8x8x160xbf16>
    %15 = vector.shape_cast %14 : vector<8x8x160xbf16> to vector<64x160xbf16>
    %c2_16 = arith.constant 2 : index
    %c0_17 = arith.constant 0 : index
    %c0_18 = arith.constant 0 : index
    %16 = vector.load %arg2[%c2_16, %c0_17, %c0_18] : memref<9x160x96xbf16, #tpu.memory_space<vmem>>, vector<1x160x96xbf16>
    %17 = vector.shape_cast %16 : vector<1x160x96xbf16> to vector<160x96xbf16>
    %cst_19 = arith.constant dense<0.000000e+00> : vector<64x96xf32>
    %18 = tpu.matmul %15, %17, %cst_19 {dimension_numbers = #tpu.dot_dimension_numbers<[1], [0], [0], [1], [0, 0, 1, 1], [], []>} : vector<64x160xbf16>, vector<160x96xbf16>, vector<64x96xf32> -> vector<64x96xf32>
    %19 = arith.addf %12, %18 : vector<64x96xf32>
    %c0_20 = arith.constant 0 : index
    %c1_21 = arith.constant 1 : index
    %c0_22 = arith.constant 0 : index
    %c0_23 = arith.constant 0 : index
    %20 = vector.load %arg1[%c0_20, %c1_21, %c0_22, %c0_23] : memref<1x10x10x160xbf16, #tpu.memory_space<vmem>>, vector<1x8x8x160xbf16>
    %21 = vector.shape_cast %20 : vector<1x8x8x160xbf16> to vector<8x8x160xbf16>
    %22 = vector.shape_cast %21 : vector<8x8x160xbf16> to vector<64x160xbf16>
    %c3 = arith.constant 3 : index
    %c0_24 = arith.constant 0 : index
    %c0_25 = arith.constant 0 : index
    %23 = vector.load %arg2[%c3, %c0_24, %c0_25] : memref<9x160x96xbf16, #tpu.memory_space<vmem>>, vector<1x160x96xbf16>
    %24 = vector.shape_cast %23 : vector<1x160x96xbf16> to vector<160x96xbf16>
    %cst_26 = arith.constant dense<0.000000e+00> : vector<64x96xf32>
    %25 = tpu.matmul %22, %24, %cst_26 {dimension_numbers = #tpu.dot_dimension_numbers<[1], [0], [0], [1], [0, 0, 1, 1], [], []>} : vector<64x160xbf16>, vector<160x96xbf16>, vector<64x96xf32> -> vector<64x96xf32>
    %26 = arith.addf %19, %25 : vector<64x96xf32>
    %c0_27 = arith.constant 0 : index
    %c1_28 = arith.constant 1 : index
    %c1_29 = arith.constant 1 : index
    %c0_30 = arith.constant 0 : index
    %27 = vector.load %arg1[%c0_27, %c1_28, %c1_29, %c0_30] : memref<1x10x10x160xbf16, #tpu.memory_space<vmem>>, vector<1x8x8x160xbf16>
    %28 = vector.shape_cast %27 : vector<1x8x8x160xbf16> to vector<8x8x160xbf16>
    %29 = vector.shape_cast %28 : vector<8x8x160xbf16> to vector<64x160xbf16>
    %c4 = arith.constant 4 : index
    %c0_31 = arith.constant 0 : index
    %c0_32 = arith.constant 0 : index
    %30 = vector.load %arg2[%c4, %c0_31, %c0_32] : memref<9x160x96xbf16, #tpu.memory_space<vmem>>, vector<1x160x96xbf16>
    %31 = vector.shape_cast %30 : vector<1x160x96xbf16> to vector<160x96xbf16>
    %cst_33 = arith.constant dense<0.000000e+00> : vector<64x96xf32>
    %32 = tpu.matmul %29, %31, %cst_33 {dimension_numbers = #tpu.dot_dimension_numbers<[1], [0], [0], [1], [0, 0, 1, 1], [], []>} : vector<64x160xbf16>, vector<160x96xbf16>, vector<64x96xf32> -> vector<64x96xf32>
    %33 = arith.addf %26, %32 : vector<64x96xf32>
    %c0_34 = arith.constant 0 : index
    %c1_35 = arith.constant 1 : index
    %c2_36 = arith.constant 2 : index
    %c0_37 = arith.constant 0 : index
    %34 = vector.load %arg1[%c0_34, %c1_35, %c2_36, %c0_37] : memref<1x10x10x160xbf16, #tpu.memory_space<vmem>>, vector<1x8x8x160xbf16>
    %35 = vector.shape_cast %34 : vector<1x8x8x160xbf16> to vector<8x8x160xbf16>
    %36 = vector.shape_cast %35 : vector<8x8x160xbf16> to vector<64x160xbf16>
    %c5 = arith.constant 5 : index
    %c0_38 = arith.constant 0 : index
    %c0_39 = arith.constant 0 : index
    %37 = vector.load %arg2[%c5, %c0_38, %c0_39] : memref<9x160x96xbf16, #tpu.memory_space<vmem>>, vector<1x160x96xbf16>
    %38 = vector.shape_cast %37 : vector<1x160x96xbf16> to vector<160x96xbf16>
    %cst_40 = arith.constant dense<0.000000e+00> : vector<64x96xf32>
    %39 = tpu.matmul %36, %38, %cst_40 {dimension_numbers = #tpu.dot_dimension_numbers<[1], [0], [0], [1], [0, 0, 1, 1], [], []>} : vector<64x160xbf16>, vector<160x96xbf16>, vector<64x96xf32> -> vector<64x96xf32>
    %40 = arith.addf %33, %39 : vector<64x96xf32>
    %c0_41 = arith.constant 0 : index
    %c2_42 = arith.constant 2 : index
    %c0_43 = arith.constant 0 : index
    %c0_44 = arith.constant 0 : index
    %41 = vector.load %arg1[%c0_41, %c2_42, %c0_43, %c0_44] : memref<1x10x10x160xbf16, #tpu.memory_space<vmem>>, vector<1x8x8x160xbf16>
    %42 = vector.shape_cast %41 : vector<1x8x8x160xbf16> to vector<8x8x160xbf16>
    %43 = vector.shape_cast %42 : vector<8x8x160xbf16> to vector<64x160xbf16>
    %c6 = arith.constant 6 : index
    %c0_45 = arith.constant 0 : index
    %c0_46 = arith.constant 0 : index
    %44 = vector.load %arg2[%c6, %c0_45, %c0_46] : memref<9x160x96xbf16, #tpu.memory_space<vmem>>, vector<1x160x96xbf16>
    %45 = vector.shape_cast %44 : vector<1x160x96xbf16> to vector<160x96xbf16>
    %cst_47 = arith.constant dense<0.000000e+00> : vector<64x96xf32>
    %46 = tpu.matmul %43, %45, %cst_47 {dimension_numbers = #tpu.dot_dimension_numbers<[1], [0], [0], [1], [0, 0, 1, 1], [], []>} : vector<64x160xbf16>, vector<160x96xbf16>, vector<64x96xf32> -> vector<64x96xf32>
    %47 = arith.addf %40, %46 : vector<64x96xf32>
    %c0_48 = arith.constant 0 : index
    %c2_49 = arith.constant 2 : index
    %c1_50 = arith.constant 1 : index
    %c0_51 = arith.constant 0 : index
    %48 = vector.load %arg1[%c0_48, %c2_49, %c1_50, %c0_51] : memref<1x10x10x160xbf16, #tpu.memory_space<vmem>>, vector<1x8x8x160xbf16>
    %49 = vector.shape_cast %48 : vector<1x8x8x160xbf16> to vector<8x8x160xbf16>
    %50 = vector.shape_cast %49 : vector<8x8x160xbf16> to vector<64x160xbf16>
    %c7 = arith.constant 7 : index
    %c0_52 = arith.constant 0 : index
    %c0_53 = arith.constant 0 : index
    %51 = vector.load %arg2[%c7, %c0_52, %c0_53] : memref<9x160x96xbf16, #tpu.memory_space<vmem>>, vector<1x160x96xbf16>
    %52 = vector.shape_cast %51 : vector<1x160x96xbf16> to vector<160x96xbf16>
    %cst_54 = arith.constant dense<0.000000e+00> : vector<64x96xf32>
    %53 = tpu.matmul %50, %52, %cst_54 {dimension_numbers = #tpu.dot_dimension_numbers<[1], [0], [0], [1], [0, 0, 1, 1], [], []>} : vector<64x160xbf16>, vector<160x96xbf16>, vector<64x96xf32> -> vector<64x96xf32>
    %54 = arith.addf %47, %53 : vector<64x96xf32>
    %c0_55 = arith.constant 0 : index
    %c2_56 = arith.constant 2 : index
    %c2_57 = arith.constant 2 : index
    %c0_58 = arith.constant 0 : index
    %55 = vector.load %arg1[%c0_55, %c2_56, %c2_57, %c0_58] : memref<1x10x10x160xbf16, #tpu.memory_space<vmem>>, vector<1x8x8x160xbf16>
    %56 = vector.shape_cast %55 : vector<1x8x8x160xbf16> to vector<8x8x160xbf16>
    %57 = vector.shape_cast %56 : vector<8x8x160xbf16> to vector<64x160xbf16>
    %c8 = arith.constant 8 : index
    %c0_59 = arith.constant 0 : index
    %c0_60 = arith.constant 0 : index
    %58 = vector.load %arg2[%c8, %c0_59, %c0_60] : memref<9x160x96xbf16, #tpu.memory_space<vmem>>, vector<1x160x96xbf16>
    %59 = vector.shape_cast %58 : vector<1x160x96xbf16> to vector<160x96xbf16>
    %cst_61 = arith.constant dense<0.000000e+00> : vector<64x96xf32>
    %60 = tpu.matmul %57, %59, %cst_61 {dimension_numbers = #tpu.dot_dimension_numbers<[1], [0], [0], [1], [0, 0, 1, 1], [], []>} : vector<64x160xbf16>, vector<160x96xbf16>, vector<64x96xf32> -> vector<64x96xf32>
    %61 = arith.addf %54, %60 : vector<64x96xf32>
    %c0_62 = arith.constant 0 : index
    %c0_63 = arith.constant 0 : index
    %62 = vector.load %arg3[%c0_62, %c0_63] : memref<1x96xf32, #tpu.memory_space<vmem>>, vector<1x96xf32>
    %63 = vector.broadcast %62 : vector<1x96xf32> to vector<64x96xf32>
    %64 = arith.addf %61, %63 : vector<64x96xf32>
    %cst_64 = arith.constant 0.000000e+00 : f32
    %65 = vector.broadcast %cst_64 : f32 to vector<64x96xf32>
    %66 = arith.maximumf %64, %65 : vector<64x96xf32>
    %67 = arith.truncf %66 : vector<64x96xf32> to vector<64x96xbf16>
    %c0_65 = arith.constant 0 : index
    %c0_66 = arith.constant 0 : index
    %c0_67 = arith.constant 0 : index
    %c0_68 = arith.constant 0 : index
    %68 = vector.load %arg4[%c0_65, %c0_66, %c0_67, %c0_68] : memref<1x1x64x96xbf16, #tpu.memory_space<vmem>>, vector<1x1x64x96xbf16>
    %69 = vector.shape_cast %68 : vector<1x1x64x96xbf16> to vector<64x96xbf16>
    %70 = vector.shape_cast %67 : vector<64x96xbf16> to vector<1x1x64x96xbf16>
    tpu.vector_store %arg4[%c0_65, %c0_66, %c0_67, %c0_68], %70 {strides = array<i32>} : memref<1x1x64x96xbf16, #tpu.memory_space<vmem>>, vector<1x1x64x96xbf16>,
    return
  }
  func.func @transform_0(%arg0: i32) -> (i32, i32, i32, i32) {
    %c0_i32 = arith.constant 0 : i32
    %c0_i32_0 = arith.constant 0 : i32
    %c0_i32_1 = arith.constant 0 : i32
    %c0_i32_2 = arith.constant 0 : i32
    return %arg0, %c0_i32, %c0_i32_0, %c0_i32_1 : i32, i32, i32, i32
  }
  func.func @transform_1(%arg0: i32) -> (i32, i32, i32) {
    %c0_i32 = arith.constant 0 : i32
    %c0_i32_0 = arith.constant 0 : i32
    %c0_i32_1 = arith.constant 0 : i32
    %c0_i32_2 = arith.constant 0 : i32
    return %c0_i32, %c0_i32_0, %c0_i32_1 : i32, i32, i32
  }
  func.func @transform_2(%arg0: i32) -> (i32, i32) {
    %c0_i32 = arith.constant 0 : i32
    %c0_i32_0 = arith.constant 0 : i32
    %c0_i32_1 = arith.constant 0 : i32
    return %c0_i32, %c0_i32_0 : i32, i32
  }
  func.func @transform_3(%arg0: i32) -> (i32, i32, i32, i32) {
    %c0_i32 = arith.constant 0 : i32
    %c0_i32_0 = arith.constant 0 : i32
    %c0_i32_1 = arith.constant 0 : i32
    %c0_i32_2 = arith.constant 0 : i32
    return %arg0, %c0_i32, %c0_i32_0, %c0_i32_1 : i32, i32, i32, i32
  }
}

module attributes {stable_mosaic.version = 11 : i64} {
  func.func @_fused_conv_kernel(%arg0: i32, %arg1: memref<1x9x9x60xbf16, #tpu.memory_space<vmem>>, %arg2: memref<9x60x128xbf16, #tpu.memory_space<vmem>>, %arg3: memref<1x128xf32, #tpu.memory_space<vmem>>, %arg4: memref<1x4x64x128xbf16, #tpu.memory_space<vmem>>) attributes {dimension_semantics = [#tpu.dimension_semantics<parallel>], iteration_bounds = array<i64: 2>, scalar_prefetch = 0 : i64, scratch_operands = 0 : i64, tpu.core_type = #tpu.core_type<tc>, window_params = [{transform_indices = @transform_0, window_bounds = array<i64: 1, 9, 9, 60>}, {pipeline_mode = #tpu.pipeline_mode<synchronous>, transform_indices = @transform_1, window_bounds = array<i64: 9, 60, 128>}, {pipeline_mode = #tpu.pipeline_mode<synchronous>, transform_indices = @transform_2, window_bounds = array<i64: 1, 128>}, {transform_indices = @transform_3, window_bounds = array<i64: 1, 4, 64, 128>}]} {
    %c0 = arith.constant 0 : index
    %c0_0 = arith.constant 0 : index
    %c0_1 = arith.constant 0 : index
    %c0_2 = arith.constant 0 : index
    %0 = vector.load %arg1[%c0, %c0_0, %c0_1, %c0_2] : memref<1x9x9x60xbf16, #tpu.memory_space<vmem>>, vector<1x8x8x60xbf16>
    %1 = vector.shape_cast %0 : vector<1x8x8x60xbf16> to vector<8x8x60xbf16>
    %2 = vector.shape_cast %1 : vector<8x8x60xbf16> to vector<64x60xbf16>
    %c4 = arith.constant 4 : index
    %c0_3 = arith.constant 0 : index
    %c0_4 = arith.constant 0 : index
    %3 = vector.load %arg2[%c4, %c0_3, %c0_4] : memref<9x60x128xbf16, #tpu.memory_space<vmem>>, vector<1x60x128xbf16>
    %4 = vector.shape_cast %3 : vector<1x60x128xbf16> to vector<60x128xbf16>
    %cst = arith.constant dense<0.000000e+00> : vector<64x128xf32>
    %5 = tpu.matmul %2, %4, %cst {dimension_numbers = #tpu.dot_dimension_numbers<[1], [0], [0], [1], [0, 0, 1, 1], [], []>} : vector<64x60xbf16>, vector<60x128xbf16>, vector<64x128xf32> -> vector<64x128xf32>
    %c0_5 = arith.constant 0 : index
    %c0_6 = arith.constant 0 : index
    %6 = vector.load %arg3[%c0_5, %c0_6] : memref<1x128xf32, #tpu.memory_space<vmem>>, vector<1x128xf32>
    %7 = vector.broadcast %6 : vector<1x128xf32> to vector<64x128xf32>
    %8 = arith.addf %5, %7 : vector<64x128xf32>
    %cst_7 = arith.constant 0.000000e+00 : f32
    %9 = vector.broadcast %cst_7 : f32 to vector<64x128xf32>
    %10 = arith.maximumf %8, %9 : vector<64x128xf32>
    %11 = arith.truncf %10 : vector<64x128xf32> to vector<64x128xbf16>
    %c0_8 = arith.constant 0 : index
    %c0_9 = arith.constant 0 : index
    %c0_10 = arith.constant 0 : index
    %c0_11 = arith.constant 0 : index
    %12 = vector.load %arg4[%c0_8, %c0_9, %c0_10, %c0_11] : memref<1x4x64x128xbf16, #tpu.memory_space<vmem>>, vector<1x1x64x128xbf16>
    %13 = vector.shape_cast %12 : vector<1x1x64x128xbf16> to vector<64x128xbf16>
    %14 = vector.shape_cast %11 : vector<64x128xbf16> to vector<1x1x64x128xbf16>
    tpu.vector_store %arg4[%c0_8, %c0_9, %c0_10, %c0_11], %14 {strides = array<i32>} : memref<1x4x64x128xbf16, #tpu.memory_space<vmem>>, vector<1x1x64x128xbf16>,
    %c0_12 = arith.constant 0 : index
    %c0_13 = arith.constant 0 : index
    %c0_14 = arith.constant 0 : index
    %c0_15 = arith.constant 0 : index
    %15 = vector.load %arg1[%c0_12, %c0_13, %c0_14, %c0_15] : memref<1x9x9x60xbf16, #tpu.memory_space<vmem>>, vector<1x8x8x60xbf16>
    %16 = vector.shape_cast %15 : vector<1x8x8x60xbf16> to vector<8x8x60xbf16>
    %17 = vector.shape_cast %16 : vector<8x8x60xbf16> to vector<64x60xbf16>
    %c5 = arith.constant 5 : index
    %c0_16 = arith.constant 0 : index
    %c0_17 = arith.constant 0 : index
    %18 = vector.load %arg2[%c5, %c0_16, %c0_17] : memref<9x60x128xbf16, #tpu.memory_space<vmem>>, vector<1x60x128xbf16>
    %19 = vector.shape_cast %18 : vector<1x60x128xbf16> to vector<60x128xbf16>
    %cst_18 = arith.constant dense<0.000000e+00> : vector<64x128xf32>
    %20 = tpu.matmul %17, %19, %cst_18 {dimension_numbers = #tpu.dot_dimension_numbers<[1], [0], [0], [1], [0, 0, 1, 1], [], []>} : vector<64x60xbf16>, vector<60x128xbf16>, vector<64x128xf32> -> vector<64x128xf32>
    %c0_19 = arith.constant 0 : index
    %c0_20 = arith.constant 0 : index
    %c1 = arith.constant 1 : index
    %c0_21 = arith.constant 0 : index
    %21 = vector.load %arg1[%c0_19, %c0_20, %c1, %c0_21] : memref<1x9x9x60xbf16, #tpu.memory_space<vmem>>, vector<1x8x8x60xbf16>
    %22 = vector.shape_cast %21 : vector<1x8x8x60xbf16> to vector<8x8x60xbf16>
    %23 = vector.shape_cast %22 : vector<8x8x60xbf16> to vector<64x60xbf16>
    %c3 = arith.constant 3 : index
    %c0_22 = arith.constant 0 : index
    %c0_23 = arith.constant 0 : index
    %24 = vector.load %arg2[%c3, %c0_22, %c0_23] : memref<9x60x128xbf16, #tpu.memory_space<vmem>>, vector<1x60x128xbf16>
    %25 = vector.shape_cast %24 : vector<1x60x128xbf16> to vector<60x128xbf16>
    %cst_24 = arith.constant dense<0.000000e+00> : vector<64x128xf32>
    %26 = tpu.matmul %23, %25, %cst_24 {dimension_numbers = #tpu.dot_dimension_numbers<[1], [0], [0], [1], [0, 0, 1, 1], [], []>} : vector<64x60xbf16>, vector<60x128xbf16>, vector<64x128xf32> -> vector<64x128xf32>
    %27 = arith.addf %20, %26 : vector<64x128xf32>
    %c0_25 = arith.constant 0 : index
    %c0_26 = arith.constant 0 : index
    %28 = vector.load %arg3[%c0_25, %c0_26] : memref<1x128xf32, #tpu.memory_space<vmem>>, vector<1x128xf32>
    %29 = vector.broadcast %28 : vector<1x128xf32> to vector<64x128xf32>
    %30 = arith.addf %27, %29 : vector<64x128xf32>
    %cst_27 = arith.constant 0.000000e+00 : f32
    %31 = vector.broadcast %cst_27 : f32 to vector<64x128xf32>
    %32 = arith.maximumf %30, %31 : vector<64x128xf32>
    %33 = arith.truncf %32 : vector<64x128xf32> to vector<64x128xbf16>
    %c0_28 = arith.constant 0 : index
    %c1_29 = arith.constant 1 : index
    %c0_30 = arith.constant 0 : index
    %c0_31 = arith.constant 0 : index
    %34 = vector.load %arg4[%c0_28, %c1_29, %c0_30, %c0_31] : memref<1x4x64x128xbf16, #tpu.memory_space<vmem>>, vector<1x1x64x128xbf16>
    %35 = vector.shape_cast %34 : vector<1x1x64x128xbf16> to vector<64x128xbf16>
    %36 = vector.shape_cast %33 : vector<64x128xbf16> to vector<1x1x64x128xbf16>
    tpu.vector_store %arg4[%c0_28, %c1_29, %c0_30, %c0_31], %36 {strides = array<i32>} : memref<1x4x64x128xbf16, #tpu.memory_space<vmem>>, vector<1x1x64x128xbf16>,
    %c0_32 = arith.constant 0 : index
    %c0_33 = arith.constant 0 : index
    %c0_34 = arith.constant 0 : index
    %c0_35 = arith.constant 0 : index
    %37 = vector.load %arg1[%c0_32, %c0_33, %c0_34, %c0_35] : memref<1x9x9x60xbf16, #tpu.memory_space<vmem>>, vector<1x8x8x60xbf16>
    %38 = vector.shape_cast %37 : vector<1x8x8x60xbf16> to vector<8x8x60xbf16>
    %39 = vector.shape_cast %38 : vector<8x8x60xbf16> to vector<64x60xbf16>
    %c7 = arith.constant 7 : index
    %c0_36 = arith.constant 0 : index
    %c0_37 = arith.constant 0 : index
    %40 = vector.load %arg2[%c7, %c0_36, %c0_37] : memref<9x60x128xbf16, #tpu.memory_space<vmem>>, vector<1x60x128xbf16>
    %41 = vector.shape_cast %40 : vector<1x60x128xbf16> to vector<60x128xbf16>
    %cst_38 = arith.constant dense<0.000000e+00> : vector<64x128xf32>
    %42 = tpu.matmul %39, %41, %cst_38 {dimension_numbers = #tpu.dot_dimension_numbers<[1], [0], [0], [1], [0, 0, 1, 1], [], []>} : vector<64x60xbf16>, vector<60x128xbf16>, vector<64x128xf32> -> vector<64x128xf32>
    %c0_39 = arith.constant 0 : index
    %c1_40 = arith.constant 1 : index
    %c0_41 = arith.constant 0 : index
    %c0_42 = arith.constant 0 : index
    %43 = vector.load %arg1[%c0_39, %c1_40, %c0_41, %c0_42] : memref<1x9x9x60xbf16, #tpu.memory_space<vmem>>, vector<1x8x8x60xbf16>
    %44 = vector.shape_cast %43 : vector<1x8x8x60xbf16> to vector<8x8x60xbf16>
    %45 = vector.shape_cast %44 : vector<8x8x60xbf16> to vector<64x60xbf16>
    %c1_43 = arith.constant 1 : index
    %c0_44 = arith.constant 0 : index
    %c0_45 = arith.constant 0 : index
    %46 = vector.load %arg2[%c1_43, %c0_44, %c0_45] : memref<9x60x128xbf16, #tpu.memory_space<vmem>>, vector<1x60x128xbf16>
    %47 = vector.shape_cast %46 : vector<1x60x128xbf16> to vector<60x128xbf16>
    %cst_46 = arith.constant dense<0.000000e+00> : vector<64x128xf32>
    %48 = tpu.matmul %45, %47, %cst_46 {dimension_numbers = #tpu.dot_dimension_numbers<[1], [0], [0], [1], [0, 0, 1, 1], [], []>} : vector<64x60xbf16>, vector<60x128xbf16>, vector<64x128xf32> -> vector<64x128xf32>
    %49 = arith.addf %42, %48 : vector<64x128xf32>
    %c0_47 = arith.constant 0 : index
    %c0_48 = arith.constant 0 : index
    %50 = vector.load %arg3[%c0_47, %c0_48] : memref<1x128xf32, #tpu.memory_space<vmem>>, vector<1x128xf32>
    %51 = vector.broadcast %50 : vector<1x128xf32> to vector<64x128xf32>
    %52 = arith.addf %49, %51 : vector<64x128xf32>
    %cst_49 = arith.constant 0.000000e+00 : f32
    %53 = vector.broadcast %cst_49 : f32 to vector<64x128xf32>
    %54 = arith.maximumf %52, %53 : vector<64x128xf32>
    %55 = arith.truncf %54 : vector<64x128xf32> to vector<64x128xbf16>
    %c0_50 = arith.constant 0 : index
    %c2 = arith.constant 2 : index
    %c0_51 = arith.constant 0 : index
    %c0_52 = arith.constant 0 : index
    %56 = vector.load %arg4[%c0_50, %c2, %c0_51, %c0_52] : memref<1x4x64x128xbf16, #tpu.memory_space<vmem>>, vector<1x1x64x128xbf16>
    %57 = vector.shape_cast %56 : vector<1x1x64x128xbf16> to vector<64x128xbf16>
    %58 = vector.shape_cast %55 : vector<64x128xbf16> to vector<1x1x64x128xbf16>
    tpu.vector_store %arg4[%c0_50, %c2, %c0_51, %c0_52], %58 {strides = array<i32>} : memref<1x4x64x128xbf16, #tpu.memory_space<vmem>>, vector<1x1x64x128xbf16>,
    %c0_53 = arith.constant 0 : index
    %c0_54 = arith.constant 0 : index
    %c0_55 = arith.constant 0 : index
    %c0_56 = arith.constant 0 : index
    %59 = vector.load %arg1[%c0_53, %c0_54, %c0_55, %c0_56] : memref<1x9x9x60xbf16, #tpu.memory_space<vmem>>, vector<1x8x8x60xbf16>
    %60 = vector.shape_cast %59 : vector<1x8x8x60xbf16> to vector<8x8x60xbf16>
    %61 = vector.shape_cast %60 : vector<8x8x60xbf16> to vector<64x60xbf16>
    %c8 = arith.constant 8 : index
    %c0_57 = arith.constant 0 : index
    %c0_58 = arith.constant 0 : index
    %62 = vector.load %arg2[%c8, %c0_57, %c0_58] : memref<9x60x128xbf16, #tpu.memory_space<vmem>>, vector<1x60x128xbf16>
    %63 = vector.shape_cast %62 : vector<1x60x128xbf16> to vector<60x128xbf16>
    %cst_59 = arith.constant dense<0.000000e+00> : vector<64x128xf32>
    %64 = tpu.matmul %61, %63, %cst_59 {dimension_numbers = #tpu.dot_dimension_numbers<[1], [0], [0], [1], [0, 0, 1, 1], [], []>} : vector<64x60xbf16>, vector<60x128xbf16>, vector<64x128xf32> -> vector<64x128xf32>
    %c0_60 = arith.constant 0 : index
    %c0_61 = arith.constant 0 : index
    %c1_62 = arith.constant 1 : index
    %c0_63 = arith.constant 0 : index
    %65 = vector.load %arg1[%c0_60, %c0_61, %c1_62, %c0_63] : memref<1x9x9x60xbf16, #tpu.memory_space<vmem>>, vector<1x8x8x60xbf16>
    %66 = vector.shape_cast %65 : vector<1x8x8x60xbf16> to vector<8x8x60xbf16>
    %67 = vector.shape_cast %66 : vector<8x8x60xbf16> to vector<64x60xbf16>
    %c6 = arith.constant 6 : index
    %c0_64 = arith.constant 0 : index
    %c0_65 = arith.constant 0 : index
    %68 = vector.load %arg2[%c6, %c0_64, %c0_65] : memref<9x60x128xbf16, #tpu.memory_space<vmem>>, vector<1x60x128xbf16>
    %69 = vector.shape_cast %68 : vector<1x60x128xbf16> to vector<60x128xbf16>
    %cst_66 = arith.constant dense<0.000000e+00> : vector<64x128xf32>
    %70 = tpu.matmul %67, %69, %cst_66 {dimension_numbers = #tpu.dot_dimension_numbers<[1], [0], [0], [1], [0, 0, 1, 1], [], []>} : vector<64x60xbf16>, vector<60x128xbf16>, vector<64x128xf32> -> vector<64x128xf32>
    %71 = arith.addf %64, %70 : vector<64x128xf32>
    %c0_67 = arith.constant 0 : index
    %c1_68 = arith.constant 1 : index
    %c0_69 = arith.constant 0 : index
    %c0_70 = arith.constant 0 : index
    %72 = vector.load %arg1[%c0_67, %c1_68, %c0_69, %c0_70] : memref<1x9x9x60xbf16, #tpu.memory_space<vmem>>, vector<1x8x8x60xbf16>
    %73 = vector.shape_cast %72 : vector<1x8x8x60xbf16> to vector<8x8x60xbf16>
    %74 = vector.shape_cast %73 : vector<8x8x60xbf16> to vector<64x60xbf16>
    %c2_71 = arith.constant 2 : index
    %c0_72 = arith.constant 0 : index
    %c0_73 = arith.constant 0 : index
    %75 = vector.load %arg2[%c2_71, %c0_72, %c0_73] : memref<9x60x128xbf16, #tpu.memory_space<vmem>>, vector<1x60x128xbf16>
    %76 = vector.shape_cast %75 : vector<1x60x128xbf16> to vector<60x128xbf16>
    %cst_74 = arith.constant dense<0.000000e+00> : vector<64x128xf32>
    %77 = tpu.matmul %74, %76, %cst_74 {dimension_numbers = #tpu.dot_dimension_numbers<[1], [0], [0], [1], [0, 0, 1, 1], [], []>} : vector<64x60xbf16>, vector<60x128xbf16>, vector<64x128xf32> -> vector<64x128xf32>
    %78 = arith.addf %71, %77 : vector<64x128xf32>
    %c0_75 = arith.constant 0 : index
    %c1_76 = arith.constant 1 : index
    %c1_77 = arith.constant 1 : index
    %c0_78 = arith.constant 0 : index
    %79 = vector.load %arg1[%c0_75, %c1_76, %c1_77, %c0_78] : memref<1x9x9x60xbf16, #tpu.memory_space<vmem>>, vector<1x8x8x60xbf16>
    %80 = vector.shape_cast %79 : vector<1x8x8x60xbf16> to vector<8x8x60xbf16>
    %81 = vector.shape_cast %80 : vector<8x8x60xbf16> to vector<64x60xbf16>
    %c0_79 = arith.constant 0 : index
    %c0_80 = arith.constant 0 : index
    %c0_81 = arith.constant 0 : index
    %82 = vector.load %arg2[%c0_79, %c0_80, %c0_81] : memref<9x60x128xbf16, #tpu.memory_space<vmem>>, vector<1x60x128xbf16>
    %83 = vector.shape_cast %82 : vector<1x60x128xbf16> to vector<60x128xbf16>
    %cst_82 = arith.constant dense<0.000000e+00> : vector<64x128xf32>
    %84 = tpu.matmul %81, %83, %cst_82 {dimension_numbers = #tpu.dot_dimension_numbers<[1], [0], [0], [1], [0, 0, 1, 1], [], []>} : vector<64x60xbf16>, vector<60x128xbf16>, vector<64x128xf32> -> vector<64x128xf32>
    %85 = arith.addf %78, %84 : vector<64x128xf32>
    %c0_83 = arith.constant 0 : index
    %c0_84 = arith.constant 0 : index
    %86 = vector.load %arg3[%c0_83, %c0_84] : memref<1x128xf32, #tpu.memory_space<vmem>>, vector<1x128xf32>
    %87 = vector.broadcast %86 : vector<1x128xf32> to vector<64x128xf32>
    %88 = arith.addf %85, %87 : vector<64x128xf32>
    %cst_85 = arith.constant 0.000000e+00 : f32
    %89 = vector.broadcast %cst_85 : f32 to vector<64x128xf32>
    %90 = arith.maximumf %88, %89 : vector<64x128xf32>
    %91 = arith.truncf %90 : vector<64x128xf32> to vector<64x128xbf16>
    %c0_86 = arith.constant 0 : index
    %c3_87 = arith.constant 3 : index
    %c0_88 = arith.constant 0 : index
    %c0_89 = arith.constant 0 : index
    %92 = vector.load %arg4[%c0_86, %c3_87, %c0_88, %c0_89] : memref<1x4x64x128xbf16, #tpu.memory_space<vmem>>, vector<1x1x64x128xbf16>
    %93 = vector.shape_cast %92 : vector<1x1x64x128xbf16> to vector<64x128xbf16>
    %94 = vector.shape_cast %91 : vector<64x128xbf16> to vector<1x1x64x128xbf16>
    tpu.vector_store %arg4[%c0_86, %c3_87, %c0_88, %c0_89], %94 {strides = array<i32>} : memref<1x4x64x128xbf16, #tpu.memory_space<vmem>>, vector<1x1x64x128xbf16>,
    return
  }
  func.func @transform_0(%arg0: i32) -> (i32, i32, i32, i32) {
    %c0_i32 = arith.constant 0 : i32
    %c0_i32_0 = arith.constant 0 : i32
    %c0_i32_1 = arith.constant 0 : i32
    %c0_i32_2 = arith.constant 0 : i32
    return %arg0, %c0_i32, %c0_i32_0, %c0_i32_1 : i32, i32, i32, i32
  }
  func.func @transform_1(%arg0: i32) -> (i32, i32, i32) {
    %c0_i32 = arith.constant 0 : i32
    %c0_i32_0 = arith.constant 0 : i32
    %c0_i32_1 = arith.constant 0 : i32
    %c0_i32_2 = arith.constant 0 : i32
    return %c0_i32, %c0_i32_0, %c0_i32_1 : i32, i32, i32
  }
  func.func @transform_2(%arg0: i32) -> (i32, i32) {
    %c0_i32 = arith.constant 0 : i32
    %c0_i32_0 = arith.constant 0 : i32
    %c0_i32_1 = arith.constant 0 : i32
    return %c0_i32, %c0_i32_0 : i32, i32
  }
  func.func @transform_3(%arg0: i32) -> (i32, i32, i32, i32) {
    %c0_i32 = arith.constant 0 : i32
    %c0_i32_0 = arith.constant 0 : i32
    %c0_i32_1 = arith.constant 0 : i32
    %c0_i32_2 = arith.constant 0 : i32
    return %arg0, %c0_i32, %c0_i32_0, %c0_i32_1 : i32, i32, i32, i32
  }
}

module attributes {stable_mosaic.version = 11 : i64} {
  func.func @_fused_conv_kernel(%arg0: i32, %arg1: memref<1x9x9x144xbf16, #tpu.memory_space<vmem>>, %arg2: memref<9x144x16xbf16, #tpu.memory_space<vmem>>, %arg3: memref<1x16xf32, #tpu.memory_space<vmem>>, %arg4: memref<1x4x64x16xf32, #tpu.memory_space<vmem>>) attributes {dimension_semantics = [#tpu.dimension_semantics<parallel>], iteration_bounds = array<i64: 2>, scalar_prefetch = 0 : i64, scratch_operands = 0 : i64, tpu.core_type = #tpu.core_type<tc>, window_params = [{transform_indices = @transform_0, window_bounds = array<i64: 1, 9, 9, 144>}, {pipeline_mode = #tpu.pipeline_mode<synchronous>, transform_indices = @transform_1, window_bounds = array<i64: 9, 144, 16>}, {pipeline_mode = #tpu.pipeline_mode<synchronous>, transform_indices = @transform_2, window_bounds = array<i64: 1, 16>}, {transform_indices = @transform_3, window_bounds = array<i64: 1, 4, 64, 16>}]} {
    %c0 = arith.constant 0 : index
    %c0_0 = arith.constant 0 : index
    %c0_1 = arith.constant 0 : index
    %c0_2 = arith.constant 0 : index
    %0 = vector.load %arg1[%c0, %c0_0, %c0_1, %c0_2] : memref<1x9x9x144xbf16, #tpu.memory_space<vmem>>, vector<1x8x8x144xbf16>
    %1 = vector.shape_cast %0 : vector<1x8x8x144xbf16> to vector<8x8x144xbf16>
    %2 = vector.shape_cast %1 : vector<8x8x144xbf16> to vector<64x144xbf16>
    %c4 = arith.constant 4 : index
    %c0_3 = arith.constant 0 : index
    %c0_4 = arith.constant 0 : index
    %3 = vector.load %arg2[%c4, %c0_3, %c0_4] : memref<9x144x16xbf16, #tpu.memory_space<vmem>>, vector<1x144x16xbf16>
    %4 = vector.shape_cast %3 : vector<1x144x16xbf16> to vector<144x16xbf16>
    %cst = arith.constant dense<0.000000e+00> : vector<64x16xf32>
    %5 = tpu.matmul %2, %4, %cst {dimension_numbers = #tpu.dot_dimension_numbers<[1], [0], [0], [1], [0, 0, 1, 1], [], []>} : vector<64x144xbf16>, vector<144x16xbf16>, vector<64x16xf32> -> vector<64x16xf32>
    %c0_5 = arith.constant 0 : index
    %c0_6 = arith.constant 0 : index
    %6 = vector.load %arg3[%c0_5, %c0_6] : memref<1x16xf32, #tpu.memory_space<vmem>>, vector<1x16xf32>
    %7 = vector.broadcast %6 : vector<1x16xf32> to vector<64x16xf32>
    %8 = arith.addf %5, %7 : vector<64x16xf32>
    %9 = arith.negf %8 : vector<64x16xf32>
    %10 = math.exp %9 : vector<64x16xf32>
    %cst_7 = arith.constant 1.000000e+00 : f32
    %11 = vector.broadcast %cst_7 : f32 to vector<64x16xf32>
    %12 = arith.addf %11, %10 : vector<64x16xf32>
    %13 = arith.divf %11, %12 : vector<64x16xf32>
    %c0_8 = arith.constant 0 : index
    %c0_9 = arith.constant 0 : index
    %c0_10 = arith.constant 0 : index
    %c0_11 = arith.constant 0 : index
    %14 = vector.load %arg4[%c0_8, %c0_9, %c0_10, %c0_11] : memref<1x4x64x16xf32, #tpu.memory_space<vmem>>, vector<1x1x64x16xf32>
    %15 = vector.shape_cast %14 : vector<1x1x64x16xf32> to vector<64x16xf32>
    %16 = vector.shape_cast %13 : vector<64x16xf32> to vector<1x1x64x16xf32>
    tpu.vector_store %arg4[%c0_8, %c0_9, %c0_10, %c0_11], %16 {strides = array<i32>} : memref<1x4x64x16xf32, #tpu.memory_space<vmem>>, vector<1x1x64x16xf32>,
    %c0_12 = arith.constant 0 : index
    %c0_13 = arith.constant 0 : index
    %c0_14 = arith.constant 0 : index
    %c0_15 = arith.constant 0 : index
    %17 = vector.load %arg1[%c0_12, %c0_13, %c0_14, %c0_15] : memref<1x9x9x144xbf16, #tpu.memory_space<vmem>>, vector<1x8x8x144xbf16>
    %18 = vector.shape_cast %17 : vector<1x8x8x144xbf16> to vector<8x8x144xbf16>
    %19 = vector.shape_cast %18 : vector<8x8x144xbf16> to vector<64x144xbf16>
    %c5 = arith.constant 5 : index
    %c0_16 = arith.constant 0 : index
    %c0_17 = arith.constant 0 : index
    %20 = vector.load %arg2[%c5, %c0_16, %c0_17] : memref<9x144x16xbf16, #tpu.memory_space<vmem>>, vector<1x144x16xbf16>
    %21 = vector.shape_cast %20 : vector<1x144x16xbf16> to vector<144x16xbf16>
    %cst_18 = arith.constant dense<0.000000e+00> : vector<64x16xf32>
    %22 = tpu.matmul %19, %21, %cst_18 {dimension_numbers = #tpu.dot_dimension_numbers<[1], [0], [0], [1], [0, 0, 1, 1], [], []>} : vector<64x144xbf16>, vector<144x16xbf16>, vector<64x16xf32> -> vector<64x16xf32>
    %c0_19 = arith.constant 0 : index
    %c0_20 = arith.constant 0 : index
    %c1 = arith.constant 1 : index
    %c0_21 = arith.constant 0 : index
    %23 = vector.load %arg1[%c0_19, %c0_20, %c1, %c0_21] : memref<1x9x9x144xbf16, #tpu.memory_space<vmem>>, vector<1x8x8x144xbf16>
    %24 = vector.shape_cast %23 : vector<1x8x8x144xbf16> to vector<8x8x144xbf16>
    %25 = vector.shape_cast %24 : vector<8x8x144xbf16> to vector<64x144xbf16>
    %c3 = arith.constant 3 : index
    %c0_22 = arith.constant 0 : index
    %c0_23 = arith.constant 0 : index
    %26 = vector.load %arg2[%c3, %c0_22, %c0_23] : memref<9x144x16xbf16, #tpu.memory_space<vmem>>, vector<1x144x16xbf16>
    %27 = vector.shape_cast %26 : vector<1x144x16xbf16> to vector<144x16xbf16>
    %cst_24 = arith.constant dense<0.000000e+00> : vector<64x16xf32>
    %28 = tpu.matmul %25, %27, %cst_24 {dimension_numbers = #tpu.dot_dimension_numbers<[1], [0], [0], [1], [0, 0, 1, 1], [], []>} : vector<64x144xbf16>, vector<144x16xbf16>, vector<64x16xf32> -> vector<64x16xf32>
    %29 = arith.addf %22, %28 : vector<64x16xf32>
    %c0_25 = arith.constant 0 : index
    %c0_26 = arith.constant 0 : index
    %30 = vector.load %arg3[%c0_25, %c0_26] : memref<1x16xf32, #tpu.memory_space<vmem>>, vector<1x16xf32>
    %31 = vector.broadcast %30 : vector<1x16xf32> to vector<64x16xf32>
    %32 = arith.addf %29, %31 : vector<64x16xf32>
    %33 = arith.negf %32 : vector<64x16xf32>
    %34 = math.exp %33 : vector<64x16xf32>
    %cst_27 = arith.constant 1.000000e+00 : f32
    %35 = vector.broadcast %cst_27 : f32 to vector<64x16xf32>
    %36 = arith.addf %35, %34 : vector<64x16xf32>
    %37 = arith.divf %35, %36 : vector<64x16xf32>
    %c0_28 = arith.constant 0 : index
    %c1_29 = arith.constant 1 : index
    %c0_30 = arith.constant 0 : index
    %c0_31 = arith.constant 0 : index
    %38 = vector.load %arg4[%c0_28, %c1_29, %c0_30, %c0_31] : memref<1x4x64x16xf32, #tpu.memory_space<vmem>>, vector<1x1x64x16xf32>
    %39 = vector.shape_cast %38 : vector<1x1x64x16xf32> to vector<64x16xf32>
    %40 = vector.shape_cast %37 : vector<64x16xf32> to vector<1x1x64x16xf32>
    tpu.vector_store %arg4[%c0_28, %c1_29, %c0_30, %c0_31], %40 {strides = array<i32>} : memref<1x4x64x16xf32, #tpu.memory_space<vmem>>, vector<1x1x64x16xf32>,
    %c0_32 = arith.constant 0 : index
    %c0_33 = arith.constant 0 : index
    %c0_34 = arith.constant 0 : index
    %c0_35 = arith.constant 0 : index
    %41 = vector.load %arg1[%c0_32, %c0_33, %c0_34, %c0_35] : memref<1x9x9x144xbf16, #tpu.memory_space<vmem>>, vector<1x8x8x144xbf16>
    %42 = vector.shape_cast %41 : vector<1x8x8x144xbf16> to vector<8x8x144xbf16>
    %43 = vector.shape_cast %42 : vector<8x8x144xbf16> to vector<64x144xbf16>
    %c7 = arith.constant 7 : index
    %c0_36 = arith.constant 0 : index
    %c0_37 = arith.constant 0 : index
    %44 = vector.load %arg2[%c7, %c0_36, %c0_37] : memref<9x144x16xbf16, #tpu.memory_space<vmem>>, vector<1x144x16xbf16>
    %45 = vector.shape_cast %44 : vector<1x144x16xbf16> to vector<144x16xbf16>
    %cst_38 = arith.constant dense<0.000000e+00> : vector<64x16xf32>
    %46 = tpu.matmul %43, %45, %cst_38 {dimension_numbers = #tpu.dot_dimension_numbers<[1], [0], [0], [1], [0, 0, 1, 1], [], []>} : vector<64x144xbf16>, vector<144x16xbf16>, vector<64x16xf32> -> vector<64x16xf32>
    %c0_39 = arith.constant 0 : index
    %c1_40 = arith.constant 1 : index
    %c0_41 = arith.constant 0 : index
    %c0_42 = arith.constant 0 : index
    %47 = vector.load %arg1[%c0_39, %c1_40, %c0_41, %c0_42] : memref<1x9x9x144xbf16, #tpu.memory_space<vmem>>, vector<1x8x8x144xbf16>
    %48 = vector.shape_cast %47 : vector<1x8x8x144xbf16> to vector<8x8x144xbf16>
    %49 = vector.shape_cast %48 : vector<8x8x144xbf16> to vector<64x144xbf16>
    %c1_43 = arith.constant 1 : index
    %c0_44 = arith.constant 0 : index
    %c0_45 = arith.constant 0 : index
    %50 = vector.load %arg2[%c1_43, %c0_44, %c0_45] : memref<9x144x16xbf16, #tpu.memory_space<vmem>>, vector<1x144x16xbf16>
    %51 = vector.shape_cast %50 : vector<1x144x16xbf16> to vector<144x16xbf16>
    %cst_46 = arith.constant dense<0.000000e+00> : vector<64x16xf32>
    %52 = tpu.matmul %49, %51, %cst_46 {dimension_numbers = #tpu.dot_dimension_numbers<[1], [0], [0], [1], [0, 0, 1, 1], [], []>} : vector<64x144xbf16>, vector<144x16xbf16>, vector<64x16xf32> -> vector<64x16xf32>
    %53 = arith.addf %46, %52 : vector<64x16xf32>
    %c0_47 = arith.constant 0 : index
    %c0_48 = arith.constant 0 : index
    %54 = vector.load %arg3[%c0_47, %c0_48] : memref<1x16xf32, #tpu.memory_space<vmem>>, vector<1x16xf32>
    %55 = vector.broadcast %54 : vector<1x16xf32> to vector<64x16xf32>
    %56 = arith.addf %53, %55 : vector<64x16xf32>
    %57 = arith.negf %56 : vector<64x16xf32>
    %58 = math.exp %57 : vector<64x16xf32>
    %cst_49 = arith.constant 1.000000e+00 : f32
    %59 = vector.broadcast %cst_49 : f32 to vector<64x16xf32>
    %60 = arith.addf %59, %58 : vector<64x16xf32>
    %61 = arith.divf %59, %60 : vector<64x16xf32>
    %c0_50 = arith.constant 0 : index
    %c2 = arith.constant 2 : index
    %c0_51 = arith.constant 0 : index
    %c0_52 = arith.constant 0 : index
    %62 = vector.load %arg4[%c0_50, %c2, %c0_51, %c0_52] : memref<1x4x64x16xf32, #tpu.memory_space<vmem>>, vector<1x1x64x16xf32>
    %63 = vector.shape_cast %62 : vector<1x1x64x16xf32> to vector<64x16xf32>
    %64 = vector.shape_cast %61 : vector<64x16xf32> to vector<1x1x64x16xf32>
    tpu.vector_store %arg4[%c0_50, %c2, %c0_51, %c0_52], %64 {strides = array<i32>} : memref<1x4x64x16xf32, #tpu.memory_space<vmem>>, vector<1x1x64x16xf32>,
    %c0_53 = arith.constant 0 : index
    %c0_54 = arith.constant 0 : index
    %c0_55 = arith.constant 0 : index
    %c0_56 = arith.constant 0 : index
    %65 = vector.load %arg1[%c0_53, %c0_54, %c0_55, %c0_56] : memref<1x9x9x144xbf16, #tpu.memory_space<vmem>>, vector<1x8x8x144xbf16>
    %66 = vector.shape_cast %65 : vector<1x8x8x144xbf16> to vector<8x8x144xbf16>
    %67 = vector.shape_cast %66 : vector<8x8x144xbf16> to vector<64x144xbf16>
    %c8 = arith.constant 8 : index
    %c0_57 = arith.constant 0 : index
    %c0_58 = arith.constant 0 : index
    %68 = vector.load %arg2[%c8, %c0_57, %c0_58] : memref<9x144x16xbf16, #tpu.memory_space<vmem>>, vector<1x144x16xbf16>
    %69 = vector.shape_cast %68 : vector<1x144x16xbf16> to vector<144x16xbf16>
    %cst_59 = arith.constant dense<0.000000e+00> : vector<64x16xf32>
    %70 = tpu.matmul %67, %69, %cst_59 {dimension_numbers = #tpu.dot_dimension_numbers<[1], [0], [0], [1], [0, 0, 1, 1], [], []>} : vector<64x144xbf16>, vector<144x16xbf16>, vector<64x16xf32> -> vector<64x16xf32>
    %c0_60 = arith.constant 0 : index
    %c0_61 = arith.constant 0 : index
    %c1_62 = arith.constant 1 : index
    %c0_63 = arith.constant 0 : index
    %71 = vector.load %arg1[%c0_60, %c0_61, %c1_62, %c0_63] : memref<1x9x9x144xbf16, #tpu.memory_space<vmem>>, vector<1x8x8x144xbf16>
    %72 = vector.shape_cast %71 : vector<1x8x8x144xbf16> to vector<8x8x144xbf16>
    %73 = vector.shape_cast %72 : vector<8x8x144xbf16> to vector<64x144xbf16>
    %c6 = arith.constant 6 : index
    %c0_64 = arith.constant 0 : index
    %c0_65 = arith.constant 0 : index
    %74 = vector.load %arg2[%c6, %c0_64, %c0_65] : memref<9x144x16xbf16, #tpu.memory_space<vmem>>, vector<1x144x16xbf16>
    %75 = vector.shape_cast %74 : vector<1x144x16xbf16> to vector<144x16xbf16>
    %cst_66 = arith.constant dense<0.000000e+00> : vector<64x16xf32>
    %76 = tpu.matmul %73, %75, %cst_66 {dimension_numbers = #tpu.dot_dimension_numbers<[1], [0], [0], [1], [0, 0, 1, 1], [], []>} : vector<64x144xbf16>, vector<144x16xbf16>, vector<64x16xf32> -> vector<64x16xf32>
    %77 = arith.addf %70, %76 : vector<64x16xf32>
    %c0_67 = arith.constant 0 : index
    %c1_68 = arith.constant 1 : index
    %c0_69 = arith.constant 0 : index
    %c0_70 = arith.constant 0 : index
    %78 = vector.load %arg1[%c0_67, %c1_68, %c0_69, %c0_70] : memref<1x9x9x144xbf16, #tpu.memory_space<vmem>>, vector<1x8x8x144xbf16>
    %79 = vector.shape_cast %78 : vector<1x8x8x144xbf16> to vector<8x8x144xbf16>
    %80 = vector.shape_cast %79 : vector<8x8x144xbf16> to vector<64x144xbf16>
    %c2_71 = arith.constant 2 : index
    %c0_72 = arith.constant 0 : index
    %c0_73 = arith.constant 0 : index
    %81 = vector.load %arg2[%c2_71, %c0_72, %c0_73] : memref<9x144x16xbf16, #tpu.memory_space<vmem>>, vector<1x144x16xbf16>
    %82 = vector.shape_cast %81 : vector<1x144x16xbf16> to vector<144x16xbf16>
    %cst_74 = arith.constant dense<0.000000e+00> : vector<64x16xf32>
    %83 = tpu.matmul %80, %82, %cst_74 {dimension_numbers = #tpu.dot_dimension_numbers<[1], [0], [0], [1], [0, 0, 1, 1], [], []>} : vector<64x144xbf16>, vector<144x16xbf16>, vector<64x16xf32> -> vector<64x16xf32>
    %84 = arith.addf %77, %83 : vector<64x16xf32>
    %c0_75 = arith.constant 0 : index
    %c1_76 = arith.constant 1 : index
    %c1_77 = arith.constant 1 : index
    %c0_78 = arith.constant 0 : index
    %85 = vector.load %arg1[%c0_75, %c1_76, %c1_77, %c0_78] : memref<1x9x9x144xbf16, #tpu.memory_space<vmem>>, vector<1x8x8x144xbf16>
    %86 = vector.shape_cast %85 : vector<1x8x8x144xbf16> to vector<8x8x144xbf16>
    %87 = vector.shape_cast %86 : vector<8x8x144xbf16> to vector<64x144xbf16>
    %c0_79 = arith.constant 0 : index
    %c0_80 = arith.constant 0 : index
    %c0_81 = arith.constant 0 : index
    %88 = vector.load %arg2[%c0_79, %c0_80, %c0_81] : memref<9x144x16xbf16, #tpu.memory_space<vmem>>, vector<1x144x16xbf16>
    %89 = vector.shape_cast %88 : vector<1x144x16xbf16> to vector<144x16xbf16>
    %cst_82 = arith.constant dense<0.000000e+00> : vector<64x16xf32>
    %90 = tpu.matmul %87, %89, %cst_82 {dimension_numbers = #tpu.dot_dimension_numbers<[1], [0], [0], [1], [0, 0, 1, 1], [], []>} : vector<64x144xbf16>, vector<144x16xbf16>, vector<64x16xf32> -> vector<64x16xf32>
    %91 = arith.addf %84, %90 : vector<64x16xf32>
    %c0_83 = arith.constant 0 : index
    %c0_84 = arith.constant 0 : index
    %92 = vector.load %arg3[%c0_83, %c0_84] : memref<1x16xf32, #tpu.memory_space<vmem>>, vector<1x16xf32>
    %93 = vector.broadcast %92 : vector<1x16xf32> to vector<64x16xf32>
    %94 = arith.addf %91, %93 : vector<64x16xf32>
    %95 = arith.negf %94 : vector<64x16xf32>
    %96 = math.exp %95 : vector<64x16xf32>
    %cst_85 = arith.constant 1.000000e+00 : f32
    %97 = vector.broadcast %cst_85 : f32 to vector<64x16xf32>
    %98 = arith.addf %97, %96 : vector<64x16xf32>
    %99 = arith.divf %97, %98 : vector<64x16xf32>
    %c0_86 = arith.constant 0 : index
    %c3_87 = arith.constant 3 : index
    %c0_88 = arith.constant 0 : index
    %c0_89 = arith.constant 0 : index
    %100 = vector.load %arg4[%c0_86, %c3_87, %c0_88, %c0_89] : memref<1x4x64x16xf32, #tpu.memory_space<vmem>>, vector<1x1x64x16xf32>
    %101 = vector.shape_cast %100 : vector<1x1x64x16xf32> to vector<64x16xf32>
    %102 = vector.shape_cast %99 : vector<64x16xf32> to vector<1x1x64x16xf32>
    tpu.vector_store %arg4[%c0_86, %c3_87, %c0_88, %c0_89], %102 {strides = array<i32>} : memref<1x4x64x16xf32, #tpu.memory_space<vmem>>, vector<1x1x64x16xf32>,
    return
  }
  func.func @transform_0(%arg0: i32) -> (i32, i32, i32, i32) {
    %c0_i32 = arith.constant 0 : i32
    %c0_i32_0 = arith.constant 0 : i32
    %c0_i32_1 = arith.constant 0 : i32
    %c0_i32_2 = arith.constant 0 : i32
    return %arg0, %c0_i32, %c0_i32_0, %c0_i32_1 : i32, i32, i32, i32
  }
  func.func @transform_1(%arg0: i32) -> (i32, i32, i32) {
    %c0_i32 = arith.constant 0 : i32
    %c0_i32_0 = arith.constant 0 : i32
    %c0_i32_1 = arith.constant 0 : i32
    %c0_i32_2 = arith.constant 0 : i32
    return %c0_i32, %c0_i32_0, %c0_i32_1 : i32, i32, i32
  }
  func.func @transform_2(%arg0: i32) -> (i32, i32) {
    %c0_i32 = arith.constant 0 : i32
    %c0_i32_0 = arith.constant 0 : i32
    %c0_i32_1 = arith.constant 0 : i32
    return %c0_i32, %c0_i32_0 : i32, i32
  }
  func.func @transform_3(%arg0: i32) -> (i32, i32, i32, i32) {
    %c0_i32 = arith.constant 0 : i32
    %c0_i32_0 = arith.constant 0 : i32
    %c0_i32_1 = arith.constant 0 : i32
    %c0_i32_2 = arith.constant 0 : i32
    return %arg0, %c0_i32, %c0_i32_0, %c0_i32_1 : i32, i32, i32, i32
  }
}

</mosaic_0001>

<bundles_post_ra>
// kernel: tile.24
= control target key start
LH: loop header
LB: loop body
LE: loop exit
PB: predicated region body
PF: predicated region fallthrough
CT: control target
= control target key end

     0   :  { %s7_s6 = smov 3  ;;  %s21_s9 = smov 3  ;;  %vm4_vm0 = vcmask 130048   ;;  %vm11_vm1 = vcmask 1048448   ;;  %vm18_vm2 = vcmask 917248   ;;  %vm25_vm3 = vcmask 786048   ;;  %s131_s0 = inlined_call_operand.vmem [shape: f32[16,16], index: 0, kind: input, shape index: {}]   ;;  %s132_s1 = inlined_call_operand.vmem [shape: f32[1,256], index: 1, kind: output, shape index: {}]  }
   0x1   :  { %v69_v0 = vld [vmem:[%s131_s0 + $0x7] ss:$8 sm:%s7_s6]   ;;  %s84_s10 = smov 112   ;;  %v71_v1 = vld [vmem:[%s131_s0 + $0x5] ss:$8 sm:%s21_s9]   ;;  %s14_s13 = smov 3 }
   0x2   :  { %9 = vrot.lane.b32.xlu0 %v69_v0, %s84_s10  ;;  %s85_s14 = smov 80   ;;  %v70_v2 = vld [vmem:[%s131_s0 + $0x6] ss:$8 sm:%s14_s13]   ;;  %s28_s17 = smov 3  ;;  %vm32_vm4 = vcmask 654848   ;;  %vm39_vm5 = vcmask 523648  }
   0x3   :  { %23 = vrot.lane.b32.xlu1 %v71_v1, %s85_s14  ;;  %v72_v3 = vld [vmem:[%s131_s0 + $0x4] ss:$8 sm:%s28_s17]   ;;  %s35_s20 = smov 3  ;;  %s42_s21 = smov 3  ;;  %vm46_vm6 = vcmask 392448   ;;  %vm53_vm7 = vcmask 261248  }
   0x4   :  { %s86_s22 = smov 96   ;;  %s87_s23 = smov 64   ;;  %v73_v4 = vld [vmem:[%s131_s0 + $0x3] ss:$8 sm:%s35_s20]   ;;  %v74_v5 = vld [vmem:[%s131_s0 + $0x2] ss:$8 sm:%s42_s21]  }
   0x5   :  { %s2_s26 = smov 3  ;;  %s49_s29 = smov 3 }
   0x6   :  { %16 = vrot.lane.b32.xlu0 %v70_v2, %s86_s22  ;;  %v3_v6 = vld [vmem:[%s131_s0] ss:$8 sm:%s2_s26]   ;;  %s88_s3 = smov 48   ;;  %s89_s4 = smov 32  }
   0x7   :  { %30 = vrot.lane.b32.xlu1 %v72_v3, %s87_s23  ;;  %5 = vst.msk [vmem:[#allocation0] ss:$8 sm:$0x3] %vm4_vm0, %v3_v6   ;;  %v75_v7 = vld [vmem:[%s131_s0 + $0x1] ss:$8 sm:%s49_s29]   ;;  %s90_s0 = smov 16  }
   0xa   :  { %37 = vrot.lane.b32.xlu0 %v73_v4, %s88_s3 }
   0xb   :  { %44 = vrot.lane.b32.xlu1 %v74_v5, %s89_s4 }
   0xe   :  { %51 = vrot.lane.b32.xlu0 %v75_v7, %s90_s0 }
  0x74   :  { %v10_v8 = vpop.permute.xlu0 %9  }
  0x75   :  { %12 = vst.msk [vmem:[#allocation0] ss:$8 sm:$0x3] %vm11_vm1, %v10_v8   ;;  %v24_v9 = vpop.permute.xlu1 %23  }
  0x78   :  { %v17_v10 = vpop.permute.xlu0 %16  }
  0x79   :  { %19 = vst.msk [vmem:[#allocation0] ss:$8 sm:$0x3] %vm18_vm2, %v17_v10   ;;  %v31_v11 = vpop.permute.xlu1 %30  }
  0x7a   :  { %26 = vst.msk [vmem:[#allocation0] ss:$8 sm:$0x3] %vm25_vm3, %v24_v9  }
  0x7b   :  { %33 = vst.msk [vmem:[#allocation0] ss:$8 sm:$0x3] %vm32_vm4, %v31_v11  }
  0x7c   :  { %v38_v12 = vpop.permute.xlu0 %37  }
  0x7d   :  { %40 = vst.msk [vmem:[#allocation0] ss:$8 sm:$0x3] %vm39_vm5, %v38_v12   ;;  %v45_v13 = vpop.permute.xlu1 %44  }
  0x7e   :  { %47 = vst.msk [vmem:[#allocation0] ss:$8 sm:$0x3] %vm46_vm6, %v45_v13  }
  0x80   :  { %v52_v14 = vpop.permute.xlu0 %51  }
  0x81   :  { %54 = vst.msk [vmem:[#allocation0] ss:$8 sm:$0x3] %vm53_vm7, %v52_v14  }
  0x88   :  { %v59_v15 = vld [vmem:[#allocation0] sm:$0x1]  ;;  %v64_v16 = vld [vmem:[#allocation0 + $0x8] sm:$0x1] }
  0x89   :  { %62 = vst [vmem:[%s132_s1] sm:$0x1] %v59_v15  ;;  %76 = vst [vmem:[%s132_s1 + $0x1] sm:$0x1] %v64_v16 }

// kernel: tile.23
= control target key start
LH: loop header
LB: loop body
LE: loop exit
PB: predicated region body
PF: predicated region fallthrough
CT: control target
= control target key end

     0   :  { %s28_s0 = inlined_call_operand.vmem [shape: f32[16], index: 0, kind: input, shape index: {}]   ;;  %s29_s1 = inlined_call_operand.vmem [shape: f32[16,16], index: 1, kind: output, shape index: {}]  }
   0x1   :  { %v4_v0 = vld [vmem:[%s28_s0] ss:$0 sm:$0xff] }
   0x2   :  { %5 = vst [vmem:[%s29_s1] sm:$0xff] %v4_v0  ;;  %8 = vst [vmem:[%s29_s1 + $0x8] sm:$0xff] %v4_v0 }

// kernel: autoencoder_forward.4
= control target key start
LH: loop header
LB: loop body
LE: loop exit
PB: predicated region body
PF: predicated region fallthrough
CT: control target
= control target key end

     0   :  { %s6688_s12 = smov 0   ;;  %s9348_s0 = inlined_call_operand.vmem [shape: bf16[2,18,18,18], index: 0, kind: input, shape index: {}]   ;;  %s9349_s1 = inlined_call_operand.vmem [shape: bf16[9,18,256], index: 1, kind: input, shape index: {}]   ;;  %s9350_s2 = inlined_call_operand.vmem [shape: f32[1,256], index: 2, kind: input, shape index: {}]   ;;  %s9351_s3 = inlined_call_operand.vmem [shape: bf16[2,1,256,256], index: 3, kind: output, shape index: {}]  }
   0x1 LB: > { %s5842_s13 = sadd.s32 4294967295, %s6665_s12   ;;  %p5846_p0 = scmp.ge.s32.totalorder %s6665_s12, 1  ;;  %s6665_s12 = sphi %s6688_s12, %s13_s12  }
   0x2   : > { %p137_p1 = scmp.lt.s32.totalorder %s6665_s12, 3 }
   0x4   : > { %p138_p2 = pnand %p5846_p0, %p137_p1 }
   0x6   : > { %141 = sbr.rel (%p138_p2) target bundleno = 816 (0x330), region = 32 }
   0xb   : > { %v5852_v0 = vld [vmem:[%s9349_s1 + $0x28] sm:$0x11]  ;;  %vm726_vm0 = vcmask 1040384   ;;  %v6530_v3 = vld [vmem:[%s9349_s1 + $0x1c] ss:$8 sps:$4 sm:$0xff]   ;;  %v9359_v4 = vmov 0  }
   0xc   : > { %v5872_v1 = vcombine.high %v5852_v0, %v5852_v0  ;;  %v5871_v2 = vcombine.low %v5852_v0, %v5852_v0  ;;  %765 = vmatprep.mubr.bf16.mxu0 %v9359_v4  ;;  %845 = vmatprep.mubr.bf16.mxu1 %v9359_v4  ;;  %v206_v5 = vld [vmem:[%s9349_s1 + $0x10] sm:$0x11]  ;;  %p161_p3 = scmp.lt.s32.totalorder %s5842_s13, 1  ;;  %v5945_v7 = vld [vmem:[%s9349_s1 + $0x40] sm:$0x11]  ;;  %vm677_vm3 = vcmask 146432  }
   0xd   : > { %v6532_v8 = vld [vmem:[%s9349_s1 + $0x18] ss:$8 sps:$4 sm:$0xff]   ;;  %v5908_v9 = vcombine.low %v206_v5, %v206_v5  ;;  %v5964_v10 = vcombine.low %v5945_v7, %v5945_v7  ;;  %v5909_v11 = vcombine.high %v206_v5, %v206_v5  ;;  %v5965_v12 = vcombine.high %v5945_v7, %v5945_v7  ;;  %v6727_v14 = vld [vmem:[%s9349_s1 + $0x70] sm:$0x11] }
   0xe   : > { %6514 = vmatprep.subr.msk.bf16.mxu1 %vm726_vm0, %v5872_v1  ;;  %5873 = vmatprep.subr.msk.bf16.mxu0 %vm726_vm0, %v5872_v1  ;;  %v728_v6 = vsel %vm726_vm0, %v5871_v2, 0  ;;  %s9632_s13 = smov (!%p161_p3, %s5842_s13), 1  ;;  %vm223_vm1 = vsmask.f32 3328  ;;  %v6722_v13 = vld [vmem:[%s9349_s1 + $0x58] sm:$0x11]  ;;  %v6125_v22 = vcombine.high %v6727_v14, %v6727_v14 }
   0xf   : > { %6516 = vmatpush1.bf16.msra.mxu1 %v728_v6  ;;  %746 = vmatpush1.bf16.msra.mxu0 %v728_v6  ;;  %s6518_s24 = smul.u32 216, %s9632_s13  ;;  %vm224_vm2 = vsmask.f32 7440  ;;  %v6735_v15 = vsel %vm726_vm0, %v5908_v9, 0  ;;  %v6738_v16 = vsel %vm726_vm0, %v5964_v10, 0  ;;  %v6037_v20 = vcombine.high %v6722_v13, %v6722_v13  ;;  %s6481_s26 = sshll.u32 %s9632_s13, 8 }
  0x10   : > { %6515 = vmatprep.subr.bf16.mxu1 %v6530_v3  ;;  %747 = vmatprep.subr.bf16.mxu0 %v6530_v3  ;;  %vm6775_vm4 = vmor %vm223_vm1, %vm224_vm2  ;;  %v6542_v9 = vld [vmem:[%s9349_s1 + $0x34] ss:$8 sps:$4 sm:$0xff]   ;;  %vm1316_vm5 = vcmask 1042432   ;;  %vm1317_vm6 = vcmask 1046532   ;;  %s9191_s29 = scalar_lea.vmem %s9351_s3, %s6481_s26 }
  0x11   : > { %s6732_s4 = scalar_lea.vmem %s9348_s0, %s6518_s24  ;;  %vm7054_vm7 = vmor %vm1316_vm5, %vm1317_vm6 }
  0x12   : > { %v6742_v17 = vld [vmem:[%s6732_s4] sm:$0xf]  ;;  %v6745_v18 = vld [vmem:[%s6732_s4 + $0x4] sm:$0xf]  ;;  %v6748_v19 = vld [vmem:[%s6732_s4 + $0x8] sm:$0x1] }
  0x13   : > { %6517 = vmatpush1.bf16.msra.mxu1 %v6532_v8  ;;  %748 = vmatpush1.bf16.msra.mxu0 %v6532_v8  ;;  %v227_v23 = vshrl.u32 %v6742_v17, 16  ;;  %v230_v24 = vshll.u32 %v6742_v17, 16  ;;  %v236_v25 = vshll.u32 %v6745_v18, 16  ;;  %v240_v26 = vshrl.u32 %v6745_v18, 16  ;;  %v188_v27 = vld [vmem:[%s6732_s4 + $0x60] sm:$0xf] }
  0x14   : > { %5910 = vmatprep.subr.msk.bf16.mxu1 %vm726_vm0, %v5909_v11  ;;  %5966 = vmatprep.subr.msk.bf16.mxu0 %vm726_vm0, %v5965_v12  ;;  %v246_v28 = vshll.u32 %v6748_v19, 16  ;;  %v189_v31 = vld [vmem:[%s6732_s4 + $0x64] sm:$0xf]  ;;  %v419_v32 = vshrl.u32 %v188_v27, 16  ;;  %v215_v37 = vld [vmem:[%s6732_s4 + $0x68] sm:$0x1] }
  0x15   : > { %v229_v33 = vrot.slane %v227_v23, 4  ;;  %v232_v34 = vrot.slane %v230_v24, 5  ;;  %v238_v35 = vrot.slane %v236_v25, 5  ;;  %v242_v36 = vrot.slane %v240_v26, 4  ;;  %v6768_v42 = vld [vmem:[%s6732_s4 + $0xc] sm:$0xf] }
  0x16   : > { %v248_v38 = vrot.slane %v246_v28, 5  ;;  %v421_v39 = vrot.slane %v419_v32, 4  ;;  %v422_v40 = vshll.u32 %v188_v27, 16  ;;  %v428_v41 = vshll.u32 %v189_v31, 16  ;;  %v6771_v47 = vld [vmem:[%s6732_s4 + $0x10] sm:$0xf] }
  0x17   : > { %v233_v43 = vor.u32 %v232_v34, %v229_v33  ;;  %v243_v44 = vor.u32 %v242_v36, %v238_v35  ;;  %v432_v45 = vshrl.u32 %v189_v31, 16  ;;  %v438_v46 = vshll.u32 %v215_v37, 16  ;;  %v6782_v57 = vld [vmem:[%s6732_s4 + $0x14] sm:$0x1]  ;;  %v190_v62 = vld [vmem:[%s6732_s4 + $0x6c] sm:$0xf] }
  0x18   : > { %v424_v49 = vrot.slane %v422_v40, 5  ;;  %v430_v50 = vrot.slane %v428_v41, 5  ;;  %v251_v51 = vshrl.u32 %v6768_v42, 16  ;;  %v254_v52 = vshll.u32 %v6768_v42, 16  ;;  %v191_v3 = vld [vmem:[%s6732_s4 + $0x70] sm:$0xf] }
  0x19   : > { %v234_v53 = vrot.slane %v233_v43, 4  ;;  %v244_v54 = vrot.slane %v243_v44, 4  ;;  %v434_v55 = vrot.slane %v432_v45, 4  ;;  %v440_v56 = vrot.slane %v438_v46, 5  ;;  %v216_v23 = vld [vmem:[%s6732_s4 + $0x74] sm:$0x1] }
  0x1a   : > { %v425_v58 = vor.u32 %v424_v49, %v421_v39  ;;  %v253_v59 = vrot.slane %v251_v51, 4  ;;  %v256_v60 = vrot.slane %v254_v52, 5  ;;  %v260_v61 = vshll.u32 %v6771_v47, 16  ;;  %v6801_v31 = vld [vmem:[%s6732_s4 + $0x18] sm:$0xf] }
  0x1b   : > { %v239_v63 = vsel %vm6775_vm4, %v234_v53, %v238_v35  ;;  %v249_v0 = vsel %vm6775_vm4, %v244_v54, %v248_v38  ;;  %v435_v1 = vor.u32 %v434_v55, %v430_v50  ;;  %v264_v2 = vshrl.u32 %v6771_v47, 16  ;;  %v6808_v36 = vld [vmem:[%s6732_s4 + $0x1c] sm:$0xf]  ;;  %v6539_v41 = vld [vmem:[%s9349_s1 + $0x4] ss:$8 sps:$4 sm:$0xff]  }
  0x1c   : > { %v5853_v5 = vcombine.low %v239_v63, %v249_v0  ;;  %v426_v6 = vrot.slane %v425_v58, 4  ;;  %v257_v7 = vor.u32 %v256_v60, %v253_v59  ;;  %v262_v8 = vrot.slane %v260_v61, 5  ;;  %v6819_v46 = vld [vmem:[%s6732_s4 + $0x20] sm:$0x1]  ;;  %v192_v55 = vld [vmem:[%s6732_s4 + $0x78] sm:$0xf] }
  0x1d   : > { %v436_v10 = vrot.slane %v435_v1, 4  ;;  %v266_v11 = vrot.slane %v264_v2, 4  ;;  %v270_v12 = vshll.u32 %v6782_v57, 16  ;;  %v443_v24 = vshrl.u32 %v190_v62, 16  ;;  %v193_v61 = vld [vmem:[%s6732_s4 + $0x7c] sm:$0xf] }
  0x1e   : > { %5874 = vmatmul.mubr.msk.bf16.vlgmr.msra.gmra.mxu0 %vm677_vm3, %v5853_v5  ;;  %v431_v25 = vsel %vm6775_vm4, %v426_v6, %v430_v50  ;;  %v258_v26 = vrot.slane %v257_v7, 4  ;;  %v446_v27 = vshll.u32 %v190_v62, 16  ;;  %v452_v28 = vshll.u32 %v191_v3, 16  ;;  %v6537_v50 = vld [vmem:[%s9349_s1] ss:$8 sps:$4 sm:$0xff]  }
  0x1f   : > { %v441_v32 = vsel %vm6775_vm4, %v436_v10, %v440_v56  ;;  %1565 = vmatpush1.bf16.msra.mxu0 %v6738_v16  ;;  %775 = vmatprep.mubr.bf16.mxu0 %v9359_v4  ;;  %v267_v33 = vor.u32 %v266_v11, %v262_v8  ;;  %v272_v34 = vrot.slane %v270_v12, 5  ;;  %v445_v35 = vrot.slane %v443_v24, 4  ;;  %v6540_v16 = vld [vmem:[%s9349_s1 + $0x30] ss:$8 sps:$4 sm:$0xff]   ;;  %v6845_v11 = vld [vmem:[%s6732_s4 + $0x24] sm:$0xf] }
  0x20   : > { %v5861_v37 = vcombine.low %v431_v25, %v441_v32  ;;  %v263_v38 = vsel %vm6775_vm4, %v258_v26, %v262_v8  ;;  %v448_v39 = vrot.slane %v446_v27, 5  ;;  %v454_v40 = vrot.slane %v452_v28, 5  ;;  %1566 = vmatprep.subr.bf16.mxu0 %v6542_v9  ;;  %v217_v8 = vld [vmem:[%s6732_s4 + $0x80] sm:$0x1]  ;;  %v7038_v30 = vld [vmem:[%s6732_s4 + $0xbc] sm:$0x1] }
  0x21   : > { %v268_v43 = vrot.slane %v267_v33, 4  ;;  %v456_v44 = vshrl.u32 %v191_v3, 16  ;;  %v462_v45 = vshll.u32 %v216_v23, 16  ;;  %v275_v49 = vshrl.u32 %v6801_v31, 16 }
  0x22   : > { %5882 = vmatmul.mubr.msk.bf16.vlgmr.msra.gmra.mxu1 %vm677_vm3, %v5861_v37  ;;  %v449_v51 = vor.u32 %v448_v39, %v445_v35  ;;  %v278_v52 = vshll.u32 %v6801_v31, 16  ;;  %v284_v53 = vshll.u32 %v6808_v36, 16  ;;  %v288_v54 = vshrl.u32 %v6808_v36, 16  ;;  %v6855_v35 = vld [vmem:[%s6732_s4 + $0x28] sm:$0xf] }
  0x23   : > { %1088 = vmatpush1.bf16.msra.mxu1 %v6735_v15  ;;  %855 = vmatprep.mubr.bf16.mxu1 %v9359_v4  ;;  %v273_v56 = vsel %vm6775_vm4, %v268_v43, %v272_v34  ;;  %v458_v58 = vrot.slane %v456_v44, 4  ;;  %v464_v59 = vrot.slane %v462_v45, 5  ;;  %v277_v60 = vrot.slane %v275_v49, 4  ;;  %v6864_v43 = vld [vmem:[%s6732_s4 + $0x84] sm:$0xf] }
  0x24   : > { %v5854_v62 = vcombine.low %v263_v38, %v273_v56  ;;  %v450_v63 = vrot.slane %v449_v51, 4  ;;  %v280_v0 = vrot.slane %v278_v52, 5  ;;  %v286_v1 = vrot.slane %v284_v53, 5  ;;  %1089 = vmatprep.subr.bf16.mxu1 %v6539_v41  ;;  %1567 = vmatpush1.bf16.msra.mxu0 %v6540_v16  ;;  %v6861_v16 = vld [vmem:[%s6732_s4 + $0x2c] sm:$0x1] }
  0x25   : > { %v459_v2 = vor.u32 %v458_v58, %v454_v40  ;;  %v290_v3 = vrot.slane %v288_v54, 4  ;;  %v294_v15 = vshll.u32 %v6819_v46, 16  ;;  %v467_v5 = vshrl.u32 %v192_v55, 16  ;;  %6126 = vmatprep.subr.msk.bf16.mxu0 %vm726_vm0, %v6125_v22  ;;  %v6875_v58 = vld [vmem:[%s6732_s4 + $0x88] sm:$0xf] }
  0x26   : > { %5875 = vmatmul.mubr.msk.bf16.gmra.mxu0 %vm677_vm3, %v5854_v62  ;;  %v455_v6 = vsel %vm6775_vm4, %v450_v63, %v454_v40  ;;  %v281_v7 = vor.u32 %v280_v0, %v277_v60  ;;  %v470_v9 = vshll.u32 %v192_v55, 16  ;;  %v476_v10 = vshll.u32 %v193_v61, 16  ;;  %v6882_v63 = vld [vmem:[%s6732_s4 + $0x8c] sm:$0x1] }
  0x27   : > { %v460_v12 = vrot.slane %v459_v2, 4  ;;  %785 = vmatprep.mubr.bf16.mxu0 %v9359_v4  ;;  %v291_v23 = vor.u32 %v290_v3, %v286_v1  ;;  %v296_v24 = vrot.slane %v294_v15, 5  ;;  %v469_v25 = vrot.slane %v467_v5, 4  ;;  %1090 = vmatpush1.bf16.msra.mxu1 %v6537_v50  ;;  %v6887_v5 = vld [vmem:[%s6732_s4 + $0x30] sm:$0xf] }
  0x28   : > { %v282_v22 = vrot.slane %v281_v7, 4  ;;  %v472_v26 = vrot.slane %v470_v9, 5  ;;  %v478_v27 = vrot.slane %v476_v10, 5  ;;  %v480_v28 = vshrl.u32 %v193_v61, 16  ;;  %6038 = vmatprep.subr.msk.bf16.mxu1 %vm726_vm0, %v6037_v20 }
  0x29   : > { %v465_v32 = vsel %vm6775_vm4, %v460_v12, %v464_v59  ;;  %v292_v33 = vrot.slane %v291_v23, 4  ;;  %v486_v34 = vshll.u32 %v217_v8, 16  ;;  %v299_v37 = vshrl.u32 %v6845_v11, 16 }
  0x2a   : > { %v5862_v38 = vcombine.low %v455_v6, %v465_v32  ;;  %v287_v39 = vsel %vm6775_vm4, %v282_v22, %v286_v1  ;;  %v473_v40 = vor.u32 %v472_v26, %v469_v25  ;;  %v482_v41 = vrot.slane %v480_v28, 4  ;;  %v6895_v25 = vld [vmem:[%s6732_s4 + $0x34] sm:$0xf]  ;;  %v6898_v28 = vld [vmem:[%s6732_s4 + $0x38] sm:$0x1] }
  0x2b   : > { %v297_v20 = vsel %vm6775_vm4, %v292_v33, %v296_v24  ;;  %v488_v44 = vrot.slane %v486_v34, 5  ;;  %v301_v45 = vrot.slane %v299_v37, 4  ;;  %v302_v49 = vshll.u32 %v6845_v11, 16 }
  0x2c   : > { %5883 = vmatmul.mubr.msk.bf16.gmra.mxu1 %vm677_vm3, %v5862_v38  ;;  %v5855_v50 = vcombine.low %v287_v39, %v297_v20  ;;  %v474_v51 = vrot.slane %v473_v40, 4  ;;  %v483_v52 = vor.u32 %v482_v41, %v478_v27  ;;  %v308_v53 = vshll.u32 %v6855_v35, 16 }
  0x2d   : > { %865 = vmatprep.mubr.bf16.mxu1 %v9359_v4  ;;  %v304_v54 = vrot.slane %v302_v49, 5  ;;  %v312_v55 = vshrl.u32 %v6855_v35, 16  ;;  %v318_v56 = vshll.u32 %v6861_v16, 16  ;;  %v491_v59 = vshrl.u32 %v6864_v43, 16 }
  0x2e   : > { %5876 = vmatmul.mubr.msk.bf16.gmra.mxu0 %vm677_vm3, %v5855_v50  ;;  %v479_v60 = vsel %vm6775_vm4, %v474_v51, %v478_v27  ;;  %v484_v61 = vrot.slane %v483_v52, 4  ;;  %v310_v62 = vrot.slane %v308_v53, 5  ;;  %v494_v0 = vshll.u32 %v6864_v43, 16  ;;  %v6915_v52 = vld [vmem:[%s6732_s4 + $0x94] sm:$0xf] }
  0x2f   : > { %795 = vmatprep.mubr.bf16.mxu0 %v9359_v4  ;;  %v305_v1 = vor.u32 %v304_v54, %v301_v45  ;;  %v314_v2 = vrot.slane %v312_v55, 4  ;;  %v320_v3 = vrot.slane %v318_v56, 5  ;;  %v493_v15 = vrot.slane %v491_v59, 4 }
  0x30   : > { %v489_v6 = vsel %vm6775_vm4, %v484_v61, %v488_v44  ;;  %v496_v7 = vrot.slane %v494_v0, 5  ;;  %v500_v8 = vshll.u32 %v6875_v58, 16  ;;  %v504_v9 = vshrl.u32 %v6875_v58, 16  ;;  %v6907_v44 = vld [vmem:[%s6732_s4 + $0x90] sm:$0xf] }
  0x31   : > { %v5863_v10 = vcombine.low %v479_v60, %v489_v6  ;;  %v306_v12 = vrot.slane %v305_v1, 4  ;;  %v315_v23 = vor.u32 %v314_v2, %v310_v62  ;;  %v510_v24 = vshll.u32 %v6882_v63, 16  ;;  %v6930_v6 = vld [vmem:[%s6732_s4 + $0x3c] sm:$0xf] }
  0x32   : > { %v497_v22 = vor.u32 %v496_v7, %v493_v15  ;;  %v502_v26 = vrot.slane %v500_v8, 5  ;;  %v506_v27 = vrot.slane %v504_v9, 4  ;;  %v323_v32 = vshrl.u32 %v6887_v5, 16 }
  0x33   : > { %v311_v33 = vsel %vm6775_vm4, %v306_v12, %v310_v62  ;;  %v316_v34 = vrot.slane %v315_v23, 4  ;;  %v512_v37 = vrot.slane %v510_v24, 5  ;;  %v326_v38 = vshll.u32 %v6887_v5, 16  ;;  %v6920_v62 = vld [vmem:[%s6732_s4 + $0x98] sm:$0x1] }
  0x34   : > { %5884 = vmatmul.mubr.msk.bf16.gmra.mxu1 %vm677_vm3, %v5863_v10  ;;  %v498_v39 = vrot.slane %v497_v22, 4  ;;  %v507_v40 = vor.u32 %v506_v27, %v502_v26  ;;  %v325_v41 = vrot.slane %v323_v32, 4  ;;  %v332_v20 = vshll.u32 %v6895_v25, 16  ;;  %v6934_v12 = vld [vmem:[%s6732_s4 + $0x40] sm:$0xf] }
  0x35   : > { %875 = vmatprep.mubr.bf16.mxu1 %v9359_v4  ;;  %v321_v45 = vsel %vm6775_vm4, %v316_v34, %v320_v3  ;;  %v328_v49 = vrot.slane %v326_v38, 5  ;;  %v336_v50 = vshrl.u32 %v6895_v25, 16  ;;  %v342_v51 = vshll.u32 %v6898_v28, 16 }
  0x36   : > { %v5856_v53 = vcombine.low %v311_v33, %v321_v45  ;;  %v503_v54 = vsel %vm6775_vm4, %v498_v39, %v502_v26  ;;  %v508_v55 = vrot.slane %v507_v40, 4  ;;  %v334_v56 = vrot.slane %v332_v20, 5  ;;  %v6943_v40 = vld [vmem:[%s6732_s4 + $0x44] sm:$0x1]  ;;  %v6947_v20 = vld [vmem:[%s6732_s4 + $0x9c] sm:$0xf] }
  0x37   : > { %v329_v59 = vor.u32 %v328_v49, %v325_v41  ;;  %v338_v60 = vrot.slane %v336_v50, 4  ;;  %v344_v61 = vrot.slane %v342_v51, 5  ;;  %v515_v0 = vshrl.u32 %v6907_v44, 16 }
  0x38   : > { %5877 = vmatmul.mubr.msk.bf16.gmra.mxu0 %vm677_vm3, %v5856_v53  ;;  %v513_v1 = vsel %vm6775_vm4, %v508_v55, %v512_v37  ;;  %v518_v2 = vshll.u32 %v6907_v44, 16  ;;  %v524_v3 = vshll.u32 %v6915_v52, 16  ;;  %v528_v15 = vshrl.u32 %v6915_v52, 16  ;;  %v6954_v53 = vld [vmem:[%s6732_s4 + $0xa0] sm:$0xf] }
  0x39   : > { %v5864_v7 = vcombine.low %v503_v54, %v513_v1  ;;  %805 = vmatprep.mubr.bf16.mxu0 %v9359_v4  ;;  %v330_v8 = vrot.slane %v329_v59, 4  ;;  %v339_v9 = vor.u32 %v338_v60, %v334_v56  ;;  %v517_v10 = vrot.slane %v515_v0, 4 }
  0x3a   : > { %v520_v23 = vrot.slane %v518_v2, 5  ;;  %v526_v24 = vrot.slane %v524_v3, 5  ;;  %v530_v22 = vrot.slane %v528_v15, 4  ;;  %v534_v26 = vshll.u32 %v6920_v62, 16  ;;  %v6964_v15 = vld [vmem:[%s6732_s4 + $0xa4] sm:$0x1] }
  0x3b   : > { %v335_v27 = vsel %vm6775_vm4, %v330_v8, %v334_v56  ;;  %v340_v32 = vrot.slane %v339_v9, 4  ;;  %v347_v33 = vshrl.u32 %v6930_v6, 16  ;;  %v350_v34 = vshll.u32 %v6930_v6, 16  ;;  %v6969_v9 = vld [vmem:[%s6732_s4 + $0x48] sm:$0xf] }
  0x3c   : > { %5885 = vmatmul.mubr.msk.bf16.gmra.mxu1 %vm677_vm3, %v5864_v7  ;;  %v521_v37 = vor.u32 %v520_v23, %v517_v10  ;;  %v531_v38 = vor.u32 %v530_v22, %v526_v24  ;;  %v536_v39 = vrot.slane %v534_v26, 5  ;;  %v356_v41 = vshll.u32 %v6934_v12, 16 }
  0x3d   : > { %885 = vmatprep.mubr.bf16.mxu1 %v9359_v4  ;;  %v345_v45 = vsel %vm6775_vm4, %v340_v32, %v344_v61  ;;  %v349_v49 = vrot.slane %v347_v33, 4  ;;  %v352_v50 = vrot.slane %v350_v34, 5  ;;  %v360_v51 = vshrl.u32 %v6934_v12, 16 }
  0x3e   : > { %v5857_v54 = vcombine.low %v335_v27, %v345_v45  ;;  %v522_v55 = vrot.slane %v521_v37, 4  ;;  %v532_v56 = vrot.slane %v531_v38, 4  ;;  %v358_v59 = vrot.slane %v356_v41, 5  ;;  %v6977_v37 = vld [vmem:[%s6732_s4 + $0x50] sm:$0x1] }
  0x3f   : > { %v353_v60 = vor.u32 %v352_v50, %v349_v49  ;;  %v362_v0 = vrot.slane %v360_v51, 4  ;;  %v366_v1 = vshll.u32 %v6943_v40, 16  ;;  %v539_v2 = vshrl.u32 %v6947_v20, 16  ;;  %v6980_v38 = vld [vmem:[%s6732_s4 + $0xa8] sm:$0xf] }
  0x40   : > { %5878 = vmatmul.mubr.msk.bf16.gmra.mxu0 %vm677_vm3, %v5857_v54  ;;  %v527_v61 = vsel %vm6775_vm4, %v522_v55, %v526_v24  ;;  %v537_v3 = vsel %vm6775_vm4, %v532_v56, %v536_v39  ;;  %v542_v7 = vshll.u32 %v6947_v20, 16  ;;  %v548_v8 = vshll.u32 %v6954_v53, 16  ;;  %v6973_v24 = vld [vmem:[%s6732_s4 + $0x4c] sm:$0xf]  ;;  %9367 = vst [vmem:[#allocation2_spill] sm:$0xff] %v6980_v38 }
  0x41   : > { %v5865_v10 = vcombine.low %v527_v61, %v537_v3  ;;  %815 = vmatprep.mubr.bf16.mxu0 %v9359_v4  ;;  %v354_v23 = vrot.slane %v353_v60, 4  ;;  %v363_v22 = vor.u32 %v362_v0, %v358_v59  ;;  %v368_v26 = vrot.slane %v366_v1, 5  ;;  %v6990_v56 = vld [vmem:[%s6732_s4 + $0xac] sm:$0xf] }
  0x42   : > { %v541_v27 = vrot.slane %v539_v2, 4  ;;  %v544_v32 = vrot.slane %v542_v7, 5  ;;  %v550_v33 = vrot.slane %v548_v8, 5  ;;  %v552_v34 = vshrl.u32 %v6954_v53, 16  ;;  %9368 = vst [vmem:[#allocation3_spill] sm:$0xff] %v6990_v56 }
  0x43   : > { %v359_v39 = vsel %vm6775_vm4, %v354_v23, %v358_v59  ;;  %v364_v41 = vrot.slane %v363_v22, 4  ;;  %v558_v45 = vshll.u32 %v6964_v15, 16  ;;  %v371_v49 = vshrl.u32 %v6969_v9, 16  ;;  %v6997_v8 = vld [vmem:[%s6732_s4 + $0xb0] sm:$0x1] }
  0x44   : > { %5886 = vmatmul.mubr.msk.bf16.gmra.mxu1 %vm677_vm3, %v5865_v10  ;;  %v545_v50 = vor.u32 %v544_v32, %v541_v27  ;;  %v554_v51 = vrot.slane %v552_v34, 4  ;;  %v374_v54 = vshll.u32 %v6969_v9, 16  ;;  %v380_v55 = vshll.u32 %v6973_v24, 16  ;;  %9369 = vst [vmem:[#allocation4_spill] sm:$0xff] %v6997_v8  ;;  %v7002_v32 = vld [vmem:[%s6732_s4 + $0x54] sm:$0xf] }
  0x45   : > { %895 = vmatprep.mubr.bf16.mxu1 %v9359_v4  ;;  %v369_v59 = vsel %vm6775_vm4, %v364_v41, %v368_v26  ;;  %v560_v60 = vrot.slane %v558_v45, 5  ;;  %v373_v0 = vrot.slane %v371_v49, 4  ;;  %v384_v1 = vshrl.u32 %v6973_v24, 16  ;;  %v7009_v45 = vld [vmem:[%s6732_s4 + $0x58] sm:$0xf] }
  0x46   : > { %v5858_v2 = vcombine.low %v359_v39, %v369_v59  ;;  %v546_v61 = vrot.slane %v545_v50, 4  ;;  %v555_v3 = vor.u32 %v554_v51, %v550_v33  ;;  %v376_v7 = vrot.slane %v374_v54, 5 }
  0x47   : > { %v382_v10 = vrot.slane %v380_v55, 5  ;;  %v386_v23 = vrot.slane %v384_v1, 4  ;;  %v390_v22 = vshll.u32 %v6977_v37, 16  ;;  %v563_v27 = vshrl.u32 %v6980_v38, 16  ;;  %v7017_v1 = vld [vmem:[%s6732_s4 + $0x5c] sm:$0x1] }
  0x48   : > { %5879 = vmatmul.mubr.msk.bf16.gmra.mxu0 %vm677_vm3, %v5858_v2  ;;  %v551_v26 = vsel %vm6775_vm4, %v546_v61, %v550_v33  ;;  %v556_v34 = vrot.slane %v555_v3, 4  ;;  %v377_v39 = vor.u32 %v376_v7, %v373_v0  ;;  %v566_v41 = vshll.u32 %v6980_v38, 16 }
  0x49   : > { %825 = vmatprep.mubr.bf16.mxu0 %v9359_v4  ;;  %v387_v49 = vor.u32 %v386_v23, %v382_v10  ;;  %v392_v50 = vrot.slane %v390_v22, 5  ;;  %v565_v51 = vrot.slane %v563_v27, 4  ;;  %v572_v54 = vshll.u32 %v6990_v56, 16  ;;  %v7021_v23 = vld [vmem:[%s6732_s4 + $0xb4] sm:$0xf] }
  0x4a   : > { %v561_v33 = vsel %vm6775_vm4, %v556_v34, %v560_v60  ;;  %v378_v55 = vrot.slane %v377_v39, 4  ;;  %v568_v59 = vrot.slane %v566_v41, 5  ;;  %v576_v0 = vshrl.u32 %v6990_v56, 16  ;;  %9370 = vst [vmem:[#allocation5_spill] sm:$0xff] %v7021_v23  ;;  %v7027_v34 = vld [vmem:[%s6732_s4 + $0xb8] sm:$0xf] }
  0x4b   : > { %v5866_v2 = vcombine.low %v551_v26, %v561_v33  ;;  %v388_v61 = vrot.slane %v387_v49, 4  ;;  %v574_v3 = vrot.slane %v572_v54, 5  ;;  %v582_v7 = vshll.u32 %v6997_v8, 16 }
  0x4c   : > { %v383_v22 = vsel %vm6775_vm4, %v378_v55, %v382_v10  ;;  %v569_v27 = vor.u32 %v568_v59, %v565_v51  ;;  %v578_v21 = vrot.slane %v576_v0, 4  ;;  %v395_v60 = vshrl.u32 %v7002_v32, 16 }
  0x4d   : > { %5887 = vmatmul.mubr.msk.bf16.gmra.mxu1 %vm677_vm3, %v5866_v2  ;;  %v393_v26 = vsel %vm6775_vm4, %v388_v61, %v392_v50  ;;  %v584_v39 = vrot.slane %v582_v7, 5  ;;  %v398_v41 = vshll.u32 %v7002_v32, 16  ;;  %v404_v49 = vshll.u32 %v7009_v45, 16 }
  0x4e   : > { %905 = vmatprep.mubr.bf16.mxu1 %v9359_v4  ;;  %v5859_v10 = vcombine.low %v383_v22, %v393_v26  ;;  %v570_v51 = vrot.slane %v569_v27, 4  ;;  %v579_v54 = vor.u32 %v578_v21, %v574_v3  ;;  %v397_v33 = vrot.slane %v395_v60, 4  ;;  %v1268_v21 = vld [vmem:[%s6732_s4] sm:$0xe] }
  0x4f   : > { %v400_v55 = vrot.slane %v398_v41, 5  ;;  %v406_v59 = vrot.slane %v404_v49, 5  ;;  %v408_v0 = vshrl.u32 %v7009_v45, 16  ;;  %v414_v2 = vshll.u32 %v7017_v1, 16 }
  0x50   : > { %5880 = vmatmul.mubr.msk.bf16.gmra.mxu0 %vm677_vm3, %v5859_v10  ;;  %v575_v50 = vsel %vm6775_vm4, %v570_v51, %v574_v3  ;;  %v580_v61 = vrot.slane %v579_v54, 4  ;;  %v587_v7 = vshrl.u32 %v7021_v23, 16  ;;  %v590_v22 = vshll.u32 %v7021_v23, 16 }
  0x51   : > { %835 = vmatprep.mubr.bf16.mxu0 %v9359_v4  ;;  %v401_v27 = vor.u32 %v400_v55, %v397_v33  ;;  %v410_v60 = vrot.slane %v408_v0, 4  ;;  %v416_v26 = vrot.slane %v414_v2, 5  ;;  %v596_v41 = vshll.u32 %v7027_v34, 16 }
  0x52   : > { %v585_v49 = vsel %vm6775_vm4, %v580_v61, %v584_v39  ;;  %v589_v10 = vrot.slane %v587_v7, 4  ;;  %v592_v29 = vrot.slane %v590_v22, 5  ;;  %v600_v3 = vshrl.u32 %v7027_v34, 16 }
  0x53   : > { %v5867_v51 = vcombine.low %v575_v50, %v585_v49  ;;  %v402_v54 = vrot.slane %v401_v27, 4  ;;  %v411_v8 = vor.u32 %v410_v60, %v406_v59  ;;  %v598_v38 = vrot.slane %v596_v41, 5  ;;  %v1269_v60 = vld [vmem:[%s6732_s4 + $0xc] sm:$0xe] }
  0x54   : > { %v593_v23 = vor.u32 %v592_v29, %v589_v10  ;;  %v602_v56 = vrot.slane %v600_v3, 4  ;;  %v606_v33 = vshll.u32 %v7038_v30, 16  ;;  %v9371_v55 = vmov 0  ;;  %v1270_v10 = vld [vmem:[%s6732_s4 + $0x18] sm:$0xe] }
  0x55   : > { %v9372_v55 = vsel %vm7054_vm7, 4294967295, %v9371_v55  ;;  %v6124_v39 = vcombine.low %v6727_v14, %v6727_v14  ;;  %5888 = vmatmul.mubr.msk.bf16.gmra.mxu1 %vm677_vm3, %v5867_v51  ;;  %v407_v0 = vsel %vm6775_vm4, %v402_v54, %v406_v59  ;;  %v412_v2 = vrot.slane %v411_v8, 4 }
  0x56   : > { %9373 = vst [vmem:[#allocation6_spill] sm:$0xff] %v9372_v55  ;;  %v5927_v29 = vrot.slane %v1268_v21, 9  ;;  %v9374_v50 = vrot.slane %v6745_v18, 5  ;;  %915 = vmatprep.mubr.bf16.mxu1 %v9359_v4  ;;  %v594_v7 = vrot.slane %v593_v23, 4  ;;  %v603_v22 = vor.u32 %v602_v56, %v598_v38 }
  0x57   : > { %v608_v27 = vrot.slane %v606_v33, 5  ;;  %v5890_v14 = vcombine.low %v6742_v17, %v6745_v18  ;;  %v417_v41 = vsel %vm6775_vm4, %v412_v2, %v416_v26  ;;  %v9376_v21 = vrot.slane %v6748_v19, 5  ;;  %v6555_v18 = vld [vmem:[%s9349_s1 + $0x48] ss:$8 sps:$4 sm:$0xff]  }
  0x58   : > { %v1323_v61 = vrot.slane %v9374_v50, 4  ;;  %v9375_v59 = vmov %v9374_v50  ;;  %v9377_v56 = vcombine.low %v6722_v13, %v6722_v13  ;;  %v5860_v3 = vcombine.low %v407_v0, %v417_v41  ;;  %v1271_v13 = vld [vmem:[%s6732_s4 + $0x24] sm:$0xe]  ;;  %v1273_v41 = vld [vmem:[%s6732_s4 + $0x3c] sm:$0xe] }
  0x59   : > { %v1322_v8 = vsel %vm7054_vm7, %v5927_v29, %v9375_v59  ;;  %v599_v26 = vsel %vm6775_vm4, %v594_v7, %v598_v38  ;;  %v604_v51 = vrot.slane %v603_v22, 4  ;;  %v2800_v54 = vsel %vm726_vm0, %v6124_v39, 0  ;;  %v1272_v39 = vld [vmem:[%s6732_s4 + $0x30] sm:$0xe] }
  0x5a   : > { %v1325_v23 = vsel %vm7054_vm7, %v1323_v61, %v9376_v21  ;;  %v7083_v49 = vsel %vm726_vm0, %v9377_v56, 0  ;;  %v5928_v19 = vrot.slane %v1269_v60, 9  ;;  %v1328_v2 = vrot.slane %v6771_v47, 5  ;;  %5881 = vmatmul.mubr.msk.bf16.gmra.mxu0 %vm677_vm3, %v5860_v3  ;;  %v1274_v3 = vld [vmem:[%s6732_s4 + $0x48] sm:$0xe] }
  0x5b   : > { %v5946_v33 = vcombine.low %v1322_v8, %v1325_v23  ;;  %v1331_v29 = vrot.slane %v6782_v57, 5  ;;  %v609_v50 = vsel %vm6775_vm4, %v604_v51, %v608_v27  ;;  %v5892_v0 = vcombine.low %v6801_v31, %v6808_v36  ;;  %1584 = vmatprep.mubr.bf16.mxu0 %v9359_v4 }
  0x5c   : > { %v5929_v38 = vrot.slane %v1270_v10, 9  ;;  %v1335_v61 = vrot.slane %v6808_v36, 5  ;;  %v5868_v7 = vcombine.low %v599_v26, %v609_v50  ;;  %v7102_v57 = vsel %vm7054_vm7, %v5928_v19, %v1328_v2 }
  0x5d   : > { %v1330_v22 = vrot.slane %v1328_v2, 4  ;;  %v1338_v60 = vrot.slane %v6819_v46, 5  ;;  %v5893_v8 = vcombine.low %v6845_v11, %v6855_v35  ;;  %v5930_v21 = vrot.slane %v1271_v13, 9  ;;  %v6621_v11 = vld [vmem:[%s6732_s4 + $0x64] sm:$0xf] }
  0x5e   : > { %v7108_v27 = vsel %vm7054_vm7, %v5929_v38, %v1335_v61  ;;  %v1337_v59 = vrot.slane %v1335_v61, 4  ;;  %5889 = vmatmul.mubr.msk.bf16.gmra.mxu1 %vm677_vm3, %v5868_v7  ;;  %v1342_v56 = vrot.slane %v6855_v35, 5  ;;  %v1345_v10 = vrot.slane %v6861_v16, 5  ;;  %v6561_v16 = vld [vmem:[%s9349_s1 + $0x64] ss:$8 sps:$4 sm:$0xff]  }
  0x5f   : > { %v1332_v23 = vsel %vm7054_vm7, %v1330_v22, %v1331_v29  ;;  %v5894_v46 = vcombine.low %v6887_v5, %v6895_v25  ;;  %1107 = vmatprep.mubr.bf16.mxu1 %v9359_v4  ;;  %v5931_v19 = vrot.slane %v1272_v39, 9  ;;  %v1349_v2 = vrot.slane %v6895_v25, 5  ;;  %v1276_v5 = vld [vmem:[%s6732_s4 + $0x60] sm:$0xe] }
  0x60   : > { %v5947_v26 = vcombine.low %v7102_v57, %v1332_v23  ;;  %v7124_v51 = vsel %vm7054_vm7, %v1337_v59, %v1338_v60  ;;  %v7134_v13 = vsel %vm7054_vm7, %v5930_v21, %v1342_v56  ;;  %v1344_v50 = vrot.slane %v1342_v56, 4  ;;  %v1275_v21 = vld [vmem:[%s6732_s4 + $0x54] sm:$0xe] }
  0x61   : > { %v5948_v29 = vcombine.low %v7108_v27, %v7124_v51  ;;  %v1352_v38 = vrot.slane %v6898_v28, 5  ;;  %v7139_v61 = vsel %vm7054_vm7, %v5931_v19, %v1349_v2  ;;  %v1351_v39 = vrot.slane %v1349_v2, 4  ;;  %v6557_v23 = vld [vmem:[%s9349_s1 + $0x4c] ss:$8 sps:$4 sm:$0xff]   ;;  %v6559_v19 = vld [vmem:[%s9349_s1 + $0x60] ss:$8 sps:$4 sm:$0xff]  }
  0x62   : > { %v5895_v7 = vcombine.low %v6930_v6, %v6934_v12  ;;  %v5932_v57 = vrot.slane %v1273_v41, 9  ;;  %v7145_v22 = vsel %vm7054_vm7, %v1344_v50, %v1345_v10  ;;  %v1356_v60 = vrot.slane %v6934_v12, 5  ;;  %5967 = vmatmul.mubr.msk.bf16.vlgmr.msra.gmra.mxu0 %vm677_vm3, %v5946_v33 }
  0x63   : > { %v1359_v59 = vrot.slane %v6943_v40, 5  ;;  %v5949_v41 = vcombine.low %v7134_v13, %v7145_v22  ;;  %v7160_v56 = vsel %vm7054_vm7, %v1351_v39, %v1352_v38  ;;  %v5933_v10 = vrot.slane %v1274_v3, 9  ;;  %2818 = vmatpush1.bf16.msra.mxu0 %v2800_v54  ;;  %1594 = vmatprep.mubr.bf16.mxu0 %v9359_v4  ;;  %v9379_v54 = vld [vmem:[#allocation2_spill] sm:$0xff]  ;;  %v1277_v22 = vld [vmem:[%s6732_s4 + $0x6c] sm:$0xe] }
  0x64   : > { %v1363_v40 = vrot.slane %v6973_v24, 5  ;;  %v5950_v33 = vcombine.low %v7139_v61, %v7160_v56  ;;  %v7171_v2 = vsel %vm7054_vm7, %v5932_v57, %v1356_v60  ;;  %v1358_v50 = vrot.slane %v1356_v60, 4  ;;  %2819 = vmatprep.subr.bf16.mxu0 %v6561_v16  ;;  %v6623_v61 = vld [vmem:[%s6732_s4 + $0x70] sm:$0xf] }
  0x65   : > { %v1366_v38 = vrot.slane %v6977_v37, 5  ;;  %v5934_v28 = vrot.slane %v1275_v21, 9  ;;  %v1370_v37 = vrot.slane %v7009_v45, 5  ;;  %v1373_v60 = vrot.slane %v7017_v1, 5 }
  0x66   : > { %v7176_v3 = vsel %vm7054_vm7, %v5933_v10, %v1363_v40  ;;  %v1365_v39 = vrot.slane %v1363_v40, 4  ;;  %5911 = vmatmul.mubr.msk.bf16.vlgmr.msra.gmra.mxu1 %vm677_vm3, %v5890_v14  ;;  %v7186_v57 = vsel %vm7054_vm7, %v1358_v50, %v1359_v59  ;;  %v5891_v59 = vcombine.low %v6768_v42, %v6771_v47  ;;  %v1279_v10 = vld [vmem:[%s6732_s4 + $0x84] sm:$0xe]  ;;  %v1283_v40 = vld [vmem:[%s6732_s4 + $0xb4] sm:$0xe] }
  0x67   : > { %2008 = vmatpush1.bf16.msra.mxu1 %v7083_v49  ;;  %1117 = vmatprep.mubr.bf16.mxu1 %v9359_v4  ;;  %v5951_v16 = vcombine.low %v7171_v2, %v7186_v57  ;;  %v7205_v14 = vsel %vm7054_vm7, %v5934_v28, %v1370_v37  ;;  %v1372_v49 = vrot.slane %v1370_v37, 4  ;;  %v1280_v28 = vld [vmem:[%s6732_s4 + $0x90] sm:$0xe]  ;;  %v5938_v50 = vrot.slane %v1279_v10, 9 }
  0x68   : > { %v7196_v17 = vsel %vm7054_vm7, %v1365_v39, %v1366_v38  ;;  %2009 = vmatprep.subr.bf16.mxu1 %v6557_v23  ;;  %2820 = vmatpush1.bf16.msra.mxu0 %v6559_v19  ;;  %v1281_v23 = vld [vmem:[%s6732_s4 + $0x9c] sm:$0xe]  ;;  %v1398_v42 = vrot.slane %v6875_v58, 5  ;;  %v1401_v47 = vrot.slane %v6882_v63, 5  ;;  %v1282_v38 = vld [vmem:[%s6732_s4 + $0xa8] sm:$0xe]  ;;  %v9382_v25 = vcombine.low %v6969_v9, %v6973_v24 }
  0x69   : > { %v5952_v1 = vcombine.low %v7176_v3, %v7196_v17  ;;  %v7211_v21 = vsel %vm7054_vm7, %v1372_v49, %v1373_v60  ;;  %v5939_v39 = vrot.slane %v1280_v28, 9  ;;  %v1405_v37 = vrot.slane %v6915_v52, 5  ;;  %v6624_v3 = vld [vmem:[%s6732_s4 + $0x74] sm:$0x1] }
  0x6a   : > { %5968 = vmatmul.mubr.msk.bf16.gmra.mxu0 %vm677_vm3, %v5947_v26  ;;  %v7232_v60 = vsel %vm7054_vm7, %v5938_v50, %v1398_v42  ;;  %v1408_v49 = vrot.slane %v6920_v62, 5  ;;  %v5940_v26 = vrot.slane %v1281_v23, 9  ;;  %v1412_v19 = vrot.slane %v6954_v53, 5 }
  0x6b   : > { %2010 = vmatpush1.bf16.msra.mxu1 %v6555_v18  ;;  %1604 = vmatprep.mubr.bf16.mxu0 %v9359_v4  ;;  %v1400_v18 = vrot.slane %v1398_v42, 4  ;;  %v7237_v63 = vsel %vm7054_vm7, %v5939_v39, %v1405_v37  ;;  %v1415_v50 = vrot.slane %v6964_v15, 5  ;;  %v9378_v42 = vld [vmem:[#allocation3_spill] sm:$0xff]  ;;  %v5942_v23 = vrot.slane %v1283_v40, 9 }
  0x6c   : > { %v7253_v39 = vld [vmem:[%s9349_s1 + $0x88] sm:$0x11]  ;;  %v7271_v27 = vsel %vm7054_vm7, %v5940_v26, %v1412_v19  ;;  %v1414_v51 = vrot.slane %v1412_v19, 4  ;;  %v1426_v19 = vrot.slane %v7027_v34, 5  ;;  %v1377_v35 = vrot.slane %v6621_v11, 5 }
  0x6d   : > { %v7243_v28 = vsel %vm7054_vm7, %v1400_v18, %v1401_v47  ;;  %v5941_v47 = vrot.slane %v1282_v38, 9  ;;  %v9381_v38 = vld [vmem:[#allocation5_spill] sm:$0xff]  ;;  %v5935_v6 = vrot.slane %v1276_v5, 9  ;;  %v9383_v13 = vcombine.low %v7205_v14, %v7211_v21 }
  0x6e   : > { %5912 = vmatmul.mubr.msk.bf16.gmra.mxu1 %vm677_vm3, %v5891_v59  ;;  %v1407_v59 = vrot.slane %v1405_v37, 4  ;;  %v1419_v37 = vrot.slane %v9378_v42, 5  ;;  %v7286_v26 = vsel %vm7054_vm7, %v1414_v51, %v1415_v50  ;;  %v7309_v50 = vld [vmem:[%s9349_s1 + $0xa0] sm:$0x11]  ;;  %v1379_v12 = vrot.slane %v1377_v35, 4 }
  0x6f   : > { %1127 = vmatprep.mubr.bf16.mxu1 %v9359_v4  ;;  %v5959_v40 = vcombine.low %v7271_v27, %v7286_v26  ;;  %v1378_v9 = vsel %vm7054_vm7, %v5935_v6, %v1377_v35  ;;  %v1387_v57 = vrot.slane %v6624_v3, 5  ;;  %v1278_v21 = vld [vmem:[%s6732_s4 + $0x78] sm:$0xe]  ;;  %v7444_v26 = vld [vmem:[%s6732_s4 + $0x14] sm:$0x1] }
  0x70   : > { %v7263_v15 = vsel %vm7054_vm7, %v1407_v59, %v1408_v49  ;;  %v7276_v10 = vsel %vm7054_vm7, %v5941_v47, %v1419_v37  ;;  %v1421_v49 = vrot.slane %v1419_v37, 4  ;;  %v5905_v59 = vcombine.low %v9381_v38, %v7027_v34  ;;  %v6058_v27 = vld [vmem:[%s6732_s4 + $0x18] sm:$0xf]  ;;  %v6065_v38 = vld [vmem:[%s6732_s4 + $0x34] sm:$0xf] }
  0x71   : > { %v5958_v18 = vcombine.low %v7237_v63, %v7263_v15  ;;  %v6197_v47 = vcombine.high %v7253_v39, %v7253_v39 }
  0x72   : > { %5969 = vmatmul.mubr.msk.bf16.gmra.mxu0 %vm677_vm3, %v5948_v29  ;;  %v9380_v29 = vld [vmem:[#allocation4_spill] sm:$0xff] }
  0x73   : > { %1614 = vmatprep.mubr.bf16.mxu0 %v9359_v4  ;;  %v1422_v62 = vrot.slane %v9380_v29, 5  ;;  %v1429_v29 = vrot.slane %v7038_v30, 5  ;;  %v1428_v30 = vrot.slane %v1426_v19, 4  ;;  %6198 = vmatprep.subr.msk.bf16.mxu1 %vm726_vm0, %v6197_v47 }
  0x75   : > { %v7297_v31 = vsel %vm7054_vm7, %v1421_v49, %v1422_v62  ;;  %v7313_v37 = vsel %vm7054_vm7, %v1428_v30, %v1429_v29  ;;  %v5937_v49 = vrot.slane %v1278_v21, 9  ;;  %v6627_v29 = vld [vmem:[%s6732_s4 + $0x80] sm:$0x1]  ;;  %v6628_v30 = vld [vmem:[%s6732_s4 + $0x6c] sm:$0xf] }
  0x76   : > { %5913 = vmatmul.mubr.msk.bf16.gmra.mxu1 %vm677_vm3, %v5892_v0  ;;  %v5960_v36 = vcombine.low %v7276_v10, %v7297_v31  ;;  %v7303_v0 = vsel %vm7054_vm7, %v5942_v23, %v1426_v19  ;;  %v6269_v23 = vcombine.high %v7309_v50, %v7309_v50  ;;  %v1394_v47 = vrot.slane %v6627_v29, 5 }
  0x77   : > { %1137 = vmatprep.mubr.bf16.mxu1 %v9359_v4  ;;  %v5961_v62 = vcombine.low %v7303_v0, %v7313_v37  ;;  %v6196_v0 = vcombine.low %v7253_v39, %v7253_v39  ;;  %v6268_v37 = vcombine.low %v7309_v50, %v7309_v50 }
  0x78   : > { %6270 = vmatprep.subr.msk.bf16.mxu0 %vm726_vm0, %v6269_v23  ;;  %v5899_v23 = vcombine.low %v6628_v30, %v6623_v61 }
  0x7a   : > { %5970 = vmatmul.mubr.msk.bf16.gmra.mxu0 %vm677_vm3, %v5949_v41  ;;  %v9384_v41 = vcombine.low %v7002_v32, %v7009_v45 }
  0x7b   : > { %1624 = vmatprep.mubr.bf16.mxu0 %v9359_v4 }
  0x7e   : > { %5914 = vmatmul.mubr.msk.bf16.gmra.mxu1 %vm677_vm3, %v5893_v8  ;;  %v6622_v8 = vld [vmem:[%s6732_s4 + $0x68] sm:$0x1] }
  0x7f   : > { %1147 = vmatprep.mubr.bf16.mxu1 %v9359_v4 }
  0x82   : > { %5971 = vmatmul.mubr.msk.bf16.gmra.mxu0 %vm677_vm3, %v5950_v33  ;;  %v5936_v33 = vrot.slane %v1277_v22, 9 }
  0x83   : > { %1634 = vmatprep.mubr.bf16.mxu0 %v9359_v4 }
  0x86   : > { %5915 = vmatmul.mubr.msk.bf16.gmra.mxu1 %vm677_vm3, %v5894_v46  ;;  %v1380_v46 = vrot.slane %v6622_v8, 5  ;;  %v9386_v8 = vcombine.low %v6864_v43, %v6875_v58  ;;  %v6055_v43 = vld [vmem:[%s6732_s4 + $0xc] sm:$0xf]  ;;  %v7428_v58 = vld [vmem:[%s6732_s4 + $0x10] sm:$0xf] }
  0x87   : > { %1157 = vmatprep.mubr.bf16.mxu1 %v9359_v4  ;;  %v2310_v63 = vshll.u32 %v7428_v58, 16  ;;  %v3128_v29 = vrot.slane %v7428_v58, 5 }
  0x88   : > { %v1381_v24 = vsel %vm7054_vm7, %v1379_v12, %v1380_v46  ;;  %v9385_v12 = vcombine.low %v7232_v60, %v7243_v28  ;;  %v9387_v60 = vcombine.low %v6907_v44, %v6915_v52  ;;  %v2301_v28 = vshrl.u32 %v6055_v43, 16 }
  0x89   : > { %v5954_v56 = vcombine.low %v1378_v9, %v1381_v24  ;;  %v2304_v46 = vshll.u32 %v6055_v43, 16  ;;  %v2314_v44 = vshrl.u32 %v7428_v58, 16  ;;  %v9388_v52 = vcombine.low %v6947_v20, %v6954_v53  ;;  %v6587_v43 = vld [vmem:[%s9349_s1 + $0x94] ss:$8 sps:$4 sm:$0xff]  }
  0x8a   : > { %5972 = vmatmul.mubr.msk.bf16.gmra.mxu0 %vm677_vm3, %v5951_v16  ;;  %v6625_v16 = vld [vmem:[%s6732_s4 + $0x60] sm:$0xf]  ;;  %v2303_v15 = vrot.slane %v2301_v28, 4  ;;  %v2320_v53 = vshll.u32 %v7444_v26, 16  ;;  %v3130_v28 = vrot.slane %v3128_v29, 4 }
  0x8b   : > { %1644 = vmatprep.mubr.bf16.mxu0 %v9359_v4  ;;  %v5898_v17 = vcombine.low %v6625_v16, %v6621_v11  ;;  %v2316_v9 = vrot.slane %v2314_v44, 4 }
  0x8c   : > { %v2322_v31 = vrot.slane %v2320_v53, 5  ;;  %v6585_v53 = vld [vmem:[%s9349_s1 + $0x90] ss:$8 sps:$4 sm:$0xff]  }
  0x8e   : > { %5916 = vmatmul.mubr.msk.bf16.gmra.mxu1 %vm677_vm3, %v5895_v7  ;;  %v1384_v7 = vrot.slane %v6623_v61, 5  ;;  %v2325_v61 = vshrl.u32 %v6058_v27, 16 }
  0x8f   : > { %1167 = vmatprep.mubr.bf16.mxu1 %v9359_v4 }
  0x90   : > { %v1386_v2 = vrot.slane %v1384_v7, 4  ;;  %v1385_v32 = vsel %vm7054_vm7, %v5936_v33, %v1384_v7  ;;  %v2328_v7 = vshll.u32 %v6058_v27, 16 }
  0x92   : > { %5973 = vmatmul.mubr.msk.bf16.gmra.mxu0 %vm677_vm3, %v5952_v1  ;;  %v1388_v45 = vsel %vm7054_vm7, %v1386_v2, %v1387_v57  ;;  %v6626_v1 = vld [vmem:[%s6732_s4 + $0x7c] sm:$0xf]  ;;  %v2327_v2 = vrot.slane %v2325_v61, 4  ;;  %v2330_v3 = vrot.slane %v2328_v7, 5  ;;  %v2382_v61 = vshll.u32 %v6065_v38, 16 }
  0x93   : > { %1654 = vmatprep.mubr.bf16.mxu0 %v9359_v4  ;;  %v1391_v14 = vrot.slane %v6626_v1, 5  ;;  %v5955_v51 = vcombine.low %v1385_v32, %v1388_v45  ;;  %v6062_v32 = vld [vmem:[%s6732_s4 + $0x28] sm:$0xf]  ;;  %v2386_v7 = vshrl.u32 %v6065_v38, 16 }
  0x95   : > { %v1393_v19 = vrot.slane %v1391_v14, 4  ;;  %v1392_v11 = vsel %vm7054_vm7, %v5937_v49, %v1391_v14  ;;  %v2358_v49 = vshll.u32 %v6062_v32, 16 }
  0x96   : > { %5917 = vmatmul.mubr.msk.bf16.gmra.mxu1 %vm677_vm3, %v9382_v25  ;;  %v6629_v25 = vld [vmem:[%s6732_s4 + $0x78] sm:$0xf] }
  0x97   : > { %1177 = vmatprep.mubr.bf16.mxu1 %v9359_v4  ;;  %v1395_v35 = vsel %vm7054_vm7, %v1393_v19, %v1394_v47  ;;  %v5900_v6 = vcombine.low %v6629_v25, %v6626_v1  ;;  %v2331_v1 = vor.u32 %v2330_v3, %v2327_v2  ;;  %v2362_v19 = vshrl.u32 %v6062_v32, 16  ;;  %v6064_v25 = vld [vmem:[%s6732_s4 + $0x30] sm:$0xf]  ;;  %v6337_v32 = vld [vmem:[%s9349_s1 + $0xb8] sm:$0x11] }
  0x98   : > { %v5956_v5 = vcombine.low %v1392_v11, %v1395_v35  ;;  %v3131_v47 = vrot.slane %v7444_v26, 5 }
  0x99   : > { %v2332_v30 = vrot.slane %v2331_v1, 4  ;;  %v2364_v34 = vrot.slane %v2362_v19, 4  ;;  %v7545_v1 = vrot.slane %v2382_v61, 5  ;;  %v7556_v19 = vld [vmem:[%s9349_s1 + $0xd0] sm:$0x11]  ;;  %v6575_v61 = vld [vmem:[%s6732_s4 + $0x24] sm:$0xff]  }
  0x9a   : > { %5974 = vmatmul.mubr.msk.bf16.gmra.mxu0 %vm677_vm3, %v9383_v13  ;;  %v2312_v13 = vrot.slane %v2310_v63, 5 }
  0x9b   : > { %1664 = vmatprep.mubr.bf16.mxu0 %v9359_v4 }
  0x9c   : > { %v2317_v20 = vor.u32 %v2316_v9, %v2312_v13 }
  0x9e   : > { %5918 = vmatmul.mubr.msk.bf16.gmra.mxu1 %vm677_vm3, %v9384_v41  ;;  %v2318_v10 = vrot.slane %v2317_v20, 4  ;;  %v6583_v20 = vld [vmem:[%s9349_s1 + $0x7c] ss:$8 sps:$4 sm:$0xff]  }
  0x9f   : > { %1187 = vmatprep.mubr.bf16.mxu1 %v9359_v4 }
  0xa2   : > { %5975 = vmatmul.mubr.msk.bf16.gmra.mxu0 %vm677_vm3, %v5954_v56  ;;  %v9389_v56 = vcombine.low %v9379_v54, %v9378_v42  ;;  %v2323_v42 = vsel %vm6775_vm4, %v2318_v10, %v2322_v31 }
  0xa3   : > { %1674 = vmatprep.mubr.bf16.mxu0 %v9359_v4 }
  0xa6   : > { %5919 = vmatmul.mubr.msk.bf16.gmra.mxu1 %vm677_vm3, %v5898_v17  ;;  %v6061_v17 = vld [vmem:[%s6732_s4 + $0x24] sm:$0xf] }
  0xa7   : > { %1197 = vmatprep.mubr.bf16.mxu1 %v9359_v4  ;;  %v2349_v21 = vshrl.u32 %v6061_v17, 16 }
  0xaa   : > { %5976 = vmatmul.mubr.msk.bf16.gmra.mxu0 %vm677_vm3, %v5955_v51  ;;  %v2352_v51 = vshll.u32 %v6061_v17, 16  ;;  %v6581_v17 = vld [vmem:[%s9349_s1 + $0x78] ss:$8 sps:$4 sm:$0xff]  }
  0xab   : > { %1684 = vmatprep.mubr.bf16.mxu0 %v9359_v4 }
  0xac   : > { %v2354_v50 = vrot.slane %v2352_v51, 5 }
  0xae   : > { %5920 = vmatmul.mubr.msk.bf16.gmra.mxu1 %vm677_vm3, %v5899_v23  ;;  %v6063_v23 = vld [vmem:[%s6732_s4 + $0x2c] sm:$0x1] }
  0xaf   : > { %1207 = vmatprep.mubr.bf16.mxu1 %v9359_v4  ;;  %v2368_v44 = vshll.u32 %v6063_v23, 16 }
  0xb2   : > { %5977 = vmatmul.mubr.msk.bf16.gmra.mxu0 %vm677_vm3, %v5956_v5  ;;  %v2351_v5 = vrot.slane %v2349_v21, 4 }
  0xb3   : > { %1694 = vmatprep.mubr.bf16.mxu0 %v9359_v4 }
  0xb4   : > { %v2355_v27 = vor.u32 %v2354_v50, %v2351_v5 }
  0xb6   : > { %5921 = vmatmul.mubr.msk.bf16.gmra.mxu1 %vm677_vm3, %v5900_v6  ;;  %v7488_v6 = vrot.slane %v2358_v49, 5  ;;  %v6068_v49 = vld [vmem:[%s6732_s4 + $0x40] sm:$0xf] }
  0xb7   : > { %1217 = vmatprep.mubr.bf16.mxu1 %v9359_v4  ;;  %v2406_v50 = vshll.u32 %v6068_v49, 16 }
  0xba   : > { %5978 = vmatmul.mubr.msk.bf16.gmra.mxu0 %vm677_vm3, %v9385_v12  ;;  %v3354_v12 = vsel %vm726_vm0, %v6196_v0, 0 }
  0xbb   : > { %1704 = vmatprep.mubr.bf16.mxu0 %v9359_v4 }
  0xbe   : > { %5922 = vmatmul.mubr.msk.bf16.gmra.mxu1 %vm677_vm3, %v9386_v8 }
  0xbf   : > { %1227 = vmatprep.mubr.bf16.mxu1 %v9359_v4 }
  0xc2   : > { %5979 = vmatmul.mubr.msk.bf16.gmra.mxu0 %vm677_vm3, %v5958_v18  ;;  %v2306_v18 = vrot.slane %v2304_v46, 5  ;;  %v6570_v46 = vld [vmem:[%s6732_s4 + $0xc] sm:$0xff]  }
  0xc3   : > { %1714 = vmatprep.mubr.bf16.mxu0 %v9359_v4 }
  0xc4   : > { %v2307_v24 = vor.u32 %v2306_v18, %v2303_v15  ;;  %v2376_v15 = vshll.u32 %v6064_v25, 16 }
  0xc6   : > { %5923 = vmatmul.mubr.msk.bf16.gmra.mxu1 %vm677_vm3, %v9387_v60  ;;  %v2308_v33 = vrot.slane %v2307_v24, 4  ;;  %v3797_v60 = vsel %vm726_vm0, %v6268_v37, 0  ;;  %v2365_v24 = vor.u32 %v2364_v34, %v7488_v6  ;;  %v2378_v3 = vrot.slane %v2376_v15, 5  ;;  %v6070_v15 = vld [vmem:[%s6732_s4 + $0x48] sm:$0xf] }
  0xc7   : > { %1237 = vmatprep.mubr.bf16.mxu1 %v9359_v4  ;;  %v6429_v37 = vcombine.high %v7556_v19, %v7556_v19 }
  0xc8   : > { %v2313_v45 = vsel %vm6775_vm4, %v2308_v33, %v2312_v13  ;;  %v6066_v33 = vld [vmem:[%s6732_s4 + $0x38] sm:$0x1] }
  0xca   : > { %5980 = vmatmul.mubr.msk.bf16.gmra.mxu0 %vm677_vm3, %v5959_v40  ;;  %v6059_v40 = vld [vmem:[%s6732_s4 + $0x1c] sm:$0xf] }
  0xcb   : > { %1724 = vmatprep.mubr.bf16.mxu0 %v9359_v4  ;;  %v2334_v22 = vshll.u32 %v6059_v40, 16  ;;  %v2338_v41 = vshrl.u32 %v6059_v40, 16  ;;  %v7516_v40 = vsel %vm7054_vm7, %v3130_v28, %v3131_v47 }
  0xcc   : > { %9392 = vst [vmem:[#allocation4_spill] sm:$0xff] %v7516_v40 }
  0xcd   : > { %v7459_v57 = vrot.slane %v2334_v22, 5  ;;  %v2340_v16 = vrot.slane %v2338_v41, 4 }
  0xce   : > { %5924 = vmatmul.mubr.msk.bf16.gmra.mxu1 %vm677_vm3, %v9388_v52  ;;  %v2373_v52 = vshrl.u32 %v6064_v25, 16  ;;  %v2410_v25 = vshrl.u32 %v6068_v49, 16 }
  0xcf   : > { %1247 = vmatprep.mubr.bf16.mxu1 %v9359_v4  ;;  %v2341_v14 = vor.u32 %v2340_v16, %v7459_v57  ;;  %v2337_v63 = vsel %vm6775_vm4, %v2332_v30, %v7459_v57  ;;  %v2356_v57 = vrot.slane %v2355_v27, 4  ;;  %v2370_v16 = vrot.slane %v2368_v44, 5 }
  0xd0   : > { %v2375_v2 = vrot.slane %v2373_v52, 4  ;;  %v2392_v30 = vshll.u32 %v6066_v33, 16  ;;  %v2408_v44 = vrot.slane %v2406_v50, 5  ;;  %v2412_v52 = vrot.slane %v2410_v25, 4  ;;  %v6576_v25 = vld [vmem:[%s6732_s4 + $0x30] sm:$0xff]  }
  0xd1   : > { %v2342_v39 = vrot.slane %v2341_v14, 4  ;;  %v6357_v14 = vcombine.high %v6337_v32, %v6337_v32  ;;  %v2361_v47 = vsel %vm6775_vm4, %v2356_v57, %v7488_v6 }
  0xd2   : > { %5981 = vmatmul.mubr.msk.bf16.gmra.mxu0 %vm677_vm3, %v5960_v36  ;;  %v6060_v36 = vld [vmem:[%s6732_s4 + $0x20] sm:$0x1]  ;;  %v2379_v0 = vor.u32 %v2378_v3, %v2375_v2  ;;  %v2421_v3 = vshrl.u32 %v6070_v15, 16 }
  0xd3   : > { %1734 = vmatprep.mubr.bf16.mxu0 %v9359_v4  ;;  %v2344_v54 = vshll.u32 %v6060_v36, 16 }
  0xd4   : > { %v2380_v38 = vrot.slane %v2379_v0, 4  ;;  %v2423_v0 = vrot.slane %v2421_v3, 4 }
  0xd5   : > { %v2346_v35 = vrot.slane %v2344_v54, 5  ;;  %v2388_v54 = vrot.slane %v2386_v7, 4 }
  0xd6   : > { %5925 = vmatmul.mubr.msk.bf16.gmra.mxu1 %vm677_vm3, %v9389_v56  ;;  %v2385_v7 = vsel %vm6775_vm4, %v2380_v38, %v7545_v1 }
  0xd7   : > { %1257 = vmatprep.mubr.bf16.mxu1 %v9359_v4  ;;  %v2347_v9 = vsel %vm6775_vm4, %v2342_v39, %v2346_v35  ;;  %v2389_v5 = vor.u32 %v2388_v54, %v7545_v1  ;;  %v6072_v54 = vld [vmem:[%s6732_s4 + $0x50] sm:$0x1] }
  0xd8   : > { %v6107_v36 = vcombine.low %v2337_v63, %v2347_v9  ;;  %v2394_v63 = vrot.slane %v2392_v30, 5 }
  0xda   : > { %5982 = vmatmul.mubr.msk.bf16.gmra.mxu0 %vm677_vm3, %v5961_v62  ;;  %v6106_v62 = vcombine.low %v2313_v45, %v2323_v42  ;;  %v2366_v45 = vrot.slane %v2365_v24, 4  ;;  %v6067_v42 = vld [vmem:[%s6732_s4 + $0x3c] sm:$0xf]  ;;  %v6071_v24 = vld [vmem:[%s6732_s4 + $0x4c] sm:$0xf] }
  0xdb   : > { %2837 = vmatprep.mubr.bf16.mxu0 %v9359_v4  ;;  %v2397_v23 = vshrl.u32 %v6067_v42, 16  ;;  %v2400_v39 = vshll.u32 %v6067_v42, 16  ;;  %v2434_v32 = vshrl.u32 %v6071_v24, 16 }
  0xdc   : > { %v2371_v35 = vsel %vm6775_vm4, %v2366_v45, %v2370_v16  ;;  %v2413_v16 = vor.u32 %v2412_v52, %v2408_v44 }
  0xdd   : > { %v2402_v28 = vrot.slane %v2400_v39, 5  ;;  %v2436_v39 = vrot.slane %v2434_v32, 4 }
  0xde   : > { %5926 = vmatmul.mubr.msk.bf16.gmra.mxu1 %vm677_vm3, %v5905_v59  ;;  %v7485_v11 = vpop.f32.mrf.mxu0  ;;  %v6143_v59 = vld [vmem:[%s6732_s4 + $0xc] sm:$0xe] }
  0xdf   : > { %2027 = vmatprep.mubr.bf16.mxu1 %v9359_v4  ;;  %v6159_v58 = vrot.slane %v6143_v59, 9 }
  0xe0   : > { %v7493_v8 = vpop.f32.mrf.mxu0 }
  0xe1   : > { %v7512_v26 = vsel %vm7054_vm7, %v6159_v58, %v3128_v29  ;;  %v6574_v29 = vld [vmem:[%s6732_s4 + $0x18] sm:$0xff]   ;;  %v2399_v58 = vrot.slane %v2397_v23, 4 }
  0xe2   : > { %v7503_v18 = vpop.f32.mrf.mxu1  ;;  %6127 = vmatmul.mubr.msk.bf16.vlgmr.msra.gmra.mxu0 %vm677_vm3, %v6106_v62  ;;  %v7506_v13 = vpop.f32.mrf.mxu0  ;;  %9391 = vst [vmem:[#allocation2_spill] sm:$0xff] %v7512_v26 }
  0xe3   : > { %9390 = vst [vmem:[#allocation3_spill] sm:$0xff] %v7503_v18  ;;  %3815 = vmatpush1.bf16.msra.mxu0 %v3797_v60  ;;  %2847 = vmatprep.mubr.bf16.mxu0 %v9359_v4  ;;  %v6108_v60 = vcombine.low %v2361_v47, %v2371_v35  ;;  %v2403_v33 = vor.u32 %v2402_v28, %v2399_v58  ;;  %v2414_v47 = vrot.slane %v2413_v16, 4  ;;  %v6074_v35 = vld [vmem:[%s6732_s4 + $0x58] sm:$0xf]  ;;  %v2440_v28 = vshll.u32 %v6072_v54, 16 }
  0xe4   : > { %v7528_v41 = vpop.f32.mrf.mxu1  ;;  %v7530_v56 = vpop.f32.mrf.mxu0  ;;  %3816 = vmatprep.subr.bf16.mxu0 %v6587_v43  ;;  %v6069_v43 = vld [vmem:[%s6732_s4 + $0x44] sm:$0x1]  ;;  %v6075_v16 = vld [vmem:[%s6732_s4 + $0x5c] sm:$0x1]  ;;  %v6076_v54 = vld [vmem:[%s6732_s4 + $0x60] sm:$0xf] }
  0xe5   : > { %9393 = vst [vmem:[#allocation5_spill] sm:$0xff] %v7528_v41  ;;  %v2416_v2 = vshll.u32 %v6069_v43, 16  ;;  %v2404_v49 = vrot.slane %v2403_v33, 4 }
  0xe6   : > { %6039 = vmatmul.mubr.msk.bf16.vlgmr.msra.gmra.mxu1 %vm677_vm3, %v6570_v46  ;;  %v7534_v10 = vpop.f32.mrf.mxu1  ;;  %v7537_v31 = vpop.f32.mrf.mxu0  ;;  %v2390_v46 = vrot.slane %v2389_v5, 4 }
  0xe7   : > { %3372 = vmatpush1.bf16.msra.mxu1 %v3354_v12  ;;  %9394 = vst [vmem:[#allocation7_spill] sm:$0xff] %v7534_v10  ;;  %2037 = vmatprep.mubr.bf16.mxu1 %v9359_v4  ;;  %v2409_v52 = vsel %vm6775_vm4, %v2404_v49, %v2408_v44 }
  0xe8   : > { %3373 = vmatprep.subr.bf16.mxu1 %v6583_v20  ;;  %3817 = vmatpush1.bf16.msra.mxu0 %v6585_v53  ;;  %v7548_v21 = vpop.f32.mrf.mxu1  ;;  %v7550_v51 = vpop.f32.mrf.mxu0  ;;  %v2395_v57 = vsel %vm6775_vm4, %v2390_v46, %v2394_v63  ;;  %v2454_v46 = vshll.u32 %v6074_v35, 16  ;;  %v2458_v63 = vshrl.u32 %v6074_v35, 16  ;;  %v2464_v35 = vshll.u32 %v6075_v16, 16  ;;  %v6078_v16 = vld [vmem:[%s6732_s4 + $0x68] sm:$0x1] }
  0xe9   : > { %9395 = vst [vmem:[#allocation8_spill] sm:$0xff] %v7548_v21  ;;  %6430 = vmatprep.subr.msk.bf16.mxu0 %vm726_vm0, %v6429_v37  ;;  %v6073_v37 = vld [vmem:[%s6732_s4 + $0x54] sm:$0xf] }
  0xea   : > { %6128 = vmatmul.mubr.msk.bf16.gmra.mxu0 %vm677_vm3, %v6107_v36  ;;  %v7562_v62 = vpop.f32.mrf.mxu0  ;;  %v2424_v36 = vshll.u32 %v6070_v15, 16  ;;  %v2445_v38 = vshrl.u32 %v6073_v37, 16  ;;  %v2460_v32 = vrot.slane %v2458_v63, 4 }
  0xeb   : > { %3374 = vmatpush1.bf16.msra.mxu1 %v6581_v17  ;;  %2857 = vmatprep.mubr.bf16.mxu0 %v9359_v4  ;;  %v2430_v17 = vshll.u32 %v6071_v24, 16 }
  0xec   : > { %6358 = vmatprep.subr.msk.bf16.mxu1 %vm726_vm0, %v6357_v14  ;;  %v7572_v34 = vpop.f32.mrf.mxu1  ;;  %v7574_v6 = vpop.f32.mrf.mxu0  ;;  %v6109_v14 = vcombine.low %v2385_v7, %v2395_v57  ;;  %v2426_v30 = vrot.slane %v2424_v36, 5 }
  0xed   : > { %9396 = vst [vmem:[#allocation9_spill] sm:$0xff] %v7572_v34  ;;  %v7612_v23 = vrot.slane %v2430_v17, 5  ;;  %v2456_v17 = vrot.slane %v2454_v46, 5  ;;  %v6580_v34 = vld [vmem:[%s6732_s4 + $0x60] sm:$0xff]  }
  0xee   : > { %6040 = vmatmul.mubr.msk.bf16.gmra.mxu1 %vm677_vm3, %v6574_v29  ;;  %v7578_v59 = vpop.f32.mrf.mxu1  ;;  %v7581_v12 = vpop.f32.mrf.mxu0  ;;  %v2418_v29 = vrot.slane %v2416_v2, 5  ;;  %v2427_v24 = vor.u32 %v2426_v30, %v2423_v0  ;;  %v2447_v2 = vrot.slane %v2445_v38, 4  ;;  %v6077_v0 = vld [vmem:[%s6732_s4 + $0x64] sm:$0xf]  ;;  %v6577_v30 = vld [vmem:[%s6732_s4 + $0x3c] sm:$0xff]   ;;  %v2472_v38 = vshll.u32 %v6076_v54, 16 }
  0xef   : > { %9397 = vst [vmem:[#allocation10_spill] sm:$0xff] %v7578_v59  ;;  %2047 = vmatprep.mubr.bf16.mxu1 %v9359_v4  ;;  %v2461_v63 = vor.u32 %v2460_v32, %v2456_v17 }
  0xf0   : > { %v7585_v9 = vpop.f32.mrf.mxu1  ;;  %v7587_v27 = vpop.f32.mrf.mxu0  ;;  %v2419_v15 = vsel %vm6775_vm4, %v2414_v47, %v2418_v29  ;;  %v2442_v29 = vrot.slane %v2440_v28, 5  ;;  %v2482_v28 = vshrl.u32 %v6077_v0, 16 }
  0xf1   : > { %9398 = vst [vmem:[#allocation11_spill] sm:$0xff] %v7585_v9  ;;  %v6110_v57 = vcombine.low %v2409_v52, %v2419_v15  ;;  %v2478_v52 = vshll.u32 %v6077_v0, 16 }
  0xf2   : > { %v7594_v20 = vpop.f32.mrf.mxu1  ;;  %6129 = vmatmul.mubr.msk.bf16.gmra.mxu0 %vm677_vm3, %v6108_v60  ;;  %v7597_v53 = vpop.f32.mrf.mxu0  ;;  %v2448_v60 = vshll.u32 %v6073_v37, 16  ;;  %v2484_v22 = vrot.slane %v2482_v28, 4 }
  0xf3   : > { %9399 = vst [vmem:[#allocation12_spill] sm:$0xff] %v7594_v20  ;;  %2867 = vmatprep.mubr.bf16.mxu0 %v9359_v4  ;;  %v6084_v20 = vld [vmem:[%s6732_s4 + $0x80] sm:$0x1] }
  0xf4   : > { %v7602_v45 = vpop.f32.mrf.mxu1  ;;  %v7604_v1 = vpop.f32.mrf.mxu0  ;;  %v2450_v3 = vrot.slane %v2448_v60, 5 }
  0xf5   : > { %9400 = vst [vmem:[#allocation13_spill] sm:$0xff] %v7602_v45 }
  0xf6   : > { %6041 = vmatmul.mubr.msk.bf16.gmra.mxu1 %vm677_vm3, %v6575_v61  ;;  %v7608_v42 = vpop.f32.mrf.mxu1  ;;  %v2437_v61 = vor.u32 %v2436_v39, %v7612_v23  ;;  %v2451_v39 = vor.u32 %v2450_v3, %v2447_v2 }
  0xf7   : > { %9401 = vst [vmem:[#allocation14_spill] sm:$0xff] %v7608_v42  ;;  %2057 = vmatprep.mubr.bf16.mxu1 %v9359_v4 }
  0xf8   : > { %v7615_v5 = vpop.f32.mrf.mxu1  ;;  %v7617_v50 = vpop.f32.mrf.mxu0  ;;  %v2438_v49 = vrot.slane %v2437_v61, 4  ;;  %v2452_v3 = vrot.slane %v2451_v39, 4  ;;  %v2488_v39 = vshll.u32 %v6078_v16, 16 }
  0xf9   : > { %9402 = vst [vmem:[#allocation15_spill] sm:$0xff] %v7615_v5 }
  0xfa   : > { %v7620_v43 = vpop.f32.mrf.mxu1  ;;  %6130 = vmatmul.mubr.msk.bf16.gmra.mxu0 %vm677_vm3, %v6109_v14  ;;  %v7623_v58 = vpop.f32.mrf.mxu0  ;;  %v2428_v14 = vrot.slane %v2427_v24, 4  ;;  %v2443_v24 = vsel %vm6775_vm4, %v2438_v49, %v2442_v29  ;;  %v2462_v49 = vrot.slane %v2461_v63, 4  ;;  %v2480_v29 = vrot.slane %v2478_v52, 5 }
  0xfb   : > { %9403 = vst [vmem:[#allocation16_spill] sm:$0xff] %v7620_v43  ;;  %2877 = vmatprep.mubr.bf16.mxu0 %v9359_v4 }
  0xfc   : > { %v7631_v7 = vpop.f32.mrf.mxu1  ;;  %v7633_v33 = vpop.f32.mrf.mxu0  ;;  %v2433_v15 = vsel %vm6775_vm4, %v2428_v14, %v7612_v23  ;;  %v2485_v28 = vor.u32 %v2484_v22, %v2480_v29 }
  0xfd   : > { %9404 = vst [vmem:[#allocation17_spill] sm:$0xff] %v7631_v7  ;;  %v6111_v14 = vcombine.low %v2433_v15, %v2443_v24 }
  0xfe   : > { %6042 = vmatmul.mubr.msk.bf16.gmra.mxu1 %vm677_vm3, %v6576_v25  ;;  %v7636_v36 = vpop.f32.mrf.mxu1  ;;  %v7638_v44 = vpop.f32.mrf.mxu0  ;;  %v2469_v25 = vshrl.u32 %v6076_v54, 16  ;;  %v2474_v54 = vrot.slane %v2472_v38, 5  ;;  %v2486_v22 = vrot.slane %v2485_v28, 4 }
  0xff   : > { %9405 = vst [vmem:[#allocation18_spill] sm:$0xff] %v7636_v36  ;;  %2067 = vmatprep.mubr.bf16.mxu1 %v9359_v4 }
 0x100   : > { %v7644_v37 = vpop.f32.mrf.mxu1  ;;  %v7646_v47 = vpop.f32.mrf.mxu0  ;;  %v2471_v32 = vrot.slane %v2469_v25, 4  ;;  %v2457_v25 = vsel %vm6775_vm4, %v2452_v3, %v2456_v17 }
 0x101   : > { %9406 = vst [vmem:[#allocation19_spill] sm:$0xff] %v7644_v37 }
 0x102   : > { %v7649_v60 = vpop.f32.mrf.mxu1  ;;  %6131 = vmatmul.mubr.msk.bf16.gmra.mxu0 %vm677_vm3, %v6110_v57  ;;  %v7652_v46 = vpop.f32.mrf.mxu0  ;;  %v2466_v57 = vrot.slane %v2464_v35, 5  ;;  %v6578_v35 = vld [vmem:[%s6732_s4 + $0x48] sm:$0xff]   ;;  %v2475_v38 = vor.u32 %v2474_v54, %v2471_v32  ;;  %v2490_v32 = vrot.slane %v2488_v39, 5  ;;  %v6579_v39 = vld [vmem:[%s6732_s4 + $0x54] sm:$0xff]  }
 0x103   : > { %9407 = vst [vmem:[#allocation20_spill] sm:$0xff] %v7649_v60  ;;  %2887 = vmatprep.mubr.bf16.mxu0 %v9359_v4  ;;  %v6080_v60 = vld [vmem:[%s6732_s4 + $0x70] sm:$0xf] }
 0x104   : > { %v7660_v61 = vpop.f32.mrf.mxu1  ;;  %v7662_v2 = vpop.f32.mrf.mxu0  ;;  %v2467_v52 = vsel %vm6775_vm4, %v2462_v49, %v2466_v57  ;;  %v2502_v15 = vshll.u32 %v6080_v60, 16  ;;  %v2506_v24 = vshrl.u32 %v6080_v60, 16  ;;  %v2476_v3 = vrot.slane %v2475_v38, 4 }
 0x105   : > { %9408 = vst [vmem:[#allocation21_spill] sm:$0xff] %v7660_v61  ;;  %v6079_v61 = vld [vmem:[%s6732_s4 + $0x6c] sm:$0xf]  ;;  %v2491_v38 = vsel %vm6775_vm4, %v2486_v22, %v2490_v32  ;;  %v6085_v32 = vld [vmem:[%s6732_s4 + $0x84] sm:$0xf] }
 0x106   : > { %6043 = vmatmul.mubr.msk.bf16.gmra.mxu1 %vm677_vm3, %v6577_v30  ;;  %v7666_v0 = vpop.f32.mrf.mxu1  ;;  %v7668_v23 = vpop.f32.mrf.mxu0  ;;  %v2496_v36 = vshll.u32 %v6079_v61, 16  ;;  %v2508_v49 = vrot.slane %v2506_v24, 4  ;;  %v2544_v9 = vshll.u32 %v6085_v32, 16 }
 0x107   : > { %9409 = vst [vmem:[#allocation22_spill] sm:$0xff] %v7666_v0  ;;  %2077 = vmatprep.mubr.bf16.mxu1 %v9359_v4  ;;  %v2493_v0 = vshrl.u32 %v6079_v61, 16  ;;  %v6112_v61 = vcombine.low %v2457_v25, %v2467_v52  ;;  %v6083_v25 = vld [vmem:[%s6732_s4 + $0x7c] sm:$0xf] }
 0x108   : > { %v7673_v37 = vpop.f32.mrf.mxu1  ;;  %v7675_v30 = vpop.f32.mrf.mxu0  ;;  %v2498_v60 = vrot.slane %v2496_v36, 5 }
 0x109   : > { %9410 = vst [vmem:[#allocation23_spill] sm:$0xff] %v7673_v37  ;;  %v2495_v54 = vrot.slane %v2493_v0, 4  ;;  %v2481_v0 = vsel %vm6775_vm4, %v2476_v3, %v2480_v29  ;;  %v2526_v29 = vshll.u32 %v6083_v25, 16  ;;  %v2530_v3 = vshrl.u32 %v6083_v25, 16 }
 0x10a   : > { %v7680_v7 = vpop.f32.mrf.mxu1  ;;  %6132 = vmatmul.mubr.msk.bf16.gmra.mxu0 %vm677_vm3, %v6111_v14  ;;  %v7683_v63 = vpop.f32.mrf.mxu0  ;;  %v7696_v14 = vrot.slane %v2502_v15, 5 }
 0x10b   : > { %9411 = vst [vmem:[#allocation24_spill] sm:$0xff] %v7680_v7  ;;  %2897 = vmatprep.mubr.bf16.mxu0 %v9359_v4  ;;  %v2499_v28 = vor.u32 %v2498_v60, %v2495_v54  ;;  %v7731_v45 = vrot.slane %v2526_v29, 5 }
 0x10c   : > { %v7688_v16 = vpop.f32.mrf.mxu0  ;;  %v2509_v15 = vor.u32 %v2508_v49, %v7696_v14 }
 0x10d   : > { %v7690_v17 = vpop.f32.mrf.mxu1  ;;  %v2500_v22 = vrot.slane %v2499_v28, 4 }
 0x10e   : > { %9412 = vst [vmem:[#allocation25_spill] sm:$0xff] %v7690_v17  ;;  %6044 = vmatmul.mubr.msk.bf16.gmra.mxu1 %vm677_vm3, %v6578_v35  ;;  %v7693_v57 = vpop.f32.mrf.mxu0  ;;  %v6081_v17 = vld [vmem:[%s6732_s4 + $0x74] sm:$0x1]  ;;  %v6082_v35 = vld [vmem:[%s6732_s4 + $0x78] sm:$0xf]  ;;  %v2510_v60 = vrot.slane %v2509_v15, 4 }
 0x10f   : > { %2087 = vmatprep.mubr.bf16.mxu1 %v9359_v4  ;;  %v7698_v7 = vpop.f32.mrf.mxu1  ;;  %v2512_v24 = vshll.u32 %v6081_v17, 16  ;;  %v2520_v43 = vshll.u32 %v6082_v35, 16  ;;  %v6113_v17 = vcombine.low %v2481_v0, %v2491_v38 }
 0x110   : > { %9413 = vst [vmem:[#allocation26_spill] sm:$0xff] %v7698_v7  ;;  %v7701_v37 = vpop.f32.mrf.mxu0  ;;  %v9416_v7 = vmov 0  }
 0x111   : > { %v7705_v52 = vpop.f32.mrf.mxu1  ;;  %v2514_v49 = vrot.slane %v2512_v24, 5  ;;  %v2522_v42 = vrot.slane %v2520_v43, 5  ;;  %v2536_v24 = vshll.u32 %v6084_v20, 16  ;;  %v6088_v20 = vld [vmem:[%s6732_s4 + $0x90] sm:$0xf] }
 0x112   : > { %9414 = vst [vmem:[#allocation27_spill] sm:$0xff] %v7705_v52  ;;  %6133 = vmatmul.mubr.msk.bf16.gmra.mxu0 %vm677_vm3, %v6112_v61  ;;  %v7711_v36 = vpop.f32.mrf.mxu0  ;;  %v2517_v52 = vshrl.u32 %v6082_v35, 16  ;;  %v6086_v35 = vld [vmem:[%s6732_s4 + $0x88] sm:$0xf] }
 0x113   : > { %v7716_v4 = vpop.f32.mrf.mxu1  ;;  %2907 = vmatprep.mubr.bf16.mxu0 %v9416_v7  ;;  %v2550_v21 = vshll.u32 %v6086_v35, 16  ;;  %v2554_v10 = vshrl.u32 %v6086_v35, 16  ;;  %v2515_v38 = vsel %vm6775_vm4, %v2510_v60, %v2514_v49 }
 0x114   : > { %9415 = vst [vmem:[#allocation28_spill] sm:$0xff] %v7716_v4  ;;  %v7719_v5 = vpop.f32.mrf.mxu0  ;;  %v2519_v25 = vrot.slane %v2517_v52, 4  ;;  %v2505_v52 = vsel %vm6775_vm4, %v2500_v22, %v7696_v14 }
 0x115   : > { %v7721_v61 = vpop.f32.mrf.mxu1  ;;  %v7754_v14 = vrot.slane %v2550_v21, 5  ;;  %v2556_v22 = vrot.slane %v2554_v10, 4  ;;  %v6584_v10 = vld [vmem:[%s6732_s4 + $0x6c] sm:$0xff]  }
 0x116   : > { %9417 = vst [vmem:[#allocation29_spill] sm:$0xff] %v7721_v61  ;;  %6045 = vmatmul.mubr.msk.bf16.gmra.mxu1 %vm677_vm3, %v6579_v39  ;;  %v7725_v54 = vpop.f32.mrf.mxu0  ;;  %v2532_v61 = vrot.slane %v2530_v3, 4  ;;  %v2541_v39 = vshrl.u32 %v6085_v32, 16  ;;  %v2523_v28 = vor.u32 %v2522_v42, %v2519_v25  ;;  %v2546_v32 = vrot.slane %v2544_v9, 5 }
 0x117   : > { %2097 = vmatprep.mubr.bf16.mxu1 %v9416_v7  ;;  %v7729_v4 = vpop.f32.mrf.mxu1  ;;  %v6114_v42 = vcombine.low %v2505_v52, %v2515_v38  ;;  %v2538_v9 = vrot.slane %v2536_v24, 5  ;;  %v2557_v21 = vor.u32 %v2556_v22, %v7754_v14  ;;  %v2565_v52 = vshrl.u32 %v6088_v20, 16 }
 0x118   : > { %9418 = vst [vmem:[#allocation30_spill] sm:$0xff] %v7729_v4  ;;  %v2533_v15 = vor.u32 %v2532_v61, %v7731_v45  ;;  %v2543_v3 = vrot.slane %v2541_v39, 4  ;;  %v6087_v61 = vld [vmem:[%s6732_s4 + $0x8c] sm:$0x1]  ;;  %v2524_v49 = vrot.slane %v2523_v28, 4  ;;  %v2568_v38 = vshll.u32 %v6088_v20, 16 }
 0x119   : > { %v7734_v59 = vpop.f32.mrf.mxu1  ;;  %v6089_v39 = vld [vmem:[%s6732_s4 + $0x94] sm:$0xf]  ;;  %v6091_v20 = vld [vmem:[%s6732_s4 + $0x9c] sm:$0xf] }
 0x11a   : > { %9419 = vst [vmem:[#allocation31_spill] sm:$0xff] %v7734_v59  ;;  %v7737_v0 = vpop.f32.mrf.mxu0  ;;  %6134 = vmatmul.mubr.msk.bf16.gmra.mxu0 %vm677_vm3, %v6113_v17  ;;  %v2534_v25 = vrot.slane %v2533_v15, 4  ;;  %v2560_v59 = vshll.u32 %v6087_v61, 16  ;;  %v2574_v28 = vshll.u32 %v6089_v39, 16  ;;  %v2578_v15 = vshrl.u32 %v6089_v39, 16 }
 0x11b   : > { %v7743_v43 = vpop.f32.mrf.mxu1  ;;  %2917 = vmatprep.mubr.bf16.mxu0 %v9416_v7  ;;  %v2570_v41 = vrot.slane %v2568_v38, 5  ;;  %v2589_v40 = vshrl.u32 %v6091_v20, 16  ;;  %v2592_v26 = vshll.u32 %v6091_v20, 16 }
 0x11c   : > { %9420 = vst [vmem:[#allocation32_spill] sm:$0xff] %v7743_v43  ;;  %v7749_v29 = vpop.f32.mrf.mxu0  ;;  %v2562_v39 = vrot.slane %v2560_v59, 5 }
 0x11e   : > { %v7751_v17 = vpop.f32.mrf.mxu1  ;;  %6046 = vmatmul.mubr.msk.bf16.gmra.mxu1 %vm677_vm3, %v6580_v34  ;;  %v7756_v35 = vpop.f32.mrf.mxu0  ;;  %v2547_v34 = vor.u32 %v2546_v32, %v2543_v3  ;;  %v2529_v3 = vsel %vm6775_vm4, %v2524_v49, %v7731_v45  ;;  %v2539_v32 = vsel %vm6775_vm4, %v2534_v25, %v2538_v9  ;;  %v7784_v49 = vrot.slane %v2574_v28, 5 }
 0x11f   : > { %9421 = vst [vmem:[#allocation33_spill] sm:$0xff] %v7751_v17  ;;  %2107 = vmatprep.mubr.bf16.mxu1 %v9416_v7  ;;  %v6115_v45 = vcombine.low %v2529_v3, %v2539_v32  ;;  %v2580_v25 = vrot.slane %v2578_v15, 4 }
 0x120   : > { %v7761_v60 = vpop.f32.mrf.mxu1  ;;  %v7764_v17 = vpop.f32.mrf.mxu0  ;;  %v2548_v61 = vrot.slane %v2547_v34, 4  ;;  %v6090_v34 = vld [vmem:[%s6732_s4 + $0x98] sm:$0x1] }
 0x121   : > { %9422 = vst [vmem:[#allocation34_spill] sm:$0xff] %v7761_v60  ;;  %9423 = vst [vmem:[#allocation35_spill] sm:$0xff] %v7764_v17 }
 0x122   : > { %v7766_v43 = vpop.f32.mrf.mxu1  ;;  %v1586_v4 = vpop.f32.mrf.mxu0  ;;  %6135 = vmatmul.mubr.msk.bf16.gmra.mxu0 %vm677_vm3, %v6114_v42  ;;  %v2558_v42 = vrot.slane %v2557_v21, 4  ;;  %v2553_v38 = vsel %vm6775_vm4, %v2548_v61, %v7754_v14  ;;  %v2591_v14 = vrot.slane %v2589_v40, 4  ;;  %v2594_v61 = vrot.slane %v2592_v26, 5 }
 0x123   : > { %9424 = vst [vmem:[#allocation36_spill] sm:$0xff] %v7766_v43  ;;  %2927 = vmatprep.mubr.bf16.mxu0 %v9416_v7  ;;  %v6092_v43 = vld [vmem:[%s6732_s4 + $0xa0] sm:$0xf] }
 0x124   : > { %v7771_v24 = vpop.f32.mrf.mxu1  ;;  %v1588_v22 = vpop.f32.mrf.mxu0  ;;  %v2598_v17 = vshll.u32 %v6092_v43, 16  ;;  %v2563_v28 = vsel %vm6775_vm4, %v2558_v42, %v2562_v39  ;;  %v6093_v42 = vld [vmem:[%s6732_s4 + $0xa4] sm:$0x1] }
 0x125   : > { %9425 = vst [vmem:[#allocation37_spill] sm:$0xff] %v7771_v24  ;;  %v2567_v24 = vrot.slane %v2565_v52, 4 }
 0x126   : > { %v1109_v60 = vpop.f32.mrf.mxu1  ;;  %6047 = vmatmul.mubr.msk.bf16.gmra.mxu1 %vm677_vm3, %v6584_v10  ;;  %v1590_v55 = vpop.f32.mrf.mxu0  ;;  %v2602_v10 = vshrl.u32 %v6092_v43, 16  ;;  %v7802_v20 = vrot.slane %v2598_v17, 5 }
 0x127   : > { %v1110_v18 = vadd.f32 %v1109_v60, %v7485_v11  ;;  %2117 = vmatprep.mubr.bf16.mxu1 %v9416_v7  ;;  %v6588_v60 = vld [vmem:[%s6732_s4 + $0x78] sm:$0xff]   ;;  %v2571_v15 = vor.u32 %v2570_v41, %v2567_v24 }
 0x128   : > { %v1111_v9 = vpop.f32.mrf.mxu1  ;;  %v1592_v52 = vpop.f32.mrf.mxu0  ;;  %v2604_v41 = vrot.slane %v2602_v10, 4 }
 0x129   : > { %v7787_v21 = vadd.f32 %v1586_v4, %v1110_v18  ;;  %v1112_v59 = vadd.f32 %v1111_v9, %v7493_v8  ;;  %v2581_v8 = vor.u32 %v2580_v25, %v7784_v49  ;;  %v2584_v18 = vshll.u32 %v6090_v34, 16  ;;  %v6094_v25 = vld [vmem:[%s6732_s4 + $0xa8] sm:$0xf]  ;;  %v6095_v34 = vld [vmem:[%s6732_s4 + $0xac] sm:$0xf] }
 0x12a   : > { %v1113_v11 = vpop.f32.mrf.mxu1  ;;  %v1596_v4 = vpop.f32.mrf.mxu0  ;;  %6136 = vmatmul.mubr.msk.bf16.gmra.mxu0 %vm677_vm3, %v6115_v45  ;;  %v6116_v45 = vcombine.low %v2553_v38, %v2563_v28  ;;  %v2572_v17 = vrot.slane %v2571_v15, 4  ;;  %v2613_v28 = vshrl.u32 %v6094_v25, 16 }
 0x12b   : > { %v7796_v3 = vadd.f32 %v1588_v22, %v1112_v59  ;;  %v1114_v43 = vadd.f32 %v1113_v11, %v7506_v13  ;;  %2937 = vmatprep.mubr.bf16.mxu0 %v9416_v7  ;;  %v2595_v59 = vor.u32 %v2594_v61, %v2591_v14  ;;  %v2605_v11 = vor.u32 %v2604_v41, %v7802_v20 }
 0x12c   : > { %v1115_v32 = vpop.f32.mrf.mxu1  ;;  %v1598_v22 = vpop.f32.mrf.mxu0 }
 0x12d   : > { %v7804_v24 = vadd.f32 %v1590_v55, %v1114_v43  ;;  %v1116_v13 = vadd.f32 %v1115_v32, %v7530_v56  ;;  %v2586_v55 = vrot.slane %v2584_v18, 5  ;;  %v2582_v56 = vrot.slane %v2581_v8, 4 }
 0x12e   : > { %v1119_v39 = vpop.f32.mrf.mxu1  ;;  %6048 = vmatmul.mubr.msk.bf16.gmra.mxu1 %vm677_vm3, %v6588_v60  ;;  %v1600_v26 = vpop.f32.mrf.mxu0  ;;  %v2608_v43 = vshll.u32 %v6093_v42, 16  ;;  %v2596_v61 = vrot.slane %v2595_v59, 4  ;;  %v2606_v41 = vrot.slane %v2605_v11, 4  ;;  %v6097_v59 = vld [vmem:[%s6732_s4 + $0xb4] sm:$0xf] }
 0x12f   : > { %v7810_v9 = vadd.f32 %v1592_v52, %v1116_v13  ;;  %v1120_v40 = vadd.f32 %v1119_v39, %v7537_v31  ;;  %2127 = vmatprep.mubr.bf16.mxu1 %v9416_v7  ;;  %v2616_v31 = vshll.u32 %v6094_v25, 16  ;;  %v6589_v13 = vld [vmem:[%s6732_s4 + $0x84] sm:$0xff]   ;;  %v2622_v39 = vshll.u32 %v6095_v34, 16 }
 0x130   : > { %v1121_v10 = vpop.f32.mrf.mxu1  ;;  %v1602_v38 = vpop.f32.mrf.mxu0  ;;  %v2615_v25 = vrot.slane %v2613_v28, 4 }
 0x131   : > { %9426 = vst [vmem:[#allocation38_spill] sm:$0xff] %v7810_v9  ;;  %v7816_v60 = vadd.f32 %v1596_v4, %v1120_v40  ;;  %v1122_v52 = vadd.f32 %v1121_v10, %v7550_v51  ;;  %v2626_v9 = vshrl.u32 %v6095_v34, 16  ;;  %v2577_v4 = vsel %vm6775_vm4, %v2572_v17, %v7784_v49 }
 0x132   : > { %v1123_v32 = vpop.f32.mrf.mxu1  ;;  %v1606_v8 = vpop.f32.mrf.mxu0  ;;  %6137 = vmatmul.mubr.msk.bf16.gmra.mxu0 %vm677_vm3, %v6116_v45  ;;  %v2587_v51 = vsel %vm6775_vm4, %v2582_v56, %v2586_v55  ;;  %v2618_v40 = vrot.slane %v2616_v31, 5  ;;  %v7834_v17 = vrot.slane %v2622_v39, 5 }
 0x133   : > { %v7820_v15 = vadd.f32 %v1598_v22, %v1122_v52  ;;  %v1124_v18 = vadd.f32 %v1123_v32, %v7562_v62  ;;  %2947 = vmatprep.mubr.bf16.mxu0 %v9416_v7  ;;  %v2610_v22 = vrot.slane %v2608_v43, 5  ;;  %v2628_v34 = vrot.slane %v2626_v9, 4  ;;  %v6098_v52 = vld [vmem:[%s6732_s4 + $0xb8] sm:$0xf] }
 0x134   : > { %v1125_v14 = vpop.f32.mrf.mxu1  ;;  %v1608_v45 = vpop.f32.mrf.mxu0  ;;  %v2601_v43 = vsel %vm6775_vm4, %v2596_v61, %v7802_v20  ;;  %v2619_v31 = vor.u32 %v2618_v40, %v2615_v25  ;;  %v2650_v61 = vshrl.u32 %v6098_v52, 16 }
 0x135   : > { %v7830_v42 = vadd.f32 %v1600_v26, %v1124_v18  ;;  %v1126_v62 = vadd.f32 %v1125_v14, %v7574_v6  ;;  %v6117_v26 = vcombine.low %v2577_v4, %v2587_v51  ;;  %v6096_v6 = vld [vmem:[%s6732_s4 + $0xb0] sm:$0x1]  ;;  %v2629_v39 = vor.u32 %v2628_v34, %v7834_v17 }
 0x136   : > { %v1129_v49 = vpop.f32.mrf.mxu1  ;;  %6049 = vmatmul.mubr.msk.bf16.gmra.mxu1 %vm677_vm3, %v6589_v13  ;;  %v1610_v56 = vpop.f32.mrf.mxu0  ;;  %v6590_v13 = vld [vmem:[%s6732_s4 + $0x90] sm:$0xff]   ;;  %v2632_v18 = vshll.u32 %v6096_v6, 16  ;;  %v2637_v4 = vshrl.u32 %v6097_v59, 16  ;;  %v2640_v14 = vshll.u32 %v6097_v59, 16 }
 0x137   : > { %v7836_v55 = vadd.f32 %v1602_v38, %v1126_v62  ;;  %v1130_v10 = vadd.f32 %v1129_v49, %v7581_v12  ;;  %2137 = vmatprep.mubr.bf16.mxu1 %v9416_v7  ;;  %v2611_v12 = vsel %vm6775_vm4, %v2606_v41, %v2610_v22  ;;  %v2620_v49 = vrot.slane %v2619_v31, 4 }
 0x138   : > { %v1131_v11 = vpop.f32.mrf.mxu1  ;;  %v1612_v38 = vpop.f32.mrf.mxu0  ;;  %v6118_v40 = vcombine.low %v2601_v43, %v2611_v12  ;;  %v2634_v34 = vrot.slane %v2632_v18, 5 }
 0x139   : > { %v7846_v28 = vadd.f32 %v1606_v8, %v1130_v10  ;;  %v1132_v9 = vadd.f32 %v1131_v11, %v7587_v27  ;;  %v2646_v27 = vshll.u32 %v6098_v52, 16  ;;  %v2639_v10 = vrot.slane %v2637_v4, 4  ;;  %v6099_v52 = vld [vmem:[%s6732_s4 + $0xbc] sm:$0x1] }
 0x13a   : > { %v1133_v32 = vpop.f32.mrf.mxu1  ;;  %v1616_v8 = vpop.f32.mrf.mxu0  ;;  %6138 = vmatmul.mubr.msk.bf16.gmra.mxu0 %vm677_vm3, %v6117_v26  ;;  %v2642_v26 = vrot.slane %v2640_v14, 5  ;;  %v2652_v11 = vrot.slane %v2650_v61, 4 }
 0x13b   : > { %v7853_v51 = vadd.f32 %v1608_v45, %v1132_v9  ;;  %v1134_v20 = vadd.f32 %v1133_v32, %v7597_v53  ;;  %2957 = vmatprep.mubr.bf16.mxu0 %v9416_v7  ;;  %v2630_v53 = vrot.slane %v2629_v39, 4  ;;  %v6100_v32 = vld [vmem:[%s6732_s4 + $0xc0] sm:$0xf] }
 0x13c   : > { %v1135_v62 = vpop.f32.mrf.mxu1  ;;  %v1618_v25 = vpop.f32.mrf.mxu0  ;;  %v6591_v39 = vld [vmem:[%s6732_s4 + $0x9c] sm:$0xff]   ;;  %v2643_v4 = vor.u32 %v2642_v26, %v2639_v10 }
 0x13d   : > { %v7858_v41 = vadd.f32 %v1610_v56, %v1134_v20  ;;  %v1136_v22 = vadd.f32 %v1135_v62, %v7604_v1  ;;  %v7866_v1 = vrot.slane %v2646_v27, 5  ;;  %v2635_v18 = vsel %vm6775_vm4, %v2630_v53, %v2634_v34 }
 0x13e   : > { %v1139_v45 = vpop.f32.mrf.mxu1  ;;  %6050 = vmatmul.mubr.msk.bf16.gmra.mxu1 %vm677_vm3, %v6590_v13  ;;  %v1620_v59 = vpop.f32.mrf.mxu0  ;;  %v7874_v13 = vld [vmem:[%s6732_s4 + $0xc4] sm:$0xf]  ;;  %v2656_v27 = vshll.u32 %v6099_v52, 16  ;;  %v2661_v62 = vshrl.u32 %v6100_v32, 16  ;;  %v2644_v34 = vrot.slane %v2643_v4, 4  ;;  %v6592_v4 = vld [vmem:[%s6732_s4 + $0xa8] sm:$0xff]  }
 0x13f   : > { %v7862_v6 = vadd.f32 %v1612_v38, %v1136_v22  ;;  %v1140_v56 = vadd.f32 %v1139_v45, %v7617_v50  ;;  %2147 = vmatprep.mubr.bf16.mxu1 %v9416_v7  ;;  %v2625_v50 = vsel %vm6775_vm4, %v2620_v49, %v7834_v17  ;;  %v2664_v22 = vshll.u32 %v6100_v32, 16 }
 0x140   : > { %v1141_v43 = vpop.f32.mrf.mxu1  ;;  %v1622_v31 = vpop.f32.mrf.mxu0  ;;  %v2670_v17 = vshll.u32 %v7874_v13, 16  ;;  %v2674_v49 = vshrl.u32 %v7874_v13, 16  ;;  %v2663_v52 = vrot.slane %v2661_v62, 4 }
 0x141   : > { %v7869_v9 = vadd.f32 %v1616_v8, %v1140_v56  ;;  %v1142_v12 = vadd.f32 %v1141_v43, %v7623_v58  ;;  %v2653_v58 = vor.u32 %v2652_v11, %v7866_v1 }
 0x142   : > { %v1143_v38 = vpop.f32.mrf.mxu1  ;;  %v1626_v8 = vpop.f32.mrf.mxu0  ;;  %6139 = vmatmul.mubr.msk.bf16.gmra.mxu0 %vm677_vm3, %v6118_v40  ;;  %v6119_v40 = vcombine.low %v2625_v50, %v2635_v18  ;;  %v2676_v32 = vrot.slane %v2674_v49, 4 }
 0x143   : > { %v7882_v14 = vadd.f32 %v1618_v25, %v1142_v12  ;;  %v1144_v20 = vadd.f32 %v1143_v38, %v7633_v33  ;;  %2967 = vmatprep.mubr.bf16.mxu0 %v9416_v7  ;;  %v2654_v11 = vrot.slane %v2653_v58, 4  ;;  %v2672_v12 = vrot.slane %v2670_v17, 5 }
 0x144   : > { %v1145_v61 = vpop.f32.mrf.mxu1  ;;  %v1628_v33 = vpop.f32.mrf.mxu0 }
 0x145   : > { %v7890_v45 = vadd.f32 %v1620_v59, %v1144_v20  ;;  %v1146_v25 = vadd.f32 %v1145_v61, %v7638_v44  ;;  %v2658_v59 = vrot.slane %v2656_v27, 5  ;;  %v2666_v44 = vrot.slane %v2664_v22, 5 }
 0x146   : > { %v1149_v53 = vpop.f32.mrf.mxu1  ;;  %6051 = vmatmul.mubr.msk.bf16.gmra.mxu1 %vm677_vm3, %v6591_v39  ;;  %v1630_v56 = vpop.f32.mrf.mxu0  ;;  %v2649_v27 = vsel %vm6775_vm4, %v2644_v34, %v7866_v1  ;;  %v2677_v62 = vor.u32 %v2676_v32, %v2672_v12 }
 0x147   : > { %v7894_v10 = vadd.f32 %v1622_v31, %v1146_v25  ;;  %v1150_v26 = vadd.f32 %v1149_v53, %v7646_v47  ;;  %2157 = vmatprep.mubr.bf16.mxu1 %v9416_v7  ;;  %v7902_v31 = vld [vmem:[%s6732_s4 + $0xc8] sm:$0x1]  ;;  %v2667_v61 = vor.u32 %v2666_v44, %v2663_v52  ;;  %v6593_v44 = vld [vmem:[%s6732_s4 + $0xb4] sm:$0xff]  }
 0x148   : > { %v1151_v43 = vpop.f32.mrf.mxu1  ;;  %v1632_v50 = vpop.f32.mrf.mxu0  ;;  %v2680_v22 = vshll.u32 %v7902_v31, 16 }
 0x149   : > { %v7898_v38 = vadd.f32 %v1626_v8, %v1150_v26  ;;  %v1152_v39 = vadd.f32 %v1151_v43, %v7652_v46  ;;  %v2659_v46 = vsel %vm6775_vm4, %v2654_v11, %v2658_v59  ;;  %v2668_v26 = vrot.slane %v2667_v61, 4 }
 0x14a   : > { %v1153_v18 = vpop.f32.mrf.mxu1  ;;  %v1636_v58 = vpop.f32.mrf.mxu0  ;;  %6140 = vmatmul.mubr.msk.bf16.gmra.mxu0 %vm677_vm3, %v6119_v40  ;;  %v6120_v40 = vcombine.low %v2649_v27, %v2659_v46  ;;  %v2678_v11 = vrot.slane %v2677_v62, 4 }
 0x14b   : > { %v7905_v47 = vadd.f32 %v1628_v33, %v1152_v39  ;;  %v1154_v20 = vadd.f32 %v1153_v18, %v7662_v2  ;;  %2977 = vmatprep.mubr.bf16.mxu0 %v9416_v7  ;;  %v2673_v18 = vsel %vm6775_vm4, %v2668_v26, %v2672_v12  ;;  %v6428_v26 = vcombine.low %v7556_v19, %v7556_v19  ;;  %v6631_v19 = vld [vmem:[%s9349_s1 + $0xb8] sm:$0x11] }
 0x14c   : > { %v1155_v8 = vpop.f32.mrf.mxu1  ;;  %v1638_v49 = vpop.f32.mrf.mxu0 }
 0x14d   : > { %v7916_v17 = vadd.f32 %v1630_v56, %v1154_v20  ;;  %v1156_v2 = vadd.f32 %v1155_v8, %v7668_v23  ;;  %v2682_v56 = vrot.slane %v2680_v22, 5 }
 0x14e   : > { %v1159_v25 = vpop.f32.mrf.mxu1  ;;  %6052 = vmatmul.mubr.msk.bf16.gmra.mxu1 %vm677_vm3, %v6592_v4  ;;  %v1640_v53 = vpop.f32.mrf.mxu0 }
 0x14f   : > { %v7920_v1 = vadd.f32 %v1632_v50, %v1156_v2  ;;  %v1160_v33 = vadd.f32 %v1159_v25, %v7675_v30  ;;  %2167 = vmatprep.mubr.bf16.mxu1 %v9416_v7  ;;  %v2683_v4 = vsel %vm6775_vm4, %v2678_v11, %v2682_v56 }
 0x150   : > { %v1161_v34 = vpop.f32.mrf.mxu1  ;;  %v1642_v43 = vpop.f32.mrf.mxu0  ;;  %v6121_v12 = vcombine.low %v2673_v18, %v2683_v4 }
 0x151   : > { %v7924_v59 = vadd.f32 %v1636_v58, %v1160_v33  ;;  %v1162_v23 = vadd.f32 %v1161_v34, %v7683_v63 }
 0x152   : > { %v1163_v52 = vpop.f32.mrf.mxu1  ;;  %v1646_v30 = vpop.f32.mrf.mxu0  ;;  %6141 = vmatmul.mubr.msk.bf16.gmra.mxu0 %vm677_vm3, %v6120_v40 }
 0x153   : > { %v7928_v32 = vadd.f32 %v1638_v49, %v1162_v23  ;;  %v1164_v39 = vadd.f32 %v1163_v52, %v7688_v16  ;;  %2987 = vmatprep.mubr.bf16.mxu0 %v9416_v7  ;;  %v6144_v52 = vld [vmem:[%s6732_s4 + $0x18] sm:$0xe] }
 0x154   : > { %v1165_v50 = vpop.f32.mrf.mxu1  ;;  %v1648_v58 = vpop.f32.mrf.mxu0 }
 0x155   : > { %v7937_v63 = vadd.f32 %v1640_v53, %v1164_v39  ;;  %v1166_v20 = vadd.f32 %v1165_v50, %v7693_v57  ;;  %v6594_v57 = vld [vmem:[%s6732_s4 + $0xc0] sm:$0xff]  }
 0x156   : > { %v1169_v27 = vpop.f32.mrf.mxu1  ;;  %6053 = vmatmul.mubr.msk.bf16.gmra.mxu1 %vm677_vm3, %v6593_v44  ;;  %v1650_v46 = vpop.f32.mrf.mxu0  ;;  %v6630_v44 = vld [vmem:[%s6732_s4 + $0x1c] sm:$0xf] }
 0x157   : > { %v7941_v16 = vadd.f32 %v1642_v43, %v1166_v20  ;;  %v1170_v8 = vadd.f32 %v1169_v27, %v7701_v37  ;;  %2177 = vmatprep.mubr.bf16.mxu1 %v9416_v7  ;;  %v6596_v43 = vld [vmem:[%s6732_s4 + $0x18] sm:$0xff]   ;;  %v3135_v39 = vrot.slane %v6630_v44, 5  ;;  %v6613_v20 = vld [vmem:[%s9349_s1 + $0xc4] ss:$8 sps:$4 sm:$0xff]   ;;  %v6160_v27 = vrot.slane %v6144_v52, 9 }
 0x158   : > { %v1171_v61 = vpop.f32.mrf.mxu1  ;;  %v1652_v2 = vpop.f32.mrf.mxu0 }
 0x159   : > { %v7945_v62 = vadd.f32 %v1646_v30, %v1170_v8  ;;  %v1172_v22 = vadd.f32 %v1171_v61, %v7711_v36  ;;  %v6356_v30 = vcombine.low %v6631_v19, %v6631_v19  ;;  %v6632_v8 = vld [vmem:[%s6732_s4 + $0x20] sm:$0x1]  ;;  %v3136_v52 = vsel %vm7054_vm7, %v6160_v27, %v3135_v39 }
 0x15a   : > { %v1173_v49 = vpop.f32.mrf.mxu1  ;;  %v1656_v53 = vpop.f32.mrf.mxu0  ;;  %6142 = vmatmul.mubr.msk.bf16.gmra.mxu0 %vm677_vm3, %v6121_v12 }
 0x15b   : > { %v7949_v25 = vadd.f32 %v1648_v58, %v1172_v22  ;;  %v1174_v33 = vadd.f32 %v1173_v49, %v7719_v5  ;;  %3834 = vmatprep.mubr.bf16.mxu0 %v9416_v7  ;;  %v4607_v49 = vsel %vm726_vm0, %v6356_v30, 0 }
 0x15c   : > { %v1175_v37 = vpop.f32.mrf.mxu1  ;;  %v1658_v34 = vpop.f32.mrf.mxu0 }
 0x15d   : > { %v7954_v40 = vadd.f32 %v1650_v46, %v1174_v33  ;;  %v1176_v36 = vadd.f32 %v1175_v37, %v7725_v54  ;;  %v3138_v46 = vrot.slane %v6632_v8, 5  ;;  %v9433_v8 = vld [vmem:[#allocation5_spill] sm:$0xff] }
 0x15e   : > { %v1179_v11 = vpop.f32.mrf.mxu1  ;;  %6054 = vmatmul.mubr.msk.bf16.gmra.mxu1 %vm677_vm3, %v6594_v57  ;;  %v1660_v23 = vpop.f32.mrf.mxu0  ;;  %v6609_v57 = vld [vmem:[%s9349_s1 + $0xac] ss:$8 sps:$4 sm:$0xff]  }
 0x15f   : > { %v7960_v5 = vadd.f32 %v1652_v2, %v1176_v36  ;;  %v1180_v56 = vadd.f32 %v1179_v11, %v7737_v0  ;;  %3391 = vmatprep.mubr.bf16.mxu1 %v9416_v7  ;;  %v5161_v0 = vsel %vm726_vm0, %v6428_v26, 0  ;;  %v3137_v2 = vrot.slane %v3135_v39, 4  ;;  %v9428_v26 = vld [vmem:[#allocation2_spill] sm:$0xff]  ;;  %v9429_v11 = vld [vmem:[#allocation4_spill] sm:$0xff] }
 0x160   : > { %v1181_v54 = vpop.f32.mrf.mxu1  ;;  %v1662_v4 = vpop.f32.mrf.mxu0  ;;  %v6607_v39 = vld [vmem:[%s9349_s1 + $0xa8] ss:$8 sps:$4 sm:$0xff]  }
 0x161   : > { %v7970_v50 = vadd.f32 %v1656_v53, %v1180_v56  ;;  %v1182_v18 = vadd.f32 %v1181_v54, %v7749_v29  ;;  %v9427_v53 = vld [vmem:[#allocation35_spill] sm:$0xff]  ;;  %v9430_v56 = vcombine.low %v9428_v26, %v9429_v11  ;;  %v3139_v30 = vsel %vm7054_vm7, %v3137_v2, %v3138_v46 }
 0x162   : > { %v1183_v58 = vpop.f32.mrf.mxu1  ;;  %v1666_v22 = vpop.f32.mrf.mxu0  ;;  %6271 = vmatmul.mubr.msk.bf16.vlgmr.msra.gmra.mxu0 %vm677_vm3, %v6596_v43  ;;  %v9432_v54 = vld [vmem:[#allocation3_spill] sm:$0xff] }
 0x163   : > { %v7978_v12 = vadd.f32 %v1658_v34, %v1182_v18  ;;  %v1184_v61 = vadd.f32 %v1183_v58, %v7756_v35  ;;  %5179 = vmatpush1.bf16.msra.mxu0 %v5161_v0  ;;  %3844 = vmatprep.mubr.bf16.mxu0 %v9416_v7  ;;  %v6611_v35 = vld [vmem:[%s9349_s1 + $0xc0] ss:$8 sps:$4 sm:$0xff]   ;;  %v6145_v0 = vld [vmem:[%s6732_s4 + $0x24] sm:$0xe]  ;;  %v6634_v46 = vld [vmem:[%s6732_s4 + $0x2c] sm:$0x1] }
 0x164   : > { %v1185_v29 = vpop.f32.mrf.mxu1  ;;  %v1668_v36 = vpop.f32.mrf.mxu0  ;;  %5180 = vmatprep.subr.bf16.mxu0 %v6613_v20  ;;  %v6600_v18 = vld [vmem:[%s6732_s4 + $0x24] sm:$0xff]   ;;  %v3145_v2 = vrot.slane %v6634_v46, 5 }
 0x165   : > { %v7990_v33 = vadd.f32 %v1660_v23, %v1184_v61  ;;  %v1186_v37 = vadd.f32 %v1185_v29, %v9427_v53  ;;  %v6633_v20 = vld [vmem:[%s6732_s4 + $0x28] sm:$0xf]  ;;  %v6179_v53 = vcombine.low %v3136_v52, %v3139_v30  ;;  %v9435_v52 = vld [vmem:[#allocation8_spill] sm:$0xff] }
 0x166   : > { %v1189_v34 = vpop.f32.mrf.mxu1  ;;  %6199 = vmatmul.mubr.msk.bf16.vlgmr.msra.gmra.mxu1 %vm677_vm3, %v9430_v56  ;;  %v1670_v23 = vpop.f32.mrf.mxu0  ;;  %v3142_v58 = vrot.slane %v6633_v20, 5  ;;  %v9434_v26 = vld [vmem:[#allocation7_spill] sm:$0xff] }
 0x167   : > { %v7999_v44 = vadd.f32 %v1662_v4, %v1186_v37  ;;  %v1190_v19 = vadd.f32 %v1189_v34, %v9432_v54  ;;  %4625 = vmatpush1.bf16.msra.mxu1 %v4607_v49  ;;  %3401 = vmatprep.mubr.bf16.mxu1 %v9416_v7  ;;  %v6161_v37 = vrot.slane %v6145_v0, 9  ;;  %v9437_v0 = vld [vmem:[#allocation9_spill] sm:$0xff] }
 0x168   : > { %v1191_v4 = vpop.f32.mrf.mxu1  ;;  %4626 = vmatprep.subr.bf16.mxu1 %v6609_v57  ;;  %5181 = vmatpush1.bf16.msra.mxu0 %v6611_v35  ;;  %v1672_v29 = vpop.f32.mrf.mxu0  ;;  %v3144_v57 = vrot.slane %v3142_v58, 4 }
 0x169   : > { %v8011_v27 = vadd.f32 %v1666_v22, %v1190_v19  ;;  %v1192_v61 = vadd.f32 %v1191_v4, %v9433_v8  ;;  %v3143_v30 = vsel %vm7054_vm7, %v6161_v37, %v3142_v58  ;;  %v6601_v4 = vld [vmem:[%s6732_s4 + $0x30] sm:$0xff]  }
 0x16a   : > { %v1193_v49 = vpop.f32.mrf.mxu1  ;;  %v1676_v56 = vpop.f32.mrf.mxu0  ;;  %6272 = vmatmul.mubr.msk.bf16.gmra.mxu0 %vm677_vm3, %v6600_v18  ;;  %v6146_v8 = vld [vmem:[%s6732_s4 + $0x30] sm:$0xe] }
 0x16b   : > { %v8015_v34 = vadd.f32 %v1668_v36, %v1192_v61  ;;  %v1194_v11 = vadd.f32 %v1193_v49, %v9434_v26  ;;  %4627 = vmatpush1.bf16.msra.mxu1 %v6607_v39  ;;  %3854 = vmatprep.mubr.bf16.mxu0 %v9416_v7  ;;  %v6635_v61 = vld [vmem:[%s6732_s4 + $0x34] sm:$0xf]  ;;  %v9438_v26 = vld [vmem:[#allocation10_spill] sm:$0xff] }
 0x16c   : > { %v1195_v22 = vpop.f32.mrf.mxu1  ;;  %v1678_v19 = vpop.f32.mrf.mxu0  ;;  %v3149_v49 = vrot.slane %v6635_v61, 5 }
 0x16d   : > { %v8020_v35 = vadd.f32 %v1670_v23, %v1194_v11  ;;  %v1196_v54 = vadd.f32 %v1195_v22, %v9435_v52  ;;  %v3146_v23 = vsel %vm7054_vm7, %v3144_v57, %v3145_v2  ;;  %v6162_v22 = vrot.slane %v6146_v8, 9  ;;  %v6636_v52 = vld [vmem:[%s6732_s4 + $0x38] sm:$0x1] }
 0x16e   : > { %v1199_v36 = vpop.f32.mrf.mxu1  ;;  %6200 = vmatmul.mubr.msk.bf16.gmra.mxu1 %vm677_vm3, %v6179_v53  ;;  %v1680_v39 = vpop.f32.mrf.mxu0  ;;  %v6180_v11 = vcombine.low %v3143_v30, %v3146_v23  ;;  %v3151_v57 = vrot.slane %v3149_v49, 4  ;;  %v9442_v30 = vld [vmem:[#allocation12_spill] sm:$0xff] }
 0x16f   : > { %v8026_v18 = vadd.f32 %v1672_v29, %v1196_v54  ;;  %v1200_v20 = vadd.f32 %v1199_v36, %v9437_v0  ;;  %3411 = vmatprep.mubr.bf16.mxu1 %v9416_v7  ;;  %v3152_v54 = vrot.slane %v6636_v52, 5  ;;  %v9440_v0 = vld [vmem:[#allocation11_spill] sm:$0xff]  ;;  %v6637_v52 = vld [vmem:[%s6732_s4 + $0x40] sm:$0xf] }
 0x170   : > { %v1201_v46 = vpop.f32.mrf.mxu1  ;;  %v1682_v29 = vpop.f32.mrf.mxu0 }
 0x171   : > { %9436 = vst [vmem:[#allocation35_spill] sm:$0xff] %v8026_v18  ;;  %v8035_v53 = vadd.f32 %v1676_v56, %v1200_v20  ;;  %v1202_v58 = vadd.f32 %v1201_v46, %v9438_v26 }
 0x172   : > { %v1203_v37 = vpop.f32.mrf.mxu1  ;;  %v1686_v2 = vpop.f32.mrf.mxu0  ;;  %6273 = vmatmul.mubr.msk.bf16.gmra.mxu0 %vm677_vm3, %v6601_v4  ;;  %v9444_v4 = vld [vmem:[#allocation13_spill] sm:$0xff] }
 0x173   : > { %v8039_v36 = vadd.f32 %v1678_v19, %v1202_v58  ;;  %v1204_v18 = vadd.f32 %v1203_v37, %v9440_v0  ;;  %3864 = vmatprep.mubr.bf16.mxu0 %v9416_v7  ;;  %v3150_v19 = vsel %vm7054_vm7, %v6162_v22, %v3149_v49  ;;  %v6147_v37 = vld [vmem:[%s6732_s4 + $0x3c] sm:$0xe]  ;;  %v3156_v0 = vrot.slane %v6637_v52, 5 }
 0x174   : > { %v1205_v56 = vpop.f32.mrf.mxu1  ;;  %v1688_v8 = vpop.f32.mrf.mxu0 }
 0x175   : > { %9439 = vst [vmem:[#allocation2_spill] sm:$0xff] %v8039_v36  ;;  %v8044_v20 = vadd.f32 %v1680_v39, %v1204_v18  ;;  %v1206_v23 = vadd.f32 %v1205_v56, %v9442_v30  ;;  %v3153_v18 = vsel %vm7054_vm7, %v3151_v57, %v3152_v54  ;;  %v6602_v39 = vld [vmem:[%s6732_s4 + $0x3c] sm:$0xff]   ;;  %v3158_v54 = vrot.slane %v3156_v0, 4  ;;  %v6638_v57 = vld [vmem:[%s6732_s4 + $0x44] sm:$0x1] }
 0x176   : > { %v1209_v61 = vpop.f32.mrf.mxu1  ;;  %6201 = vmatmul.mubr.msk.bf16.gmra.mxu1 %vm677_vm3, %v6180_v11  ;;  %v1690_v58 = vpop.f32.mrf.mxu0  ;;  %v9446_v30 = vld [vmem:[#allocation14_spill] sm:$0xff]  ;;  %v3159_v52 = vrot.slane %v6638_v57, 5  ;;  %v6639_v57 = vld [vmem:[%s6732_s4 + $0x4c] sm:$0xf] }
 0x177   : > { %9441 = vst [vmem:[#allocation4_spill] sm:$0xff] %v8044_v20  ;;  %v8050_v46 = vadd.f32 %v1682_v29, %v1206_v23  ;;  %v1210_v26 = vadd.f32 %v1209_v61, %v9444_v4  ;;  %3421 = vmatprep.mubr.bf16.mxu1 %v9416_v7  ;;  %v6181_v23 = vcombine.low %v3150_v19, %v3153_v18  ;;  %v6163_v61 = vrot.slane %v6147_v37, 9  ;;  %v9450_v19 = vld [vmem:[#allocation16_spill] sm:$0xff] }
 0x178   : > { %v1211_v56 = vpop.f32.mrf.mxu1  ;;  %v1692_v29 = vpop.f32.mrf.mxu0 }
 0x179   : > { %9443 = vst [vmem:[#allocation6_spill] sm:$0xff] %v8050_v46  ;;  %v8059_v11 = vadd.f32 %v1686_v2, %v1210_v26  ;;  %v1212_v49 = vadd.f32 %v1211_v56, %v9446_v30  ;;  %v9448_v46 = vld [vmem:[#allocation15_spill] sm:$0xff]  ;;  %v9452_v56 = vld [vmem:[#allocation17_spill] sm:$0xff] }
 0x17a   : > { %v1213_v22 = vpop.f32.mrf.mxu1  ;;  %v1696_v36 = vpop.f32.mrf.mxu0  ;;  %6274 = vmatmul.mubr.msk.bf16.gmra.mxu0 %vm677_vm3, %v6602_v39 }
 0x17b   : > { %9445 = vst [vmem:[#allocation3_spill] sm:$0xff] %v8059_v11  ;;  %v8062_v4 = vadd.f32 %v1688_v8, %v1212_v49  ;;  %v1214_v20 = vadd.f32 %v1213_v22, %v9448_v46  ;;  %3874 = vmatprep.mubr.bf16.mxu0 %v9416_v7  ;;  %v3157_v46 = vsel %vm7054_vm7, %v6163_v61, %v3156_v0  ;;  %v6148_v22 = vld [vmem:[%s6732_s4 + $0x48] sm:$0xe] }
 0x17c   : > { %v1215_v2 = vpop.f32.mrf.mxu1  ;;  %v1698_v8 = vpop.f32.mrf.mxu0 }
 0x17d   : > { %9447 = vst [vmem:[#allocation5_spill] sm:$0xff] %v8062_v4  ;;  %v8068_v26 = vadd.f32 %v1690_v58, %v1214_v20  ;;  %v1216_v18 = vadd.f32 %v1215_v2, %v9450_v19  ;;  %v3160_v20 = vsel %vm7054_vm7, %v3158_v54, %v3159_v52  ;;  %v6603_v58 = vld [vmem:[%s6732_s4 + $0x48] sm:$0xff]   ;;  %v3163_v2 = vrot.slane %v6639_v57, 5  ;;  %v6640_v52 = vld [vmem:[%s6732_s4 + $0x50] sm:$0x1] }
 0x17e   : > { %v1219_v37 = vpop.f32.mrf.mxu1  ;;  %6202 = vmatmul.mubr.msk.bf16.gmra.mxu1 %vm677_vm3, %v6181_v23  ;;  %v1700_v49 = vpop.f32.mrf.mxu0  ;;  %v3166_v57 = vrot.slane %v6640_v52, 5  ;;  %v6641_v52 = vld [vmem:[%s6732_s4 + $0x58] sm:$0xf] }
 0x17f   : > { %9449 = vst [vmem:[#allocation7_spill] sm:$0xff] %v8068_v26  ;;  %v8074_v39 = vadd.f32 %v1692_v29, %v1216_v18  ;;  %v1220_v30 = vadd.f32 %v1219_v37, %v9452_v56  ;;  %3431 = vmatprep.mubr.bf16.mxu1 %v9416_v7  ;;  %v9454_v26 = vld [vmem:[#allocation18_spill] sm:$0xff]  ;;  %v6182_v18 = vcombine.low %v3157_v46, %v3160_v20  ;;  %v6164_v37 = vrot.slane %v6148_v22, 9  ;;  %v9458_v46 = vld [vmem:[#allocation20_spill] sm:$0xff]  ;;  %v9460_v22 = vld [vmem:[#allocation21_spill] sm:$0xff] }
 0x180   : > { %v1221_v19 = vpop.f32.mrf.mxu1  ;;  %v1702_v29 = vpop.f32.mrf.mxu0  ;;  %v3165_v54 = vrot.slane %v3163_v2, 4 }
 0x181   : > { %9451 = vst [vmem:[#allocation8_spill] sm:$0xff] %v8074_v39  ;;  %v8083_v23 = vadd.f32 %v1696_v36, %v1220_v30  ;;  %v1222_v0 = vadd.f32 %v1221_v19, %v9454_v26  ;;  %v9456_v39 = vld [vmem:[#allocation19_spill] sm:$0xff] }
 0x182   : > { %v1223_v61 = vpop.f32.mrf.mxu1  ;;  %v1706_v11 = vpop.f32.mrf.mxu0  ;;  %6275 = vmatmul.mubr.msk.bf16.gmra.mxu0 %vm677_vm3, %v6603_v58 }
 0x183   : > { %9453 = vst [vmem:[#allocation9_spill] sm:$0xff] %v8083_v23  ;;  %v8086_v56 = vadd.f32 %v1698_v8, %v1222_v0  ;;  %v1224_v4 = vadd.f32 %v1223_v61, %v9456_v39  ;;  %3884 = vmatprep.mubr.bf16.mxu0 %v9416_v7  ;;  %v3164_v39 = vsel %vm7054_vm7, %v6164_v37, %v3163_v2  ;;  %v6149_v61 = vld [vmem:[%s6732_s4 + $0x54] sm:$0xe] }
 0x184   : > { %v1225_v36 = vpop.f32.mrf.mxu1  ;;  %v1708_v8 = vpop.f32.mrf.mxu0 }
 0x185   : > { %9455 = vst [vmem:[#allocation10_spill] sm:$0xff] %v8086_v56  ;;  %v8092_v26 = vadd.f32 %v1700_v49, %v1224_v4  ;;  %v1226_v30 = vadd.f32 %v1225_v36, %v9458_v46  ;;  %v3167_v4 = vsel %vm7054_vm7, %v3165_v54, %v3166_v57  ;;  %v6604_v49 = vld [vmem:[%s6732_s4 + $0x54] sm:$0xff]   ;;  %v3170_v36 = vrot.slane %v6641_v52, 5  ;;  %v6642_v57 = vld [vmem:[%s6732_s4 + $0x5c] sm:$0x1] }
 0x186   : > { %v1229_v20 = vpop.f32.mrf.mxu1  ;;  %6203 = vmatmul.mubr.msk.bf16.gmra.mxu1 %vm677_vm3, %v6182_v18  ;;  %v1710_v0 = vpop.f32.mrf.mxu0  ;;  %v3173_v52 = vrot.slane %v6642_v57, 5  ;;  %v6643_v57 = vld [vmem:[%s6732_s4 + $0x64] sm:$0xf] }
 0x187   : > { %9457 = vst [vmem:[#allocation11_spill] sm:$0xff] %v8092_v26  ;;  %v8098_v58 = vadd.f32 %v1702_v29, %v1226_v30  ;;  %v1230_v19 = vadd.f32 %v1229_v20, %v9460_v22  ;;  %3441 = vmatprep.mubr.bf16.mxu1 %v9416_v7  ;;  %v9462_v26 = vld [vmem:[#allocation22_spill] sm:$0xff]  ;;  %v6183_v30 = vcombine.low %v3164_v39, %v3167_v4  ;;  %v6165_v20 = vrot.slane %v6149_v61, 9  ;;  %v9466_v39 = vld [vmem:[#allocation24_spill] sm:$0xff]  ;;  %v9468_v61 = vld [vmem:[#allocation25_spill] sm:$0xff] }
 0x188   : > { %v1231_v46 = vpop.f32.mrf.mxu1  ;;  %v1712_v29 = vpop.f32.mrf.mxu0  ;;  %v3172_v54 = vrot.slane %v3170_v36, 4 }
 0x189   : > { %9459 = vst [vmem:[#allocation12_spill] sm:$0xff] %v8098_v58  ;;  %v8107_v18 = vadd.f32 %v1706_v11, %v1230_v19  ;;  %v1232_v2 = vadd.f32 %v1231_v46, %v9462_v26  ;;  %v9464_v58 = vld [vmem:[#allocation23_spill] sm:$0xff] }
 0x18a   : > { %v1233_v37 = vpop.f32.mrf.mxu1  ;;  %v1716_v23 = vpop.f32.mrf.mxu0  ;;  %6276 = vmatmul.mubr.msk.bf16.gmra.mxu0 %vm677_vm3, %v6604_v49 }
 0x18b   : > { %9461 = vst [vmem:[#allocation13_spill] sm:$0xff] %v8107_v18  ;;  %v8110_v22 = vadd.f32 %v1708_v8, %v1232_v2  ;;  %v1234_v56 = vadd.f32 %v1233_v37, %v9464_v58  ;;  %3894 = vmatprep.mubr.bf16.mxu0 %v9416_v7  ;;  %v3171_v58 = vsel %vm7054_vm7, %v6165_v20, %v3170_v36  ;;  %v6150_v37 = vld [vmem:[%s6732_s4 + $0x60] sm:$0xe] }
 0x18c   : > { %v1235_v11 = vpop.f32.mrf.mxu1  ;;  %v1718_v8 = vpop.f32.mrf.mxu0 }
 0x18d   : > { %9463 = vst [vmem:[#allocation14_spill] sm:$0xff] %v8110_v22  ;;  %v8116_v26 = vadd.f32 %v1710_v0, %v1234_v56  ;;  %v1236_v19 = vadd.f32 %v1235_v11, %v9466_v39  ;;  %v3174_v56 = vsel %vm7054_vm7, %v3172_v54, %v3173_v52  ;;  %v6605_v0 = vld [vmem:[%s6732_s4 + $0x60] sm:$0xff]   ;;  %v3177_v11 = vrot.slane %v6643_v57, 5  ;;  %v6644_v52 = vld [vmem:[%s6732_s4 + $0x68] sm:$0x1] }
 0x18e   : > { %v1239_v4 = vpop.f32.mrf.mxu1  ;;  %6204 = vmatmul.mubr.msk.bf16.gmra.mxu1 %vm677_vm3, %v6183_v30  ;;  %v1720_v2 = vpop.f32.mrf.mxu0  ;;  %v3180_v57 = vrot.slane %v6644_v52, 5  ;;  %v6645_v52 = vld [vmem:[%s6732_s4 + $0x70] sm:$0xf] }
 0x18f   : > { %9465 = vst [vmem:[#allocation15_spill] sm:$0xff] %v8116_v26  ;;  %v8122_v49 = vadd.f32 %v1712_v29, %v1236_v19  ;;  %v1240_v46 = vadd.f32 %v1239_v4, %v9468_v61  ;;  %3451 = vmatprep.mubr.bf16.mxu1 %v9416_v7  ;;  %v9470_v26 = vld [vmem:[#allocation26_spill] sm:$0xff]  ;;  %v6184_v19 = vcombine.low %v3171_v58, %v3174_v56  ;;  %v6166_v4 = vrot.slane %v6150_v37, 9  ;;  %v9474_v58 = vld [vmem:[#allocation28_spill] sm:$0xff]  ;;  %v9476_v37 = vld [vmem:[#allocation29_spill] sm:$0xff] }
 0x190   : > { %v1241_v39 = vpop.f32.mrf.mxu1  ;;  %v1722_v29 = vpop.f32.mrf.mxu0  ;;  %v3179_v54 = vrot.slane %v3177_v11, 4 }
 0x191   : > { %9467 = vst [vmem:[#allocation16_spill] sm:$0xff] %v8122_v49  ;;  %v8131_v30 = vadd.f32 %v1716_v23, %v1240_v46  ;;  %v1242_v36 = vadd.f32 %v1241_v39, %v9470_v26  ;;  %v9472_v49 = vld [vmem:[#allocation27_spill] sm:$0xff] }
 0x192   : > { %v1243_v20 = vpop.f32.mrf.mxu1  ;;  %v1726_v18 = vpop.f32.mrf.mxu0  ;;  %6277 = vmatmul.mubr.msk.bf16.gmra.mxu0 %vm677_vm3, %v6605_v0 }
 0x193   : > { %9469 = vst [vmem:[#allocation17_spill] sm:$0xff] %v8131_v30  ;;  %v8134_v61 = vadd.f32 %v1718_v8, %v1242_v36  ;;  %v1244_v22 = vadd.f32 %v1243_v20, %v9472_v49  ;;  %3904 = vmatprep.mubr.bf16.mxu0 %v9416_v7  ;;  %v3178_v49 = vsel %vm7054_vm7, %v6166_v4, %v3177_v11  ;;  %v6151_v20 = vld [vmem:[%s6732_s4 + $0x6c] sm:$0xe] }
 0x194   : > { %v1245_v23 = vpop.f32.mrf.mxu1  ;;  %v1728_v8 = vpop.f32.mrf.mxu0 }
 0x195   : > { %9471 = vst [vmem:[#allocation18_spill] sm:$0xff] %v8134_v61  ;;  %v8140_v26 = vadd.f32 %v1720_v2, %v1244_v22  ;;  %v1246_v46 = vadd.f32 %v1245_v23, %v9474_v58  ;;  %v3181_v22 = vsel %vm7054_vm7, %v3179_v54, %v3180_v57  ;;  %v6606_v2 = vld [vmem:[%s6732_s4 + $0x6c] sm:$0xff]   ;;  %v3184_v23 = vrot.slane %v6645_v52, 5  ;;  %v6646_v57 = vld [vmem:[%s6732_s4 + $0x74] sm:$0x1] }
 0x196   : > { %v1249_v56 = vpop.f32.mrf.mxu1  ;;  %6205 = vmatmul.mubr.msk.bf16.gmra.mxu1 %vm677_vm3, %v6184_v19  ;;  %v1730_v36 = vpop.f32.mrf.mxu0  ;;  %v3187_v52 = vrot.slane %v6646_v57, 5  ;;  %v6647_v57 = vld [vmem:[%s6732_s4 + $0x7c] sm:$0xf] }
 0x197   : > { %9473 = vst [vmem:[#allocation19_spill] sm:$0xff] %v8140_v26  ;;  %v8146_v0 = vadd.f32 %v1722_v29, %v1246_v46  ;;  %v1250_v39 = vadd.f32 %v1249_v56, %v9476_v37  ;;  %3461 = vmatprep.mubr.bf16.mxu1 %v9416_v7  ;;  %v9478_v26 = vld [vmem:[#allocation30_spill] sm:$0xff]  ;;  %v6185_v46 = vcombine.low %v3178_v49, %v3181_v22  ;;  %v6167_v56 = vrot.slane %v6151_v20, 9  ;;  %v9482_v49 = vld [vmem:[#allocation32_spill] sm:$0xff]  ;;  %v9484_v20 = vld [vmem:[#allocation33_spill] sm:$0xff] }
 0x198   : > { %v1251_v58 = vpop.f32.mrf.mxu1  ;;  %v1732_v29 = vpop.f32.mrf.mxu0  ;;  %v3186_v54 = vrot.slane %v3184_v23, 4 }
 0x199   : > { %9475 = vst [vmem:[#allocation20_spill] sm:$0xff] %v8146_v0  ;;  %v8155_v19 = vadd.f32 %v1726_v18, %v1250_v39  ;;  %v1252_v11 = vadd.f32 %v1251_v58, %v9478_v26  ;;  %v9480_v0 = vld [vmem:[#allocation31_spill] sm:$0xff] }
 0x19a   : > { %v1253_v4 = vpop.f32.mrf.mxu1  ;;  %v1736_v30 = vpop.f32.mrf.mxu0  ;;  %6278 = vmatmul.mubr.msk.bf16.gmra.mxu0 %vm677_vm3, %v6606_v2 }
 0x19b   : > { %9477 = vst [vmem:[#allocation21_spill] sm:$0xff] %v8155_v19  ;;  %v8158_v37 = vadd.f32 %v1728_v8, %v1252_v11  ;;  %v1254_v61 = vadd.f32 %v1253_v4, %v9480_v0  ;;  %3914 = vmatprep.mubr.bf16.mxu0 %v9416_v7  ;;  %v3185_v0 = vsel %vm7054_vm7, %v6167_v56, %v3184_v23  ;;  %v6152_v4 = vld [vmem:[%s6732_s4 + $0x78] sm:$0xe] }
 0x19c   : > { %v1255_v18 = vpop.f32.mrf.mxu1  ;;  %v1738_v8 = vpop.f32.mrf.mxu0 }
 0x19d   : > { %9479 = vst [vmem:[#allocation22_spill] sm:$0xff] %v8158_v37  ;;  %v8164_v26 = vadd.f32 %v1730_v36, %v1254_v61  ;;  %v1256_v39 = vadd.f32 %v1255_v18, %v9482_v49  ;;  %v3188_v61 = vsel %vm7054_vm7, %v3186_v54, %v3187_v52  ;;  %v6610_v36 = vld [vmem:[%s6732_s4 + $0x78] sm:$0xff]   ;;  %v3191_v18 = vrot.slane %v6647_v57, 5  ;;  %v6648_v52 = vld [vmem:[%s6732_s4 + $0x80] sm:$0x1] }
 0x19e   : > { %v1259_v22 = vpop.f32.mrf.mxu1  ;;  %6206 = vmatmul.mubr.msk.bf16.gmra.mxu1 %vm677_vm3, %v6185_v46  ;;  %v1740_v11 = vpop.f32.mrf.mxu0  ;;  %v3194_v57 = vrot.slane %v6648_v52, 5 }
 0x19f   : > { %9481 = vst [vmem:[#allocation23_spill] sm:$0xff] %v8164_v26  ;;  %v8170_v2 = vadd.f32 %v1732_v29, %v1256_v39  ;;  %v1260_v58 = vadd.f32 %v1259_v22, %v9484_v20  ;;  %3471 = vmatprep.mubr.bf16.mxu1 %v9416_v7  ;;  %v9485_v26 = vld [vmem:[#allocation34_spill] sm:$0xff]  ;;  %v6186_v39 = vcombine.low %v3185_v0, %v3188_v61  ;;  %v6168_v22 = vrot.slane %v6152_v4, 9  ;;  %v9487_v0 = vld [vmem:[#allocation37_spill] sm:$0xff] }
 0x1a0   : > { %v1261_v49 = vpop.f32.mrf.mxu1  ;;  %v1742_v29 = vpop.f32.mrf.mxu0  ;;  %v3193_v54 = vrot.slane %v3191_v18, 4 }
 0x1a1   : > { %9483 = vst [vmem:[#allocation24_spill] sm:$0xff] %v8170_v2  ;;  %v8179_v46 = vadd.f32 %v1736_v30, %v1260_v58  ;;  %v1262_v23 = vadd.f32 %v1261_v49, %v9485_v26  ;;  %v9486_v2 = vld [vmem:[#allocation36_spill] sm:$0xff] }
 0x1a2   : > { %v1263_v56 = vpop.f32.mrf.mxu1  ;;  %v2839_v19 = vpop.f32.mrf.mxu0  ;;  %6279 = vmatmul.mubr.msk.bf16.gmra.mxu0 %vm677_vm3, %v6610_v36 }
 0x1a3   : > { %v8182_v20 = vadd.f32 %v1738_v8, %v1262_v23  ;;  %v1264_v37 = vadd.f32 %v1263_v56, %v9486_v2  ;;  %3924 = vmatprep.mubr.bf16.mxu0 %v9416_v7  ;;  %v3192_v2 = vsel %vm7054_vm7, %v6168_v22, %v3191_v18  ;;  %v6153_v23 = vld [vmem:[%s6732_s4 + $0x84] sm:$0xe]  ;;  %v6649_v56 = vld [vmem:[%s6732_s4 + $0x88] sm:$0xf] }
 0x1a4   : > { %v1265_v30 = vpop.f32.mrf.mxu1  ;;  %v2841_v8 = vpop.f32.mrf.mxu0  ;;  %v3198_v52 = vrot.slane %v6649_v56, 5 }
 0x1a5   : > { %v8188_v26 = vadd.f32 %v1740_v11, %v1264_v37  ;;  %v1266_v58 = vadd.f32 %v1265_v30, %v9487_v0  ;;  %v3195_v37 = vsel %vm7054_vm7, %v3193_v54, %v3194_v57  ;;  %v6614_v11 = vld [vmem:[%s6732_s4 + $0x84] sm:$0xff]   ;;  %v6650_v57 = vld [vmem:[%s6732_s4 + $0x8c] sm:$0x1] }
 0x1a6   : > { %v2029_v61 = vpop.f32.mrf.mxu1  ;;  %6207 = vmatmul.mubr.msk.bf16.gmra.mxu1 %vm677_vm3, %v6186_v39  ;;  %v2843_v49 = vpop.f32.mrf.mxu0  ;;  %v6187_v0 = vcombine.low %v3192_v2, %v3195_v37  ;;  %v3200_v54 = vrot.slane %v3198_v52, 4  ;;  %v3201_v56 = vrot.slane %v6650_v57, 5  ;;  %v9489_v2 = vld [vmem:[#allocation38_spill] sm:$0xff] }
 0x1a7   : > { %v8194_v36 = vadd.f32 %v1742_v29, %v1266_v58  ;;  %v2188_v4 = vadd.f32 %v2029_v61, %v7787_v21  ;;  %3481 = vmatprep.mubr.bf16.mxu1 %v9416_v7  ;;  %v6169_v21 = vrot.slane %v6153_v23, 9 }
 0x1a8   : > { %v2031_v30 = vpop.f32.mrf.mxu1  ;;  %v2845_v29 = vpop.f32.mrf.mxu0 }
 0x1a9   : > { %9488 = vst [vmem:[#allocation25_spill] sm:$0xff] %v8194_v36  ;;  %v8203_v39 = vadd.f32 %v2839_v19, %v2188_v4  ;;  %v2189_v18 = vadd.f32 %v2031_v30, %v7796_v3 }
 0x1aa   : > { %v2033_v22 = vpop.f32.mrf.mxu1  ;;  %v2849_v36 = vpop.f32.mrf.mxu0  ;;  %6280 = vmatmul.mubr.msk.bf16.gmra.mxu0 %vm677_vm3, %v6614_v11 }
 0x1ab   : > { %v8206_v58 = vadd.f32 %v2841_v8, %v2189_v18  ;;  %v2190_v61 = vadd.f32 %v2033_v22, %v7804_v24  ;;  %3934 = vmatprep.mubr.bf16.mxu0 %v9416_v7  ;;  %v3199_v24 = vsel %vm7054_vm7, %v6169_v21, %v3198_v52  ;;  %v6615_v18 = vld [vmem:[%s6732_s4 + $0x90] sm:$0xff]  }
 0x1ac   : > { %v2035_v19 = vpop.f32.mrf.mxu1  ;;  %v2851_v8 = vpop.f32.mrf.mxu0  ;;  %v6154_v22 = vld [vmem:[%s6732_s4 + $0x90] sm:$0xe] }
 0x1ad   : > { %v8212_v3 = vadd.f32 %v2843_v49, %v2190_v61  ;;  %v2191_v4 = vadd.f32 %v2035_v19, %v9489_v2  ;;  %v3202_v49 = vsel %vm7054_vm7, %v3200_v54, %v3201_v56  ;;  %v6651_v61 = vld [vmem:[%s6732_s4 + $0x94] sm:$0xf]  ;;  %v6652_v56 = vld [vmem:[%s6732_s4 + $0x98] sm:$0x1] }
 0x1ae   : > { %v2039_v37 = vpop.f32.mrf.mxu1  ;;  %6208 = vmatmul.mubr.msk.bf16.gmra.mxu1 %vm677_vm3, %v6187_v0  ;;  %v2853_v30 = vpop.f32.mrf.mxu0  ;;  %v3205_v57 = vrot.slane %v6651_v61, 5  ;;  %v6188_v2 = vcombine.low %v3199_v24, %v3202_v49  ;;  %v3208_v61 = vrot.slane %v6652_v56, 5 }
 0x1af   : > { %v8218_v11 = vadd.f32 %v2845_v29, %v2191_v4  ;;  %v2192_v23 = vadd.f32 %v2039_v37, %v7816_v60  ;;  %3491 = vmatprep.mubr.bf16.mxu1 %v9416_v7  ;;  %v6170_v60 = vrot.slane %v6154_v22, 9 }
 0x1b0   : > { %v2041_v19 = vpop.f32.mrf.mxu1  ;;  %v2855_v29 = vpop.f32.mrf.mxu0  ;;  %v3207_v54 = vrot.slane %v3205_v57, 4 }
 0x1b1   : > { %9490 = vst [vmem:[#allocation26_spill] sm:$0xff] %v8218_v11  ;;  %v8227_v0 = vadd.f32 %v2849_v36, %v2192_v23  ;;  %v2193_v52 = vadd.f32 %v2041_v19, %v7820_v15  ;;  %v6616_v19 = vld [vmem:[%s6732_s4 + $0x9c] sm:$0xff]  }
 0x1b2   : > { %v2043_v21 = vpop.f32.mrf.mxu1  ;;  %v2859_v11 = vpop.f32.mrf.mxu0  ;;  %6281 = vmatmul.mubr.msk.bf16.gmra.mxu0 %vm677_vm3, %v6615_v18 }
 0x1b3   : > { %v8230_v4 = vadd.f32 %v2851_v8, %v2193_v52  ;;  %v2194_v37 = vadd.f32 %v2043_v21, %v7830_v42  ;;  %3944 = vmatprep.mubr.bf16.mxu0 %v9416_v7  ;;  %v3206_v42 = vsel %vm7054_vm7, %v6170_v60, %v3205_v57  ;;  %v6653_v52 = vld [vmem:[%s6732_s4 + $0xa0] sm:$0xf] }
 0x1b4   : > { %v2045_v36 = vpop.f32.mrf.mxu1  ;;  %v2861_v8 = vpop.f32.mrf.mxu0  ;;  %v3212_v21 = vrot.slane %v6653_v52, 5 }
 0x1b5   : > { %v8236_v15 = vadd.f32 %v2853_v30, %v2194_v37  ;;  %v2195_v24 = vadd.f32 %v2045_v36, %v7836_v55  ;;  %v3209_v30 = vsel %vm7054_vm7, %v3207_v54, %v3208_v61  ;;  %v6155_v55 = vld [vmem:[%s6732_s4 + $0x9c] sm:$0xe] }
 0x1b6   : > { %v2049_v23 = vpop.f32.mrf.mxu1  ;;  %6209 = vmatmul.mubr.msk.bf16.gmra.mxu1 %vm677_vm3, %v6188_v2  ;;  %v2863_v22 = vpop.f32.mrf.mxu0  ;;  %v6189_v56 = vcombine.low %v3206_v42, %v3209_v30  ;;  %v3214_v61 = vrot.slane %v3212_v21, 4 }
 0x1b7   : > { %v8242_v49 = vadd.f32 %v2855_v29, %v2195_v24  ;;  %v2196_v18 = vadd.f32 %v2049_v23, %v7846_v28  ;;  %3501 = vmatprep.mubr.bf16.mxu1 %v9416_v7  ;;  %v6171_v28 = vrot.slane %v6155_v55, 9  ;;  %v6654_v23 = vld [vmem:[%s6732_s4 + $0xa4] sm:$0x1] }
 0x1b8   : > { %v2051_v37 = vpop.f32.mrf.mxu1  ;;  %v2865_v29 = vpop.f32.mrf.mxu0  ;;  %v3215_v52 = vrot.slane %v6654_v23, 5 }
 0x1b9   : > { %v8251_v2 = vadd.f32 %v2859_v11, %v2196_v18  ;;  %v2197_v57 = vadd.f32 %v2051_v37, %v7853_v51 }
 0x1ba   : > { %v2053_v60 = vpop.f32.mrf.mxu1  ;;  %v2869_v54 = vpop.f32.mrf.mxu0  ;;  %6282 = vmatmul.mubr.msk.bf16.gmra.mxu0 %vm677_vm3, %v6616_v19 }
 0x1bb   : > { %v8254_v36 = vadd.f32 %v2861_v8, %v2197_v57  ;;  %v2198_v24 = vadd.f32 %v2053_v60, %v7858_v41  ;;  %3954 = vmatprep.mubr.bf16.mxu0 %v9416_v7  ;;  %v6655_v41 = vld [vmem:[%s6732_s4 + $0xac] sm:$0xf]  ;;  %v6156_v60 = vld [vmem:[%s6732_s4 + $0xa8] sm:$0xe] }
 0x1bc   : > { %v2055_v11 = vpop.f32.mrf.mxu1  ;;  %v2871_v18 = vpop.f32.mrf.mxu0  ;;  %v3219_v30 = vrot.slane %v6655_v41, 5  ;;  %v6617_v57 = vld [vmem:[%s6732_s4 + $0xa8] sm:$0xff]   ;;  %v6656_v41 = vld [vmem:[%s6732_s4 + $0xb0] sm:$0x1] }
 0x1bd   : > { %v8260_v51 = vadd.f32 %v2863_v22, %v2198_v24  ;;  %v2199_v42 = vadd.f32 %v2055_v11, %v7862_v6  ;;  %v3213_v22 = vsel %vm7054_vm7, %v6171_v28, %v3212_v21  ;;  %v3216_v6 = vsel %vm7054_vm7, %v3214_v61, %v3215_v52 }
 0x1be   : > { %v2059_v8 = vpop.f32.mrf.mxu1  ;;  %6210 = vmatmul.mubr.msk.bf16.gmra.mxu1 %vm677_vm3, %v6189_v56  ;;  %v2873_v37 = vpop.f32.mrf.mxu0  ;;  %v6190_v11 = vcombine.low %v3213_v22, %v3216_v6 }
 0x1bf   : > { %9491 = vst [vmem:[#allocation27_spill] sm:$0xff] %v8260_v51  ;;  %v8265_v55 = vadd.f32 %v2865_v29, %v2199_v42  ;;  %v2200_v19 = vadd.f32 %v2059_v8, %v7869_v9  ;;  %3511 = vmatprep.mubr.bf16.mxu1 %v9416_v7  ;;  %v6172_v42 = vrot.slane %v6156_v60, 9  ;;  %v3221_v8 = vrot.slane %v3219_v30, 4 }
 0x1c0   : > { %v2061_v24 = vpop.f32.mrf.mxu1  ;;  %v2875_v23 = vpop.f32.mrf.mxu0 }
 0x1c1   : > { %9492 = vst [vmem:[#allocation28_spill] sm:$0xff] %v8265_v55  ;;  %v8275_v56 = vadd.f32 %v2869_v54, %v2200_v19  ;;  %v2201_v29 = vadd.f32 %v2061_v24, %v7882_v14  ;;  %v3222_v55 = vrot.slane %v6656_v41, 5  ;;  %v6157_v54 = vld [vmem:[%s6732_s4 + $0xb4] sm:$0xe]  ;;  %v6657_v14 = vld [vmem:[%s6732_s4 + $0xb8] sm:$0xf] }
 0x1c2   : > { %v2063_v9 = vpop.f32.mrf.mxu1  ;;  %v2879_v61 = vpop.f32.mrf.mxu0  ;;  %6283 = vmatmul.mubr.msk.bf16.gmra.mxu0 %vm677_vm3, %v6617_v57  ;;  %v3226_v19 = vrot.slane %v6657_v14, 5  ;;  %v6287_v41 = vld [vmem:[%s6732_s4 + $0x18] sm:$0xf] }
 0x1c3   : > { %9493 = vst [vmem:[#allocation29_spill] sm:$0xff] %v8275_v56  ;;  %v8279_v21 = vadd.f32 %v2871_v18, %v2201_v29  ;;  %v2202_v28 = vadd.f32 %v2063_v9, %v7890_v45  ;;  %3964 = vmatprep.mubr.bf16.mxu0 %v9416_v7  ;;  %v3220_v45 = vsel %vm7054_vm7, %v6172_v42, %v3219_v30  ;;  %v6173_v9 = vrot.slane %v6157_v54, 9  ;;  %v6658_v30 = vld [vmem:[%s6732_s4 + $0xbc] sm:$0x1]  ;;  %v6290_v56 = vld [vmem:[%s6732_s4 + $0x24] sm:$0xf] }
 0x1c4   : > { %v2065_v52 = vpop.f32.mrf.mxu1  ;;  %v2881_v18 = vpop.f32.mrf.mxu0  ;;  %v3223_v57 = vsel %vm7054_vm7, %v3221_v8, %v3222_v55  ;;  %v3229_v42 = vrot.slane %v6658_v30, 5  ;;  %v3233_v55 = vrot.slane %v7874_v13, 5  ;;  %v4111_v54 = vshll.u32 %v6287_v41, 16 }
 0x1c5   : > { %9494 = vst [vmem:[#allocation30_spill] sm:$0xff] %v8279_v21  ;;  %v8286_v22 = vadd.f32 %v2873_v37, %v2202_v28  ;;  %v2203_v6 = vadd.f32 %v2065_v52, %v7894_v10  ;;  %v6618_v10 = vld [vmem:[%s6732_s4 + $0xb4] sm:$0xff]   ;;  %v8301_v28 = vld [vmem:[%s6732_s4 + $0x1c] sm:$0xf]  ;;  %v3228_v52 = vrot.slane %v3226_v19, 4  ;;  %v6191_v14 = vcombine.low %v3220_v45, %v3223_v57 }
 0x1c6   : > { %v2069_v60 = vpop.f32.mrf.mxu1  ;;  %6211 = vmatmul.mubr.msk.bf16.gmra.mxu1 %vm677_vm3, %v6190_v11  ;;  %v2883_v37 = vpop.f32.mrf.mxu0  ;;  %v4121_v21 = vshrl.u32 %v8301_v28, 16 }
 0x1c7   : > { %9495 = vst [vmem:[#allocation31_spill] sm:$0xff] %v8286_v22  ;;  %v8294_v24 = vadd.f32 %v2875_v23, %v2203_v6  ;;  %v2204_v29 = vadd.f32 %v2069_v60, %v7898_v38  ;;  %3521 = vmatprep.mubr.bf16.mxu1 %v9416_v7  ;;  %v6158_v6 = vld [vmem:[%s6732_s4 + $0xc0] sm:$0xe]  ;;  %v4117_v22 = vshll.u32 %v8301_v28, 16  ;;  %v3230_v57 = vsel %vm7054_vm7, %v3228_v52, %v3229_v42 }
 0x1c8   : > { %v2071_v11 = vpop.f32.mrf.mxu1  ;;  %v2885_v8 = vpop.f32.mrf.mxu0  ;;  %v4113_v42 = vrot.slane %v4111_v54, 5 }
 0x1c9   : > { %9496 = vst [vmem:[#allocation32_spill] sm:$0xff] %v8294_v24  ;;  %v8305_v23 = vadd.f32 %v2879_v61, %v2204_v29  ;;  %v2205_v38 = vadd.f32 %v2071_v11, %v7905_v47  ;;  %v4108_v24 = vshrl.u32 %v6287_v41, 16  ;;  %v3227_v47 = vsel %vm7054_vm7, %v6173_v9, %v3226_v19 }
 0x1ca   : > { %v2073_v60 = vpop.f32.mrf.mxu1  ;;  %v2889_v61 = vpop.f32.mrf.mxu0  ;;  %6284 = vmatmul.mubr.msk.bf16.gmra.mxu0 %vm677_vm3, %v6618_v10  ;;  %v6174_v29 = vrot.slane %v6158_v6, 9  ;;  %v3235_v41 = vrot.slane %v3233_v55, 4  ;;  %v3236_v11 = vrot.slane %v7902_v31, 5  ;;  %v8326_v10 = vld [vmem:[%s6732_s4 + $0x28] sm:$0xf]  ;;  %v4132_v19 = vshrl.u32 %v6290_v56, 16 }
 0x1cb   : > { %9497 = vst [vmem:[#allocation33_spill] sm:$0xff] %v8305_v23  ;;  %v8312_v51 = vadd.f32 %v2881_v18, %v2205_v38  ;;  %v2206_v13 = vadd.f32 %v2073_v60, %v7916_v17  ;;  %3974 = vmatprep.mubr.bf16.mxu0 %v9416_v7  ;;  %v4135_v9 = vshll.u32 %v6290_v56, 16  ;;  %v4110_v52 = vrot.slane %v4108_v24, 4 }
 0x1cc   : > { %v2075_v45 = vpop.f32.mrf.mxu1  ;;  %v2891_v30 = vpop.f32.mrf.mxu0  ;;  %v8329_v6 = vrot.slane %v4117_v22, 5  ;;  %v4123_v31 = vrot.slane %v4121_v21, 4  ;;  %v4935_v56 = vrot.slane %v8301_v28, 5  ;;  %v8341_v24 = vsel %vm7054_vm7, %v6174_v29, %v3233_v55 }
 0x1cd   : > { %9498 = vst [vmem:[#allocation34_spill] sm:$0xff] %v8312_v51  ;;  %v8322_v18 = vadd.f32 %v2883_v37, %v2206_v13  ;;  %v2207_v17 = vadd.f32 %v2075_v45, %v7920_v1  ;;  %v6192_v13 = vcombine.low %v3227_v47, %v3230_v57  ;;  %v6619_v45 = vld [vmem:[%s6732_s4 + $0xc0] sm:$0xff]   ;;  %v6375_v51 = vld [vmem:[%s6732_s4 + $0x18] sm:$0xe]  ;;  %v8345_v21 = vsel %vm7054_vm7, %v3235_v41, %v3236_v11 }
 0x1ce   : > { %v2079_v38 = vpop.f32.mrf.mxu1  ;;  %6212 = vmatmul.mubr.msk.bf16.gmra.mxu1 %vm677_vm3, %v6191_v14  ;;  %v2893_v60 = vpop.f32.mrf.mxu0  ;;  %v4145_v22 = vshrl.u32 %v8326_v10, 16  ;;  %v4134_v47 = vrot.slane %v4132_v19, 4  ;;  %v4137_v28 = vrot.slane %v4135_v9, 5  ;;  %v4124_v55 = vor.u32 %v4123_v31, %v8329_v6 }
 0x1cf   : > { %9499 = vst [vmem:[#allocation36_spill] sm:$0xff] %v8322_v18  ;;  %v8331_v37 = vadd.f32 %v2885_v8, %v2207_v17  ;;  %v2208_v1 = vadd.f32 %v2079_v38, %v7924_v59  ;;  %3531 = vmatprep.mubr.bf16.mxu1 %v9416_v7  ;;  %v6289_v18 = vld [vmem:[%s6732_s4 + $0x20] sm:$0x1]  ;;  %v4141_v59 = vshll.u32 %v8326_v10, 16  ;;  %v4114_v17 = vor.u32 %v4113_v42, %v4110_v52  ;;  %v6292_v42 = vld [vmem:[%s6732_s4 + $0x2c] sm:$0x1] }
 0x1d0   : > { %v2081_v23 = vpop.f32.mrf.mxu1  ;;  %v2895_v54 = vpop.f32.mrf.mxu0  ;;  %v4127_v29 = vshll.u32 %v6289_v18, 16  ;;  %v6391_v38 = vrot.slane %v6375_v51, 9  ;;  %v4147_v9 = vrot.slane %v4145_v22, 4  ;;  %v4138_v31 = vor.u32 %v4137_v28, %v4134_v47  ;;  %v6376_v22 = vld [vmem:[%s6732_s4 + $0x24] sm:$0xe]  ;;  %v6620_v47 = vld [vmem:[%s6732_s4 + $0xcc] sm:$0xff]  }
 0x1d1   : > { %9500 = vst [vmem:[#allocation37_spill] sm:$0xff] %v8331_v37  ;;  %v8349_v8 = vadd.f32 %v2889_v61, %v2208_v1  ;;  %v2209_v14 = vadd.f32 %v2081_v23, %v7928_v32  ;;  %v4937_v61 = vrot.slane %v4935_v56, 4  ;;  %v4938_v32 = vrot.slane %v6289_v18, 5  ;;  %v6293_v18 = vld [vmem:[%s6732_s4 + $0x30] sm:$0xf] }
 0x1d2   : > { %v2083_v57 = vpop.f32.mrf.mxu1  ;;  %v2899_v37 = vpop.f32.mrf.mxu0  ;;  %6285 = vmatmul.mubr.msk.bf16.gmra.mxu0 %vm677_vm3, %v6619_v45  ;;  %v8358_v19 = vrot.slane %v4141_v59, 5  ;;  %v8368_v45 = vrot.slane %v4114_v17, 4  ;;  %v8370_v59 = vrot.slane %v4124_v55, 4  ;;  %v4156_v55 = vshrl.u32 %v6293_v18, 16 }
 0x1d3   : > { %v8353_v41 = vadd.f32 %v2891_v30, %v2209_v14  ;;  %v2210_v11 = vadd.f32 %v2083_v57, %v7937_v63  ;;  %3984 = vmatprep.mubr.bf16.mxu0 %v9416_v7  ;;  %v6193_v63 = vcombine.low %v8341_v24, %v8345_v21  ;;  %v8387_v28 = vsel %vm7054_vm7, %v4937_v61, %v4938_v32  ;;  %v8390_v57 = vld [vmem:[%s6732_s4 + $0x34] sm:$0xf] }
 0x1d4   : > { %v2085_v23 = vpop.f32.mrf.mxu1  ;;  %v2901_v30 = vpop.f32.mrf.mxu0  ;;  %v4945_v61 = vrot.slane %v6292_v42, 5  ;;  %v4165_v32 = vshll.u32 %v8390_v57, 16 }
 0x1d5   : > { %v8360_v52 = vadd.f32 %v2893_v60, %v2210_v11  ;;  %v2211_v51 = vadd.f32 %v2085_v23, %v7941_v16  ;;  %v8372_v60 = vrot.slane %v4127_v29, 5  ;;  %v4942_v16 = vrot.slane %v8326_v10, 5 }
 0x1d6   : > { %v2089_v1 = vpop.f32.mrf.mxu1  ;;  %6213 = vmatmul.mubr.msk.bf16.gmra.mxu1 %vm677_vm3, %v6192_v13  ;;  %v2903_v21 = vpop.f32.mrf.mxu0  ;;  %v8383_v13 = vsel %vm7054_vm7, %v6391_v38, %v4935_v56  ;;  %v4148_v10 = vor.u32 %v4147_v9, %v8358_v19  ;;  %v6392_v56 = vrot.slane %v6376_v22, 9 }
 0x1d7   : > { %v8376_v14 = vadd.f32 %v2895_v54, %v2211_v51  ;;  %v2212_v24 = vadd.f32 %v2089_v1, %v7945_v62  ;;  %3541 = vmatprep.mubr.bf16.mxu1 %v9416_v7  ;;  %v4151_v54 = vshll.u32 %v6292_v42, 16  ;;  %v4159_v62 = vshll.u32 %v6293_v18, 16 }
 0x1d8   : > { %v2091_v17 = vpop.f32.mrf.mxu1  ;;  %v2905_v23 = vpop.f32.mrf.mxu0  ;;  %v8396_v51 = vrot.slane %v4138_v31, 4  ;;  %v4944_v1 = vrot.slane %v4942_v16, 4  ;;  %v4130_v42 = vsel %vm6775_vm4, %v8370_v59, %v8372_v60  ;;  %v8421_v59 = vsel %vm7054_vm7, %v6392_v56, %v4942_v16  ;;  %v8424_v60 = vld [vmem:[%s6732_s4 + $0x38] sm:$0x1] }
 0x1d9   : > { %9501 = vst [vmem:[#allocation38_spill] sm:$0xff] %v8376_v14  ;;  %v8393_v29 = vadd.f32 %v2899_v37, %v2212_v24  ;;  %v2213_v11 = vadd.f32 %v2091_v17, %v7949_v25  ;;  %v4169_v14 = vshrl.u32 %v8390_v57, 16  ;;  %v4120_v25 = vsel %vm6775_vm4, %v8368_v45, %v8329_v6  ;;  %v6296_v17 = vld [vmem:[%s6732_s4 + $0x3c] sm:$0xf] }
 0x1da   : > { %v2093_v38 = vpop.f32.mrf.mxu1  ;;  %v2909_v37 = vpop.f32.mrf.mxu0  ;;  %6286 = vmatmul.mubr.msk.bf16.gmra.mxu0 %vm677_vm3, %v6620_v47  ;;  %v4153_v22 = vrot.slane %v4151_v54, 5  ;;  %v4161_v24 = vrot.slane %v4159_v62, 5  ;;  %v6410_v45 = vcombine.low %v8383_v13, %v8387_v28  ;;  %v8435_v54 = vrot.slane %v4165_v32, 5  ;;  %v8438_v28 = vld [vmem:[%s6732_s4 + $0x40] sm:$0xf] }
 0x1db   : > { %v8400_v9 = vadd.f32 %v2901_v30, %v2213_v11  ;;  %v2214_v18 = vadd.f32 %v2093_v38, %v7954_v40  ;;  %5198 = vmatprep.mubr.bf16.mxu0 %v9416_v7  ;;  %v4149_v30 = vrot.slane %v4148_v10, 4  ;;  %v4158_v40 = vrot.slane %v4156_v55, 4 }
 0x1dc   : > { %v2095_v31 = vpop.f32.mrf.mxu1  ;;  %v2911_v6 = vpop.f32.mrf.mxu0  ;;  %v4171_v13 = vrot.slane %v4169_v14, 4  ;;  %v4180_v56 = vshrl.u32 %v6296_v17, 16  ;;  %v4183_v38 = vshll.u32 %v6296_v17, 16  ;;  %v4949_v14 = vrot.slane %v8390_v57, 5 }
 0x1dd   : > { %v8414_v47 = vadd.f32 %v2903_v21, %v2214_v18  ;;  %v2215_v11 = vadd.f32 %v2095_v31, %v7960_v5  ;;  %v4144_v21 = vsel %vm6775_vm4, %v8396_v51, %v8358_v19  ;;  %v8433_v5 = vsel %vm7054_vm7, %v4944_v1, %v4945_v61 }
 0x1de   : > { %v2099_v10 = vpop.f32.mrf.mxu1  ;;  %6214 = vmatmul.mubr.msk.bf16.gmra.mxu1 %vm677_vm3, %v6193_v63  ;;  %v2913_v62 = vpop.f32.mrf.mxu0  ;;  %v6377_v63 = vld [vmem:[%s6732_s4 + $0x30] sm:$0xe]  ;;  %v4154_v51 = vsel %vm6775_vm4, %v4149_v30, %v4153_v22  ;;  %v4162_v1 = vor.u32 %v4161_v24, %v4158_v40  ;;  %v4175_v61 = vshll.u32 %v8424_v60, 16  ;;  %v4189_v18 = vshll.u32 %v8438_v28, 16 }
 0x1df   : > { %v8440_v16 = vadd.f32 %v2905_v23, %v2215_v11  ;;  %v2216_v55 = vadd.f32 %v2099_v10, %v7970_v50  ;;  %4644 = vmatprep.mubr.bf16.mxu1 %v9416_v7  ;;  %v4193_v31 = vshrl.u32 %v8438_v28, 16  ;;  %v6338_v11 = vcombine.low %v4120_v25, %v4130_v42 }
 0x1e0   : > { %v2101_v19 = vpop.f32.mrf.mxu1  ;;  %v2915_v32 = vpop.f32.mrf.mxu0  ;;  %v6411_v30 = vcombine.low %v8421_v59, %v8433_v5  ;;  %v4172_v22 = vor.u32 %v4171_v13, %v8435_v54  ;;  %v6393_v40 = vrot.slane %v6377_v63, 9  ;;  %v4182_v10 = vrot.slane %v4180_v56, 4  ;;  %v6299_v56 = vld [vmem:[%s6732_s4 + $0x48] sm:$0xf] }
 0x1e1   : > { %v8449_v23 = vadd.f32 %v2909_v37, %v2216_v55  ;;  %v2217_v50 = vadd.f32 %v2101_v19, %v7978_v12  ;;  %v8462_v12 = vld [vmem:[%s6732_s4 + $0x44] sm:$0x1]  ;;  %v4185_v55 = vrot.slane %v4183_v38, 5  ;;  %v6339_v42 = vcombine.low %v4144_v21, %v4154_v51  ;;  %v8476_v38 = vld [vmem:[%s6732_s4 + $0x4c] sm:$0xf] }
 0x1e2   : > { %v2103_v17 = vpop.f32.mrf.mxu1  ;;  %v2919_v37 = vpop.f32.mrf.mxu0  ;;  %6431 = vmatmul.mubr.msk.bf16.vlgmr.msra.gmra.mxu0 %vm677_vm3, %v6410_v45  ;;  %v8465_v59 = vrot.slane %v4162_v1, 4  ;;  %v8467_v5 = vrot.slane %v4175_v61, 5  ;;  %v8472_v45 = vrot.slane %v4189_v18, 5  ;;  %v4195_v19 = vrot.slane %v4193_v31, 4 }
 0x1e3   : > { %v8457_v24 = vadd.f32 %v2911_v6, %v2217_v50  ;;  %v2218_v57 = vadd.f32 %v2103_v17, %v7990_v33  ;;  %5208 = vmatprep.mubr.bf16.mxu0 %v9416_v7  ;;  %v4951_v6 = vrot.slane %v4949_v14, 4  ;;  %v4173_v21 = vrot.slane %v4172_v22, 4  ;;  %v6378_v17 = vld [vmem:[%s6732_s4 + $0x3c] sm:$0xe] }
 0x1e4   : > { %v2105_v25 = vpop.f32.mrf.mxu1  ;;  %v2921_v63 = vpop.f32.mrf.mxu0  ;;  %v8481_v51 = vsel %vm7054_vm7, %v6393_v40, %v4949_v14  ;;  %v4186_v31 = vor.u32 %v4185_v55, %v4182_v10  ;;  %v4213_v14 = vshll.u32 %v8476_v38, 16  ;;  %v4168_v10 = vsel %vm6775_vm4, %v8465_v59, %v8435_v54 }
 0x1e5   : > { %v8469_v13 = vadd.f32 %v2913_v62, %v2218_v57  ;;  %v2219_v33 = vadd.f32 %v2105_v25, %v7999_v44  ;;  %v4952_v62 = vrot.slane %v8424_v60, 5  ;;  %v4199_v44 = vshll.u32 %v8462_v12, 16 }
 0x1e6   : > { %v2109_v50 = vpop.f32.mrf.mxu1  ;;  %6359 = vmatmul.mubr.msk.bf16.vlgmr.msra.gmra.mxu1 %vm677_vm3, %v6338_v11  ;;  %v2923_v18 = vpop.f32.mrf.mxu0  ;;  %v4956_v11 = vrot.slane %v8438_v28, 5  ;;  %v4204_v57 = vshrl.u32 %v6299_v56, 16  ;;  %v4207_v25 = vshll.u32 %v6299_v56, 16  ;;  %v4217_v60 = vshrl.u32 %v8476_v38, 16 }
 0x1e7   : > { %v8485_v1 = vadd.f32 %v2915_v32, %v2219_v33  ;;  %v2220_v61 = vadd.f32 %v2109_v50, %v8011_v27  ;;  %4654 = vmatprep.mubr.bf16.mxu1 %v9416_v7  ;;  %v4196_v28 = vor.u32 %v4195_v19, %v8472_v45  ;;  %v4178_v33 = vsel %vm6775_vm4, %v4173_v21, %v8467_v5  ;;  %v8513_v19 = vld [vmem:[%s6732_s4 + $0x50] sm:$0x1] }
 0x1e8   : > { %v2111_v22 = vpop.f32.mrf.mxu1  ;;  %v2925_v27 = vpop.f32.mrf.mxu0  ;;  %v8506_v56 = vrot.slane %v4199_v44, 5  ;;  %v6394_v50 = vrot.slane %v6378_v17, 9  ;;  %v4187_v54 = vrot.slane %v4186_v31, 4  ;;  %v4958_v59 = vrot.slane %v4956_v11, 4  ;;  %v9503_v44 = vld [vmem:[#allocation35_spill] sm:$0xff] }
 0x1e9   : > { %v8493_v40 = vadd.f32 %v2919_v37, %v2220_v61  ;;  %v2221_v32 = vadd.f32 %v2111_v22, %v8015_v34  ;;  %v4953_v37 = vsel %vm7054_vm7, %v4951_v6, %v4952_v62  ;;  %v4206_v5 = vrot.slane %v4204_v57, 4 }
 0x1ea   : > { %v2113_v55 = vpop.f32.mrf.mxu1  ;;  %v2929_v22 = vpop.f32.mrf.mxu0  ;;  %6432 = vmatmul.mubr.msk.bf16.gmra.mxu0 %vm677_vm3, %v6411_v30  ;;  %v4209_v21 = vrot.slane %v4207_v25, 5  ;;  %v8516_v6 = vrot.slane %v4213_v14, 5  ;;  %v4219_v62 = vrot.slane %v4217_v60, 4  ;;  %v4197_v30 = vrot.slane %v4196_v28, 4 }
 0x1eb   : > { %9502 = vst [vmem:[#allocation39_spill] sm:$0xff] %v8493_v40  ;;  %v8508_v34 = vadd.f32 %v2921_v63, %v2221_v32  ;;  %v2222_v61 = vadd.f32 %v2113_v55, %v8020_v35  ;;  %5218 = vmatprep.mubr.bf16.mxu0 %v9416_v7  ;;  %v4959_v31 = vrot.slane %v8462_v12, 5  ;;  %v6412_v57 = vcombine.low %v8481_v51, %v4953_v37  ;;  %v6379_v12 = vld [vmem:[%s6732_s4 + $0x48] sm:$0xe]  ;;  %v6302_v55 = vld [vmem:[%s6732_s4 + $0x54] sm:$0xf] }
 0x1ec   : > { %v2115_v40 = vpop.f32.mrf.mxu1  ;;  %v2931_v17 = vpop.f32.mrf.mxu0  ;;  %v4223_v25 = vshll.u32 %v8513_v19, 16  ;;  %v8531_v28 = vsel %vm7054_vm7, %v6394_v50, %v4956_v11  ;;  %v4192_v51 = vsel %vm6775_vm4, %v4187_v54, %v8472_v45  ;;  %v4210_v37 = vor.u32 %v4209_v21, %v4206_v5 }
 0x1ed   : > { %v8518_v63 = vadd.f32 %v2923_v18, %v2222_v61  ;;  %v2223_v35 = vadd.f32 %v2115_v40, %v9503_v44  ;;  %v6340_v40 = vcombine.low %v4168_v10, %v4178_v33  ;;  %v8541_v61 = vld [vmem:[%s6732_s4 + $0x58] sm:$0xf]  ;;  %v9506_v10 = vld [vmem:[#allocation2_spill] sm:$0xff]  ;;  %v4202_v50 = vsel %vm6775_vm4, %v4197_v30, %v8506_v56 }
 0x1ee   : > { %v2119_v32 = vpop.f32.mrf.mxu1  ;;  %6360 = vmatmul.mubr.msk.bf16.gmra.mxu1 %vm677_vm3, %v6339_v42  ;;  %v2933_v60 = vpop.f32.mrf.mxu0  ;;  %v4225_v54 = vrot.slane %v4223_v25, 5  ;;  %v6395_v5 = vrot.slane %v6379_v12, 9  ;;  %v4228_v21 = vshrl.u32 %v6302_v55, 16  ;;  %v4241_v56 = vshrl.u32 %v8541_v61, 16 }
 0x1ef   : > { %v8525_v14 = vadd.f32 %v2925_v27, %v2223_v35  ;;  %v2224_v18 = vadd.f32 %v2119_v32, %v8035_v53  ;;  %4664 = vmatprep.mubr.bf16.mxu1 %v9416_v7  ;;  %v4220_v27 = vor.u32 %v4219_v62, %v8516_v6  ;;  %v4963_v53 = vrot.slane %v8476_v38, 5  ;;  %v9508_v32 = vld [vmem:[#allocation4_spill] sm:$0xff] }
 0x1f0   : > { %v2121_v42 = vpop.f32.mrf.mxu1  ;;  %v2935_v11 = vpop.f32.mrf.mxu0  ;;  %v4960_v35 = vsel %vm7054_vm7, %v4958_v59, %v4959_v31  ;;  %v4231_v62 = vshll.u32 %v6302_v55, 16  ;;  %v4211_v59 = vrot.slane %v4210_v37, 4  ;;  %v9510_v55 = vld [vmem:[#allocation6_spill] sm:$0xff] }
 0x1f1   : > { %9504 = vst [vmem:[#allocation35_spill] sm:$0xff] %v8525_v14  ;;  %v8543_v44 = vadd.f32 %v2929_v22, %v2224_v18  ;;  %v2225_v33 = vadd.f32 %v2121_v42, %v9506_v10  ;;  %v4237_v42 = vshll.u32 %v8541_v61, 16  ;;  %v4221_v31 = vrot.slane %v4220_v27, 4 }
 0x1f2   : > { %v2123_v45 = vpop.f32.mrf.mxu1  ;;  %v2939_v18 = vpop.f32.mrf.mxu0  ;;  %6433 = vmatmul.mubr.msk.bf16.gmra.mxu0 %vm677_vm3, %v6412_v57  ;;  %v4965_v25 = vrot.slane %v4963_v53, 4  ;;  %v6413_v57 = vcombine.low %v8531_v28, %v4960_v35  ;;  %v8569_v37 = vsel %vm7054_vm7, %v6395_v5, %v4963_v53  ;;  %v4230_v27 = vrot.slane %v4228_v21, 4 }
 0x1f3   : > { %9505 = vst [vmem:[#allocation40_spill] sm:$0xff] %v8543_v44  ;;  %v8551_v38 = vadd.f32 %v2931_v17, %v2225_v33  ;;  %v2226_v22 = vadd.f32 %v2123_v45, %v9508_v32  ;;  %5228 = vmatprep.mubr.bf16.mxu0 %v9416_v7  ;;  %v4966_v17 = vrot.slane %v8513_v19, 5  ;;  %v8564_v45 = vld [vmem:[%s6732_s4 + $0x5c] sm:$0x1]  ;;  %v4233_v19 = vrot.slane %v4231_v62, 5 }
 0x1f4   : > { %v2125_v30 = vpop.f32.mrf.mxu1  ;;  %v2941_v33 = vpop.f32.mrf.mxu0  ;;  %v8576_v28 = vrot.slane %v4237_v42, 5  ;;  %v4243_v35 = vrot.slane %v4241_v56, 4  ;;  %v4216_v53 = vsel %vm6775_vm4, %v4211_v59, %v8516_v6  ;;  %v4247_v5 = vshll.u32 %v8564_v45, 16  ;;  %v9514_v62 = vld [vmem:[#allocation5_spill] sm:$0xff] }
 0x1f5   : > { %9507 = vst [vmem:[#allocation2_spill] sm:$0xff] %v8551_v38  ;;  %v8559_v12 = vadd.f32 %v2933_v60, %v2226_v22  ;;  %v2227_v10 = vadd.f32 %v2125_v30, %v9510_v55  ;;  %v6341_v38 = vcombine.low %v4192_v51, %v4202_v50  ;;  %v6305_v60 = vld [vmem:[%s6732_s4 + $0x60] sm:$0xf]  ;;  %v9512_v30 = vld [vmem:[#allocation3_spill] sm:$0xff]  ;;  %v4226_v50 = vsel %vm6775_vm4, %v4221_v31, %v4225_v54 }
 0x1f6   : > { %v2129_v32 = vpop.f32.mrf.mxu1  ;;  %6361 = vmatmul.mubr.msk.bf16.gmra.mxu1 %vm677_vm3, %v6340_v40  ;;  %v8579_v40 = vld [vmem:[%s6732_s4 + $0x64] sm:$0xf]  ;;  %v4234_v44 = vor.u32 %v4233_v19, %v4230_v27  ;;  %v4970_v6 = vrot.slane %v8541_v61, 5  ;;  %v6342_v27 = vcombine.low %v4216_v53, %v4226_v50  ;;  %v8606_v19 = vrot.slane %v4247_v5, 5 }
 0x1f7   : > { %9509 = vst [vmem:[#allocation4_spill] sm:$0xff] %v8559_v12  ;;  %v8572_v22 = vadd.f32 %v2935_v11, %v2227_v10  ;;  %v2228_v55 = vadd.f32 %v2129_v32, %v9512_v30  ;;  %v2943_v12 = vpop.f32.mrf.mxu0  ;;  %4674 = vmatprep.mubr.bf16.mxu1 %v9416_v7  ;;  %v8588_v11 = vsel %vm7054_vm7, %v4965_v25, %v4966_v17  ;;  %v6380_v10 = vld [vmem:[%s6732_s4 + $0x54] sm:$0xe]  ;;  %v4252_v32 = vshrl.u32 %v6305_v60, 16  ;;  %v9516_v25 = vld [vmem:[#allocation7_spill] sm:$0xff] }
 0x1f8   : > { %v2131_v51 = vpop.f32.mrf.mxu1  ;;  %v4255_v30 = vshll.u32 %v6305_v60, 16  ;;  %v4261_v54 = vshll.u32 %v8579_v40, 16  ;;  %v4265_v59 = vshrl.u32 %v8579_v40, 16  ;;  %v6414_v61 = vcombine.low %v8569_v37, %v8588_v11 }
 0x1f9   : > { %9511 = vst [vmem:[#allocation6_spill] sm:$0xff] %v8572_v22  ;;  %v8591_v21 = vadd.f32 %v2939_v18, %v2228_v55  ;;  %v2229_v42 = vadd.f32 %v2131_v51, %v9514_v62  ;;  %v2945_v56 = vpop.f32.mrf.mxu0  ;;  %v4244_v55 = vor.u32 %v4243_v35, %v8576_v28  ;;  %v6396_v51 = vrot.slane %v6380_v10, 9  ;;  %v9518_v62 = vld [vmem:[#allocation8_spill] sm:$0xff] }
 0x1fa   : > { %v2133_v22 = vpop.f32.mrf.mxu1  ;;  %6434 = vmatmul.mubr.msk.bf16.gmra.mxu0 %vm677_vm3, %v6413_v57  ;;  %v4254_v57 = vrot.slane %v4252_v32, 4  ;;  %v4257_v35 = vrot.slane %v4255_v30, 5  ;;  %v4235_v53 = vrot.slane %v4234_v44, 4  ;;  %v4972_v50 = vrot.slane %v4970_v6, 4  ;;  %v8624_v30 = vld [vmem:[%s6732_s4 + $0x70] sm:$0xf] }
 0x1fb   : > { %9513 = vst [vmem:[#allocation3_spill] sm:$0xff] %v8591_v21  ;;  %v8598_v31 = vadd.f32 %v2941_v33, %v2229_v42  ;;  %v2230_v18 = vadd.f32 %v2133_v22, %v9516_v25  ;;  %v2949_v17 = vpop.f32.mrf.mxu0  ;;  %5238 = vmatprep.mubr.bf16.mxu0 %v9416_v7  ;;  %v8612_v25 = vld [vmem:[%s6732_s4 + $0x68] sm:$0x1]  ;;  %v8616_v37 = vrot.slane %v4261_v54, 5  ;;  %v4267_v11 = vrot.slane %v4265_v59, 4 }
 0x1fc   : > { %v2135_v60 = vpop.f32.mrf.mxu1  ;;  %v4973_v32 = vrot.slane %v8564_v45, 5  ;;  %v8628_v44 = vsel %vm7054_vm7, %v6396_v51, %v4970_v6  ;;  %v4977_v45 = vrot.slane %v8579_v40, 5  ;;  %v4240_v14 = vsel %vm6775_vm4, %v4235_v53, %v8576_v28 }
 0x1fd   : > { %9515 = vst [vmem:[#allocation5_spill] sm:$0xff] %v8598_v31  ;;  %v8608_v33 = vadd.f32 %v2943_v12, %v2230_v18  ;;  %v2231_v22 = vadd.f32 %v2135_v60, %v9518_v62  ;;  %v2951_v42 = vpop.f32.mrf.mxu0  ;;  %v6308_v31 = vld [vmem:[%s6732_s4 + $0x6c] sm:$0xf]  ;;  %v9520_v12 = vld [vmem:[#allocation9_spill] sm:$0xff]  ;;  %v4245_v60 = vrot.slane %v4244_v55, 4  ;;  %v4268_v6 = vor.u32 %v4267_v11, %v8616_v37 }
 0x1fe   : > { %v2139_v21 = vpop.f32.mrf.mxu1  ;;  %6362 = vmatmul.mubr.msk.bf16.gmra.mxu1 %vm677_vm3, %v6341_v38  ;;  %v4271_v38 = vshll.u32 %v8612_v25, 16  ;;  %v4279_v54 = vshll.u32 %v6308_v31, 16  ;;  %v6381_v55 = vld [vmem:[%s6732_s4 + $0x60] sm:$0xe]  ;;  %v4285_v51 = vshll.u32 %v8624_v30, 16  ;;  %v4974_v28 = vsel %vm7054_vm7, %v4972_v50, %v4973_v32 }
 0x1ff   : > { %9517 = vst [vmem:[#allocation7_spill] sm:$0xff] %v8608_v33  ;;  %v8618_v5 = vadd.f32 %v2945_v56, %v2231_v22  ;;  %v2232_v10 = vadd.f32 %v2139_v21, %v9520_v12  ;;  %v2953_v18 = vpop.f32.mrf.mxu0  ;;  %4684 = vmatprep.mubr.bf16.mxu1 %v9416_v7  ;;  %v4276_v56 = vshrl.u32 %v6308_v31, 16  ;;  %v9522_v21 = vld [vmem:[#allocation10_spill] sm:$0xff]  ;;  %v4289_v31 = vshrl.u32 %v8624_v30, 16 }
 0x200   : > { %v2141_v62 = vpop.f32.mrf.mxu1  ;;  %v4250_v40 = vsel %vm6775_vm4, %v4245_v60, %v8606_v19  ;;  %v8652_v53 = vrot.slane %v4271_v38, 5  ;;  %v4979_v19 = vrot.slane %v4977_v45, 4  ;;  %v6311_v60 = vld [vmem:[%s6732_s4 + $0x78] sm:$0xf]  ;;  %v4269_v50 = vrot.slane %v4268_v6, 4 }
 0x201   : > { %9519 = vst [vmem:[#allocation8_spill] sm:$0xff] %v8618_v5  ;;  %v8631_v59 = vadd.f32 %v2949_v17, %v2232_v10  ;;  %v2233_v22 = vadd.f32 %v2141_v62, %v9522_v21  ;;  %v2955_v12 = vpop.f32.mrf.mxu0  ;;  %v4258_v5 = vor.u32 %v4257_v35, %v4254_v57  ;;  %v9524_v10 = vld [vmem:[#allocation11_spill] sm:$0xff]  ;;  %v4278_v11 = vrot.slane %v4276_v56, 4  ;;  %v8675_v6 = vld [vmem:[%s6732_s4 + $0x7c] sm:$0xf] }
 0x202   : > { %v2143_v33 = vpop.f32.mrf.mxu1  ;;  %6435 = vmatmul.mubr.msk.bf16.gmra.mxu0 %vm677_vm3, %v6414_v61  ;;  %v4281_v21 = vrot.slane %v4279_v54, 5  ;;  %v4980_v32 = vrot.slane %v8612_v25, 5  ;;  %v8662_v38 = vrot.slane %v4285_v51, 5  ;;  %v4291_v56 = vrot.slane %v4289_v31, 4  ;;  %v9528_v54 = vld [vmem:[#allocation13_spill] sm:$0xff] }
 0x203   : > { %9521 = vst [vmem:[#allocation9_spill] sm:$0xff] %v8631_v59  ;;  %v8642_v17 = vadd.f32 %v2951_v42, %v2233_v22  ;;  %v2234_v62 = vadd.f32 %v2143_v33, %v9524_v10  ;;  %v2959_v57 = vpop.f32.mrf.mxu0  ;;  %5248 = vmatprep.mubr.bf16.mxu0 %v9416_v7  ;;  %v6397_v42 = vrot.slane %v6381_v55, 9  ;;  %v9526_v22 = vld [vmem:[#allocation12_spill] sm:$0xff]  ;;  %v4303_v51 = vshll.u32 %v6311_v60, 16 }
 0x204   : > { %v2145_v35 = vpop.f32.mrf.mxu1  ;;  %v4282_v25 = vor.u32 %v4281_v21, %v4278_v11 }
 0x205   : > { %9523 = vst [vmem:[#allocation10_spill] sm:$0xff] %v8642_v17  ;;  %v8654_v33 = vadd.f32 %v2953_v18, %v2234_v62  ;;  %v2235_v10 = vadd.f32 %v2145_v35, %v9526_v22  ;;  %v2961_v61 = vpop.f32.mrf.mxu0  ;;  %v8657_v17 = vrot.slane %v4258_v5, 4  ;;  %v6343_v5 = vcombine.low %v4240_v14, %v4250_v40  ;;  %v6310_v22 = vld [vmem:[%s6732_s4 + $0x74] sm:$0x1] }
 0x206   : > { %v2149_v59 = vpop.f32.mrf.mxu1  ;;  %6363 = vmatmul.mubr.msk.bf16.gmra.mxu1 %vm677_vm3, %v6342_v27  ;;  %v6415_v35 = vcombine.low %v8628_v44, %v4974_v28  ;;  %v8672_v27 = vsel %vm7054_vm7, %v6397_v42, %v4977_v45  ;;  %v6382_v44 = vld [vmem:[%s6732_s4 + $0x6c] sm:$0xe]  ;;  %v4984_v40 = vrot.slane %v8624_v30, 5  ;;  %v4274_v28 = vsel %vm6775_vm4, %v4269_v50, %v8652_v53 }
 0x207   : > { %9525 = vst [vmem:[#allocation11_spill] sm:$0xff] %v8654_v33  ;;  %v8664_v18 = vadd.f32 %v2955_v12, %v2235_v10  ;;  %v2236_v55 = vadd.f32 %v2149_v59, %v9528_v54  ;;  %v2963_v62 = vpop.f32.mrf.mxu0  ;;  %4694 = vmatprep.mubr.bf16.mxu1 %v9416_v7  ;;  %v4300_v12 = vshrl.u32 %v6311_v60, 16  ;;  %v9530_v59 = vld [vmem:[#allocation14_spill] sm:$0xff]  ;;  %v4264_v14 = vsel %vm6775_vm4, %v8657_v17, %v8616_v37 }
 0x208   : > { %v2151_v33 = vpop.f32.mrf.mxu1  ;;  %v4292_v42 = vor.u32 %v4291_v56, %v8662_v38  ;;  %v4295_v11 = vshll.u32 %v6310_v22, 16  ;;  %v4309_v37 = vshll.u32 %v8675_v6, 16  ;;  %v4313_v30 = vshrl.u32 %v8675_v6, 16 }
 0x209   : > { %9527 = vst [vmem:[#allocation12_spill] sm:$0xff] %v8664_v18  ;;  %v8677_v31 = vadd.f32 %v2959_v57, %v2236_v55  ;;  %v2237_v10 = vadd.f32 %v2151_v33, %v9530_v59  ;;  %v2965_v54 = vpop.f32.mrf.mxu0  ;;  %v4981_v57 = vsel %vm7054_vm7, %v4979_v19, %v4980_v32  ;;  %v9532_v33 = vld [vmem:[#allocation15_spill] sm:$0xff]  ;;  %v4283_v53 = vrot.slane %v4282_v25, 4  ;;  %v8705_v25 = vld [vmem:[%s6732_s4 + $0x80] sm:$0x1] }
 0x20a   : > { %v2153_v45 = vpop.f32.mrf.mxu1  ;;  %6436 = vmatmul.mubr.msk.bf16.gmra.mxu0 %vm677_vm3, %v6415_v35  ;;  %v6398_v19 = vrot.slane %v6382_v44, 9  ;;  %v4302_v50 = vrot.slane %v4300_v12, 4  ;;  %v4305_v32 = vrot.slane %v4303_v51, 5  ;;  %v4987_v35 = vrot.slane %v6310_v22, 5 }
 0x20b   : > { %9529 = vst [vmem:[#allocation13_spill] sm:$0xff] %v8677_v31  ;;  %v8692_v21 = vadd.f32 %v2961_v61, %v2237_v10  ;;  %v2238_v60 = vadd.f32 %v2153_v45, %v9532_v33  ;;  %v2969_v55 = vpop.f32.mrf.mxu0  ;;  %5258 = vmatprep.mubr.bf16.mxu0 %v9416_v7  ;;  %v9534_v61 = vld [vmem:[#allocation16_spill] sm:$0xff]  ;;  %v4986_v45 = vrot.slane %v4984_v40, 4  ;;  %v4293_v31 = vrot.slane %v4292_v42, 4  ;;  %v6383_v42 = vld [vmem:[%s6732_s4 + $0x78] sm:$0xe] }
 0x20c   : > { %v2155_v17 = vpop.f32.mrf.mxu1  ;;  %v4297_v18 = vrot.slane %v4295_v11, 5  ;;  %v4315_v22 = vrot.slane %v4313_v30, 4 }
 0x20d   : > { %9531 = vst [vmem:[#allocation14_spill] sm:$0xff] %v8692_v21  ;;  %v8699_v56 = vadd.f32 %v2963_v62, %v2238_v60  ;;  %v2239_v59 = vadd.f32 %v2155_v17, %v9534_v61  ;;  %v2971_v10 = vpop.f32.mrf.mxu0  ;;  %v6416_v21 = vcombine.low %v8672_v27, %v4981_v57  ;;  %v9536_v62 = vld [vmem:[#allocation17_spill] sm:$0xff]  ;;  %v8711_v60 = vrot.slane %v4309_v37, 5  ;;  %v6314_v17 = vld [vmem:[%s6732_s4 + $0x84] sm:$0xf] }
 0x20e   : > { %v2159_v33 = vpop.f32.mrf.mxu1  ;;  %6364 = vmatmul.mubr.msk.bf16.gmra.mxu1 %vm677_vm3, %v6343_v5  ;;  %v6344_v61 = vcombine.low %v4264_v14, %v4274_v28  ;;  %v4288_v27 = vsel %vm6775_vm4, %v4283_v53, %v8662_v38  ;;  %v4306_v57 = vor.u32 %v4305_v32, %v4302_v50  ;;  %v4988_v30 = vsel %vm7054_vm7, %v4986_v45, %v4987_v35  ;;  %v8729_v28 = vld [vmem:[%s6732_s4 + $0x88] sm:$0xf] }
 0x20f   : > { %9533 = vst [vmem:[#allocation15_spill] sm:$0xff] %v8699_v56  ;;  %v8707_v12 = vadd.f32 %v2965_v54, %v2239_v59  ;;  %v2240_v51 = vadd.f32 %v2159_v33, %v9536_v62  ;;  %v2973_v44 = vpop.f32.mrf.mxu0  ;;  %4704 = vmatprep.mubr.bf16.mxu1 %v9416_v7  ;;  %v8719_v54 = vsel %vm7054_vm7, %v6398_v19, %v4984_v40  ;;  %v9538_v59 = vld [vmem:[#allocation18_spill] sm:$0xff]  ;;  %v4319_v14 = vshll.u32 %v8705_v25, 16  ;;  %v9540_v50 = vld [vmem:[#allocation19_spill] sm:$0xff] }
 0x210   : > { %v2161_v5 = vpop.f32.mrf.mxu1  ;;  %v4298_v38 = vsel %vm6775_vm4, %v4293_v31, %v4297_v18  ;;  %v4991_v40 = vrot.slane %v8675_v6, 5  ;;  %v4324_v53 = vshrl.u32 %v6314_v17, 16  ;;  %v4327_v19 = vshll.u32 %v6314_v17, 16 }
 0x211   : > { %9535 = vst [vmem:[#allocation16_spill] sm:$0xff] %v8707_v12  ;;  %v8722_v11 = vadd.f32 %v2969_v55, %v2240_v51  ;;  %v2241_v33 = vadd.f32 %v2161_v5, %v9538_v59  ;;  %v2975_v37 = vpop.f32.mrf.mxu0  ;;  %v4316_v45 = vor.u32 %v4315_v22, %v8711_v60  ;;  %v6399_v35 = vrot.slane %v6383_v42, 9  ;;  %v9542_v59 = vld [vmem:[#allocation20_spill] sm:$0xff] }
 0x212   : > { %v2163_v62 = vpop.f32.mrf.mxu1  ;;  %6437 = vmatmul.mubr.msk.bf16.gmra.mxu0 %vm677_vm3, %v6416_v21  ;;  %v6417_v18 = vcombine.low %v8719_v54, %v4988_v30  ;;  %v8741_v31 = vrot.slane %v4306_v57, 4  ;;  %v4333_v6 = vshll.u32 %v8729_v28, 16  ;;  %v6345_v22 = vcombine.low %v4288_v27, %v4298_v38 }
 0x213   : > { %9537 = vst [vmem:[#allocation17_spill] sm:$0xff] %v8722_v11  ;;  %v8734_v55 = vadd.f32 %v2971_v10, %v2241_v33  ;;  %v2242_v32 = vadd.f32 %v2163_v62, %v9540_v50  ;;  %v2979_v51 = vpop.f32.mrf.mxu0  ;;  %5268 = vmatprep.mubr.bf16.mxu0 %v9416_v7  ;;  %v4337_v10 = vshrl.u32 %v8729_v28, 16  ;;  %v4321_v42 = vrot.slane %v4319_v14, 5 }
 0x214   : > { %v2165_v5 = vpop.f32.mrf.mxu1  ;;  %v4993_v50 = vrot.slane %v4991_v40, 4  ;;  %v4994_v54 = vrot.slane %v8705_v25, 5  ;;  %v4326_v57 = vrot.slane %v4324_v53, 4  ;;  %v4329_v30 = vrot.slane %v4327_v19, 5 }
 0x215   : > { %9539 = vst [vmem:[#allocation18_spill] sm:$0xff] %v8734_v55  ;;  %v8745_v17 = vadd.f32 %v2973_v44, %v2242_v32  ;;  %v2243_v33 = vadd.f32 %v2165_v5, %v9542_v59  ;;  %v2981_v21 = vpop.f32.mrf.mxu0  ;;  %v6317_v55 = vld [vmem:[%s6732_s4 + $0x90] sm:$0xf]  ;;  %v9544_v44 = vld [vmem:[#allocation21_spill] sm:$0xff]  ;;  %v4317_v27 = vrot.slane %v4316_v45, 4  ;;  %v8757_v14 = vsel %vm7054_vm7, %v6399_v35, %v4991_v40  ;;  %v9545_v45 = vld [vmem:[#allocation22_spill] sm:$0xff] }
 0x216   : > { %v2169_v62 = vpop.f32.mrf.mxu1  ;;  %6365 = vmatmul.mubr.msk.bf16.gmra.mxu1 %vm677_vm3, %v6344_v61  ;;  %v8760_v61 = vld [vmem:[%s6732_s4 + $0x94] sm:$0xf]  ;;  %v4312_v25 = vsel %vm6775_vm4, %v8741_v31, %v8711_v60  ;;  %v8767_v53 = vrot.slane %v4333_v6, 5  ;;  %v4339_v19 = vrot.slane %v4337_v10, 4  ;;  %v4998_v59 = vrot.slane %v8729_v28, 5  ;;  %v9547_v28 = vld [vmem:[#allocation23_spill] sm:$0xff] }
 0x217   : > { %9541 = vst [vmem:[#allocation19_spill] sm:$0xff] %v8745_v17  ;;  %v8751_v11 = vadd.f32 %v2975_v37, %v2243_v33  ;;  %v2244_v32 = vadd.f32 %v2169_v62, %v9544_v44  ;;  %v2983_v5 = vpop.f32.mrf.mxu0  ;;  %4714 = vmatprep.mubr.bf16.mxu1 %v9416_v7  ;;  %v6316_v37 = vld [vmem:[%s6732_s4 + $0x8c] sm:$0x1]  ;;  %v6384_v35 = vld [vmem:[%s6732_s4 + $0x84] sm:$0xe]  ;;  %v4348_v44 = vshrl.u32 %v6317_v55, 16  ;;  %v4995_v12 = vsel %vm7054_vm7, %v4993_v50, %v4994_v54 }
 0x218   : > { %v2171_v38 = vpop.f32.mrf.mxu1  ;;  %v4330_v56 = vor.u32 %v4329_v30, %v4326_v57  ;;  %v4357_v60 = vshll.u32 %v8760_v61, 16  ;;  %v4361_v31 = vshrl.u32 %v8760_v61, 16  ;;  %v4340_v50 = vor.u32 %v4339_v19, %v8767_v53 }
 0x219   : > { %9543 = vst [vmem:[#allocation20_spill] sm:$0xff] %v8751_v11  ;;  %v8770_v33 = vadd.f32 %v2979_v51, %v2244_v32  ;;  %v2245_v62 = vadd.f32 %v2171_v38, %v9545_v45  ;;  %v2985_v40 = vpop.f32.mrf.mxu0  ;;  %v4351_v11 = vshll.u32 %v6317_v55, 16  ;;  %v4322_v55 = vsel %vm6775_vm4, %v4317_v27, %v4321_v42 }
 0x21a   : > { %v2173_v17 = vpop.f32.mrf.mxu1  ;;  %6438 = vmatmul.mubr.msk.bf16.gmra.mxu0 %vm677_vm3, %v6417_v18  ;;  %v4343_v32 = vshll.u32 %v6316_v37, 16  ;;  %v6400_v54 = vrot.slane %v6384_v35, 9  ;;  %v5000_v57 = vrot.slane %v4998_v59, 4  ;;  %v5001_v30 = vrot.slane %v6316_v37, 5 }
 0x21b   : > { %v8778_v6 = vadd.f32 %v2981_v21, %v2245_v62  ;;  %v2246_v51 = vadd.f32 %v2173_v17, %v9547_v28  ;;  %v2989_v10 = vpop.f32.mrf.mxu0  ;;  %5278 = vmatprep.mubr.bf16.mxu0 %v9416_v7  ;;  %v9549_v21 = vld [vmem:[#allocation24_spill] sm:$0xff]  ;;  %v8790_v28 = vld [vmem:[%s6732_s4 + $0x98] sm:$0x1]  ;;  %v4350_v18 = vrot.slane %v4348_v44, 4  ;;  %v6418_v27 = vcombine.low %v8757_v14, %v4995_v12 }
 0x21c   : > { %v2175_v38 = vpop.f32.mrf.mxu1  ;;  %v4331_v19 = vrot.slane %v4330_v56, 4  ;;  %v8794_v35 = vrot.slane %v4357_v60, 5  ;;  %v4363_v37 = vrot.slane %v4361_v31, 4  ;;  %v6346_v44 = vcombine.low %v4312_v25, %v4322_v55  ;;  %v6385_v55 = vld [vmem:[%s6732_s4 + $0x90] sm:$0xe] }
 0x21d   : > { %9546 = vst [vmem:[#allocation21_spill] sm:$0xff] %v8778_v6  ;;  %v8786_v45 = vadd.f32 %v2983_v5, %v2246_v51  ;;  %v2247_v62 = vadd.f32 %v2175_v38, %v9549_v21  ;;  %v2991_v17 = vpop.f32.mrf.mxu0  ;;  %v4353_v6 = vrot.slane %v4351_v11, 5  ;;  %v4345_v11 = vrot.slane %v4343_v32, 5  ;;  %v6320_v21 = vld [vmem:[%s6732_s4 + $0x9c] sm:$0xf] }
 0x21e   : > { %v2179_v42 = vpop.f32.mrf.mxu1  ;;  %6366 = vmatmul.mubr.msk.bf16.gmra.mxu1 %vm677_vm3, %v6345_v22  ;;  %v4341_v22 = vrot.slane %v4340_v50, 4  ;;  %v8803_v12 = vsel %vm7054_vm7, %v6400_v54, %v4998_v59  ;;  %v8807_v56 = vsel %vm7054_vm7, %v5000_v57, %v5001_v30  ;;  %v4367_v14 = vshll.u32 %v8790_v28, 16 }
 0x21f   : > { %9548 = vst [vmem:[#allocation22_spill] sm:$0xff] %v8786_v45  ;;  %v8796_v5 = vadd.f32 %v2985_v40, %v2247_v62  ;;  %v2248_v51 = vadd.f32 %v2179_v42, %v8179_v46  ;;  %v2993_v38 = vpop.f32.mrf.mxu0  ;;  %4724 = vmatprep.mubr.bf16.mxu1 %v9416_v7  ;;  %v8811_v46 = vld [vmem:[%s6732_s4 + $0xa0] sm:$0xf]  ;;  %v4354_v31 = vor.u32 %v4353_v6, %v4350_v18  ;;  %v5005_v32 = vrot.slane %v8760_v61, 5 }
 0x220   : > { %v2181_v45 = vpop.f32.mrf.mxu1  ;;  %v4336_v59 = vsel %vm6775_vm4, %v4331_v19, %v8767_v53  ;;  %v4364_v54 = vor.u32 %v4363_v37, %v8794_v35  ;;  %v4372_v57 = vshrl.u32 %v6320_v21, 16  ;;  %v4375_v30 = vshll.u32 %v6320_v21, 16  ;;  %v9551_v19 = vld [vmem:[#allocation25_spill] sm:$0xff] }
 0x221   : > { %v8813_v40 = vadd.f32 %v2989_v10, %v2248_v51  ;;  %v2249_v25 = vadd.f32 %v2181_v45, %v8182_v20  ;;  %v2995_v60 = vpop.f32.mrf.mxu0  ;;  %v4381_v20 = vshll.u32 %v8811_v46, 16  ;;  %v4385_v61 = vshrl.u32 %v8811_v46, 16 }
 0x222   : > { %v2183_v50 = vpop.f32.mrf.mxu1  ;;  %6439 = vmatmul.mubr.msk.bf16.gmra.mxu0 %vm677_vm3, %v6418_v27  ;;  %v4346_v53 = vsel %vm6775_vm4, %v4341_v22, %v4345_v11  ;;  %v6419_v45 = vcombine.low %v8803_v12, %v8807_v56  ;;  %v6401_v18 = vrot.slane %v6385_v55, 9  ;;  %v4355_v51 = vrot.slane %v4354_v31, 4 }
 0x223   : > { %v8822_v62 = vadd.f32 %v2991_v17, %v2249_v25  ;;  %v2250_v10 = vadd.f32 %v2183_v50, %v8188_v26  ;;  %v3836_v42 = vpop.f32.mrf.mxu0  ;;  %5288 = vmatprep.mubr.bf16.mxu0 %v9416_v7  ;;  %v4369_v17 = vrot.slane %v4367_v14, 5  ;;  %v5007_v21 = vrot.slane %v5005_v32, 4  ;;  %v6322_v14 = vld [vmem:[%s6732_s4 + $0xa4] sm:$0x1] }
 0x224   : > { %v2185_v6 = vpop.f32.mrf.mxu1  ;;  %v4365_v50 = vrot.slane %v4364_v54, 4  ;;  %v5008_v11 = vrot.slane %v8790_v28, 5  ;;  %v4374_v22 = vrot.slane %v4372_v57, 4  ;;  %v8843_v31 = vrot.slane %v4381_v20, 5  ;;  %v6386_v54 = vld [vmem:[%s6732_s4 + $0x9c] sm:$0xe] }
 0x225   : > { %9550 = vst [vmem:[#allocation23_spill] sm:$0xff] %v8822_v62  ;;  %v8833_v26 = vadd.f32 %v2993_v38, %v2250_v10  ;;  %v2251_v27 = vadd.f32 %v2185_v6, %v9551_v19  ;;  %v3838_v37 = vpop.f32.mrf.mxu0  ;;  %v4377_v62 = vrot.slane %v4375_v30, 5  ;;  %v4387_v55 = vrot.slane %v4385_v61, 4  ;;  %v6323_v6 = vld [vmem:[%s6732_s4 + $0xa8] sm:$0xf] }
 0x226   : > { %v3393_v25 = vpop.f32.mrf.mxu1  ;;  %6367 = vmatmul.mubr.msk.bf16.gmra.mxu1 %vm677_vm3, %v6346_v44  ;;  %v6347_v44 = vcombine.low %v4336_v59, %v4346_v53  ;;  %v5012_v28 = vrot.slane %v8811_v46, 5  ;;  %v5006_v20 = vsel %vm7054_vm7, %v6401_v18, %v5005_v32  ;;  %v4370_v59 = vsel %vm6775_vm4, %v4365_v50, %v4369_v17  ;;  %v8861_v19 = vld [vmem:[%s6732_s4 + $0xac] sm:$0xf] }
 0x227   : > { %v8838_v12 = vadd.f32 %v2995_v60, %v2251_v27  ;;  %v3552_v38 = vadd.f32 %v3393_v25, %v8203_v39  ;;  %v3840_v56 = vpop.f32.mrf.mxu0  ;;  %4734 = vmatprep.mubr.bf16.mxu1 %v9416_v7  ;;  %v4360_v39 = vsel %vm6775_vm4, %v4355_v51, %v8794_v35  ;;  %v5009_v46 = vsel %vm7054_vm7, %v5007_v21, %v5008_v11  ;;  %v9552_v11 = vld [vmem:[#allocation26_spill] sm:$0xff] }
 0x228   : > { %v3395_v10 = vpop.f32.mrf.mxu1  ;;  %v4391_v53 = vshll.u32 %v6322_v14, 16  ;;  %v4388_v32 = vor.u32 %v4387_v55, %v8843_v31  ;;  %v6402_v18 = vrot.slane %v6386_v54, 9  ;;  %v5014_v17 = vrot.slane %v5012_v28, 4 }
 0x229   : > { %v8847_v57 = vadd.f32 %v3836_v42, %v3552_v38  ;;  %v3553_v60 = vadd.f32 %v3395_v10, %v8206_v58  ;;  %v3842_v30 = vpop.f32.mrf.mxu0  ;;  %v4378_v42 = vor.u32 %v4377_v62, %v4374_v22  ;;  %v5015_v25 = vrot.slane %v6322_v14, 5 }
 0x22a   : > { %v3397_v61 = vpop.f32.mrf.mxu1  ;;  %6440 = vmatmul.mubr.msk.bf16.gmra.mxu0 %vm677_vm3, %v6419_v45  ;;  %v4396_v21 = vshrl.u32 %v6323_v6, 16  ;;  %v4399_v62 = vshll.u32 %v6323_v6, 16  ;;  %v4409_v45 = vshrl.u32 %v8861_v19, 16  ;;  %v6348_v55 = vcombine.low %v4360_v39, %v4370_v59  ;;  %v8889_v59 = vld [vmem:[%s6732_s4 + $0xb8] sm:$0xf] }
 0x22b   : > { %v8863_v58 = vadd.f32 %v3838_v37, %v3553_v60  ;;  %v3554_v27 = vadd.f32 %v3397_v61, %v8212_v3  ;;  %v3846_v35 = vpop.f32.mrf.mxu0  ;;  %5298 = vmatprep.mubr.bf16.mxu0 %v9416_v7  ;;  %v4405_v3 = vshll.u32 %v8861_v19, 16  ;;  %v6420_v10 = vcombine.low %v5006_v20, %v5009_v46 }
 0x22c   : > { %v3399_v51 = vpop.f32.mrf.mxu1  ;;  %v4379_v54 = vrot.slane %v4378_v42, 4  ;;  %v4393_v6 = vrot.slane %v4391_v53, 5  ;;  %v8881_v61 = vsel %vm7054_vm7, %v6402_v18, %v5012_v28  ;;  %v8886_v39 = vsel %vm7054_vm7, %v5014_v17, %v5015_v25  ;;  %v6325_v53 = vld [vmem:[%s6732_s4 + $0xb0] sm:$0x1]  ;;  %v6387_v17 = vld [vmem:[%s6732_s4 + $0xa8] sm:$0xe] }
 0x22d   : > { %v8869_v50 = vadd.f32 %v3840_v56, %v3554_v27  ;;  %v3555_v37 = vadd.f32 %v3399_v51, %v9552_v11  ;;  %v3848_v22 = vpop.f32.mrf.mxu0  ;;  %v6326_v27 = vld [vmem:[%s6732_s4 + $0xb4] sm:$0xf]  ;;  %v4389_v51 = vrot.slane %v4388_v32, 4  ;;  %v4401_v20 = vrot.slane %v4399_v62, 5 }
 0x22e   : > { %v3403_v38 = vpop.f32.mrf.mxu1  ;;  %6368 = vmatmul.mubr.msk.bf16.gmra.mxu1 %vm677_vm3, %v6347_v44  ;;  %v8895_v28 = vrot.slane %v4405_v3, 5  ;;  %v4411_v18 = vrot.slane %v4409_v45, 4  ;;  %v4384_v32 = vsel %vm6775_vm4, %v4379_v54, %v8843_v31  ;;  %v5019_v25 = vrot.slane %v8861_v19, 5 }
 0x22f   : > { %v8875_v14 = vadd.f32 %v3842_v30, %v3555_v37  ;;  %v3556_v56 = vadd.f32 %v3403_v38, %v8227_v0  ;;  %v3850_v60 = vpop.f32.mrf.mxu0  ;;  %4744 = vmatprep.mubr.bf16.mxu1 %v9416_v7  ;;  %v4398_v30 = vrot.slane %v4396_v21, 4  ;;  %v4420_v21 = vshrl.u32 %v6326_v27, 16 }
 0x230   : > { %v3405_v44 = vpop.f32.mrf.mxu1  ;;  %v4423_v62 = vshll.u32 %v6326_v27, 16  ;;  %v4429_v3 = vshll.u32 %v8889_v59, 16  ;;  %v4433_v45 = vshrl.u32 %v8889_v59, 16  ;;  %v4394_v31 = vsel %vm6775_vm4, %v4389_v51, %v4393_v6 }
 0x231   : > { %v8891_v0 = vadd.f32 %v3846_v35, %v3556_v56  ;;  %v3557_v46 = vadd.f32 %v3405_v44, %v8230_v4  ;;  %v3852_v42 = vpop.f32.mrf.mxu0  ;;  %v6421_v19 = vcombine.low %v8881_v61, %v8886_v39  ;;  %v4415_v54 = vshll.u32 %v6325_v53, 16 }
 0x232   : > { %v3407_v11 = vpop.f32.mrf.mxu1  ;;  %6441 = vmatmul.mubr.msk.bf16.gmra.mxu0 %vm677_vm3, %v6420_v10  ;;  %v4412_v27 = vor.u32 %v4411_v18, %v8895_v28  ;;  %v6403_v44 = vrot.slane %v6387_v17, 9  ;;  %v5022_v6 = vrot.slane %v6325_v53, 5  ;;  %v4422_v51 = vrot.slane %v4420_v21, 4 }
 0x233   : > { %v8902_v37 = vadd.f32 %v3848_v22, %v3557_v46  ;;  %v3558_v35 = vadd.f32 %v3407_v11, %v8236_v15  ;;  %v3856_v4 = vpop.f32.mrf.mxu0  ;;  %5308 = vmatprep.mubr.bf16.mxu0 %v9416_v7  ;;  %v4402_v22 = vor.u32 %v4401_v20, %v4398_v30  ;;  %v5021_v11 = vrot.slane %v5019_v25, 4 }
 0x234   : > { %v3409_v38 = vpop.f32.mrf.mxu1  ;;  %v8923_v30 = vrot.slane %v4429_v3, 5  ;;  %v4435_v20 = vrot.slane %v4433_v45, 4  ;;  %v6349_v17 = vcombine.low %v4384_v32, %v4394_v31  ;;  %v5026_v53 = vrot.slane %v8889_v59, 5 }
 0x235   : > { %9553 = vst [vmem:[#allocation24_spill] sm:$0xff] %v8902_v37  ;;  %v8913_v15 = vadd.f32 %v3850_v60, %v3558_v35  ;;  %v3559_v10 = vadd.f32 %v3409_v38, %v8242_v49  ;;  %v3858_v56 = vpop.f32.mrf.mxu0  ;;  %v4425_v37 = vrot.slane %v4423_v62, 5  ;;  %v6328_v49 = vld [vmem:[%s6732_s4 + $0xbc] sm:$0x1]  ;;  %v6388_v35 = vld [vmem:[%s6732_s4 + $0xb4] sm:$0xe]  ;;  %v5020_v38 = vsel %vm7054_vm7, %v6403_v44, %v5019_v25 }
 0x236   : > { %v3413_v46 = vpop.f32.mrf.mxu1  ;;  %6369 = vmatmul.mubr.msk.bf16.gmra.mxu1 %vm677_vm3, %v6348_v55  ;;  %v4417_v55 = vrot.slane %v4415_v54, 5  ;;  %v4403_v62 = vrot.slane %v4402_v22, 4  ;;  %v5023_v45 = vsel %vm7054_vm7, %v5021_v11, %v5022_v6  ;;  %v4439_v31 = vshll.u32 %v6328_v49, 16  ;;  %v8936_v54 = vld [vmem:[%s6732_s4 + $0xc4] sm:$0xf] }
 0x237   : > { %v8918_v61 = vadd.f32 %v3852_v42, %v3559_v10  ;;  %v3560_v39 = vadd.f32 %v3413_v46, %v8251_v2  ;;  %v3860_v60 = vpop.f32.mrf.mxu0  ;;  %4754 = vmatprep.mubr.bf16.mxu1 %v9416_v7  ;;  %v6329_v10 = vld [vmem:[%s6732_s4 + $0xc0] sm:$0xf]  ;;  %v4413_v46 = vrot.slane %v4412_v27, 4  ;;  %v4426_v32 = vor.u32 %v4425_v37, %v4422_v51  ;;  %v9557_v51 = vld [vmem:[#allocation28_spill] sm:$0xff] }
 0x238   : > { %v3415_v18 = vpop.f32.mrf.mxu1  ;;  %v4436_v22 = vor.u32 %v4435_v20, %v8923_v30  ;;  %v6404_v25 = vrot.slane %v6388_v35, 9  ;;  %v5028_v27 = vrot.slane %v5026_v53, 4  ;;  %v4444_v11 = vshrl.u32 %v6329_v10, 16 }
 0x239   : > { %v8927_v21 = vadd.f32 %v3856_v4, %v3560_v39  ;;  %v3561_v42 = vadd.f32 %v3415_v18, %v8254_v36  ;;  %v3862_v2 = vpop.f32.mrf.mxu0  ;;  %v9555_v4 = vld [vmem:[#allocation27_spill] sm:$0xff]  ;;  %v5029_v18 = vrot.slane %v6328_v49, 5  ;;  %v4447_v37 = vshll.u32 %v6329_v10, 16 }
 0x23a   : > { %v3417_v3 = vpop.f32.mrf.mxu1  ;;  %6442 = vmatmul.mubr.msk.bf16.gmra.mxu0 %vm677_vm3, %v6421_v19  ;;  %v4408_v20 = vsel %vm6775_vm4, %v4403_v62, %v8895_v28  ;;  %v4418_v49 = vsel %vm6775_vm4, %v4413_v46, %v4417_v55  ;;  %v6422_v35 = vcombine.low %v5020_v38, %v5023_v45  ;;  %v4437_v62 = vrot.slane %v4436_v22, 4  ;;  %v9560_v45 = vld [vmem:[#allocation30_spill] sm:$0xff] }
 0x23b   : > { %v8938_v59 = vadd.f32 %v3858_v56, %v3561_v42  ;;  %v3562_v39 = vadd.f32 %v3417_v3, %v9555_v4  ;;  %v3866_v36 = vpop.f32.mrf.mxu0  ;;  %5318 = vmatprep.mubr.bf16.mxu0 %v9416_v7  ;;  %v4453_v3 = vshll.u32 %v8936_v54, 16  ;;  %v4457_v4 = vshrl.u32 %v8936_v54, 16 }
 0x23c   : > { %v3419_v44 = vpop.f32.mrf.mxu1  ;;  %v5030_v55 = vsel %vm7054_vm7, %v5028_v27, %v5029_v18  ;;  %v4446_v38 = vrot.slane %v4444_v11, 4  ;;  %v4449_v46 = vrot.slane %v4447_v37, 5  ;;  %v5033_v22 = vrot.slane %v8936_v54, 5  ;;  %v9562_v27 = vld [vmem:[#allocation31_spill] sm:$0xff] }
 0x23d   : > { %9554 = vst [vmem:[#allocation25_spill] sm:$0xff] %v8938_v59  ;;  %v8944_v6 = vadd.f32 %v3860_v60, %v3562_v39  ;;  %v3563_v56 = vadd.f32 %v3419_v44, %v9557_v51  ;;  %v3868_v42 = vpop.f32.mrf.mxu0  ;;  %v4441_v60 = vrot.slane %v4439_v31, 5  ;;  %v9559_v39 = vld [vmem:[#allocation29_spill] sm:$0xff]  ;;  %v6332_v37 = vld [vmem:[%s6732_s4 + $0xcc] sm:$0xf] }
 0x23e   : > { %v3423_v19 = vpop.f32.mrf.mxu1  ;;  %6370 = vmatmul.mubr.msk.bf16.gmra.mxu1 %vm677_vm3, %v6349_v17  ;;  %v8961_v17 = vsel %vm7054_vm7, %v6404_v25, %v5026_v53  ;;  %v6350_v53 = vcombine.low %v4408_v20, %v4418_v49  ;;  %v6389_v25 = vld [vmem:[%s6732_s4 + $0xc0] sm:$0xe]  ;;  %v8986_v49 = vld [vmem:[%s6732_s4 + $0xd0] sm:$0xf] }
 0x23f   : > { %9556 = vst [vmem:[#allocation26_spill] sm:$0xff] %v8944_v6  ;;  %v8955_v10 = vadd.f32 %v3862_v2, %v3563_v56  ;;  %v3564_v44 = vadd.f32 %v3423_v19, %v9559_v39  ;;  %v3870_v51 = vpop.f32.mrf.mxu0  ;;  %4764 = vmatprep.mubr.bf16.mxu1 %v9416_v7  ;;  %v4427_v6 = vrot.slane %v4426_v32, 4  ;;  %v6331_v19 = vld [vmem:[%s6732_s4 + $0xc8] sm:$0x1]  ;;  %v8969_v39 = vrot.slane %v4453_v3, 5 }
 0x240   : > { %v3425_v28 = vpop.f32.mrf.mxu1  ;;  %v4459_v32 = vrot.slane %v4457_v4, 4  ;;  %v4442_v4 = vsel %vm6775_vm4, %v4437_v62, %v4441_v60  ;;  %v6423_v54 = vcombine.low %v8961_v17, %v5030_v55  ;;  %v4463_v20 = vshll.u32 %v6331_v19, 16  ;;  %v9566_v55 = vld [vmem:[#allocation33_spill] sm:$0xff] }
 0x241   : > { %9558 = vst [vmem:[#allocation27_spill] sm:$0xff] %v8955_v10  ;;  %v8965_v2 = vadd.f32 %v3866_v36, %v3564_v44  ;;  %v3565_v31 = vadd.f32 %v3425_v28, %v9560_v45  ;;  %v3872_v56 = vpop.f32.mrf.mxu0  ;;  %v4432_v36 = vsel %vm6775_vm4, %v4427_v6, %v8923_v30  ;;  %v6405_v6 = vrot.slane %v6389_v25, 9 }
 0x242   : > { %v3427_v10 = vpop.f32.mrf.mxu1  ;;  %6443 = vmatmul.mubr.msk.bf16.gmra.mxu0 %vm677_vm3, %v6422_v35  ;;  %v9564_v35 = vld [vmem:[#allocation32_spill] sm:$0xff]  ;;  %v4460_v30 = vor.u32 %v4459_v32, %v8969_v39  ;;  %v4468_v60 = vshrl.u32 %v6332_v37, 16  ;;  %v4471_v62 = vshll.u32 %v6332_v37, 16  ;;  %v6351_v25 = vcombine.low %v4432_v36, %v4442_v4 }
 0x243   : > { %v8973_v59 = vadd.f32 %v3868_v42, %v3565_v31  ;;  %v3566_v18 = vadd.f32 %v3427_v10, %v9562_v27  ;;  %v3876_v11 = vpop.f32.mrf.mxu0  ;;  %5328 = vmatprep.mubr.bf16.mxu0 %v9416_v7  ;;  %v4450_v42 = vor.u32 %v4449_v46, %v4446_v38  ;;  %v5035_v31 = vrot.slane %v5033_v22, 4 }
 0x244   : > { %v3429_v3 = vpop.f32.mrf.mxu1  ;;  %v5036_v27 = vrot.slane %v6331_v19, 5  ;;  %v5034_v37 = vsel %vm7054_vm7, %v6405_v6, %v5033_v22  ;;  %v6334_v22 = vld [vmem:[%s6732_s4 + $0xd4] sm:$0x1] }
 0x245   : > { %9561 = vst [vmem:[#allocation28_spill] sm:$0xff] %v8973_v59  ;;  %v8988_v10 = vadd.f32 %v3870_v51, %v3566_v18  ;;  %v3567_v44 = vadd.f32 %v3429_v3, %v9564_v35  ;;  %v3878_v28 = vpop.f32.mrf.mxu0  ;;  %v4477_v51 = vshll.u32 %v8986_v49, 16  ;;  %v4481_v18 = vshrl.u32 %v8986_v49, 16 }
 0x246   : > { %v3433_v45 = vpop.f32.mrf.mxu1  ;;  %6371 = vmatmul.mubr.msk.bf16.gmra.mxu1 %vm677_vm3, %v6350_v53  ;;  %v4465_v3 = vrot.slane %v4463_v20, 5  ;;  %v9567_v53 = vld [vmem:[#allocation34_spill] sm:$0xff]  ;;  %v4473_v59 = vrot.slane %v4471_v62, 5 }
 0x247   : > { %9563 = vst [vmem:[#allocation29_spill] sm:$0xff] %v8988_v10  ;;  %v8993_v17 = vadd.f32 %v3872_v56, %v3567_v44  ;;  %v3568_v38 = vadd.f32 %v3433_v45, %v9566_v55  ;;  %v3880_v46 = vpop.f32.mrf.mxu0  ;;  %4774 = vmatprep.mubr.bf16.mxu1 %v9416_v7  ;;  %v4451_v56 = vrot.slane %v4450_v42, 4  ;;  %v4461_v45 = vrot.slane %v4460_v30, 4 }
 0x248   : > { %v3435_v32 = vpop.f32.mrf.mxu1  ;;  %v5037_v55 = vsel %vm7054_vm7, %v5035_v31, %v5036_v27  ;;  %v4483_v42 = vrot.slane %v4481_v18, 4  ;;  %v5040_v30 = vrot.slane %v8986_v49, 5  ;;  %v9570_v31 = vld [vmem:[#allocation37_spill] sm:$0xff] }
 0x249   : > { %9565 = vst [vmem:[#allocation30_spill] sm:$0xff] %v8993_v17  ;;  %v8999_v35 = vadd.f32 %v3876_v11, %v3568_v38  ;;  %v3569_v19 = vadd.f32 %v3435_v32, %v9567_v53  ;;  %v3882_v10 = vpop.f32.mrf.mxu0  ;;  %v4470_v17 = vrot.slane %v4468_v60, 4  ;;  %v9568_v11 = vld [vmem:[#allocation36_spill] sm:$0xff]  ;;  %v4479_v38 = vrot.slane %v4477_v51, 5 }
 0x24a   : > { %v3437_v44 = vpop.f32.mrf.mxu1  ;;  %6444 = vmatmul.mubr.msk.bf16.gmra.mxu0 %vm677_vm3, %v6423_v54  ;;  %v4456_v54 = vsel %vm6775_vm4, %v4451_v56, %v8969_v39  ;;  %v4466_v51 = vsel %vm6775_vm4, %v4461_v45, %v4465_v3  ;;  %v6424_v18 = vcombine.low %v5034_v37, %v5037_v55 }
 0x24b   : > { %v9006_v36 = vadd.f32 %v3878_v28, %v3569_v19  ;;  %v3570_v4 = vadd.f32 %v3437_v44, %v9568_v11  ;;  %v3886_v20 = vpop.f32.mrf.mxu0  ;;  %5338 = vmatprep.mubr.bf16.mxu0 %v9416_v7  ;;  %v6390_v28 = vld [vmem:[%s6732_s4 + $0xcc] sm:$0xe]  ;;  %v4474_v53 = vor.u32 %v4473_v59, %v4470_v17  ;;  %v4484_v44 = vor.u32 %v4483_v42, %v4479_v38 }
 0x24c   : > { %v3439_v32 = vpop.f32.mrf.mxu1  ;;  %v4487_v11 = vshll.u32 %v6334_v22, 16  ;;  %v6352_v59 = vcombine.low %v4456_v54, %v4466_v51 }
 0x24d   : > { %v9013_v6 = vadd.f32 %v3880_v46, %v3570_v4  ;;  %v3571_v27 = vadd.f32 %v3439_v32, %v9570_v31  ;;  %v3888_v60 = vpop.f32.mrf.mxu0  ;;  %v5042_v32 = vrot.slane %v5040_v30, 4  ;;  %v5043_v31 = vrot.slane %v6334_v22, 5 }
 0x24e   : > { %v3443_v62 = vpop.f32.mrf.mxu1  ;;  %6372 = vmatmul.mubr.msk.bf16.gmra.mxu1 %vm677_vm3, %v6351_v25  ;;  %v6406_v25 = vrot.slane %v6390_v28, 9  ;;  %v4485_v45 = vrot.slane %v4484_v44, 4  ;;  %v4489_v55 = vrot.slane %v4487_v11, 5 }
 0x24f   : > { %9569 = vst [vmem:[#allocation31_spill] sm:$0xff] %v9013_v6  ;;  %v9023_v19 = vadd.f32 %v3882_v10, %v3571_v27  ;;  %v3572_v49 = vadd.f32 %v3443_v62, %v8349_v8  ;;  %v3890_v46 = vpop.f32.mrf.mxu0  ;;  %4784 = vmatprep.mubr.bf16.mxu1 %v9416_v7  ;;  %v4475_v10 = vrot.slane %v4474_v53, 4  ;;  %v9571_v27 = vld [vmem:[#allocation38_spill] sm:$0xff] }
 0x250   : > { %v3445_v4 = vpop.f32.mrf.mxu1  ;;  %v4490_v43 = vsel %vm6775_vm4, %v4485_v45, %v4489_v55 }
 0x251   : > { %v9027_v6 = vadd.f32 %v3886_v20, %v3572_v49  ;;  %v3573_v39 = vadd.f32 %v3445_v4, %v8353_v41  ;;  %v3892_v3 = vpop.f32.mrf.mxu0  ;;  %v5041_v20 = vsel %vm7054_vm7, %v6406_v25, %v5040_v30  ;;  %v5044_v41 = vsel %vm7054_vm7, %v5042_v32, %v5043_v31 }
 0x252   : > { %v3447_v56 = vpop.f32.mrf.mxu1  ;;  %6445 = vmatmul.mubr.msk.bf16.gmra.mxu0 %vm677_vm3, %v6424_v18  ;;  %v4480_v62 = vsel %vm6775_vm4, %v4475_v10, %v4479_v38  ;;  %v6425_v30 = vcombine.low %v5041_v20, %v5044_v41 }
 0x253   : > { %v9030_v17 = vadd.f32 %v3888_v60, %v3573_v39  ;;  %v3574_v8 = vadd.f32 %v3447_v56, %v8360_v52  ;;  %v3896_v37 = vpop.f32.mrf.mxu0  ;;  %5348 = vmatprep.mubr.bf16.mxu0 %v9416_v7  ;;  %v6353_v4 = vcombine.low %v4480_v62, %v4490_v43 }
 0x254   : > { %v3449_v42 = vpop.f32.mrf.mxu1 }
 0x255   : > { %v9039_v22 = vadd.f32 %v3890_v46, %v3574_v8  ;;  %v3575_v60 = vadd.f32 %v3449_v42, %v9571_v27  ;;  %v3898_v28 = vpop.f32.mrf.mxu0 }
 0x256   : > { %v3453_v52 = vpop.f32.mrf.mxu1  ;;  %6373 = vmatmul.mubr.msk.bf16.gmra.mxu1 %vm677_vm3, %v6352_v59 }
 0x257   : > { %v9045_v54 = vadd.f32 %v3892_v3, %v3575_v60  ;;  %v3576_v51 = vadd.f32 %v3453_v52, %v8393_v29  ;;  %v3900_v18 = vpop.f32.mrf.mxu0  ;;  %4794 = vmatprep.mubr.bf16.mxu1 %v9416_v7 }
 0x258   : > { %v3455_v53 = vpop.f32.mrf.mxu1 }
 0x259   : > { %v9051_v49 = vadd.f32 %v3896_v37, %v3576_v51  ;;  %v3577_v46 = vadd.f32 %v3455_v53, %v8400_v9  ;;  %v3902_v44 = vpop.f32.mrf.mxu0 }
 0x25a   : > { %v3457_v11 = vpop.f32.mrf.mxu1  ;;  %6446 = vmatmul.mubr.msk.bf16.gmra.mxu0 %vm677_vm3, %v6425_v30 }
 0x25b   : > { %v9054_v38 = vadd.f32 %v3898_v28, %v3577_v46  ;;  %v3578_v25 = vadd.f32 %v3457_v11, %v8414_v47  ;;  %v3906_v29 = vpop.f32.mrf.mxu0  ;;  %v9572_v28 = vld [vmem:[#allocation39_spill] sm:$0xff] }
 0x25c   : > { %v3459_v7 = vpop.f32.mrf.mxu1  ;;  %v9573_v11 = vld [vmem:[#allocation35_spill] sm:$0xff] }
 0x25d   : > { %v9058_v32 = vadd.f32 %v3900_v18, %v3578_v25  ;;  %v3579_v48 = vadd.f32 %v3459_v7, %v8440_v16  ;;  %v3908_v31 = vpop.f32.mrf.mxu0 }
 0x25e   : > { %v3463_v39 = vpop.f32.mrf.mxu1  ;;  %6374 = vmatmul.mubr.msk.bf16.gmra.mxu1 %vm677_vm3, %v6353_v4 }
 0x25f   : > { %v9062_v9 = vadd.f32 %v3902_v44, %v3579_v48  ;;  %v3580_v3 = vadd.f32 %v3463_v39, %v8449_v23  ;;  %v3910_v56 = vpop.f32.mrf.mxu0  ;;  %v9574_v48 = vld [vmem:[#allocation40_spill] sm:$0xff] }
 0x260   : > { %v3465_v59 = vpop.f32.mrf.mxu1 }
 0x261   : > { %v9065_v10 = vadd.f32 %v3906_v29, %v3580_v3  ;;  %v3581_v47 = vadd.f32 %v3465_v59, %v8457_v24  ;;  %v3912_v8 = vpop.f32.mrf.mxu0 }
 0x262   : > { %v3467_v37 = vpop.f32.mrf.mxu1 }
 0x263   : > { %v9068_v45 = vadd.f32 %v3908_v31, %v3581_v47  ;;  %v3582_v16 = vadd.f32 %v3467_v37, %v8469_v13  ;;  %v3916_v55 = vpop.f32.mrf.mxu0  ;;  %v9576_v37 = vld [vmem:[#allocation4_spill] sm:$0xff] }
 0x264   : > { %v3469_v42 = vpop.f32.mrf.mxu1 }
 0x265   : > { %v9071_v20 = vadd.f32 %v3910_v56, %v3582_v16  ;;  %v3583_v41 = vadd.f32 %v3469_v42, %v8485_v1  ;;  %v3918_v27 = vpop.f32.mrf.mxu0  ;;  %v9575_v56 = vld [vmem:[#allocation2_spill] sm:$0xff] }
 0x266   : > { %v3473_v23 = vpop.f32.mrf.mxu1 }
 0x267   : > { %v9074_v60 = vadd.f32 %v3912_v8, %v3583_v41  ;;  %v3584_v52 = vadd.f32 %v3473_v23, %v9572_v28  ;;  %v3920_v62 = vpop.f32.mrf.mxu0 }
 0x268   : > { %v3475_v24 = vpop.f32.mrf.mxu1 }
 0x269   : > { %v9077_v51 = vadd.f32 %v3916_v55, %v3584_v52  ;;  %v3585_v18 = vadd.f32 %v3475_v24, %v8508_v34  ;;  %v3922_v43 = vpop.f32.mrf.mxu0  ;;  %v9578_v24 = vld [vmem:[#allocation3_spill] sm:$0xff] }
 0x26a   : > { %v3477_v13 = vpop.f32.mrf.mxu1 }
 0x26b   : > { %v9080_v30 = vadd.f32 %v3918_v27, %v3585_v18  ;;  %v3586_v53 = vadd.f32 %v3477_v13, %v8518_v63  ;;  %v3926_v46 = vpop.f32.mrf.mxu0  ;;  %v9577_v27 = vld [vmem:[#allocation6_spill] sm:$0xff] }
 0x26c   : > { %v3479_v1 = vpop.f32.mrf.mxu1 }
 0x26d   : > { %v9083_v44 = vadd.f32 %v3920_v62, %v3586_v53  ;;  %v3587_v4 = vadd.f32 %v3479_v1, %v9573_v11  ;;  %v3928_v25 = vpop.f32.mrf.mxu0 }
 0x26e   : > { %v3483_v29 = vpop.f32.mrf.mxu1 }
 0x26f   : > { %v9086_v7 = vadd.f32 %v3922_v43, %v3587_v4  ;;  %v3588_v31 = vadd.f32 %v3483_v29, %v9574_v48  ;;  %v3930_v39 = vpop.f32.mrf.mxu0  ;;  %v9580_v29 = vld [vmem:[#allocation7_spill] sm:$0xff] }
 0x270   : > { %v3485_v34 = vpop.f32.mrf.mxu1 }
 0x271   : > { %v9089_v3 = vadd.f32 %v3926_v46, %v3588_v31  ;;  %v3589_v59 = vadd.f32 %v3485_v34, %v9575_v56  ;;  %v3932_v47 = vpop.f32.mrf.mxu0  ;;  %v9579_v46 = vld [vmem:[#allocation5_spill] sm:$0xff]  ;;  %v9581_v56 = vld [vmem:[#allocation8_spill] sm:$0xff] }
 0x272   : > { %v3487_v63 = vpop.f32.mrf.mxu1 }
 0x273   : > { %v9092_v8 = vadd.f32 %v3928_v25, %v3589_v59  ;;  %v3590_v16 = vadd.f32 %v3487_v63, %v9576_v37  ;;  %v3936_v55 = vpop.f32.mrf.mxu0 }
 0x274   : > { %v3489_v42 = vpop.f32.mrf.mxu1 }
 0x275   : > { %v9095_v41 = vadd.f32 %v3930_v39, %v3590_v16  ;;  %v3591_v23 = vadd.f32 %v3489_v42, %v9577_v27  ;;  %v3938_v28 = vpop.f32.mrf.mxu0  ;;  %v9582_v16 = vld [vmem:[#allocation9_spill] sm:$0xff] }
 0x276   : > { %v3493_v52 = vpop.f32.mrf.mxu1 }
 0x277   : > { %v9098_v62 = vadd.f32 %v3932_v47, %v3591_v23  ;;  %v3592_v18 = vadd.f32 %v3493_v52, %v9578_v24  ;;  %v3940_v43 = vpop.f32.mrf.mxu0 }
 0x278   : > { %v3495_v13 = vpop.f32.mrf.mxu1 }
 0x279   : > { %v9101_v53 = vadd.f32 %v3936_v55, %v3592_v18  ;;  %v3593_v1 = vadd.f32 %v3495_v13, %v9579_v46  ;;  %v3942_v11 = vpop.f32.mrf.mxu0 }
 0x27a   : > { %v3497_v4 = vpop.f32.mrf.mxu1 }
 0x27b   : > { %v9104_v25 = vadd.f32 %v3938_v28, %v3593_v1  ;;  %v3594_v48 = vadd.f32 %v3497_v4, %v9580_v29  ;;  %v3946_v31 = vpop.f32.mrf.mxu0  ;;  %v9583_v28 = vld [vmem:[#allocation10_spill] sm:$0xff] }
 0x27c   : > { %v3499_v39 = vpop.f32.mrf.mxu1 }
 0x27d   : > { %v9107_v34 = vadd.f32 %v3940_v43, %v3594_v48  ;;  %v3595_v59 = vadd.f32 %v3499_v39, %v9581_v56  ;;  %v3948_v47 = vpop.f32.mrf.mxu0  ;;  %v9584_v43 = vld [vmem:[#allocation11_spill] sm:$0xff] }
 0x27e   : > { %v3503_v63 = vpop.f32.mrf.mxu1 }
 0x27f   : > { %v9110_v37 = vadd.f32 %v3942_v11, %v3595_v59  ;;  %v3596_v55 = vadd.f32 %v3503_v63, %v9582_v16  ;;  %v3950_v42 = vpop.f32.mrf.mxu0  ;;  %v9586_v11 = vld [vmem:[#allocation12_spill] sm:$0xff] }
 0x280   : > { %v3505_v27 = vpop.f32.mrf.mxu1 }
 0x281   : > { %v9113_v23 = vadd.f32 %v3946_v31, %v3596_v55  ;;  %v3597_v52 = vadd.f32 %v3505_v27, %v9583_v28  ;;  %v3952_v24 = vpop.f32.mrf.mxu0  ;;  %v9588_v31 = vld [vmem:[#allocation13_spill] sm:$0xff] }
 0x282   : > { %v3507_v18 = vpop.f32.mrf.mxu1 }
 0x283   : > { %v9116_v13 = vadd.f32 %v3948_v47, %v3597_v52  ;;  %v3598_v46 = vadd.f32 %v3507_v18, %v9584_v43  ;;  %v3956_v1 = vpop.f32.mrf.mxu0  ;;  %v9590_v47 = vld [vmem:[#allocation14_spill] sm:$0xff] }
 0x284   : > { %v3509_v4 = vpop.f32.mrf.mxu1 }
 0x285   : > { %v9119_v29 = vadd.f32 %v3950_v42, %v3598_v46  ;;  %v3599_v48 = vadd.f32 %v3509_v4, %v9586_v11  ;;  %v3958_v39 = vpop.f32.mrf.mxu0  ;;  %v9592_v42 = vld [vmem:[#allocation15_spill] sm:$0xff] }
 0x286   : > { %v3513_v56 = vpop.f32.mrf.mxu1 }
 0x287   : > { %9585 = vst [vmem:[#allocation32_spill] sm:$0xff] %v9119_v29  ;;  %v9122_v59 = vadd.f32 %v3952_v24, %v3599_v48  ;;  %v3600_v63 = vadd.f32 %v3513_v56, %v9588_v31  ;;  %v3960_v16 = vpop.f32.mrf.mxu0  ;;  %v9594_v24 = vld [vmem:[#allocation16_spill] sm:$0xff] }
 0x288   : > { %v3515_v55 = vpop.f32.mrf.mxu1 }
 0x289   : > { %9587 = vst [vmem:[#allocation33_spill] sm:$0xff] %v9122_v59  ;;  %v9125_v27 = vadd.f32 %v3956_v1, %v3600_v63  ;;  %v3601_v28 = vadd.f32 %v3515_v55, %v9590_v47  ;;  %v3962_v52 = vpop.f32.mrf.mxu0  ;;  %v9596_v1 = vld [vmem:[#allocation17_spill] sm:$0xff] }
 0x28a   : > { %v3517_v18 = vpop.f32.mrf.mxu1 }
 0x28b   : > { %9589 = vst [vmem:[#allocation34_spill] sm:$0xff] %v9125_v27  ;;  %v9128_v43 = vadd.f32 %v3958_v39, %v3601_v28  ;;  %v3602_v46 = vadd.f32 %v3517_v18, %v9592_v42  ;;  %v3966_v29 = vpop.f32.mrf.mxu0  ;;  %v9598_v39 = vld [vmem:[#allocation18_spill] sm:$0xff] }
 0x28c   : > { %v3519_v4 = vpop.f32.mrf.mxu1 }
 0x28d   : > { %9591 = vst [vmem:[#allocation36_spill] sm:$0xff] %v9128_v43  ;;  %v9131_v11 = vadd.f32 %v3960_v16, %v3602_v46  ;;  %v3603_v48 = vadd.f32 %v3519_v4, %v9594_v24  ;;  %v3968_v59 = vpop.f32.mrf.mxu0  ;;  %v9600_v16 = vld [vmem:[#allocation19_spill] sm:$0xff] }
 0x28e   : > { %v3523_v56 = vpop.f32.mrf.mxu1 }
 0x28f   : > { %9593 = vst [vmem:[#allocation37_spill] sm:$0xff] %v9131_v11  ;;  %v9134_v31 = vadd.f32 %v3962_v52, %v3603_v48  ;;  %v3604_v63 = vadd.f32 %v3523_v56, %v9596_v1  ;;  %v3970_v27 = vpop.f32.mrf.mxu0  ;;  %v9602_v52 = vld [vmem:[#allocation20_spill] sm:$0xff] }
 0x290   : > { %v3525_v55 = vpop.f32.mrf.mxu1 }
 0x291   : > { %9595 = vst [vmem:[#allocation38_spill] sm:$0xff] %v9134_v31  ;;  %v9137_v47 = vadd.f32 %v3966_v29, %v3604_v63  ;;  %v3605_v28 = vadd.f32 %v3525_v55, %v9598_v39  ;;  %v3972_v43 = vpop.f32.mrf.mxu0 }
 0x292   : > { %v3527_v18 = vpop.f32.mrf.mxu1 }
 0x293   : > { %9597 = vst [vmem:[#allocation39_spill] sm:$0xff] %v9137_v47  ;;  %v9140_v42 = vadd.f32 %v3968_v59, %v3605_v28  ;;  %v3606_v46 = vadd.f32 %v3527_v18, %v9600_v16  ;;  %v3976_v11 = vpop.f32.mrf.mxu0  ;;  %v9604_v59 = vld [vmem:[#allocation21_spill] sm:$0xff] }
 0x294   : > { %v3529_v4 = vpop.f32.mrf.mxu1 }
 0x295   : > { %9599 = vst [vmem:[#allocation35_spill] sm:$0xff] %v9140_v42  ;;  %v9143_v24 = vadd.f32 %v3970_v27, %v3606_v46  ;;  %v3607_v48 = vadd.f32 %v3529_v4, %v9602_v52  ;;  %v3978_v31 = vpop.f32.mrf.mxu0  ;;  %v9606_v27 = vld [vmem:[#allocation22_spill] sm:$0xff]  ;;  %v5425_v4 = vlaneseq }
 0x296   : > { %v3533_v56 = vpop.f32.mrf.mxu1 }
 0x297   : > { %9601 = vst [vmem:[#allocation40_spill] sm:$0xff] %v9143_v24  ;;  %v9146_v1 = vadd.f32 %v3972_v43, %v3607_v48  ;;  %v3608_v29 = vadd.f32 %v3533_v56, %v8770_v33  ;;  %v3980_v63 = vpop.f32.mrf.mxu0 }
 0x298   : > { %v3535_v55 = vpop.f32.mrf.mxu1 }
 0x299   : > { %v9149_v39 = vadd.f32 %v3976_v11, %v3608_v29  ;;  %v3609_v28 = vadd.f32 %v3535_v55, %v9604_v59  ;;  %v3982_v42 = vpop.f32.mrf.mxu0  ;;  %v5426_v55 = vshrl.u32 %v5425_v4, 7 }
 0x29a   : > { %v3537_v18 = vpop.f32.mrf.mxu1 }
 0x29b   : > { %9603 = vst [vmem:[#allocation2_spill] sm:$0xff] %v9149_v39  ;;  %v9152_v16 = vadd.f32 %v3978_v31, %v3609_v28  ;;  %v3610_v46 = vadd.f32 %v3537_v18, %v9606_v27  ;;  %v3986_v24 = vpop.f32.mrf.mxu0  ;;  %v9607_v28 = vld [vmem:[#allocation23_spill] sm:$0xff] }
 0x29c   : > { %v3539_v52 = vpop.f32.mrf.mxu1 }
 0x29d   : > { %9605 = vst [vmem:[#allocation4_spill] sm:$0xff] %v9152_v16  ;;  %v9155_v47 = vadd.f32 %v3980_v63, %v3610_v46  ;;  %v3611_v43 = vadd.f32 %v3539_v52, %v8796_v5  ;;  %v3988_v33 = vpop.f32.mrf.mxu0  ;;  %v5427_v46 = vsub.s32 0, %v5426_v55 }
 0x29e   : > { %v3543_v48 = vpop.f32.mrf.mxu1 }
 0x29f   : > { %v9158_v56 = vadd.f32 %v3982_v42, %v3611_v43  ;;  %v3612_v11 = vadd.f32 %v3543_v48, %v8813_v40  ;;  %v3990_v29 = vpop.f32.mrf.mxu0  ;;  %v5423_v40 = vld [vmem:[%s9350_s2] sm:$0x3]  ;;  %v5431_v43 = vsub.s32 1, %v5426_v55 }
 0x2a0   : > { %v3545_v59 = vpop.f32.mrf.mxu1 }
 0x2a1   : > { %v9161_v31 = vadd.f32 %v3986_v24, %v3612_v11  ;;  %v3613_v18 = vadd.f32 %v3545_v59, %v9607_v28  ;;  %v3992_v27 = vpop.f32.mrf.mxu0 }
 0x2a2   : > { %v3547_v16 = vpop.f32.mrf.mxu1 }
 0x2a3   : > { %v9164_v39 = vadd.f32 %v3988_v33, %v3613_v18  ;;  %v3614_v63 = vadd.f32 %v3547_v16, %v8833_v26  ;;  %v5200_v5 = vpop.f32.mrf.mxu0  ;;  %v9176_v26 = vrot.slane %v5423_v40, %v5427_v46 }
 0x2a4   : > { %v3549_v52 = vpop.f32.mrf.mxu1 }
 0x2a5   : > { %9608 = vst [vmem:[#allocation6_spill] sm:$0xff] %v9164_v39  ;;  %v9170_v42 = vadd.f32 %v3990_v29, %v3614_v63  ;;  %v3615_v24 = vadd.f32 %v3549_v52, %v8838_v12  ;;  %v5202_v4 = vpop.f32.mrf.mxu0  ;;  %v9179_v39 = vrot.slane %v5423_v40, %v5431_v43 }
 0x2a6   : > { %v4646_v48 = vpop.f32.mrf.mxu1 }
 0x2a7   : > { %v9173_v11 = vadd.f32 %v3992_v27, %v3615_v24  ;;  %v4805_v33 = vadd.f32 %v4646_v48, %v8847_v57  ;;  %v5204_v16 = vpop.f32.mrf.mxu0 }
 0x2a8   : > { %v4648_v59 = vpop.f32.mrf.mxu1 }
 0x2a9   : > { %9609 = vst [vmem:[#allocation3_spill] sm:$0xff] %v9173_v11  ;;  %v5359_v28 = vadd.f32 %v5200_v5, %v4805_v33  ;;  %v4806_v18 = vadd.f32 %v4648_v59, %v8863_v58  ;;  %v5206_v29 = vpop.f32.mrf.mxu0 }
 0x2aa   : > { %v4650_v63 = vpop.f32.mrf.mxu1 }
 0x2ab   : > { %v5435_v12 = vadd.f32 %v9176_v26, %v5359_v28  ;;  %v5360_v55 = vadd.f32 %v5202_v4, %v4806_v18  ;;  %v4807_v52 = vadd.f32 %v4650_v63, %v8869_v50  ;;  %v5210_v27 = vpop.f32.mrf.mxu0 }
 0x2ac   : > { %v4652_v24 = vpop.f32.mrf.mxu1 }
 0x2ad   : > { %v5436_v57 = vadd.f32 %v9179_v39, %v5360_v55  ;;  %v5361_v46 = vadd.f32 %v5204_v16, %v4807_v52  ;;  %v4808_v48 = vadd.f32 %v4652_v24, %v8875_v14  ;;  %v5212_v5 = vpop.f32.mrf.mxu0  ;;  %v5499_v33 = vmax.f32 %v5435_v12, 0.0  ;;  %v9610_v12 = vld [vmem:[#allocation24_spill] sm:$0xff] }
 0x2ae   : > { %v4656_v58 = vpop.f32.mrf.mxu1 }
 0x2af   : > { %v5500_v40 = vmax.f32 %v5436_v57, 0.0  ;;  %v5437_v43 = vadd.f32 %v9176_v26, %v5361_v46  ;;  %v5362_v59 = vadd.f32 %v5206_v29, %v4808_v48  ;;  %v4809_v28 = vadd.f32 %v4656_v58, %v8891_v0  ;;  %v5214_v4 = vpop.f32.mrf.mxu0 }
 0x2b0   : > { %v4658_v50 = vpop.f32.mrf.mxu1 }
 0x2b1   : > { %v6482_v16 = vpack.c.bf16 %v5500_v40, %v5499_v33  ;;  %v5438_v14 = vadd.f32 %v9179_v39, %v5362_v59  ;;  %v5363_v18 = vadd.f32 %v5210_v27, %v4809_v28  ;;  %v5216_v63 = vpop.f32.mrf.mxu0  ;;  %v4810_v55 = vadd.f32 %v4658_v50, %v9610_v12 }
 0x2b2   : > { %v4660_v52 = vpop.f32.mrf.mxu1  ;;  %v5501_v29 = vmax.f32 %v5437_v43, 0.0 }
 0x2b3   : > { %5755 = vst [vmem:[%s9191_s29] sm:$0xff] %v6482_v16  ;;  %v5502_v0 = vmax.f32 %v5438_v14, 0.0  ;;  %v4811_v24 = vadd.f32 %v4660_v52, %v8913_v15  ;;  %v5220_v57 = vpop.f32.mrf.mxu0  ;;  %v5439_v46 = vadd.f32 %v9176_v26, %v5363_v18  ;;  %v5364_v48 = vadd.f32 %v5212_v5, %v4810_v55  ;;  %v9611_v55 = vld [vmem:[#allocation25_spill] sm:$0xff] }
 0x2b4   : > { %v4662_v58 = vpop.f32.mrf.mxu1 }
 0x2b5   : > { %v6483_v11 = vpack.c.bf16 %v5502_v0, %v5501_v29  ;;  %v5365_v33 = vadd.f32 %v5214_v4, %v4811_v24  ;;  %v4812_v40 = vadd.f32 %v4662_v58, %v8918_v61  ;;  %v5222_v27 = vpop.f32.mrf.mxu0  ;;  %v5440_v59 = vadd.f32 %v9179_v39, %v5364_v48 }
 0x2b6   : > { %v4666_v28 = vpop.f32.mrf.mxu1  ;;  %v5503_v14 = vmax.f32 %v5439_v46, 0.0 }
 0x2b7   : > { %5756 = vst [vmem:[%s9191_s29 + $0x8] sm:$0xff] %v6483_v11  ;;  %v5441_v50 = vadd.f32 %v9176_v26, %v5365_v33  ;;  %v5366_v43 = vadd.f32 %v5216_v63, %v4812_v40  ;;  %v4813_v16 = vadd.f32 %v4666_v28, %v8927_v21  ;;  %v5224_v15 = vpop.f32.mrf.mxu0  ;;  %v5504_v18 = vmax.f32 %v5440_v59, 0.0  ;;  %v9612_v21 = vld [vmem:[#allocation26_spill] sm:$0xff] }
 0x2b8   : > { %v4668_v5 = vpop.f32.mrf.mxu1 }
 0x2b9   : > { %v5442_v12 = vadd.f32 %v9179_v39, %v5366_v43  ;;  %v5367_v4 = vadd.f32 %v5220_v57, %v4813_v16  ;;  %v4814_v61 = vadd.f32 %v4668_v5, %v9611_v55  ;;  %v5226_v52 = vpop.f32.mrf.mxu0  ;;  %v6484_v29 = vpack.c.bf16 %v5504_v18, %v5503_v14  ;;  %v9613_v43 = vld [vmem:[#allocation27_spill] sm:$0xff] }
 0x2ba   : > { %v5505_v0 = vmax.f32 %v5441_v50, 0.0  ;;  %v4670_v11 = vpop.f32.mrf.mxu1 }
 0x2bb   : > { %v5506_v24 = vmax.f32 %v5442_v12, 0.0  ;;  %v5443_v63 = vadd.f32 %v9176_v26, %v5367_v4  ;;  %v5368_v48 = vadd.f32 %v5222_v27, %v4814_v61  ;;  %v4815_v58 = vadd.f32 %v4670_v11, %v9612_v21  ;;  %v5230_v33 = vpop.f32.mrf.mxu0  ;;  %5757 = vst [vmem:[%s9191_s29 + $0x10] sm:$0xff] %v6484_v29 }
 0x2bc   : > { %v4672_v46 = vpop.f32.mrf.mxu1 }
 0x2bd   : > { %v6485_v40 = vpack.c.bf16 %v5506_v24, %v5505_v0  ;;  %v5444_v59 = vadd.f32 %v9179_v39, %v5368_v48  ;;  %v5369_v57 = vadd.f32 %v5224_v15, %v4815_v58  ;;  %v5232_v28 = vpop.f32.mrf.mxu0  ;;  %v4816_v16 = vadd.f32 %v4672_v46, %v9613_v43  ;;  %v9614_v0 = vld [vmem:[#allocation28_spill] sm:$0xff]  ;;  %v9615_v58 = vld [vmem:[#allocation29_spill] sm:$0xff]  ;;  %v9616_v43 = vld [vmem:[#allocation30_spill] sm:$0xff] }
 0x2be   : > { %v4676_v14 = vpop.f32.mrf.mxu1  ;;  %v5507_v50 = vmax.f32 %v5443_v63, 0.0 }
 0x2bf   : > { %5758 = vst [vmem:[%s9191_s29 + $0x18] sm:$0xff] %v6485_v40  ;;  %v5508_v18 = vmax.f32 %v5444_v59, 0.0  ;;  %v4817_v5 = vadd.f32 %v4676_v14, %v8965_v2  ;;  %v5234_v27 = vpop.f32.mrf.mxu0  ;;  %v5445_v12 = vadd.f32 %v9176_v26, %v5369_v57  ;;  %v5370_v4 = vadd.f32 %v5226_v52, %v4816_v16 }
 0x2c0   : > { %v4678_v55 = vpop.f32.mrf.mxu1 }
 0x2c1   : > { %v6486_v61 = vpack.c.bf16 %v5508_v18, %v5507_v50  ;;  %v5371_v29 = vadd.f32 %v5230_v33, %v4817_v5  ;;  %v4818_v11 = vadd.f32 %v4678_v55, %v9614_v0  ;;  %v5236_v15 = vpop.f32.mrf.mxu0  ;;  %v5446_v24 = vadd.f32 %v9179_v39, %v5370_v4 }
 0x2c2   : > { %v4680_v48 = vpop.f32.mrf.mxu1  ;;  %v5509_v40 = vmax.f32 %v5445_v12, 0.0 }
 0x2c3   : > { %5759 = vst [vmem:[%s9191_s29 + $0x20] sm:$0xff] %v6486_v61  ;;  %v5447_v21 = vadd.f32 %v9176_v26, %v5371_v29  ;;  %v5372_v63 = vadd.f32 %v5232_v28, %v4818_v11  ;;  %v4819_v46 = vadd.f32 %v4680_v48, %v9615_v58  ;;  %v5240_v2 = vpop.f32.mrf.mxu0  ;;  %v5510_v59 = vmax.f32 %v5446_v24, 0.0 }
 0x2c4   : > { %v4682_v52 = vpop.f32.mrf.mxu1 }
 0x2c5   : > { %v5448_v57 = vadd.f32 %v9179_v39, %v5372_v63  ;;  %v5373_v33 = vadd.f32 %v5234_v27, %v4819_v46  ;;  %v4820_v16 = vadd.f32 %v4682_v52, %v9616_v43  ;;  %v5242_v14 = vpop.f32.mrf.mxu0  ;;  %v6487_v50 = vpack.c.bf16 %v5510_v59, %v5509_v40  ;;  %v9617_v46 = vld [vmem:[#allocation31_spill] sm:$0xff] }
 0x2c6   : > { %v5511_v18 = vmax.f32 %v5447_v21, 0.0  ;;  %v4686_v5 = vpop.f32.mrf.mxu1 }
 0x2c7   : > { %v5512_v4 = vmax.f32 %v5448_v57, 0.0  ;;  %v5449_v28 = vadd.f32 %v9176_v26, %v5373_v33  ;;  %v5374_v55 = vadd.f32 %v5236_v15, %v4820_v16  ;;  %v4821_v61 = vadd.f32 %v4686_v5, %v8999_v35  ;;  %v5244_v29 = vpop.f32.mrf.mxu0  ;;  %5760 = vst [vmem:[%s9191_s29 + $0x28] sm:$0xff] %v6487_v50 }
 0x2c8   : > { %v4688_v12 = vpop.f32.mrf.mxu1 }
 0x2c9   : > { %v6488_v0 = vpack.c.bf16 %v5512_v4, %v5511_v18  ;;  %v5450_v11 = vadd.f32 %v9179_v39, %v5374_v55  ;;  %v5375_v27 = vadd.f32 %v5240_v2, %v4821_v61  ;;  %v5246_v24 = vpop.f32.mrf.mxu0  ;;  %v4822_v48 = vadd.f32 %v4688_v12, %v9006_v36 }
 0x2ca   : > { %v4690_v63 = vpop.f32.mrf.mxu1  ;;  %v5513_v21 = vmax.f32 %v5449_v28, 0.0 }
 0x2cb   : > { %5761 = vst [vmem:[%s9191_s29 + $0x30] sm:$0xff] %v6488_v0  ;;  %v5514_v58 = vmax.f32 %v5450_v11, 0.0  ;;  %v4823_v40 = vadd.f32 %v4690_v63, %v9617_v46  ;;  %v5250_v15 = vpop.f32.mrf.mxu0  ;;  %v5451_v35 = vadd.f32 %v9176_v26, %v5375_v27  ;;  %v5376_v59 = vadd.f32 %v5242_v14, %v4822_v48 }
 0x2cc   : > { %v4692_v52 = vpop.f32.mrf.mxu1 }
 0x2cd   : > { %v6489_v57 = vpack.c.bf16 %v5514_v58, %v5513_v21  ;;  %v5377_v33 = vadd.f32 %v5244_v29, %v4823_v40  ;;  %v4824_v43 = vadd.f32 %v4692_v52, %v9023_v19  ;;  %v5252_v2 = vpop.f32.mrf.mxu0  ;;  %v5452_v16 = vadd.f32 %v9179_v39, %v5376_v59 }
 0x2ce   : > { %v4696_v36 = vpop.f32.mrf.mxu1  ;;  %v5515_v28 = vmax.f32 %v5451_v35, 0.0 }
 0x2cf   : > { %5762 = vst [vmem:[%s9191_s29 + $0x38] sm:$0xff] %v6489_v57  ;;  %v5453_v50 = vadd.f32 %v9176_v26, %v5377_v33  ;;  %v5378_v18 = vadd.f32 %v5246_v24, %v4824_v43  ;;  %v4825_v5 = vadd.f32 %v4696_v36, %v9027_v6  ;;  %v5254_v4 = vpop.f32.mrf.mxu0  ;;  %v5516_v55 = vmax.f32 %v5452_v16, 0.0 }
 0x2d0   : > { %v4698_v14 = vpop.f32.mrf.mxu1 }
 0x2d1   : > { %v5454_v61 = vadd.f32 %v9179_v39, %v5378_v18  ;;  %v5379_v29 = vadd.f32 %v5250_v15, %v4825_v5  ;;  %v4826_v19 = vadd.f32 %v4698_v14, %v9030_v17  ;;  %v5256_v12 = vpop.f32.mrf.mxu0  ;;  %v6490_v0 = vpack.c.bf16 %v5516_v55, %v5515_v28 }
 0x2d2   : > { %v5517_v11 = vmax.f32 %v5453_v50, 0.0  ;;  %v4700_v27 = vpop.f32.mrf.mxu1 }
 0x2d3   : > { %v5518_v48 = vmax.f32 %v5454_v61, 0.0  ;;  %v5455_v24 = vadd.f32 %v9176_v26, %v5379_v29  ;;  %v5380_v63 = vadd.f32 %v5252_v2, %v4826_v19  ;;  %v4827_v6 = vadd.f32 %v4700_v27, %v9039_v22  ;;  %v5260_v21 = vpop.f32.mrf.mxu0  ;;  %5763 = vst [vmem:[%s9191_s29 + $0x40] sm:$0xff] %v6490_v0 }
 0x2d4   : > { %v4702_v58 = vpop.f32.mrf.mxu1 }
 0x2d5   : > { %v6491_v46 = vpack.c.bf16 %v5518_v48, %v5517_v11  ;;  %v5456_v40 = vadd.f32 %v9179_v39, %v5380_v63  ;;  %v5381_v15 = vadd.f32 %v5254_v4, %v4827_v6  ;;  %v5262_v35 = vpop.f32.mrf.mxu0  ;;  %v4828_v17 = vadd.f32 %v4702_v58, %v9045_v54 }
 0x2d6   : > { %v4706_v59 = vpop.f32.mrf.mxu1  ;;  %v5519_v52 = vmax.f32 %v5455_v24, 0.0 }
 0x2d7   : > { %5764 = vst [vmem:[%s9191_s29 + $0x48] sm:$0xff] %v6491_v46  ;;  %v5520_v57 = vmax.f32 %v5456_v40, 0.0  ;;  %v4829_v33 = vadd.f32 %v4706_v59, %v9051_v49  ;;  %v5264_v43 = vpop.f32.mrf.mxu0  ;;  %v5457_v22 = vadd.f32 %v9176_v26, %v5381_v15  ;;  %v5382_v2 = vadd.f32 %v5256_v12, %v4828_v17 }
 0x2d8   : > { %v4708_v16 = vpop.f32.mrf.mxu1 }
 0x2d9   : > { %v6492_v36 = vpack.c.bf16 %v5520_v57, %v5519_v52  ;;  %v5383_v50 = vadd.f32 %v5260_v21, %v4829_v33  ;;  %v4830_v18 = vadd.f32 %v4708_v16, %v9054_v38  ;;  %v5266_v5 = vpop.f32.mrf.mxu0  ;;  %v5458_v4 = vadd.f32 %v9179_v39, %v5382_v2 }
 0x2da   : > { %v4710_v54 = vpop.f32.mrf.mxu1  ;;  %v5521_v61 = vmax.f32 %v5457_v22, 0.0 }
 0x2db   : > { %5765 = vst [vmem:[%s9191_s29 + $0x50] sm:$0xff] %v6492_v36  ;;  %v5459_v28 = vadd.f32 %v9176_v26, %v5383_v50  ;;  %v5384_v55 = vadd.f32 %v5262_v35, %v4830_v18  ;;  %v4831_v14 = vadd.f32 %v4710_v54, %v9058_v32  ;;  %v5270_v49 = vpop.f32.mrf.mxu0  ;;  %v5522_v29 = vmax.f32 %v5458_v4, 0.0 }
 0x2dc   : > { %v4712_v19 = vpop.f32.mrf.mxu1 }
 0x2dd   : > { %v5460_v12 = vadd.f32 %v9179_v39, %v5384_v55  ;;  %v5385_v0 = vadd.f32 %v5264_v43, %v4831_v14  ;;  %v4832_v38 = vadd.f32 %v4712_v19, %v9062_v9  ;;  %v5272_v11 = vpop.f32.mrf.mxu0  ;;  %v6493_v27 = vpack.c.bf16 %v5522_v29, %v5521_v61 }
 0x2de   : > { %v5523_v48 = vmax.f32 %v5459_v28, 0.0  ;;  %v4716_v24 = vpop.f32.mrf.mxu1 }
 0x2df   : > { %v5524_v63 = vmax.f32 %v5460_v12, 0.0  ;;  %v5461_v6 = vadd.f32 %v9176_v26, %v5385_v0  ;;  %v5386_v21 = vadd.f32 %v5266_v5, %v4832_v38  ;;  %v4833_v32 = vadd.f32 %v4716_v24, %v9065_v10  ;;  %v5274_v58 = vpop.f32.mrf.mxu0  ;;  %5766 = vst [vmem:[%s9191_s29 + $0x58] sm:$0xff] %v6493_v27 }
 0x2e0   : > { %v4718_v46 = vpop.f32.mrf.mxu1 }
 0x2e1   : > { %v6494_v40 = vpack.c.bf16 %v5524_v63, %v5523_v48  ;;  %v5462_v15 = vadd.f32 %v9179_v39, %v5386_v21  ;;  %v5387_v35 = vadd.f32 %v5270_v49, %v4833_v32  ;;  %v5276_v17 = vpop.f32.mrf.mxu0  ;;  %v4834_v9 = vadd.f32 %v4718_v46, %v9068_v45 }
 0x2e2   : > { %v4720_v59 = vpop.f32.mrf.mxu1  ;;  %v5525_v52 = vmax.f32 %v5461_v6, 0.0 }
 0x2e3   : > { %5767 = vst [vmem:[%s9191_s29 + $0x60] sm:$0xff] %v6494_v40  ;;  %v5526_v57 = vmax.f32 %v5462_v15, 0.0  ;;  %v4835_v33 = vadd.f32 %v4720_v59, %v9071_v20  ;;  %v5280_v43 = vpop.f32.mrf.mxu0  ;;  %v5463_v10 = vadd.f32 %v9176_v26, %v5387_v35  ;;  %v5388_v22 = vadd.f32 %v5272_v11, %v4834_v9 }
 0x2e4   : > { %v4722_v2 = vpop.f32.mrf.mxu1 }
 0x2e5   : > { %v6495_v16 = vpack.c.bf16 %v5526_v57, %v5525_v52  ;;  %v5389_v36 = vadd.f32 %v5274_v58, %v4835_v33  ;;  %v4836_v50 = vadd.f32 %v4722_v2, %v9074_v60  ;;  %v5282_v18 = vpop.f32.mrf.mxu0  ;;  %v5464_v5 = vadd.f32 %v9179_v39, %v5388_v22 }
 0x2e6   : > { %v4726_v45 = vpop.f32.mrf.mxu1  ;;  %v5527_v55 = vmax.f32 %v5463_v10, 0.0 }
 0x2e7   : > { %5768 = vst [vmem:[%s9191_s29 + $0x68] sm:$0xff] %v6495_v16  ;;  %v5465_v4 = vadd.f32 %v9176_v26, %v5389_v36  ;;  %v5390_v54 = vadd.f32 %v5276_v17, %v4836_v50  ;;  %v4837_v28 = vadd.f32 %v4726_v45, %v9077_v51  ;;  %v5284_v20 = vpop.f32.mrf.mxu0  ;;  %v5528_v14 = vmax.f32 %v5464_v5, 0.0 }
 0x2e8   : > { %v4728_v49 = vpop.f32.mrf.mxu1 }
 0x2e9   : > { %v5466_v61 = vadd.f32 %v9179_v39, %v5390_v54  ;;  %v5391_v29 = vadd.f32 %v5280_v43, %v4837_v28  ;;  %v4838_v60 = vadd.f32 %v4728_v49, %v9080_v30  ;;  %v5286_v19 = vpop.f32.mrf.mxu0  ;;  %v6496_v12 = vpack.c.bf16 %v5528_v14, %v5527_v55 }
 0x2ea   : > { %v5529_v0 = vmax.f32 %v5465_v4, 0.0  ;;  %v4730_v38 = vpop.f32.mrf.mxu1 }
 0x2eb   : > { %v5530_v11 = vmax.f32 %v5466_v61, 0.0  ;;  %v5467_v27 = vadd.f32 %v9176_v26, %v5391_v29  ;;  %v5392_v48 = vadd.f32 %v5282_v18, %v4838_v60  ;;  %v4839_v51 = vadd.f32 %v4730_v38, %v9083_v44  ;;  %v5290_v24 = vpop.f32.mrf.mxu0  ;;  %5769 = vst [vmem:[%s9191_s29 + $0x70] sm:$0xff] %v6496_v12 }
 0x2ec   : > { %v4732_v63 = vpop.f32.mrf.mxu1 }
 0x2ed   : > { %v6497_v6 = vpack.c.bf16 %v5530_v11, %v5529_v0  ;;  %v5468_v21 = vadd.f32 %v9179_v39, %v5392_v48  ;;  %v5393_v32 = vadd.f32 %v5284_v20, %v4839_v51  ;;  %v5292_v58 = vpop.f32.mrf.mxu0  ;;  %v4840_v30 = vadd.f32 %v4732_v63, %v9086_v7 }
 0x2ee   : > { %v4736_v46 = vpop.f32.mrf.mxu1  ;;  %v5531_v40 = vmax.f32 %v5467_v27, 0.0 }
 0x2ef   : > { %5770 = vst [vmem:[%s9191_s29 + $0x78] sm:$0xff] %v6497_v6  ;;  %v5532_v15 = vmax.f32 %v5468_v21, 0.0  ;;  %v4841_v35 = vadd.f32 %v4736_v46, %v9089_v3  ;;  %v5294_v17 = vpop.f32.mrf.mxu0  ;;  %v5469_v44 = vadd.f32 %v9176_v26, %v5393_v32  ;;  %v5394_v9 = vadd.f32 %v5286_v19, %v4840_v30 }
 0x2f0   : > { %v4738_v59 = vpop.f32.mrf.mxu1 }
 0x2f1   : > { %v6498_v52 = vpack.c.bf16 %v5532_v15, %v5531_v40  ;;  %v5395_v57 = vadd.f32 %v5290_v24, %v4841_v35  ;;  %v4842_v33 = vadd.f32 %v4738_v59, %v9092_v8  ;;  %v5296_v43 = vpop.f32.mrf.mxu0  ;;  %v5470_v10 = vadd.f32 %v9179_v39, %v5394_v9 }
 0x2f2   : > { %v4740_v7 = vpop.f32.mrf.mxu1  ;;  %v5533_v36 = vmax.f32 %v5469_v44, 0.0 }
 0x2f3   : > { %5771 = vst [vmem:[%s9191_s29 + $0x80] sm:$0xff] %v6498_v52  ;;  %v5471_v22 = vadd.f32 %v9176_v26, %v5395_v57  ;;  %v5396_v2 = vadd.f32 %v5292_v58, %v4842_v33  ;;  %v4843_v16 = vadd.f32 %v4740_v7, %v9095_v41  ;;  %v5300_v3 = vpop.f32.mrf.mxu0  ;;  %v5534_v50 = vmax.f32 %v5470_v10, 0.0 }
 0x2f4   : > { %v4742_v18 = vpop.f32.mrf.mxu1 }
 0x2f5   : > { %v5472_v5 = vadd.f32 %v9179_v39, %v5396_v2  ;;  %v5397_v45 = vadd.f32 %v5294_v17, %v4843_v16  ;;  %v4844_v8 = vadd.f32 %v4742_v18, %v9098_v62  ;;  %v5302_v4 = vpop.f32.mrf.mxu0  ;;  %v6499_v54 = vpack.c.bf16 %v5534_v50, %v5533_v36 }
 0x2f6   : > { %v5535_v28 = vmax.f32 %v5471_v22, 0.0  ;;  %v4746_v20 = vpop.f32.mrf.mxu1 }
 0x2f7   : > { %v5536_v55 = vmax.f32 %v5472_v5, 0.0  ;;  %v5473_v14 = vadd.f32 %v9176_v26, %v5397_v45  ;;  %v5398_v49 = vadd.f32 %v5296_v43, %v4844_v8  ;;  %v4845_v41 = vadd.f32 %v4746_v20, %v9101_v53  ;;  %v5304_v61 = vpop.f32.mrf.mxu0  ;;  %5772 = vst [vmem:[%s9191_s29 + $0x88] sm:$0xff] %v6499_v54 }
 0x2f8   : > { %v4748_v29 = vpop.f32.mrf.mxu1 }
 0x2f9   : > { %v6500_v60 = vpack.c.bf16 %v5536_v55, %v5535_v28  ;;  %v5474_v19 = vadd.f32 %v9179_v39, %v5398_v49  ;;  %v5399_v12 = vadd.f32 %v5300_v3, %v4845_v41  ;;  %v5306_v0 = vpop.f32.mrf.mxu0  ;;  %v4846_v62 = vadd.f32 %v4748_v29, %v9104_v25  ;;  %v9620_v28 = vld [vmem:[#allocation34_spill] sm:$0xff] }
 0x2fa   : > { %v4750_v38 = vpop.f32.mrf.mxu1  ;;  %v5537_v11 = vmax.f32 %v5473_v14, 0.0 }
 0x2fb   : > { %5773 = vst [vmem:[%s9191_s29 + $0x90] sm:$0xff] %v6500_v60  ;;  %v5538_v27 = vmax.f32 %v5474_v19, 0.0  ;;  %v4847_v48 = vadd.f32 %v4750_v38, %v9107_v34  ;;  %v5310_v51 = vpop.f32.mrf.mxu0  ;;  %v5475_v53 = vadd.f32 %v9176_v26, %v5399_v12  ;;  %v5400_v24 = vadd.f32 %v5302_v4, %v4846_v62  ;;  %v9621_v60 = vld [vmem:[#allocation36_spill] sm:$0xff] }
 0x2fc   : > { %v4752_v63 = vpop.f32.mrf.mxu1 }
 0x2fd   : > { %v6501_v6 = vpack.c.bf16 %v5538_v27, %v5537_v11  ;;  %v5401_v21 = vadd.f32 %v5304_v61, %v4847_v48  ;;  %v4848_v32 = vadd.f32 %v4752_v63, %v9110_v37  ;;  %v5312_v58 = vpop.f32.mrf.mxu0  ;;  %v5476_v30 = vadd.f32 %v9179_v39, %v5400_v24  ;;  %v9622_v27 = vld [vmem:[#allocation37_spill] sm:$0xff] }
 0x2fe   : > { %v4756_v25 = vpop.f32.mrf.mxu1  ;;  %v5539_v35 = vmax.f32 %v5475_v53, 0.0 }
 0x2ff   : > { %5774 = vst [vmem:[%s9191_s29 + $0x98] sm:$0xff] %v6501_v6  ;;  %v5477_v46 = vadd.f32 %v9176_v26, %v5401_v21  ;;  %v5402_v40 = vadd.f32 %v5306_v0, %v4848_v32  ;;  %v4849_v15 = vadd.f32 %v4756_v25, %v9113_v23  ;;  %v5314_v34 = vpop.f32.mrf.mxu0  ;;  %v5540_v17 = vmax.f32 %v5476_v30, 0.0  ;;  %v9618_v23 = vld [vmem:[#allocation32_spill] sm:$0xff]  ;;  %v9623_v32 = vld [vmem:[#allocation38_spill] sm:$0xff] }
 0x300   : > { %v4758_v44 = vpop.f32.mrf.mxu1 }
 0x301   : > { %v5478_v9 = vadd.f32 %v9179_v39, %v5402_v40  ;;  %v5403_v59 = vadd.f32 %v5310_v51, %v4849_v15  ;;  %v4850_v37 = vadd.f32 %v4758_v44, %v9116_v13  ;;  %v5316_v52 = vpop.f32.mrf.mxu0  ;;  %v6502_v57 = vpack.c.bf16 %v5540_v17, %v5539_v35  ;;  %v9619_v13 = vld [vmem:[#allocation33_spill] sm:$0xff]  ;;  %v9624_v17 = vld [vmem:[#allocation39_spill] sm:$0xff] }
 0x302   : > { %v5541_v33 = vmax.f32 %v5477_v46, 0.0  ;;  %v4760_v43 = vpop.f32.mrf.mxu1 }
 0x303   : > { %v5542_v10 = vmax.f32 %v5478_v9, 0.0  ;;  %v5479_v7 = vadd.f32 %v9176_v26, %v5403_v59  ;;  %v5404_v22 = vadd.f32 %v5312_v58, %v4850_v37  ;;  %v4851_v2 = vadd.f32 %v4760_v43, %v9618_v23  ;;  %v5320_v16 = vpop.f32.mrf.mxu0  ;;  %5775 = vst [vmem:[%s9191_s29 + $0xa0] sm:$0xff] %v6502_v57  ;;  %v9625_v43 = vld [vmem:[#allocation35_spill] sm:$0xff] }
 0x304   : > { %v4762_v3 = vpop.f32.mrf.mxu1 }
 0x305   : > { %v6503_v36 = vpack.c.bf16 %v5542_v10, %v5541_v33  ;;  %v5480_v50 = vadd.f32 %v9179_v39, %v5404_v22  ;;  %v5405_v18 = vadd.f32 %v5314_v34, %v4851_v2  ;;  %v5322_v5 = vpop.f32.mrf.mxu0  ;;  %v4852_v45 = vadd.f32 %v4762_v3, %v9619_v13  ;;  %v9626_v2 = vld [vmem:[#allocation40_spill] sm:$0xff] }
 0x306   : > { %v4766_v8 = vpop.f32.mrf.mxu1  ;;  %v5543_v4 = vmax.f32 %v5479_v7, 0.0 }
 0x307   : > { %5776 = vst [vmem:[%s9191_s29 + $0xa8] sm:$0xff] %v6503_v36  ;;  %v5544_v54 = vmax.f32 %v5480_v50, 0.0  ;;  %v4853_v20 = vadd.f32 %v4766_v8, %v9620_v28  ;;  %v5324_v55 = vpop.f32.mrf.mxu0  ;;  %v5481_v14 = vadd.f32 %v9176_v26, %v5405_v18  ;;  %v5406_v49 = vadd.f32 %v5316_v52, %v4852_v45 }
 0x308   : > { %v4768_v41 = vpop.f32.mrf.mxu1 }
 0x309   : > { %v6504_v61 = vpack.c.bf16 %v5544_v54, %v5543_v4  ;;  %v5407_v29 = vadd.f32 %v5320_v16, %v4853_v20  ;;  %v4854_v19 = vadd.f32 %v4768_v41, %v9621_v60  ;;  %v5326_v12 = vpop.f32.mrf.mxu0  ;;  %v5482_v0 = vadd.f32 %v9179_v39, %v5406_v49 }
 0x30a   : > { %v4770_v62 = vpop.f32.mrf.mxu1  ;;  %v5545_v53 = vmax.f32 %v5481_v14, 0.0 }
 0x30b   : > { %5777 = vst [vmem:[%s9191_s29 + $0xb0] sm:$0xff] %v6504_v61  ;;  %v5483_v38 = vadd.f32 %v9176_v26, %v5407_v29  ;;  %v5408_v11 = vadd.f32 %v5322_v5, %v4854_v19  ;;  %v4855_v48 = vadd.f32 %v4770_v62, %v9622_v27  ;;  %v5330_v51 = vpop.f32.mrf.mxu0  ;;  %v5546_v24 = vmax.f32 %v5482_v0, 0.0 }
 0x30c   : > { %v4772_v63 = vpop.f32.mrf.mxu1 }
 0x30d   : > { %v5484_v6 = vadd.f32 %v9179_v39, %v5408_v11  ;;  %v5409_v21 = vadd.f32 %v5324_v55, %v4855_v48  ;;  %v4856_v58 = vadd.f32 %v4772_v63, %v9623_v32  ;;  %v5332_v30 = vpop.f32.mrf.mxu0  ;;  %v6505_v25 = vpack.c.bf16 %v5546_v24, %v5545_v53  ;;  %v9627_v55 = vld [vmem:[#allocation2_spill] sm:$0xff] }
 0x30e   : > { %v5547_v46 = vmax.f32 %v5483_v38, 0.0  ;;  %v4776_v40 = vpop.f32.mrf.mxu1 }
 0x30f   : > { %v5548_v15 = vmax.f32 %v5484_v6, 0.0  ;;  %v5485_v34 = vadd.f32 %v9176_v26, %v5409_v21  ;;  %v5410_v35 = vadd.f32 %v5326_v12, %v4856_v58  ;;  %v4857_v44 = vadd.f32 %v4776_v40, %v9624_v17  ;;  %v5334_v9 = vpop.f32.mrf.mxu0  ;;  %5778 = vst [vmem:[%s9191_s29 + $0xb8] sm:$0xff] %v6505_v25  ;;  %v9628_v12 = vld [vmem:[#allocation4_spill] sm:$0xff] }
 0x310   : > { %v4778_v59 = vpop.f32.mrf.mxu1 }
 0x311   : > { %v6506_v37 = vpack.c.bf16 %v5548_v15, %v5547_v46  ;;  %v5486_v52 = vadd.f32 %v9179_v39, %v5410_v35  ;;  %v5411_v57 = vadd.f32 %v5330_v51, %v4857_v44  ;;  %v5336_v33 = vpop.f32.mrf.mxu0  ;;  %v4858_v10 = vadd.f32 %v4778_v59, %v9625_v43 }
 0x312   : > { %v4780_v7 = vpop.f32.mrf.mxu1  ;;  %v5549_v22 = vmax.f32 %v5485_v34, 0.0 }
 0x313   : > { %5779 = vst [vmem:[%s9191_s29 + $0xc0] sm:$0xff] %v6506_v37  ;;  %v5550_v23 = vmax.f32 %v5486_v52, 0.0  ;;  %v4859_v16 = vadd.f32 %v4780_v7, %v9626_v2  ;;  %v5340_v3 = vpop.f32.mrf.mxu0  ;;  %v5487_v36 = vadd.f32 %v9176_v26, %v5411_v57  ;;  %v5412_v50 = vadd.f32 %v5332_v30, %v4858_v10  ;;  %v9630_v2 = vld [vmem:[#allocation3_spill] sm:$0xff] }
 0x314   : > { %v4782_v18 = vpop.f32.mrf.mxu1 }
 0x315   : > { %v6507_v5 = vpack.c.bf16 %v5550_v23, %v5549_v22  ;;  %v5413_v13 = vadd.f32 %v5334_v9, %v4859_v16  ;;  %v4860_v45 = vadd.f32 %v4782_v18, %v9146_v1  ;;  %v5342_v8 = vpop.f32.mrf.mxu0  ;;  %v5488_v4 = vadd.f32 %v9179_v39, %v5412_v50  ;;  %v9629_v9 = vld [vmem:[#allocation6_spill] sm:$0xff] }
 0x316   : > { %v4786_v54 = vpop.f32.mrf.mxu1  ;;  %v5551_v41 = vmax.f32 %v5487_v36, 0.0 }
 0x317   : > { %5780 = vst [vmem:[%s9191_s29 + $0xc8] sm:$0xff] %v6507_v5  ;;  %v5489_v28 = vadd.f32 %v9176_v26, %v5413_v13  ;;  %v5414_v20 = vadd.f32 %v5336_v33, %v4860_v45  ;;  %v4861_v14 = vadd.f32 %v4786_v54, %v9627_v55  ;;  %v5344_v49 = vpop.f32.mrf.mxu0  ;;  %v5552_v61 = vmax.f32 %v5488_v4, 0.0 }
 0x318   : > { %v4788_v29 = vpop.f32.mrf.mxu1 }
 0x319   : > { %v5490_v60 = vadd.f32 %v9179_v39, %v5414_v20  ;;  %v5415_v19 = vadd.f32 %v5340_v3, %v4861_v14  ;;  %v4862_v1 = vadd.f32 %v4788_v29, %v9628_v12  ;;  %v5346_v0 = vpop.f32.mrf.mxu0  ;;  %v6508_v62 = vpack.c.bf16 %v5552_v61, %v5551_v41 }
 0x31a   : > { %v5553_v38 = vmax.f32 %v5489_v28, 0.0  ;;  %v4790_v11 = vpop.f32.mrf.mxu1 }
 0x31b   : > { %v5554_v27 = vmax.f32 %v5490_v60, 0.0  ;;  %v5491_v48 = vadd.f32 %v9176_v26, %v5415_v19  ;;  %v5416_v51 = vadd.f32 %v5342_v8, %v4862_v1  ;;  %v4863_v53 = vadd.f32 %v4790_v11, %v9155_v47  ;;  %v5350_v24 = vpop.f32.mrf.mxu0  ;;  %5781 = vst [vmem:[%s9191_s29 + $0xd0] sm:$0xff] %v6508_v62 }
 0x31c   : > { %v4792_v63 = vpop.f32.mrf.mxu1 }
 0x31d   : > { %v6509_v6 = vpack.c.bf16 %v5554_v27, %v5553_v38  ;;  %v5492_v21 = vadd.f32 %v9179_v39, %v5416_v51  ;;  %v5417_v32 = vadd.f32 %v5344_v49, %v4863_v53  ;;  %v4864_v58 = vadd.f32 %v4792_v63, %v9158_v56  ;;  %v5352_v25 = vpop.f32.mrf.mxu0 }
 0x31e   : > { %v4796_v30 = vpop.f32.mrf.mxu1  ;;  %v5555_v46 = vmax.f32 %v5491_v48, 0.0 }
 0x31f   : > { %5782 = vst [vmem:[%s9191_s29 + $0xd8] sm:$0xff] %v6509_v6  ;;  %v5556_v40 = vmax.f32 %v5492_v21, 0.0  ;;  %v4865_v15 = vadd.f32 %v4796_v30, %v9161_v31  ;;  %v5493_v34 = vadd.f32 %v9176_v26, %v5417_v32  ;;  %v5418_v47 = vadd.f32 %v5346_v0, %v4864_v58  ;;  %v5354_v56 = vpop.f32.mrf.mxu0 }
 0x320   : > { %v4798_v35 = vpop.f32.mrf.mxu1 }
 0x321   : > { %v6510_v17 = vpack.c.bf16 %v5556_v40, %v5555_v46  ;;  %v5419_v44 = vadd.f32 %v5350_v24, %v4865_v15  ;;  %v4866_v59 = vadd.f32 %v4798_v35, %v9629_v9  ;;  %v5494_v37 = vadd.f32 %v9179_v39, %v5418_v47  ;;  %v5356_v36 = vpop.f32.mrf.mxu0 }
 0x322   : > { %v4800_v52 = vpop.f32.mrf.mxu1  ;;  %v5557_v31 = vmax.f32 %v5493_v34, 0.0 }
 0x323   : > { %5783 = vst [vmem:[%s9191_s29 + $0xe0] sm:$0xff] %v6510_v17  ;;  %v5495_v57 = vadd.f32 %v9176_v26, %v5419_v44  ;;  %v5420_v33 = vadd.f32 %v5352_v25, %v4866_v59  ;;  %v4867_v43 = vadd.f32 %v4800_v52, %v9170_v42  ;;  %v5558_v10 = vmax.f32 %v5494_v37, 0.0 }
 0x324   : > { %v4802_v7 = vpop.f32.mrf.mxu1 }
 0x325   : > { %v5496_v22 = vadd.f32 %v9179_v39, %v5420_v33  ;;  %v5421_v23 = vadd.f32 %v5354_v56, %v4867_v43  ;;  %v4868_v16 = vadd.f32 %v4802_v7, %v9630_v2  ;;  %v6511_v3 = vpack.c.bf16 %v5558_v10, %v5557_v31 }
 0x326   : > { %v5559_v50 = vmax.f32 %v5495_v57, 0.0 }
 0x327   : > { %v5560_v18 = vmax.f32 %v5496_v22, 0.0  ;;  %v5497_v5 = vadd.f32 %v9176_v26, %v5421_v23  ;;  %v5422_v13 = vadd.f32 %v5356_v36, %v4868_v16  ;;  %5784 = vst [vmem:[%s9191_s29 + $0xe8] sm:$0xff] %v6511_v3 }
 0x329   : > { %v6512_v45 = vpack.c.bf16 %v5560_v18, %v5559_v50  ;;  %v5498_v42 = vadd.f32 %v9179_v39, %v5422_v13  ;;  %v5561_v8 = vmax.f32 %v5497_v5, 0.0 }
 0x32b   : > { %5785 = vst [vmem:[%s9191_s29 + $0xf0] sm:$0xff] %v6512_v45  ;;  %v5562_v4 = vmax.f32 %v5498_v42, 0.0 }
 0x32d   : > { %v6513_v54 = vpack.c.bf16 %v5562_v4, %v5561_v8 }
 0x32f   : > { %5786 = vst [vmem:[%s9191_s29 + $0xf8] sm:$0xff] %v6513_v54 }
 0x330 PF: > { %s13_s12 = sadd.s32 1, %s6665_s12  }
 0x331   : > { %p10_p4 = scmp.ge.s32.totalorder %s13_s12, 4  }
 0x333   :  { %12 = sbr.rel (!%p10_p4) target bundleno = 1 (0x1), region = 72 }

// kernel: tile.28
= control target key start
LH: loop header
LB: loop body
LE: loop exit
PB: predicated region body
PF: predicated region fallthrough
CT: control target
= control target key end

     0   :  { %s22_s0 = inlined_call_operand.vmem [shape: f32[12], index: 0, kind: input, shape index: {}]   ;;  %s23_s1 = inlined_call_operand.vmem [shape: f32[8,12], index: 1, kind: output, shape index: {}]  }
   0x1   :  { %v4_v0 = vld [vmem:[%s22_s0] ss:$0 sm:$0xff] }
   0x2   :  { %5 = vst [vmem:[%s23_s1] sm:$0xff] %v4_v0 }

// kernel: tile.29
= control target key start
LH: loop header
LB: loop body
LE: loop exit
PB: predicated region body
PF: predicated region fallthrough
CT: control target
= control target key end

     0   :  { %s69_s10 = smov 84   ;;  %s70_s11 = smov 60   ;;  %vm3_vm0 = vcmask 97280   ;;  %vm9_vm1 = vcmask 786080   ;;  %vm15_vm2 = vcmask 687680   ;;  %vm21_vm3 = vcmask 589280   ;;  %s113_s0 = inlined_call_operand.vmem [shape: f32[8,12], index: 0, kind: input, shape index: {}]   ;;  %s114_s1 = inlined_call_operand.vmem [shape: f32[1,96], index: 1, kind: output, shape index: {}]  }
   0x1   :  { %v55_v0 = vld [vmem:[%s113_s0 + $0x7] sm:$0x1]   ;;  %v57_v1 = vld [vmem:[%s113_s0 + $0x5] sm:$0x1]   ;;  %v56_v2 = vld [vmem:[%s113_s0 + $0x6] sm:$0x1]  }
   0x2   :  { %7 = vrot.lane.b32.xlu0 %v55_v0, %s69_s10  ;;  %19 = vrot.lane.b32.xlu1 %v57_v1, %s70_s11  ;;  %v58_v3 = vld [vmem:[%s113_s0 + $0x4] sm:$0x1]   ;;  %v2_v4 = vld [vmem:[%s113_s0] sm:$0x1]   ;;  %s71_s18 = smov 72   ;;  %s72_s19 = smov 48  }
   0x3   :  { %4 = vst.msk [vmem:[#allocation0] sm:$0x1] %vm3_vm0, %v2_v4   ;;  %v59_v5 = vld [vmem:[%s113_s0 + $0x3] sm:$0x1]   ;;  %v60_v6 = vld [vmem:[%s113_s0 + $0x2] sm:$0x1]  }
   0x4   :  { %s73_s24 = smov 36   ;;  %s74_s25 = smov 24   ;;  %v61_v7 = vld [vmem:[%s113_s0 + $0x1] sm:$0x1]   ;;  %vm27_vm4 = vcmask 490880   ;;  %vm33_vm5 = vcmask 392480  }
   0x5   :  { %s75_s0 = smov 12   ;;  %vm39_vm6 = vcmask 294080   ;;  %vm45_vm7 = vcmask 195680  }
   0x6   :  { %13 = vrot.lane.b32.xlu0 %v56_v2, %s71_s18  ;;  %25 = vrot.lane.b32.xlu1 %v58_v3, %s72_s19 }
   0xa   :  { %31 = vrot.lane.b32.xlu0 %v59_v5, %s73_s24  ;;  %37 = vrot.lane.b32.xlu1 %v60_v6, %s74_s25 }
   0xe   :  { %43 = vrot.lane.b32.xlu0 %v61_v7, %s75_s0 }
  0x74   :  { %v8_v8 = vpop.permute.xlu0 %7   ;;  %v20_v9 = vpop.permute.xlu1 %19  }
  0x75   :  { %10 = vst.msk [vmem:[#allocation0] sm:$0x1] %vm9_vm1, %v8_v8  }
  0x78   :  { %v14_v10 = vpop.permute.xlu0 %13   ;;  %v26_v11 = vpop.permute.xlu1 %25  }
  0x79   :  { %16 = vst.msk [vmem:[#allocation0] sm:$0x1] %vm15_vm2, %v14_v10  }
  0x7a   :  { %22 = vst.msk [vmem:[#allocation0] sm:$0x1] %vm21_vm3, %v20_v9  }
  0x7b   :  { %28 = vst.msk [vmem:[#allocation0] sm:$0x1] %vm27_vm4, %v26_v11  }
  0x7c   :  { %v32_v12 = vpop.permute.xlu0 %31   ;;  %v38_v13 = vpop.permute.xlu1 %37  }
  0x7d   :  { %34 = vst.msk [vmem:[#allocation0] sm:$0x1] %vm33_vm5, %v32_v12  }
  0x7e   :  { %40 = vst.msk [vmem:[#allocation0] sm:$0x1] %vm39_vm6, %v38_v13  }
  0x80   :  { %v44_v14 = vpop.permute.xlu0 %43  }
  0x81   :  { %46 = vst.msk [vmem:[#allocation0] sm:$0x1] %vm45_vm7, %v44_v14  }
  0x88   :  { %v51_v15 = vld [vmem:[#allocation0] sm:$0x1] }
  0x89   :  { %54 = vst [vmem:[%s114_s1] sm:$0x1] %v51_v15 }

// kernel: autoencoder_forward.5
= control target key start
LH: loop header
LB: loop body
LE: loop exit
PB: predicated region body
PF: predicated region fallthrough
CT: control target
= control target key end

     0   :  { %s3268_s12 = smov 0   ;;  %s4210_s0 = inlined_call_operand.vmem [shape: bf16[2,10,10,160], index: 0, kind: input, shape index: {}]   ;;  %s4211_s1 = inlined_call_operand.vmem [shape: bf16[9,160,96], index: 1, kind: input, shape index: {}]   ;;  %s4212_s2 = inlined_call_operand.vmem [shape: f32[1,96], index: 2, kind: input, shape index: {}]   ;;  %s4213_s3 = inlined_call_operand.vmem [shape: bf16[2,1,64,96], index: 3, kind: output, shape index: {}]  }
   0x1 LB: > { %s2621_s13 = sadd.s32 4294967295, %s3245_s12   ;;  %p2625_p0 = scmp.ge.s32.totalorder %s3245_s12, 1  ;;  %s3245_s12 = sphi %s3268_s12, %s13_s12  }
   0x2   : > { %p137_p1 = scmp.lt.s32.totalorder %s3245_s12, 3 }
   0x4   : > { %p138_p2 = pnand %p2625_p0, %p137_p1 }
   0x5   : > { %p161_p3 = scmp.lt.s32.totalorder (!%p138_p2), %s2621_s13, 1 }
   0x6   : > { %141 = sbr.rel (%p138_p2) target bundleno = 426 (0x1aa), region = 32 }
   0xb   : > { %v3125_v0 = vld [vmem:[%s4211_s1 + $0x88] sm:$0xff]   ;;  %v3247_v1 = vmov 0   ;;  %v3126_v2 = vld [vmem:[%s4211_s1 + $0x38] sm:$0xff]   ;;  %v3127_v3 = vld [vmem:[%s4211_s1 + $0x80] sm:$0xff]   ;;  %s4219_s13 = smov (!%p161_p3, %s2621_s13), 1  ;;  %vm432_vm0 = vcmask 261120  }
   0xc   : > { %445 = vmatprep.subr.bf16.mxu0 %v3247_v1  ;;  %618 = vmatprep.subr.bf16.mxu1 %v3247_v1  ;;  %v3128_v4 = vld [vmem:[%s4211_s1 + $0x30] sm:$0xff]   ;;  %v3129_v5 = vld [vmem:[%s4211_s1 + $0x78] sm:$0xff]   ;;  %v3130_v6 = vld [vmem:[%s4211_s1 + $0x28] sm:$0xff]   ;;  %s3115_s30 = smul.u32 160, %s4219_s13  ;;  %vm208_vm1 = vsmask.f32 3328 }
   0xd   : > { %446 = vmatpush1.bf16.msra.mxu0 %v3125_v0  ;;  %619 = vmatpush1.bf16.msra.mxu1 %v3126_v2  ;;  %v3131_v7 = vld [vmem:[%s4211_s1 + $0x70] sm:$0xff]   ;;  %v3132_v8 = vld [vmem:[%s4211_s1 + $0x20] sm:$0xff]   ;;  %v3133_v9 = vld [vmem:[%s4211_s1 + $0x68] sm:$0xff]   ;;  %vm209_vm2 = vsmask.f32 7440  ;;  %vm707_vm4 = vcmask 1042432  }
   0xe   : > { %447 = vmatprep.subr.bf16.mxu0 %v3247_v1  ;;  %620 = vmatprep.subr.bf16.mxu1 %v3247_v1  ;;  %v3134_v10 = vld [vmem:[%s4211_s1 + $0x18] sm:$0xff]   ;;  %s3322_s10 = scalar_lea.vmem %s4210_s0, %s3115_s30  ;;  %v3135_v11 = vld [vmem:[%s4211_s1 + $0x60] sm:$0xff]   ;;  %v3136_v12 = vld [vmem:[%s4211_s1 + $0x10] sm:$0xff]   ;;  %vm708_vm5 = vcmask 1046532   ;;  %s3086_s30 = sshll.u32 %s4219_s13, 5  ;;  %vm2557_vm7 = vcmask 781312  }
   0xf   : > { %v3137_v13 = vld [vmem:[%s4211_s1 + $0x58] sm:$0xff]   ;;  %v3336_v14 = vld [vmem:[%s3322_s10] sm:$0xff]  ;;  %v3339_v15 = vld [vmem:[%s3322_s10 + $0x10] sm:$0xff]  ;;  %s4181_s6 = scalar_lea.vmem %s4213_s3, %s3086_s30 }
  0x10   : > { %v3342_v16 = vld [vmem:[%s3322_s10 + $0x8] sm:$0x11]  ;;  %v3348_v18 = vld [vmem:[%s3322_s10 + $0x18] sm:$0x11]  ;;  %v212_v19 = vshrl.u32 %v3336_v14, 16  ;;  %v215_v20 = vshll.u32 %v3336_v14, 16  ;;  %v2672_v21 = vcombine.high %v3336_v14, %v3339_v15  ;;  %vm3365_vm3 = vmor %vm208_vm1, %vm209_vm2 }
  0x11   : > { %448 = vmatpush1.bf16.msra.mxu0 %v3127_v3  ;;  %621 = vmatpush1.bf16.msra.mxu1 %v3128_v4  ;;  %v3138_v17 = vld [vmem:[%s4211_s1 + $0x8] sm:$0xff]   ;;  %v221_v22 = vshll.u32 %v3342_v16, 16  ;;  %v226_v23 = vshrl.u32 %v3339_v15, 16  ;;  %v229_v24 = vshll.u32 %v3339_v15, 16  ;;  %v235_v25 = vshll.u32 %v3348_v18, 16  ;;  %v3139_v28 = vld [vmem:[%s4211_s1 + $0x50] sm:$0xff]   ;;  %vm3543_vm6 = vmor %vm707_vm4, %vm708_vm5 }
  0x12   : > { %449 = vmatprep.subr.bf16.mxu0 %v3247_v1  ;;  %622 = vmatprep.subr.bf16.mxu1 %v3247_v1  ;;  %v214_v26 = vrot.slane %v212_v19, 4  ;;  %v217_v27 = vrot.slane %v215_v20, 5  ;;  %v3140_v36 = vld [vmem:[%s4211_s1] sm:$0xff]   ;;  %v3141_v38 = vld [vmem:[%s4211_s1 + $0x98] sm:$0xff]   ;;  %v3142_v40 = vld [vmem:[%s4211_s1 + $0x48] sm:$0xff]  }
  0x13   : > { %v223_v29 = vrot.slane %v221_v22, 5  ;;  %v228_v30 = vrot.slane %v226_v23, 4  ;;  %v231_v31 = vrot.slane %v229_v24, 5  ;;  %2689 = vmatprep.mubr.msk.bf16.mxu1 %vm432_vm0, %v2672_v21  ;;  %v237_v35 = vrot.slane %v235_v25, 5  ;;  %v3385_v42 = vld [vmem:[%s3322_s10 + $0x20] sm:$0xff]  ;;  %v3391_v44 = vld [vmem:[%s3322_s10 + $0x30] sm:$0xff] }
  0x14   : > { %v218_v32 = vor.u32 %v217_v27, %v214_v26  ;;  %v3394_v45 = vld [vmem:[%s3322_s10 + $0x28] sm:$0x11]  ;;  %v3397_v46 = vld [vmem:[%s3322_s10 + $0x38] sm:$0x11]  ;;  %v240_v47 = vshrl.u32 %v3385_v42, 16  ;;  %v243_v49 = vshll.u32 %v3385_v42, 16  ;;  %v2674_v26 = vcombine.high %v3385_v42, %v3391_v44 }
  0x15   : > { %450 = vmatpush1.bf16.msra.mxu0 %v3129_v5  ;;  %623 = vmatpush1.bf16.msra.mxu1 %v3130_v6  ;;  %v232_v34 = vor.u32 %v231_v31, %v228_v30  ;;  %v249_v50 = vshll.u32 %v3394_v45, 16  ;;  %v254_v52 = vshrl.u32 %v3391_v44, 16  ;;  %v257_v53 = vshll.u32 %v3391_v44, 16  ;;  %v3143_v55 = vld [vmem:[%s4211_s1 + $0x90] sm:$0xff]   ;;  %v3144_v57 = vld [vmem:[%s4211_s1 + $0x40] sm:$0xff]   ;;  %v3147_v62 = vld [vmem:[%s4211_s1 + $0xd8] sm:$0xff]  }
  0x16   : > { %451 = vmatprep.subr.bf16.mxu0 %v3247_v1  ;;  %624 = vmatprep.subr.bf16.mxu1 %v3247_v1  ;;  %v219_v37 = vrot.slane %v218_v32, 4  ;;  %v242_v51 = vrot.slane %v240_v47, 4  ;;  %v263_v54 = vshll.u32 %v3397_v46, 16  ;;  %v245_v56 = vrot.slane %v243_v49, 5  ;;  %v3420_v2 = vld [vmem:[%s3322_s10 + $0x40] sm:$0xff]  ;;  %v3423_v3 = vld [vmem:[%s3322_s10 + $0x50] sm:$0xff] }
  0x17   : > { %v3377_v39 = vrot.slane %v232_v34, 4  ;;  %v251_v58 = vrot.slane %v249_v50, 5  ;;  %v256_v59 = vrot.slane %v254_v52, 4  ;;  %v259_v60 = vrot.slane %v257_v53, 5  ;;  %v3150_v31 = vld [vmem:[%s4211_s1 + $0x120] sm:$0xff]  }
  0x18   : > { %v224_v41 = vsel %vm3365_vm3, %v219_v37, %v223_v29  ;;  %v246_v61 = vor.u32 %v245_v56, %v242_v51  ;;  %v265_v0 = vrot.slane %v263_v54, 5  ;;  %v2671_v5 = vcombine.low %v3336_v14, %v3339_v15  ;;  %v3148_v14 = vld [vmem:[%s4211_s1 + $0x128] sm:$0xff]   ;;  %v3152_v56 = vld [vmem:[%s4211_s1 + $0x118] sm:$0xff]  }
  0x19   : > { %452 = vmatpush1.bf16.msra.mxu0 %v3131_v7  ;;  %625 = vmatpush1.bf16.msra.mxu1 %v3132_v8  ;;  %v238_v43 = vsel %vm3365_vm3, %v3377_v39, %v237_v35  ;;  %v260_v63 = vor.u32 %v259_v60, %v256_v59  ;;  %v3430_v7 = vld [vmem:[%s3322_s10 + $0x48] sm:$0x11]  ;;  %v3433_v8 = vld [vmem:[%s3322_s10 + $0x58] sm:$0x11]  ;;  %v285_v20 = vshll.u32 %v3423_v3, 16  ;;  %v3464_v35 = vld [vmem:[%s3322_s10 + $0x60] sm:$0xff]  ;;  %v2673_v37 = vcombine.low %v3385_v42, %v3391_v44 }
  0x1a   : > { %453 = vmatprep.subr.bf16.mxu0 %v3247_v1  ;;  %626 = vmatprep.subr.bf16.mxu1 %v3247_v1  ;;  %v2650_v48 = vcombine.high %v224_v41, %v238_v43  ;;  %v2649_v4 = vcombine.low %v224_v41, %v238_v43  ;;  %v3427_v6 = vrot.slane %v246_v61, 4  ;;  %v291_v21 = vshll.u32 %v3433_v8, 16  ;;  %v3476_v41 = vld [vmem:[%s3322_s10 + $0x68] sm:$0x11]  ;;  %v3479_v43 = vld [vmem:[%s3322_s10 + $0x78] sm:$0x11] }
  0x1b   : > { %v287_v27 = vrot.slane %v285_v20, 5  ;;  %v299_v49 = vshll.u32 %v3464_v35, 16  ;;  %v305_v50 = vshll.u32 %v3476_v41, 16  ;;  %v3151_v51 = vld [vmem:[%s4211_s1 + $0xc8] sm:$0xff]  }
  0x1c   : > { %2667 = vmatprep.mubr.msk.bf16.mxu0 %vm432_vm0, %v2650_v48  ;;  %v293_v34 = vrot.slane %v291_v21, 5  ;;  %v296_v48 = vshrl.u32 %v3464_v35, 16 }
  0x1d   : > { %454 = vmatpush1.bf16.msra.mxu0 %v3133_v9  ;;  %627 = vmatpush1.bf16.msra.mxu1 %v3134_v10  ;;  %v268_v9 = vshrl.u32 %v3420_v2, 16  ;;  %v3436_v10 = vrot.slane %v260_v63, 4  ;;  %v301_v59 = vrot.slane %v299_v49, 5  ;;  %v2676_v63 = vcombine.high %v3420_v2, %v3423_v3 }
  0x1e   : > { %455 = vmatprep.subr.bf16.mxu0 %v3247_v1  ;;  %628 = vmatprep.subr.bf16.mxu1 %v3247_v1 }
  0x1f   : > { %v270_v19 = vrot.slane %v268_v9, 4  ;;  %v266_v22 = vsel %vm3365_vm3, %v3436_v10, %v265_v0 }
  0x21   : > { %456 = vmatpush1.bf16.msra.mxu0 %v3135_v11  ;;  %629 = vmatpush1.bf16.msra.mxu1 %v3136_v12  ;;  %v271_v11 = vshll.u32 %v3420_v2, 16  ;;  %v277_v12 = vshll.u32 %v3430_v7, 16 }
  0x22   : > { %457 = vmatprep.subr.bf16.mxu0 %v3247_v1  ;;  %630 = vmatprep.subr.bf16.mxu1 %v3247_v1 }
  0x23   : > { %v273_v23 = vrot.slane %v271_v11, 5  ;;  %v279_v30 = vrot.slane %v277_v12, 5  ;;  %v3156_v12 = vld [vmem:[%s4211_s1 + $0x110] sm:$0xff]  }
  0x25   : > { %458 = vmatpush1.bf16.msra.mxu0 %v3137_v13  ;;  %631 = vmatpush1.bf16.msra.mxu1 %v3138_v17  ;;  %v282_v13 = vshrl.u32 %v3423_v3, 16  ;;  %v252_v17 = vsel %vm3365_vm3, %v3427_v6, %v251_v58  ;;  %v274_v29 = vor.u32 %v273_v23, %v270_v19  ;;  %v298_v58 = vrot.slane %v296_v48, 4  ;;  %v3158_v19 = vld [vmem:[%s4211_s1 + $0x108] sm:$0xff]  }
  0x26   : > { %459 = vmatprep.subr.bf16.mxu0 %v3247_v1  ;;  %632 = vmatprep.subr.bf16.mxu1 %v3247_v1  ;;  %v2652_v25 = vcombine.high %v252_v17, %v266_v22  ;;  %v2675_v23 = vcombine.low %v3420_v2, %v3423_v3  ;;  %v3163_v48 = vld [vmem:[%s4211_s1 + $0xa8] sm:$0xff]  }
  0x27   : > { %v284_v24 = vrot.slane %v282_v13, 4  ;;  %v302_v0 = vor.u32 %v301_v59, %v298_v58  ;;  %v3170_v58 = vld [vmem:[%s4211_s1 + $0x138] sm:$0xff]   ;;  %v720_v59 = vrot.slane %v3394_v45, 5 }
  0x29   : > { %460 = vmatpush1.bf16.msra.mxu0 %v3139_v28  ;;  %633 = vmatpush1.bf16.msra.mxu1 %v3140_v36  ;;  %v3149_v28 = vld [vmem:[%s4211_s1 + $0xd0] sm:$0xff]   ;;  %v288_v32 = vor.u32 %v287_v27, %v284_v24  ;;  %v2651_v36 = vcombine.low %v252_v17, %v266_v22  ;;  %v3513_v13 = vrot.slane %v302_v0, 4  ;;  %v683_v22 = vld [vmem:[%s3322_s10] sm:$0xee] }
  0x2a   : > { %473 = vmatprep.subr.bf16.mxu0 %v3247_v1  ;;  %646 = vmatprep.subr.bf16.mxu1 %v3247_v1  ;;  %v3172_v0 = vld [vmem:[%s4211_s1 + $0x130] sm:$0xff]  }
  0x2b   : > { %v3482_v47 = vrot.slane %v288_v32, 4 }
  0x2d   : > { %474 = vmatpush2.bf16.msra.mxu0 %v3141_v38  ;;  %647 = vmatpush2.bf16.msra.mxu1 %v3142_v40  ;;  %v3470_v38 = vrot.slane %v274_v29, 4  ;;  %v3473_v40 = vld [vmem:[%s3322_s10 + $0x70] sm:$0xff] }
  0x2e   : > { %475 = vmatprep.subr.bf16.mxu0 %v3247_v1  ;;  %648 = vmatprep.subr.bf16.mxu1 %v3247_v1  ;;  %v310_v53 = vshrl.u32 %v3473_v40, 16  ;;  %v313_v54 = vshll.u32 %v3473_v40, 16  ;;  %v2678_v29 = vcombine.high %v3464_v35, %v3473_v40  ;;  %v2677_v49 = vcombine.low %v3464_v35, %v3473_v40 }
  0x2f   : > { %v280_v52 = vsel %vm3365_vm3, %v3470_v38, %v279_v30 }
  0x30   : > { %v312_v61 = vrot.slane %v310_v53, 4  ;;  %v3167_v53 = vld [vmem:[%s4211_s1 + $0xa0] sm:$0xff]  }
  0x31   : > { %476 = vmatpush2.bf16.msra.mxu0 %v3143_v55  ;;  %649 = vmatpush2.bf16.msra.mxu1 %v3144_v57  ;;  %v319_v55 = vshll.u32 %v3479_v43, 16  ;;  %v294_v57 = vsel %vm3365_vm3, %v3482_v47, %v293_v34 }
  0x32   : > { %863 = vmatprep.subr.bf16.mxu0 %v3247_v1  ;;  %1074 = vmatprep.subr.bf16.mxu1 %v3247_v1  ;;  %v2654_v60 = vcombine.high %v280_v52, %v294_v57  ;;  %v2653_v20 = vcombine.low %v280_v52, %v294_v57  ;;  %v2772_v52 = vcombine.high %v3339_v15, %v3385_v42  ;;  %v686_v57 = vld [vmem:[%s3322_s10 + $0x30] sm:$0xee] }
  0x33   : > { %v321_v11 = vrot.slane %v319_v55, 5  ;;  %v3169_v55 = vld [vmem:[%s4211_s1 + $0xe8] sm:$0xff]  }
  0x34   : > { %478 = vmatmul.mubr.bf16.vlgmr.msra.gmra.mxu0 %v2649_v4  ;;  %651 = vmatmul.mubr.bf16.vlgmr.msra.gmra.mxu1 %v2671_v5  ;;  %v307_v4 = vrot.slane %v305_v50, 5  ;;  %v3155_v5 = vld [vmem:[%s4211_s1 + $0xc0] sm:$0xff]   ;;  %v3164_v50 = vld [vmem:[%s4211_s1 + $0xf8] sm:$0xff]  }
  0x35   : > { %864 = vmatpush1.bf16.msra.mxu0 %v3147_v62  ;;  %1075 = vmatpush1.bf16.msra.mxu1 %v3148_v14  ;;  %v315_v62 = vrot.slane %v313_v54, 5  ;;  %v3157_v14 = vld [vmem:[%s4211_s1 + $0xb8] sm:$0xff]   ;;  %v3168_v54 = vld [vmem:[%s4211_s1 + $0xf0] sm:$0xff]  }
  0x36   : > { %865 = vmatprep.subr.bf16.mxu0 %v3247_v1  ;;  %1076 = vmatprep.subr.bf16.mxu1 %v3247_v1  ;;  %v308_v21 = vsel %vm3365_vm3, %v3513_v13, %v307_v4  ;;  %v3605_v4 = vld [vmem:[%s3322_s10 + $0x18] sm:$0x11] }
  0x37   : > { %2668 = vmatprep.mubr.msk.bf16.mxu0 %vm432_vm0, %v2652_v25  ;;  %2690 = vmatprep.mubr.msk.bf16.mxu1 %vm432_vm0, %v2674_v26  ;;  %v316_v9 = vor.u32 %v315_v62, %v312_v61  ;;  %v684_v25 = vld [vmem:[%s3322_s10 + $0x10] sm:$0xee]  ;;  %v712_v26 = vrot.slane %v3342_v16, 5  ;;  %v2696_v62 = vrot.slane %v686_v57, 9 }
  0x38   : > { %v2694_v32 = vrot.slane %v684_v25, 9  ;;  %v3161_v16 = vld [vmem:[%s4211_s1 + $0xb0] sm:$0xff]  }
  0x39   : > { %866 = vmatpush1.bf16.msra.mxu0 %v3149_v28  ;;  %1077 = vmatpush1.bf16.msra.mxu1 %v3150_v31  ;;  %v3520_v17 = vrot.slane %v316_v9, 4  ;;  %v716_v28 = vrot.slane %v3348_v18, 5  ;;  %v2693_v31 = vrot.slane %v683_v22, 9  ;;  %v3162_v18 = vld [vmem:[%s4211_s1 + $0x100] sm:$0xff]   ;;  %v3175_v9 = vld [vmem:[%s4211_s1 + $0x178] sm:$0xff]   ;;  %v3176_v22 = vld [vmem:[%s4211_s1 + $0x1c8] sm:$0xff]  }
  0x3a   : > { %867 = vmatprep.subr.bf16.mxu0 %v3247_v1  ;;  %1078 = vmatprep.subr.bf16.mxu1 %v3247_v1 }
  0x3b   : > { %v322_v24 = vsel %vm3365_vm3, %v3520_v17, %v321_v11 }
  0x3c   : > { %486 = vmatmul.mubr.bf16.gmra.mxu0 %v2651_v36  ;;  %659 = vmatmul.mubr.bf16.gmra.mxu1 %v2673_v37  ;;  %v2656_v27 = vcombine.high %v308_v21, %v322_v24  ;;  %v2655_v34 = vcombine.low %v308_v21, %v322_v24  ;;  %v713_v36 = vsel %vm3543_vm6, %v2693_v31, %v712_v26  ;;  %v688_v21 = vld [vmem:[%s3322_s10 + $0x50] sm:$0xee] }
  0x3d   : > { %868 = vmatpush1.bf16.msra.mxu0 %v3151_v51  ;;  %1079 = vmatpush1.bf16.msra.mxu1 %v3152_v56  ;;  %v717_v37 = vsel %vm3543_vm6, %v2694_v32, %v716_v28  ;;  %v685_v56 = vld [vmem:[%s3322_s10 + $0x20] sm:$0xee] }
  0x3e   : > { %869 = vmatprep.subr.bf16.mxu0 %v3247_v1  ;;  %1080 = vmatprep.subr.bf16.mxu1 %v3247_v1  ;;  %v2722_v51 = vcombine.high %v713_v36, %v717_v37  ;;  %v2695_v61 = vrot.slane %v685_v56, 9  ;;  %v2721_v45 = vcombine.low %v713_v36, %v717_v37  ;;  %v690_v36 = vld [vmem:[%s3322_s10 + $0x70] sm:$0xee]  ;;  %v2776_v56 = vcombine.high %v3423_v3, %v3464_v35 }
  0x3f   : > { %2669 = vmatprep.mubr.msk.bf16.mxu0 %vm432_vm0, %v2654_v60  ;;  %2691 = vmatprep.mubr.msk.bf16.mxu1 %vm432_vm0, %v2676_v63  ;;  %v724_v60 = vrot.slane %v3397_v46, 5  ;;  %v3171_v63 = vld [vmem:[%s4211_s1 + $0xe0] sm:$0xff]   ;;  %v728_v46 = vrot.slane %v3430_v7, 5  ;;  %v2771_v7 = vcombine.low %v3339_v15, %v3385_v42  ;;  %v2774_v15 = vcombine.high %v3391_v44, %v3420_v2 }
  0x40   : > { %v721_v11 = vsel %vm3543_vm6, %v2695_v61, %v720_v59  ;;  %v2700_v61 = vrot.slane %v690_v36, 9 }
  0x41   : > { %870 = vmatpush1.bf16.msra.mxu0 %v3155_v5  ;;  %1081 = vmatpush1.bf16.msra.mxu1 %v3156_v12  ;;  %v3608_v5 = vld [vmem:[%s3322_s10 + $0x28] sm:$0x11]  ;;  %v725_v12 = vsel %vm3543_vm6, %v2696_v62, %v724_v60 }
  0x42   : > { %871 = vmatprep.subr.bf16.mxu0 %v3247_v1  ;;  %1082 = vmatprep.subr.bf16.mxu1 %v3247_v1  ;;  %v2724_v26 = vcombine.high %v721_v11, %v725_v12 }
  0x44   : > { %494 = vmatmul.mubr.bf16.gmra.mxu0 %v2653_v20  ;;  %667 = vmatmul.mubr.bf16.gmra.mxu1 %v2675_v23  ;;  %v687_v20 = vld [vmem:[%s3322_s10 + $0x40] sm:$0xee]  ;;  %v732_v23 = vrot.slane %v3433_v8, 5 }
  0x45   : > { %872 = vmatpush1.bf16.msra.mxu0 %v3157_v14  ;;  %1083 = vmatpush1.bf16.msra.mxu1 %v3158_v19  ;;  %v1173_v14 = vshll.u32 %v3605_v4, 16  ;;  %v1187_v19 = vshll.u32 %v3608_v5, 16  ;;  %v2697_v42 = vrot.slane %v687_v20, 9  ;;  %v3725_v20 = vld [vmem:[%s3322_s10 + $0x80] sm:$0xff] }
  0x46   : > { %873 = vmatprep.subr.bf16.mxu0 %v3247_v1  ;;  %1084 = vmatprep.subr.bf16.mxu1 %v3247_v1 }
  0x47   : > { %2670 = vmatprep.mubr.msk.bf16.mxu0 %vm432_vm0, %v2656_v27  ;;  %2692 = vmatprep.mubr.msk.bf16.mxu1 %vm432_vm0, %v2678_v29  ;;  %v1175_v24 = vrot.slane %v1173_v14, 5  ;;  %v1189_v25 = vrot.slane %v1187_v19, 5  ;;  %v2698_v27 = vrot.slane %v688_v21, 9  ;;  %v3177_v29 = vld [vmem:[%s4211_s1 + $0x170] sm:$0xff]  }
  0x49   : > { %874 = vmatpush1.bf16.msra.mxu0 %v3161_v16  ;;  %1085 = vmatpush1.bf16.msra.mxu1 %v3162_v18  ;;  %v3634_v28 = vsel %vm3365_vm3, %v3377_v39, %v1175_v24  ;;  %v3639_v8 = vsel %vm3365_vm3, %v3427_v6, %v1189_v25  ;;  %v3649_v39 = vld [vmem:[%s3322_s10 + $0x38] sm:$0x11]  ;;  %v3178_v6 = vld [vmem:[%s4211_s1 + $0x1c0] sm:$0xff]   ;;  %v3656_v16 = vld [vmem:[%s3322_s10 + $0x48] sm:$0x11] }
  0x4a   : > { %875 = vmatprep.subr.bf16.mxu0 %v3247_v1  ;;  %1086 = vmatprep.subr.bf16.mxu1 %v3247_v1  ;;  %v2829_v31 = vcombine.low %v3634_v28, %v3639_v8  ;;  %v2830_v32 = vcombine.high %v3634_v28, %v3639_v8  ;;  %v1201_v18 = vshll.u32 %v3649_v39, 16  ;;  %v1215_v37 = vshll.u32 %v3656_v16, 16  ;;  %v3205_v28 = vld [vmem:[%s4211_s1 + $0x208] sm:$0xff]  }
  0x4c   : > { %502 = vmatmul.mubr.bf16.gmra.mxu0 %v2655_v34  ;;  %675 = vmatmul.mubr.bf16.gmra.mxu1 %v2677_v49  ;;  %v689_v34 = vld [vmem:[%s3322_s10 + $0x60] sm:$0xee]  ;;  %v729_v49 = vsel %vm3543_vm6, %v2697_v42, %v728_v46  ;;  %v3186_v46 = vld [vmem:[%s4211_s1 + $0x158] sm:$0xff]  }
  0x4d   : > { %876 = vmatpush1.bf16.msra.mxu0 %v3163_v48  ;;  %1087 = vmatpush1.bf16.msra.mxu1 %v3164_v50  ;;  %v2723_v48 = vcombine.low %v721_v11, %v725_v12  ;;  %v733_v50 = vsel %vm3543_vm6, %v2698_v27, %v732_v23  ;;  %v2699_v60 = vrot.slane %v689_v34, 9  ;;  %v3187_v23 = vld [vmem:[%s4211_s1 + $0x1a8] sm:$0xff]   ;;  %v1495_v27 = vrot.slane %v3605_v4, 5 }
  0x4e   : > { %877 = vmatprep.subr.bf16.mxu0 %v3247_v1  ;;  %1088 = vmatprep.subr.bf16.mxu1 %v3247_v1  ;;  %v2725_v12 = vcombine.low %v729_v49, %v733_v50  ;;  %v3192_v34 = vld [vmem:[%s4211_s1 + $0x148] sm:$0xff]   ;;  %v2777_v4 = vcombine.low %v3473_v40, %v3725_v20 }
  0x4f   : > { %2739 = vmatprep.mubr.msk.bf16.mxu0 %vm432_vm0, %v2722_v51  ;;  %2789 = vmatprep.mubr.msk.bf16.mxu1 %vm432_vm0, %v2772_v52  ;;  %v1203_v51 = vrot.slane %v1201_v18, 5  ;;  %v3180_v52 = vld [vmem:[%s4211_s1 + $0x168] sm:$0xff]  }
  0x51   : > { %878 = vmatpush1.bf16.msra.mxu0 %v3167_v53  ;;  %1089 = vmatpush1.bf16.msra.mxu1 %v3168_v54  ;;  %v2773_v53 = vcombine.low %v3391_v44, %v3420_v2  ;;  %v1217_v54 = vrot.slane %v1215_v37, 5  ;;  %v3683_v57 = vsel %vm3365_vm3, %v3436_v10, %v1203_v51  ;;  %v2726_v44 = vcombine.high %v729_v49, %v733_v50  ;;  %v3193_v37 = vld [vmem:[%s4211_s1 + $0x198] sm:$0xff]   ;;  %v3196_v49 = vld [vmem:[%s4211_s1 + $0x190] sm:$0xff]   ;;  %v3197_v50 = vld [vmem:[%s4211_s1 + $0x188] sm:$0xff]  }
  0x52   : > { %891 = vmatprep.subr.bf16.mxu0 %v3247_v1  ;;  %1102 = vmatprep.subr.bf16.mxu1 %v3247_v1  ;;  %v736_v2 = vrot.slane %v3476_v41, 5  ;;  %v3198_v51 = vld [vmem:[%s4211_s1 + $0x1d8] sm:$0xff]  }
  0x53   : > { %v3691_v59 = vsel %vm3365_vm3, %v3470_v38, %v1217_v54  ;;  %v3183_v38 = vld [vmem:[%s4211_s1 + $0x160] sm:$0xff]  }
  0x54   : > { %v2832_v62 = vcombine.high %v3683_v57, %v3691_v59  ;;  %v2831_v10 = vcombine.low %v3683_v57, %v3691_v59  ;;  %v737_v14 = vsel %vm3543_vm6, %v2699_v60, %v736_v2  ;;  %v3200_v2 = vld [vmem:[%s4211_s1 + $0x1d0] sm:$0xff]   ;;  %v1265_v60 = vshll.u32 %v3725_v20, 16  ;;  %v3882_v59 = vld [vmem:[%s3322_s10 + $0x28] sm:$0x11] }
  0x55   : > { %892 = vmatpush2.bf16.msra.mxu0 %v3169_v55  ;;  %1103 = vmatpush2.bf16.msra.mxu1 %v3170_v58  ;;  %v3181_v55 = vld [vmem:[%s4211_s1 + $0x1b8] sm:$0xff]   ;;  %v740_v58 = vrot.slane %v3479_v43, 5  ;;  %v3208_v57 = vld [vmem:[%s4211_s1 + $0x250] sm:$0xff]  }
  0x56   : > { %893 = vmatprep.subr.bf16.mxu0 %v3247_v1  ;;  %1104 = vmatprep.subr.bf16.mxu1 %v3247_v1 }
  0x57   : > { %v741_v19 = vsel %vm3543_vm6, %v2700_v61, %v740_v58  ;;  %v1262_v58 = vshrl.u32 %v3725_v20, 16  ;;  %v2855_v61 = vld [vmem:[%s3322_s10 + $0x50] sm:$0xee] }
  0x58   : > { %v2728_v25 = vcombine.high %v737_v14, %v741_v19  ;;  %v2727_v18 = vcombine.low %v737_v14, %v741_v19 }
  0x59   : > { %894 = vmatpush2.bf16.msra.mxu0 %v3171_v63  ;;  %1105 = vmatpush2.bf16.msra.mxu1 %v3172_v0  ;;  %v3698_v63 = vld [vmem:[%s3322_s10 + $0x58] sm:$0x11]  ;;  %v3701_v0 = vld [vmem:[%s3322_s10 + $0x68] sm:$0x11] }
  0x5a   : > { %1396 = vmatprep.subr.bf16.mxu0 %v3247_v1  ;;  %1646 = vmatprep.subr.bf16.mxu1 %v3247_v1  ;;  %v1229_v41 = vshll.u32 %v3698_v63, 16  ;;  %v1243_v43 = vshll.u32 %v3701_v0, 16  ;;  %v1511_v14 = vrot.slane %v3698_v63, 5  ;;  %v3843_v63 = vld [vmem:[%s3322_s10 + $0x30] sm:$0xff] }
  0x5c   : > { %896 = vmatmul.mubr.bf16.vlgmr.msra.gmra.mxu0 %v2721_v45  ;;  %1107 = vmatmul.mubr.bf16.vlgmr.msra.gmra.mxu1 %v2771_v7  ;;  %v3184_v45 = vld [vmem:[%s4211_s1 + $0x1b0] sm:$0xff]   ;;  %v1245_v11 = vrot.slane %v1243_v43, 5  ;;  %v2775_v7 = vcombine.low %v3423_v3, %v3464_v35  ;;  %v2852_v35 = vld [vmem:[%s3322_s10 + $0x20] sm:$0xee] }
  0x5d   : > { %1397 = vmatpush1.bf16.msra.mxu0 %v3175_v9  ;;  %1647 = vmatpush1.bf16.msra.mxu1 %v3176_v22  ;;  %v1231_v9 = vrot.slane %v1229_v41, 5  ;;  %v2851_v3 = vld [vmem:[%s3322_s10 + $0x10] sm:$0xee] }
  0x5e   : > { %1398 = vmatprep.subr.bf16.mxu0 %v3247_v1  ;;  %1648 = vmatprep.subr.bf16.mxu1 %v3247_v1  ;;  %v3735_v22 = vsel %vm3365_vm3, %v3513_v13, %v1245_v11  ;;  %v3189_v13 = vld [vmem:[%s4211_s1 + $0x150] sm:$0xff]   ;;  %v2859_v42 = vrot.slane %v2851_v3, 9 }
  0x5f   : > { %2740 = vmatprep.mubr.msk.bf16.mxu0 %vm432_vm0, %v2724_v26  ;;  %2790 = vmatprep.mubr.msk.bf16.mxu1 %vm432_vm0, %v2774_v15  ;;  %v3730_v21 = vsel %vm3365_vm3, %v3482_v47, %v1231_v9  ;;  %v3190_v26 = vld [vmem:[%s4211_s1 + $0x1a0] sm:$0xff]   ;;  %v2778_v15 = vcombine.high %v3473_v40, %v3725_v20  ;;  %v1267_v9 = vrot.slane %v1265_v60, 5  ;;  %v3203_v11 = vld [vmem:[%s4211_s1 + $0x210] sm:$0xff]  }
  0x60   : > { %v2834_v24 = vcombine.high %v3730_v21, %v3735_v22  ;;  %v2833_v47 = vcombine.low %v3730_v21, %v3735_v22  ;;  %v3195_v40 = vld [vmem:[%s4211_s1 + $0x140] sm:$0xff]  }
  0x61   : > { %1399 = vmatpush1.bf16.msra.mxu0 %v3177_v29  ;;  %1649 = vmatpush1.bf16.msra.mxu1 %v3178_v6  ;;  %v2860_v29 = vrot.slane %v2852_v35, 9  ;;  %v1499_v6 = vrot.slane %v3608_v5, 5  ;;  %v1496_v5 = vsel %vm3543_vm6, %v2859_v42, %v1495_v27  ;;  %v2806_v35 = vld [vmem:[%s3322_s10 + $0x78] sm:$0x11]  ;;  %v2857_v27 = vld [vmem:[%s3322_s10 + $0x70] sm:$0xee] }
  0x62   : > { %1400 = vmatprep.subr.bf16.mxu0 %v3247_v1  ;;  %1650 = vmatprep.subr.bf16.mxu1 %v3247_v1  ;;  %v1257_v8 = vshll.u32 %v2806_v35, 16  ;;  %v3212_v21 = vld [vmem:[%s4211_s1 + $0x240] sm:$0xff]  }
  0x63   : > { %v1500_v36 = vsel %vm3543_vm6, %v2860_v29, %v1499_v6  ;;  %v2858_v29 = vld [vmem:[%s3322_s10 + $0x80] sm:$0xee] }
  0x64   : > { %904 = vmatmul.mubr.bf16.gmra.mxu0 %v2723_v48  ;;  %1115 = vmatmul.mubr.bf16.gmra.mxu1 %v2773_v53  ;;  %v2888_v48 = vcombine.high %v1496_v5, %v1500_v36  ;;  %v2854_v53 = vld [vmem:[%s3322_s10 + $0x40] sm:$0xee] }
  0x65   : > { %1401 = vmatpush1.bf16.msra.mxu0 %v3180_v52  ;;  %1651 = vmatpush1.bf16.msra.mxu1 %v3181_v55  ;;  %v2853_v52 = vld [vmem:[%s3322_s10 + $0x30] sm:$0xee]  ;;  %v1503_v55 = vrot.slane %v3649_v39, 5  ;;  %v2887_v39 = vcombine.low %v1496_v5, %v1500_v36 }
  0x66   : > { %1402 = vmatprep.subr.bf16.mxu0 %v3247_v1  ;;  %1652 = vmatprep.subr.bf16.mxu1 %v3247_v1  ;;  %v2861_v54 = vrot.slane %v2853_v52, 9  ;;  %v3207_v52 = vld [vmem:[%s4211_s1 + $0x200] sm:$0xff]  }
  0x67   : > { %2741 = vmatprep.mubr.msk.bf16.mxu0 %vm432_vm0, %v2726_v44  ;;  %2791 = vmatprep.mubr.msk.bf16.mxu1 %vm432_vm0, %v2776_v56  ;;  %v2862_v56 = vrot.slane %v2854_v53, 9  ;;  %v1507_v44 = vrot.slane %v3656_v16, 5  ;;  %v3201_v16 = vld [vmem:[%s4211_s1 + $0x218] sm:$0xff]  }
  0x68   : > { %v1504_v41 = vsel %vm3543_vm6, %v2861_v54, %v1503_v55 }
  0x69   : > { %1403 = vmatpush1.bf16.msra.mxu0 %v3183_v38  ;;  %1653 = vmatpush1.bf16.msra.mxu1 %v3184_v45  ;;  %v2856_v38 = vld [vmem:[%s3322_s10 + $0x60] sm:$0xee]  ;;  %v1508_v43 = vsel %vm3543_vm6, %v2862_v56, %v1507_v44  ;;  %v3202_v45 = vld [vmem:[%s4211_s1 + $0x268] sm:$0xff]  }
  0x6a   : > { %1404 = vmatprep.subr.bf16.mxu0 %v3247_v1  ;;  %1654 = vmatprep.subr.bf16.mxu1 %v3247_v1  ;;  %v2864_v19 = vrot.slane %v2856_v38, 9  ;;  %v2890_v3 = vcombine.high %v1504_v41, %v1508_v43  ;;  %v1956_v38 = vshll.u32 %v3882_v59, 16 }
  0x6c   : > { %912 = vmatmul.mubr.bf16.gmra.mxu0 %v2725_v12  ;;  %1123 = vmatmul.mubr.bf16.gmra.mxu1 %v2775_v7  ;;  %v2863_v12 = vrot.slane %v2855_v61, 9  ;;  %v1515_v7 = vrot.slane %v3701_v0, 5 }
  0x6d   : > { %1405 = vmatpush1.bf16.msra.mxu0 %v3186_v46  ;;  %1655 = vmatpush1.bf16.msra.mxu1 %v3187_v23  ;;  %v1264_v46 = vrot.slane %v1262_v58, 4  ;;  %v3204_v23 = vld [vmem:[%s4211_s1 + $0x260] sm:$0xff]  }
  0x6e   : > { %1406 = vmatprep.subr.bf16.mxu0 %v3247_v1  ;;  %1656 = vmatprep.subr.bf16.mxu1 %v3247_v1  ;;  %v1516_v42 = vsel %vm3543_vm6, %v2864_v19, %v1515_v7  ;;  %v3923_v19 = vld [vmem:[%s3322_s10 + $0x50] sm:$0xff] }
  0x6f   : > { %2742 = vmatprep.mubr.msk.bf16.mxu0 %vm432_vm0, %v2728_v25  ;;  %2792 = vmatprep.mubr.msk.bf16.mxu1 %vm432_vm0, %v2778_v15  ;;  %v2808_v25 = vld [vmem:[%s3322_s10 + $0x88] sm:$0x11]  ;;  %v1512_v15 = vsel %vm3543_vm6, %v2863_v12, %v1511_v14 }
  0x70   : > { %v1271_v0 = vshll.u32 %v2808_v25, 16  ;;  %v2892_v5 = vcombine.high %v1512_v15, %v1516_v42  ;;  %v2891_v56 = vcombine.low %v1512_v15, %v1516_v42 }
  0x71   : > { %1407 = vmatpush1.bf16.msra.mxu0 %v3189_v13  ;;  %1657 = vmatpush1.bf16.msra.mxu1 %v3190_v26  ;;  %v3839_v13 = vld [vmem:[%s3322_s10 + $0x20] sm:$0xff]  ;;  %v2889_v26 = vcombine.low %v1504_v41, %v1508_v43 }
  0x72   : > { %1408 = vmatprep.subr.bf16.mxu0 %v3247_v1  ;;  %1658 = vmatprep.subr.bf16.mxu1 %v3247_v1  ;;  %v1950_v6 = vshll.u32 %v3839_v13, 16 }
  0x74   : > { %920 = vmatmul.mubr.bf16.gmra.mxu0 %v2727_v18  ;;  %1131 = vmatmul.mubr.bf16.gmra.mxu1 %v2777_v4  ;;  %v1961_v18 = vshrl.u32 %v3843_v63, 16  ;;  %v3206_v4 = vld [vmem:[%s4211_s1 + $0x258] sm:$0xff]  }
  0x75   : > { %1409 = vmatpush1.bf16.msra.mxu0 %v3192_v34  ;;  %1659 = vmatpush1.bf16.msra.mxu1 %v3193_v37  ;;  %v1964_v34 = vshll.u32 %v3843_v63, 16  ;;  %v2865_v37 = vrot.slane %v2857_v27, 9 }
  0x76   : > { %1410 = vmatprep.subr.bf16.mxu0 %v3247_v1  ;;  %1660 = vmatprep.subr.bf16.mxu1 %v3247_v1  ;;  %v1963_v54 = vrot.slane %v1961_v18, 4  ;;  %v3963_v18 = vld [vmem:[%s3322_s10 + $0x58] sm:$0x11] }
  0x77   : > { %2847 = vmatprep.mubr.msk.bf16.mxu0 %vm432_vm0, %v2830_v32  ;;  %2905 = vmatprep.mubr.msk.bf16.mxu1 %vm432_vm0, %v2888_v48  ;;  %v3199_v32 = vld [vmem:[%s4211_s1 + $0x180] sm:$0xff]   ;;  %v1519_v48 = vrot.slane %v2806_v35, 5  ;;  %v1966_v55 = vrot.slane %v1964_v34, 5  ;;  %v3213_v35 = vld [vmem:[%s4211_s1 + $0x1e8] sm:$0xff]   ;;  %v3216_v34 = vld [vmem:[%s4211_s1 + $0x230] sm:$0xff]  }
  0x79   : > { %1411 = vmatpush1.bf16.msra.mxu0 %v3195_v40  ;;  %1661 = vmatpush1.bf16.msra.mxu1 %v3196_v49  ;;  %v1259_v40 = vrot.slane %v1257_v8, 5  ;;  %v1273_v49 = vrot.slane %v1271_v0, 5  ;;  %v1520_v58 = vsel %vm3543_vm6, %v2865_v37, %v1519_v48  ;;  %v2938_v0 = vcombine.high %v3839_v13, %v3843_v63 }
  0x7a   : > { %1424 = vmatprep.subr.bf16.mxu0 %v3247_v1  ;;  %1674 = vmatprep.subr.bf16.mxu1 %v3247_v1 }
  0x7b   : > { %v1260_v44 = vsel %vm3365_vm3, %v3520_v17, %v1259_v40  ;;  %v1967_v17 = vor.u32 %v1966_v55, %v1963_v54  ;;  %v3218_v54 = vld [vmem:[%s4211_s1 + $0x278] sm:$0xff]   ;;  %v3219_v55 = vld [vmem:[%s4211_s1 + $0x220] sm:$0xff]  }
  0x7d   : > { %1425 = vmatpush2.bf16.msra.mxu0 %v3197_v50  ;;  %1675 = vmatpush2.bf16.msra.mxu1 %v3198_v51  ;;  %v2866_v50 = vrot.slane %v2858_v29, 9  ;;  %v1523_v51 = vrot.slane %v2808_v25, 5  ;;  %v1968_v12 = vrot.slane %v1967_v17, 4 }
  0x7e   : > { %1426 = vmatprep.subr.bf16.mxu0 %v3247_v1  ;;  %1676 = vmatprep.subr.bf16.mxu1 %v3247_v1 }
  0x7f   : > { %v1524_v60 = vsel %vm3543_vm6, %v2866_v50, %v1523_v51  ;;  %v3217_v50 = vld [vmem:[%s4211_s1 + $0x228] sm:$0xff]  }
  0x80   : > { %v2894_v43 = vcombine.high %v1520_v58, %v1524_v60  ;;  %v2893_v25 = vcombine.low %v1520_v58, %v1524_v60  ;;  %v3996_v58 = vld [vmem:[%s3322_s10 + $0x68] sm:$0x11]  ;;  %v3999_v60 = vld [vmem:[%s3322_s10 + $0x78] sm:$0x11] }
  0x81   : > { %1427 = vmatpush2.bf16.msra.mxu0 %v3199_v32  ;;  %1677 = vmatpush2.bf16.msra.mxu1 %v3200_v2  ;;  %v1952_v32 = vrot.slane %v1950_v6, 5  ;;  %v3960_v6 = vld [vmem:[%s3322_s10 + $0x48] sm:$0x11] }
  0x82   : > { %1857 = vmatprep.subr.bf16.mxu0 %v3247_v1  ;;  %2179 = vmatprep.subr.bf16.mxu1 %v3247_v1  ;;  %v1984_v48 = vshll.u32 %v3960_v6, 16 }
  0x84   : > { %1429 = vmatmul.mubr.bf16.vlgmr.msra.gmra.mxu0 %v2829_v31  ;;  %1679 = vmatmul.mubr.bf16.vlgmr.msra.gmra.mxu1 %v2887_v39  ;;  %v1268_v31 = vor.u32 %v1267_v9, %v1264_v46  ;;  %v3211_v46 = vld [vmem:[%s4211_s1 + $0x1f0] sm:$0xff]  }
  0x85   : > { %1858 = vmatpush1.bf16.msra.mxu0 %v3201_v16  ;;  %2180 = vmatpush1.bf16.msra.mxu1 %v3202_v45  ;;  %v3210_v16 = vld [vmem:[%s4211_s1 + $0x248] sm:$0xff]   ;;  %v3917_v45 = vld [vmem:[%s3322_s10 + $0x40] sm:$0xff] }
  0x86   : > { %1859 = vmatprep.subr.bf16.mxu0 %v3247_v1  ;;  %2181 = vmatprep.subr.bf16.mxu1 %v3247_v1  ;;  %v3869_v36 = vrot.slane %v1268_v31, 4  ;;  %v1975_v22 = vshrl.u32 %v3917_v45, 16  ;;  %v1978_v7 = vshll.u32 %v3917_v45, 16  ;;  %v3214_v31 = vld [vmem:[%s4211_s1 + $0x238] sm:$0xff]  }
  0x87   : > { %2848 = vmatprep.mubr.msk.bf16.mxu0 %vm432_vm0, %v2832_v62  ;;  %2906 = vmatprep.mubr.msk.bf16.mxu1 %vm432_vm0, %v2890_v3  ;;  %v1947_v62 = vshrl.u32 %v3839_v13, 16  ;;  %v1992_v3 = vshll.u32 %v3923_v19, 16 }
  0x88   : > { %v1274_v2 = vsel %vm3365_vm3, %v3869_v36, %v1273_v49  ;;  %v1980_v42 = vrot.slane %v1978_v7, 5  ;;  %v1998_v49 = vshll.u32 %v3963_v18, 16  ;;  %v3224_v7 = vld [vmem:[%s4211_s1 + $0x2b0] sm:$0xff]  }
  0x89   : > { %1860 = vmatpush1.bf16.msra.mxu0 %v3203_v11  ;;  %2182 = vmatpush1.bf16.msra.mxu1 %v3204_v23  ;;  %v1949_v53 = vrot.slane %v1947_v62, 4  ;;  %v2836_v41 = vcombine.high %v1260_v44, %v1274_v2  ;;  %v1958_v11 = vrot.slane %v1956_v38, 5  ;;  %v1989_v23 = vshrl.u32 %v3923_v19, 16  ;;  %v3215_v62 = vld [vmem:[%s4211_s1 + $0x1e0] sm:$0xff]  }
  0x8a   : > { %1861 = vmatprep.subr.bf16.mxu0 %v3247_v1  ;;  %2183 = vmatprep.subr.bf16.mxu1 %v3247_v1  ;;  %v1994_v29 = vrot.slane %v1992_v3, 5 }
  0x8b   : > { %v1953_v61 = vor.u32 %v1952_v32, %v1949_v53  ;;  %v1991_v27 = vrot.slane %v1989_v23, 4 }
  0x8c   : > { %1437 = vmatmul.mubr.bf16.gmra.mxu0 %v2831_v10  ;;  %1687 = vmatmul.mubr.bf16.gmra.mxu1 %v2889_v26  ;;  %v3885_v10 = vld [vmem:[%s3322_s10 + $0x38] sm:$0x11]  ;;  %v1977_v26 = vrot.slane %v1975_v22, 4 }
  0x8d   : > { %1862 = vmatpush1.bf16.msra.mxu0 %v3205_v28  ;;  %2184 = vmatpush1.bf16.msra.mxu1 %v3206_v4  ;;  %v1970_v39 = vshll.u32 %v3885_v10, 16  ;;  %v1954_v9 = vrot.slane %v1953_v61, 4  ;;  %v3970_v4 = vld [vmem:[%s3322_s10 + $0x60] sm:$0xff]  ;;  %v1995_v40 = vor.u32 %v1994_v29, %v1991_v27  ;;  %v3227_v29 = vld [vmem:[%s4211_s1 + $0x2a8] sm:$0xff]   ;;  %v2282_v33 = vrot.slane %v3885_v10, 5 }
  0x8e   : > { %1863 = vmatprep.subr.bf16.mxu0 %v3247_v1  ;;  %2185 = vmatprep.subr.bf16.mxu1 %v3247_v1  ;;  %v1981_v37 = vor.u32 %v1980_v42, %v1977_v26  ;;  %v2003_v51 = vshrl.u32 %v3970_v4, 16  ;;  %v4036_v26 = vld [vmem:[%s3322_s10 + $0x98] sm:$0x11] }
  0x8f   : > { %2849 = vmatprep.mubr.msk.bf16.mxu0 %vm432_vm0, %v2834_v24  ;;  %2907 = vmatprep.mubr.msk.bf16.mxu1 %vm432_vm0, %v2892_v5  ;;  %v3209_v24 = vld [vmem:[%s4211_s1 + $0x1f8] sm:$0xff]   ;;  %v1972_v14 = vrot.slane %v1970_v39, 5  ;;  %v3941_v28 = vsel %vm3365_vm3, %v1954_v9, %v1958_v11  ;;  %v3973_v5 = vld [vmem:[%s3322_s10 + $0x70] sm:$0xff]  ;;  %v2012_v11 = vshll.u32 %v3996_v58, 16 }
  0x90   : > { %v2017_v53 = vshrl.u32 %v3973_v5, 16  ;;  %v2020_v32 = vshll.u32 %v3973_v5, 16  ;;  %v3220_v39 = vld [vmem:[%s4211_s1 + $0x270] sm:$0xff]  }
  0x91   : > { %1864 = vmatpush1.bf16.msra.mxu0 %v3207_v52  ;;  %2186 = vmatpush1.bf16.msra.mxu1 %v3208_v57  ;;  %v3945_v8 = vsel %vm3365_vm3, %v1968_v12, %v1972_v14  ;;  %v2006_v52 = vshll.u32 %v3970_v4, 16  ;;  %v1982_v57 = vrot.slane %v1981_v37, 4  ;;  %v2026_v12 = vshll.u32 %v3999_v60, 16  ;;  %v3223_v14 = vld [vmem:[%s4211_s1 + $0x2b8] sm:$0xff]  }
  0x92   : > { %1865 = vmatprep.subr.bf16.mxu0 %v3247_v1  ;;  %2187 = vmatprep.subr.bf16.mxu1 %v3247_v1  ;;  %v2996_v15 = vcombine.high %v3941_v28, %v3945_v8  ;;  %v2019_v38 = vrot.slane %v2017_v53, 4  ;;  %v2022_v17 = vrot.slane %v2020_v32, 5  ;;  %v2014_v3 = vrot.slane %v2012_v11, 5  ;;  %v3231_v53 = vld [vmem:[%s4211_s1 + $0x298] sm:$0xff]  }
  0x93   : > { %v2008_v61 = vrot.slane %v2006_v52, 5  ;;  %v2941_v52 = vcombine.low %v3970_v4, %v3973_v5 }
  0x94   : > { %1445 = vmatmul.mubr.bf16.gmra.mxu0 %v2833_v47  ;;  %1695 = vmatmul.mubr.bf16.gmra.mxu1 %v2891_v56  ;;  %v2835_v47 = vcombine.low %v1260_v44, %v1274_v2  ;;  %v1986_v56 = vrot.slane %v1984_v48, 5  ;;  %v1996_v44 = vrot.slane %v1995_v40, 4  ;;  %v2000_v2 = vrot.slane %v1998_v49, 5  ;;  %v3228_v40 = vld [vmem:[%s4211_s1 + $0x2a0] sm:$0xff]  }
  0x95   : > { %1866 = vmatpush1.bf16.msra.mxu0 %v3209_v24  ;;  %2188 = vmatpush1.bf16.msra.mxu1 %v3210_v16  ;;  %v2005_v24 = vrot.slane %v2003_v51, 4  ;;  %v4006_v16 = vld [vmem:[%s3322_s10 + $0x90] sm:$0xff]  ;;  %v2054_v48 = vshll.u32 %v4036_v26, 16 }
  0x96   : > { %1867 = vmatprep.subr.bf16.mxu0 %v3247_v1  ;;  %2189 = vmatprep.subr.bf16.mxu1 %v3247_v1  ;;  %v2001_v9 = vsel %vm3365_vm3, %v1996_v44, %v2000_v2  ;;  %v2048_v22 = vshll.u32 %v4006_v16, 16  ;;  %v2944_v44 = vcombine.high %v3725_v20, %v4006_v16  ;;  %v2278_v2 = vrot.slane %v3882_v59, 5 }
  0x97   : > { %2850 = vmatprep.mubr.msk.bf16.mxu0 %vm432_vm0, %v2836_v41  ;;  %2908 = vmatprep.mubr.msk.bf16.mxu1 %vm432_vm0, %v2894_v43  ;;  %v2937_v41 = vcombine.low %v3839_v13, %v3843_v63  ;;  %v2995_v43 = vcombine.low %v3941_v28, %v3945_v8  ;;  %v2023_v13 = vor.u32 %v2022_v17, %v2019_v38  ;;  %v2045_v63 = vshrl.u32 %v4006_v16, 16  ;;  %v4032_v8 = vld [vmem:[%s3322_s10 + $0x88] sm:$0x11]  ;;  %v3232_v38 = vld [vmem:[%s4211_s1 + $0x290] sm:$0xff]  }
  0x98   : > { %v2040_v27 = vshll.u32 %v4032_v8, 16  ;;  %v2056_v51 = vrot.slane %v2054_v48, 5  ;;  %v2943_v59 = vcombine.low %v3725_v20, %v4006_v16 }
  0x99   : > { %1868 = vmatpush1.bf16.msra.mxu0 %v3211_v46  ;;  %2190 = vmatpush1.bf16.msra.mxu1 %v3212_v21  ;;  %v1987_v46 = vsel %vm3365_vm3, %v1982_v57, %v1986_v56  ;;  %v2009_v21 = vor.u32 %v2008_v61, %v2005_v24  ;;  %v2024_v28 = vrot.slane %v2023_v13, 4  ;;  %v3017_v57 = vld [vmem:[%s3322_s10 + $0x20] sm:$0xee]  ;;  %v3018_v56 = vld [vmem:[%s3322_s10 + $0x30] sm:$0xee] }
  0x9a   : > { %1869 = vmatprep.subr.bf16.mxu0 %v3247_v1  ;;  %2191 = vmatprep.subr.bf16.mxu1 %v3247_v1  ;;  %v2998_v23 = vcombine.high %v1987_v46, %v2001_v9  ;;  %v2997_v42 = vcombine.low %v1987_v46, %v2001_v9  ;;  %v2042_v49 = vrot.slane %v2040_v27, 5  ;;  %v3026_v61 = vrot.slane %v3018_v56, 9  ;;  %v3023_v13 = vld [vmem:[%s3322_s10 + $0x80] sm:$0xee] }
  0x9c   : > { %1453 = vmatmul.mubr.bf16.gmra.mxu0 %v2835_v47  ;;  %1703 = vmatmul.mubr.bf16.gmra.mxu1 %v2893_v25  ;;  %v2940_v47 = vcombine.high %v3917_v45, %v3923_v19  ;;  %v2010_v25 = vrot.slane %v2009_v21, 4  ;;  %v3020_v21 = vld [vmem:[%s3322_s10 + $0x50] sm:$0xee] }
  0x9d   : > { %1870 = vmatpush1.bf16.msra.mxu0 %v3213_v35  ;;  %2192 = vmatpush1.bf16.msra.mxu1 %v3214_v31  ;;  %v2028_v35 = vrot.slane %v2026_v12, 5  ;;  %v2047_v31 = vrot.slane %v2045_v63, 4  ;;  %v3236_v12 = vld [vmem:[%s4211_s1 + $0x280] sm:$0xff]   ;;  %v3024_v63 = vld [vmem:[%s3322_s10 + $0x90] sm:$0xee] }
  0x9e   : > { %1871 = vmatprep.subr.bf16.mxu0 %v3247_v1  ;;  %2193 = vmatprep.subr.bf16.mxu1 %v3247_v1 }
  0x9f   : > { %2955 = vmatprep.mubr.msk.bf16.mxu0 %vm432_vm0, %v2938_v0  ;;  %3013 = vmatprep.mubr.msk.bf16.mxu1 %vm432_vm0, %v2996_v15  ;;  %v2050_v0 = vrot.slane %v2048_v22, 5  ;;  %v2939_v15 = vcombine.low %v3917_v45, %v3923_v19  ;;  %v2942_v45 = vcombine.high %v3970_v4, %v3973_v5  ;;  %v3021_v4 = vld [vmem:[%s3322_s10 + $0x60] sm:$0xee]  ;;  %v3022_v5 = vld [vmem:[%s3322_s10 + $0x70] sm:$0xee]  ;;  %v3237_v22 = vld [vmem:[%s4211_s1 + $0x2c8] sm:$0xff]  }
  0xa0   : > { %v3029_v17 = vrot.slane %v3021_v4, 9 }
  0xa1   : > { %1872 = vmatpush1.bf16.msra.mxu0 %v3215_v62  ;;  %2194 = vmatpush1.bf16.msra.mxu1 %v3216_v34  ;;  %v2015_v62 = vsel %vm3365_vm3, %v2010_v25, %v2014_v3  ;;  %v2029_v34 = vsel %vm3365_vm3, %v2024_v28, %v2028_v35  ;;  %v2051_v37 = vor.u32 %v2050_v0, %v2047_v31  ;;  %v2290_v3 = vrot.slane %v3963_v18, 5  ;;  %v3238_v0 = vld [vmem:[%s4211_s1 + $0x2c0] sm:$0xff]  }
  0xa2   : > { %1885 = vmatprep.subr.bf16.mxu0 %v3247_v1  ;;  %2207 = vmatprep.subr.bf16.mxu1 %v3247_v1  ;;  %v3000_v19 = vcombine.high %v2015_v62, %v2029_v34  ;;  %v2999_v32 = vcombine.low %v2015_v62, %v2029_v34  ;;  %v3031_v35 = vrot.slane %v3023_v13, 9  ;;  %v2302_v25 = vrot.slane %v4032_v8, 5 }
  0xa3   : > { %v3032_v28 = vrot.slane %v3024_v63, 9  ;;  %v2306_v31 = vrot.slane %v4036_v26, 5 }
  0xa4   : > { %v2303_v8 = vsel %vm3543_vm6, %v3031_v35, %v2302_v25 }
  0xa5   : > { %1886 = vmatpush2.bf16.msra.mxu0 %v3217_v50  ;;  %2208 = vmatpush2.bf16.msra.mxu1 %v3218_v54  ;;  %v2052_v50 = vrot.slane %v2051_v37, 4  ;;  %v2043_v54 = vsel %vm3365_vm3, %v3869_v36, %v2042_v49  ;;  %v3025_v36 = vrot.slane %v3017_v57, 9  ;;  %v2307_v26 = vsel %vm3543_vm6, %v3032_v28, %v2306_v31 }
  0xa6   : > { %1887 = vmatprep.subr.bf16.mxu0 %v3247_v1  ;;  %2209 = vmatprep.subr.bf16.mxu1 %v3247_v1 }
  0xa7   : > { %v2279_v10 = vsel %vm3543_vm6, %v3025_v36, %v2278_v2 }
  0xa9   : > { %1888 = vmatpush2.bf16.msra.mxu0 %v3219_v55  ;;  %2210 = vmatpush2.bf16.msra.mxu1 %v3220_v39  ;;  %v2057_v55 = vsel %vm3365_vm3, %v2052_v50, %v2056_v51  ;;  %v2294_v39 = vrot.slane %v3996_v58, 5  ;;  %v2283_v58 = vsel %vm3543_vm6, %v3026_v61, %v2282_v33 }
  0xaa   : > { %2429 = vmatprep.subr.bf16.mxu0 %v3247_v1  ;;  %3095 = vmatprep.subr.bf16.mxu1 %v3247_v1  ;;  %v3002_v24 = vcombine.high %v2043_v54, %v2057_v55  ;;  %v3001_v46 = vcombine.low %v2043_v54, %v2057_v55  ;;  %v3054_v16 = vcombine.high %v2279_v10, %v2283_v58 }
  0xab   : > { %v2295_v9 = vsel %vm3543_vm6, %v3029_v17, %v2294_v39 }
  0xac   : > { %1890 = vmatmul.mubr.bf16.vlgmr.msra.gmra.mxu0 %v2937_v41  ;;  %2212 = vmatmul.mubr.bf16.vlgmr.msra.gmra.mxu1 %v2995_v43  ;;  %v3030_v41 = vrot.slane %v3022_v5, 9  ;;  %v2298_v43 = vrot.slane %v3999_v60, 5  ;;  %v3235_v60 = vld [vmem:[%s4211_s1 + $0x288] sm:$0xff]  }
  0xad   : > { %2430 = vmatpush1.bf16.msra.mxu0 %v3223_v14  ;;  %3105 = vmatpush1.bf16.msra.mxu1 %v3223_v14  ;;  %v3019_v14 = vld [vmem:[%s3322_s10 + $0x40] sm:$0xee] }
  0xae   : > { %2431 = vmatprep.subr.bf16.mxu0 %v3247_v1  ;;  %3096 = vmatprep.subr.bf16.mxu1 %v3247_v1  ;;  %v2299_v20 = vsel %vm3543_vm6, %v3030_v41, %v2298_v43 }
  0xaf   : > { %2956 = vmatprep.mubr.msk.bf16.mxu0 %vm432_vm0, %v2940_v47  ;;  %3014 = vmatprep.mubr.msk.bf16.mxu1 %vm432_vm0, %v2998_v23  ;;  %v3058_v11 = vcombine.high %v2295_v9, %v2299_v20  ;;  %v3027_v47 = vrot.slane %v3019_v14, 9  ;;  %v3028_v23 = vrot.slane %v3020_v21, 9 }
  0xb1   : > { %2432 = vmatpush1.bf16.msra.mxu0 %v3224_v7  ;;  %3106 = vmatpush1.bf16.msra.mxu1 %v3224_v7  ;;  %v2286_v7 = vrot.slane %v3960_v6, 5  ;;  %v2291_v18 = vsel %vm3543_vm6, %v3028_v23, %v2290_v3 }
  0xb2   : > { %2433 = vmatprep.subr.bf16.mxu0 %v3247_v1  ;;  %3097 = vmatprep.subr.bf16.mxu1 %v3247_v1 }
  0xb3   : > { %v2287_v6 = vsel %vm3543_vm6, %v3027_v47, %v2286_v7 }
  0xb4   : > { %1898 = vmatmul.mubr.bf16.gmra.mxu0 %v2939_v15  ;;  %2220 = vmatmul.mubr.bf16.gmra.mxu1 %v2997_v42  ;;  %v3053_v15 = vcombine.low %v2279_v10, %v2283_v58  ;;  %v3057_v42 = vcombine.low %v2295_v9, %v2299_v20  ;;  %v3056_v27 = vcombine.high %v2287_v6, %v2291_v18 }
  0xb5   : > { %2434 = vmatpush1.bf16.msra.mxu0 %v3227_v29  ;;  %3107 = vmatpush1.bf16.msra.mxu1 %v3227_v29  ;;  %v3060_v29 = vcombine.high %v2303_v8, %v2307_v26  ;;  %v3055_v62 = vcombine.low %v2287_v6, %v2291_v18 }
  0xb6   : > { %2435 = vmatprep.subr.bf16.mxu0 %v3247_v1  ;;  %3098 = vmatprep.subr.bf16.mxu1 %v3247_v1 }
  0xb7   : > { %2957 = vmatprep.mubr.msk.bf16.mxu0 %vm432_vm0, %v2942_v45  ;;  %3015 = vmatprep.mubr.msk.bf16.mxu1 %vm432_vm0, %v3000_v19 }
  0xb9   : > { %2436 = vmatpush1.bf16.msra.mxu0 %v3228_v40  ;;  %3108 = vmatpush1.bf16.msra.mxu1 %v3228_v40 }
  0xba   : > { %2437 = vmatprep.subr.bf16.mxu0 %v3247_v1  ;;  %3099 = vmatprep.subr.bf16.mxu1 %v3247_v1 }
  0xbc   : > { %1906 = vmatmul.mubr.bf16.gmra.mxu0 %v2941_v52  ;;  %2228 = vmatmul.mubr.bf16.gmra.mxu1 %v2999_v32 }
  0xbd   : > { %2438 = vmatpush1.bf16.msra.mxu0 %v3231_v53  ;;  %3109 = vmatpush1.bf16.msra.mxu1 %v3231_v53 }
  0xbe   : > { %2439 = vmatprep.subr.bf16.mxu0 %v3247_v1  ;;  %3100 = vmatprep.subr.bf16.mxu1 %v3247_v1 }
  0xbf   : > { %2958 = vmatprep.mubr.msk.bf16.mxu0 %vm432_vm0, %v2944_v44  ;;  %3016 = vmatprep.mubr.msk.bf16.mxu1 %vm432_vm0, %v3002_v24 }
  0xc1   : > { %2440 = vmatpush1.bf16.msra.mxu0 %v3232_v38  ;;  %3110 = vmatpush1.bf16.msra.mxu1 %v3232_v38 }
  0xc2   : > { %2441 = vmatprep.subr.bf16.mxu0 %v3247_v1  ;;  %3101 = vmatprep.subr.bf16.mxu1 %v3247_v1 }
  0xc4   : > { %1914 = vmatmul.mubr.bf16.gmra.mxu0 %v2943_v59  ;;  %2236 = vmatmul.mubr.bf16.gmra.mxu1 %v3001_v46 }
  0xc5   : > { %2442 = vmatpush1.bf16.msra.mxu0 %v3235_v60  ;;  %3111 = vmatpush1.bf16.msra.mxu1 %v3235_v60 }
  0xc6   : > { %2443 = vmatprep.subr.bf16.mxu0 %v3247_v1  ;;  %3102 = vmatprep.subr.bf16.mxu1 %v3247_v1 }
  0xc7   : > { %3071 = vmatprep.mubr.msk.bf16.mxu0 %vm432_vm0, %v3054_v16  ;;  %3073 = vmatprep.mubr.msk.bf16.mxu1 %vm432_vm0, %v3058_v11 }
  0xc9   : > { %2444 = vmatpush1.bf16.msra.mxu0 %v3236_v12  ;;  %3112 = vmatpush1.bf16.msra.mxu1 %v3236_v12 }
  0xca   : > { %2457 = vmatprep.subr.bf16.mxu0 %v3247_v1  ;;  %3103 = vmatprep.subr.bf16.mxu1 %v3247_v1 }
  0xcd   : > { %2458 = vmatpush2.bf16.msra.mxu0 %v3237_v22  ;;  %3113 = vmatpush2.bf16.msra.mxu1 %v3237_v22 }
  0xce   : > { %2459 = vmatprep.subr.bf16.mxu0 %v3247_v1  ;;  %3104 = vmatprep.subr.bf16.mxu1 %v3247_v1  ;;  %v3059_v1 = vcombine.low %v2303_v8, %v2307_v26 }
  0xd1   : > { %2460 = vmatpush2.bf16.msra.mxu0 %v3238_v0  ;;  %3114 = vmatpush2.bf16.msra.mxu1 %v3238_v0 }
  0xd4   : > { %2462 = vmatmul.mubr.bf16.vlgmr.msra.gmra.mxu0 %v3053_v15  ;;  %2478 = vmatmul.mubr.bf16.vlgmr.msra.gmra.mxu1 %v3057_v42 }
  0xd5   : > { %3072 = vmatprep.mubr.msk.bf16.mxu0 %vm432_vm0, %v3056_v27  ;;  %3074 = vmatprep.mubr.msk.bf16.mxu1 %vm432_vm0, %v3060_v29 }
  0xdc   : > { %2470 = vmatmul.mubr.bf16.gmra.mxu0 %v3055_v62  ;;  %2486 = vmatmul.mubr.bf16.gmra.mxu1 %v3059_v1 }
  0xf4   : > { %v479_v34 = vpop.f32.mrf.mxu0  ;;  %v652_v37 = vpop.f32.mrf.mxu1 }
  0xf5   : > { %v653_v30 = vadd.f32 %v652_v37, %v479_v34 }
  0xf6   : > { %v481_v48 = vpop.f32.mrf.mxu0  ;;  %v654_v45 = vpop.f32.mrf.mxu1 }
  0xf8   : > { %v482_v19 = vpop.f32.mrf.mxu0  ;;  %v655_v40 = vpop.f32.mrf.mxu1 }
  0xf9   : > { %v656_v49 = vadd.f32 %v655_v40, %v482_v19 }
  0xfa   : > { %v484_v50 = vpop.f32.mrf.mxu0  ;;  %v657_v51 = vpop.f32.mrf.mxu1 }
  0xfc   : > { %v487_v52 = vpop.f32.mrf.mxu0  ;;  %v660_v53 = vpop.f32.mrf.mxu1 }
  0xfd   : > { %v661_v32 = vadd.f32 %v660_v53, %v487_v52 }
  0xfe   : > { %v489_v54 = vpop.f32.mrf.mxu0  ;;  %v662_v55 = vpop.f32.mrf.mxu1 }
 0x100   : > { %v490_v57 = vpop.f32.mrf.mxu0  ;;  %v663_v56 = vpop.f32.mrf.mxu1 }
 0x101   : > { %v664_v4 = vadd.f32 %v663_v56, %v490_v57 }
 0x102   : > { %v492_v5 = vpop.f32.mrf.mxu0  ;;  %v665_v44 = vpop.f32.mrf.mxu1 }
 0x104   : > { %v495_v2 = vpop.f32.mrf.mxu0  ;;  %v668_v24 = vpop.f32.mrf.mxu1 }
 0x105   : > { %v669_v36 = vadd.f32 %v668_v24, %v495_v2 }
 0x106   : > { %v497_v61 = vpop.f32.mrf.mxu0  ;;  %v670_v33 = vpop.f32.mrf.mxu1 }
 0x108   : > { %v498_v38 = vpop.f32.mrf.mxu0  ;;  %v671_v17 = vpop.f32.mrf.mxu1 }
 0x109   : > { %v672_v39 = vadd.f32 %v671_v17, %v498_v38 }
 0x10a   : > { %v500_v41 = vpop.f32.mrf.mxu0  ;;  %v673_v43 = vpop.f32.mrf.mxu1 }
 0x10c   : > { %v503_v59 = vpop.f32.mrf.mxu0  ;;  %v676_v10 = vpop.f32.mrf.mxu1 }
 0x10d   : > { %v677_v58 = vadd.f32 %v676_v10, %v503_v59 }
 0x10e   : > { %v505_v60 = vpop.f32.mrf.mxu0  ;;  %v678_v46 = vpop.f32.mrf.mxu1 }
 0x110   : > { %v506_v9 = vpop.f32.mrf.mxu0  ;;  %v679_v20 = vpop.f32.mrf.mxu1 }
 0x111   : > { %v680_v16 = vadd.f32 %v679_v20, %v506_v9 }
 0x112   : > { %v508_v11 = vpop.f32.mrf.mxu0  ;;  %v681_v12 = vpop.f32.mrf.mxu1 }
 0x11c   : > { %v897_v14 = vpop.f32.mrf.mxu0  ;;  %v1108_v13 = vpop.f32.mrf.mxu1 }
 0x11d   : > { %v928_v21 = vadd.f32 %v897_v14, %v653_v30 }
 0x11e   : > { %v899_v63 = vpop.f32.mrf.mxu0  ;;  %v1110_v47 = vpop.f32.mrf.mxu1 }
 0x11f   : > { %v1139_v22 = vadd.f32 %v1108_v13, %v928_v21 }
 0x120   : > { %v900_v7 = vpop.f32.mrf.mxu0  ;;  %v1111_v3 = vpop.f32.mrf.mxu1 }
 0x121   : > { %v929_v23 = vadd.f32 %v900_v7, %v656_v49 }
 0x122   : > { %v902_v35 = vpop.f32.mrf.mxu0  ;;  %v1113_v28 = vpop.f32.mrf.mxu1 }
 0x123   : > { %v1140_v25 = vadd.f32 %v1111_v3, %v929_v23 }
 0x124   : > { %v905_v31 = vpop.f32.mrf.mxu0  ;;  %v1116_v6 = vpop.f32.mrf.mxu1 }
 0x125   : > { %v930_v0 = vadd.f32 %v905_v31, %v661_v32 }
 0x126   : > { %v907_v18 = vpop.f32.mrf.mxu0  ;;  %v1118_v26 = vpop.f32.mrf.mxu1 }
 0x127   : > { %v1141_v8 = vadd.f32 %v1116_v6, %v930_v0 }
 0x128   : > { %v908_v15 = vpop.f32.mrf.mxu0  ;;  %v1119_v27 = vpop.f32.mrf.mxu1 }
 0x129   : > { %v931_v42 = vadd.f32 %v908_v15, %v664_v4 }
 0x12a   : > { %v910_v29 = vpop.f32.mrf.mxu0  ;;  %v1121_v1 = vpop.f32.mrf.mxu1 }
 0x12b   : > { %v1142_v62 = vadd.f32 %v1119_v27, %v931_v42 }
 0x12c   : > { %v913_v34 = vpop.f32.mrf.mxu0  ;;  %v1124_v30 = vpop.f32.mrf.mxu1 }
 0x12d   : > { %v932_v37 = vadd.f32 %v913_v34, %v669_v36 }
 0x12e   : > { %v915_v48 = vpop.f32.mrf.mxu0  ;;  %v1126_v19 = vpop.f32.mrf.mxu1 }
 0x12f   : > { %v4142_v45 = vadd.f32 %v1124_v30, %v932_v37 }
 0x130   : > { %v916_v40 = vpop.f32.mrf.mxu0  ;;  %v1127_v50 = vpop.f32.mrf.mxu1 }
 0x131   : > { %v933_v49 = vadd.f32 %v916_v40, %v672_v39 }
 0x132   : > { %v918_v51 = vpop.f32.mrf.mxu0  ;;  %v1129_v53 = vpop.f32.mrf.mxu1 }
 0x133   : > { %v4144_v52 = vadd.f32 %v1127_v50, %v933_v49 }
 0x134   : > { %v921_v32 = vpop.f32.mrf.mxu0  ;;  %v1132_v55 = vpop.f32.mrf.mxu1 }
 0x135   : > { %v934_v54 = vadd.f32 %v921_v32, %v677_v58 }
 0x136   : > { %v923_v57 = vpop.f32.mrf.mxu0  ;;  %v1134_v4 = vpop.f32.mrf.mxu1 }
 0x137   : > { %v4146_v56 = vadd.f32 %v1132_v55, %v934_v54 }
 0x138   : > { %v924_v5 = vpop.f32.mrf.mxu0  ;;  %v1135_v2 = vpop.f32.mrf.mxu1 }
 0x139   : > { %v935_v44 = vadd.f32 %v924_v5, %v680_v16 }
 0x13a   : > { %v926_v24 = vpop.f32.mrf.mxu0  ;;  %v1137_v61 = vpop.f32.mrf.mxu1 }
 0x13b   : > { %v4148_v36 = vadd.f32 %v1135_v2, %v935_v44 }
 0x144   : > { %v1430_v33 = vpop.f32.mrf.mxu0  ;;  %v1680_v17 = vpop.f32.mrf.mxu1 }
 0x145   : > { %v1461_v38 = vadd.f32 %v1430_v33, %v1139_v22 }
 0x146   : > { %v1432_v39 = vpop.f32.mrf.mxu0  ;;  %v1682_v43 = vpop.f32.mrf.mxu1 }
 0x147   : > { %v4150_v41 = vadd.f32 %v1680_v17, %v1461_v38 }
 0x148   : > { %v1433_v59 = vpop.f32.mrf.mxu0  ;;  %v1683_v58 = vpop.f32.mrf.mxu1 }
 0x149   : > { %v1462_v10 = vadd.f32 %v1433_v59, %v1140_v25 }
 0x14a   : > { %v1435_v60 = vpop.f32.mrf.mxu0  ;;  %v1685_v9 = vpop.f32.mrf.mxu1 }
 0x14b   : > { %v4152_v46 = vadd.f32 %v1683_v58, %v1462_v10 }
 0x14c   : > { %v1438_v20 = vpop.f32.mrf.mxu0  ;;  %v1688_v11 = vpop.f32.mrf.mxu1 }
 0x14d   : > { %v1463_v16 = vadd.f32 %v1438_v20, %v1141_v8 }
 0x14e   : > { %v1440_v12 = vpop.f32.mrf.mxu0  ;;  %v1690_v21 = vpop.f32.mrf.mxu1 }
 0x14f   : > { %v4154_v14 = vadd.f32 %v1688_v11, %v1463_v16 }
 0x150   : > { %v1441_v13 = vpop.f32.mrf.mxu0  ;;  %v1691_v22 = vpop.f32.mrf.mxu1 }
 0x151   : > { %v1464_v63 = vadd.f32 %v1441_v13, %v1142_v62 }
 0x152   : > { %v1443_v47 = vpop.f32.mrf.mxu0  ;;  %v1693_v23 = vpop.f32.mrf.mxu1 }
 0x153   : > { %v4156_v7 = vadd.f32 %v1691_v22, %v1464_v63 }
 0x154   : > { %v1446_v3 = vpop.f32.mrf.mxu0  ;;  %v1696_v35 = vpop.f32.mrf.mxu1 }
 0x155   : > { %v1465_v20 = vadd.f32 %v1446_v3, %v4142_v45  ;;  %v4170_v45 = vld [vmem:[%s4212_s2] ss:$0 sm:$0xff] }
 0x156   : > { %v1448_v25 = vpop.f32.mrf.mxu0  ;;  %v1698_v28 = vpop.f32.mrf.mxu1 }
 0x157   : > { %v1715_v12 = vadd.f32 %v1696_v35, %v1465_v20 }
 0x158   : > { %v1449_v31 = vpop.f32.mrf.mxu0  ;;  %v1699_v0 = vpop.f32.mrf.mxu1 }
 0x159   : > { %v1466_v21 = vadd.f32 %v1449_v31, %v4144_v52 }
 0x15a   : > { %v1451_v6 = vpop.f32.mrf.mxu0  ;;  %v1701_v18 = vpop.f32.mrf.mxu1 }
 0x15b   : > { %v1716_v22 = vadd.f32 %v1699_v0, %v1466_v21 }
 0x15c   : > { %v1454_v8 = vpop.f32.mrf.mxu0  ;;  %v1704_v26 = vpop.f32.mrf.mxu1 }
 0x15d   : > { %v1467_v47 = vadd.f32 %v1454_v8, %v4146_v56 }
 0x15e   : > { %v1456_v15 = vpop.f32.mrf.mxu0  ;;  %v1706_v42 = vpop.f32.mrf.mxu1 }
 0x15f   : > { %v1717_v35 = vadd.f32 %v1704_v26, %v1467_v47 }
 0x160   : > { %v1457_v27 = vpop.f32.mrf.mxu0  ;;  %v4158_v29 = vpop.f32.mrf.mxu1 }
 0x162   : > { %v1459_v62 = vpop.f32.mrf.mxu0  ;;  %v1709_v1 = vpop.f32.mrf.mxu1 }
 0x16c   : > { %v1891_v34 = vpop.f32.mrf.mxu0  ;;  %v2213_v37 = vpop.f32.mrf.mxu1 }
 0x16d   : > { %v1922_v13 = vadd.f32 %v1891_v34, %v4150_v41  ;;  %v1468_v41 = vadd.f32 %v1457_v27, %v4148_v36 }
 0x16e   : > { %v1893_v30 = vpop.f32.mrf.mxu0  ;;  %v2215_v48 = vpop.f32.mrf.mxu1 }
 0x16f   : > { %v2244_v23 = vadd.f32 %v2213_v37, %v1922_v13  ;;  %v1718_v26 = vadd.f32 %v4158_v29, %v1468_v41 }
 0x170   : > { %v1894_v19 = vpop.f32.mrf.mxu0  ;;  %v2216_v40 = vpop.f32.mrf.mxu1 }
 0x171   : > { %v1923_v25 = vadd.f32 %v1894_v19, %v4152_v46 }
 0x172   : > { %v1896_v49 = vpop.f32.mrf.mxu0  ;;  %v2218_v50 = vpop.f32.mrf.mxu1 }
 0x173   : > { %v2245_v15 = vadd.f32 %v2216_v40, %v1923_v25 }
 0x174   : > { %v1899_v51 = vpop.f32.mrf.mxu0  ;;  %v2221_v53 = vpop.f32.mrf.mxu1 }
 0x175   : > { %v1924_v56 = vadd.f32 %v1899_v51, %v4154_v14 }
 0x176   : > { %v1901_v32 = vpop.f32.mrf.mxu0  ;;  %v2223_v54 = vpop.f32.mrf.mxu1 }
 0x177   : > { %v2246_v19 = vadd.f32 %v2221_v53, %v1924_v56 }
 0x178   : > { %v1902_v55 = vpop.f32.mrf.mxu0  ;;  %v4160_v57 = vpop.f32.mrf.mxu1 }
 0x179   : > { %v1925_v40 = vadd.f32 %v1902_v55, %v4156_v7 }
 0x17a   : > { %v1904_v4 = vpop.f32.mrf.mxu0  ;;  %v2226_v5 = vpop.f32.mrf.mxu1 }
 0x17c   : > { %v1907_v44 = vpop.f32.mrf.mxu0  ;;  %v2229_v2 = vpop.f32.mrf.mxu1 }
 0x17d   : > { %v1926_v63 = vadd.f32 %v1907_v44, %v1715_v12 }
 0x17e   : > { %v1909_v24 = vpop.f32.mrf.mxu0  ;;  %v2231_v61 = vpop.f32.mrf.mxu1 }
 0x17f   : > { %v2248_v28 = vadd.f32 %v2229_v2, %v1926_v63  ;;  %v2247_v61 = vadd.f32 %v4160_v57, %v1925_v40 }
 0x180   : > { %v1910_v33 = vpop.f32.mrf.mxu0  ;;  %v2232_v38 = vpop.f32.mrf.mxu1 }
 0x181   : > { %v1927_v6 = vadd.f32 %v1910_v33, %v1716_v22 }
 0x182   : > { %v1912_v17 = vpop.f32.mrf.mxu0  ;;  %v2234_v39 = vpop.f32.mrf.mxu1 }
 0x183   : > { %v2249_v42 = vadd.f32 %v2232_v38, %v1927_v6 }
 0x184   : > { %v1915_v43 = vpop.f32.mrf.mxu0  ;;  %v2237_v59 = vpop.f32.mrf.mxu1 }
 0x185   : > { %v1928_v62 = vadd.f32 %v1915_v43, %v1717_v35 }
 0x186   : > { %v1917_v10 = vpop.f32.mrf.mxu0  ;;  %v2239_v58 = vpop.f32.mrf.mxu1 }
 0x187   : > { %v2250_v32 = vadd.f32 %v2237_v59, %v1928_v62 }
 0x188   : > { %v1918_v60 = vpop.f32.mrf.mxu0  ;;  %v2240_v9 = vpop.f32.mrf.mxu1 }
 0x189   : > { %v1929_v29 = vadd.f32 %v1918_v60, %v1718_v26 }
 0x18a   : > { %v1920_v16 = vpop.f32.mrf.mxu0  ;;  %v2242_v11 = vpop.f32.mrf.mxu1 }
 0x18b   : > { %v2251_v39 = vadd.f32 %v2240_v9, %v1929_v29 }
 0x194   : > { %v2463_v18 = vpop.f32.mrf.mxu0  ;;  %v2479_v52 = vpop.f32.mrf.mxu1 }
 0x195   : > { %v2494_v3 = vadd.f32 %v2463_v18, %v2244_v23  ;;  %v2498_v31 = vadd.f32 %v2479_v52, %v2248_v28 }
 0x196   : > { %v2465_v0 = vpop.f32.mrf.mxu0  ;;  %v2481_v8 = vpop.f32.mrf.mxu1 }
 0x197   : > { %v2509_v46 = vadd.f32 %v4170_v45, %v2494_v3  ;;  %v2513_v1 = vadd.f32 %v4170_v45, %v2498_v31 }
 0x198   : > { %v2466_v34 = vpop.f32.mrf.mxu0  ;;  %v2482_v48 = vpop.f32.mrf.mxu1 }
 0x199   : > { %v2517_v37 = vmax.f32 %v2509_v46, 0.0  ;;  %v2495_v30 = vadd.f32 %v2466_v34, %v2245_v15  ;;  %v2521_v36 = vmax.f32 %v2513_v1, 0.0  ;;  %v2499_v14 = vadd.f32 %v2482_v48, %v2249_v42 }
 0x19a   : > { %v2468_v27 = vpop.f32.mrf.mxu0  ;;  %v2484_v51 = vpop.f32.mrf.mxu1 }
 0x19b   : > { %v3087_v49 = vpack.c.bf16 %v2517_v37, %v2517_v37  ;;  %v2510_v50 = vadd.f32 %v4170_v45, %v2495_v30  ;;  %v3091_v54 = vpack.c.bf16 %v2521_v36, %v2521_v36  ;;  %v2514_v4 = vadd.f32 %v4170_v45, %v2499_v14 }
 0x19c   : > { %v2471_v5 = vpop.f32.mrf.mxu0  ;;  %v2487_v24 = vpop.f32.mrf.mxu1 }
 0x19d   : > { %2558 = vst.msk [vmem:[%s4181_s6] sm:$0xf] %vm2557_vm7, %v3087_v49  ;;  %v2518_v44 = vmax.f32 %v2510_v50, 0.0  ;;  %v2496_v2 = vadd.f32 %v2471_v5, %v2246_v19  ;;  %2562 = vst.msk [vmem:[%s4181_s6 + $0x10] sm:$0xf] %vm2557_vm7, %v3091_v54  ;;  %v2522_v7 = vmax.f32 %v2514_v4, 0.0  ;;  %v2500_v53 = vadd.f32 %v2487_v24, %v2250_v32 }
 0x19e   : > { %v2473_v55 = vpop.f32.mrf.mxu0  ;;  %v2489_v17 = vpop.f32.mrf.mxu1 }
 0x19f   : > { %v3088_v33 = vpack.c.bf16 %v2518_v44, %v2518_v44  ;;  %v2511_v38 = vadd.f32 %v4170_v45, %v2496_v2  ;;  %v3092_v43 = vpack.c.bf16 %v2522_v7, %v2522_v7  ;;  %v2515_v59 = vadd.f32 %v4170_v45, %v2500_v53 }
 0x1a0   : > { %v2474_v10 = vpop.f32.mrf.mxu0  ;;  %v2490_v20 = vpop.f32.mrf.mxu1 }
 0x1a1   : > { %2559 = vst.msk [vmem:[%s4181_s6 + $0x4] sm:$0xf] %vm2557_vm7, %v3088_v33  ;;  %v2519_v58 = vmax.f32 %v2511_v38, 0.0  ;;  %v2497_v60 = vadd.f32 %v2474_v10, %v2247_v61  ;;  %2563 = vst.msk [vmem:[%s4181_s6 + $0x14] sm:$0xf] %vm2557_vm7, %v3092_v43  ;;  %v2523_v57 = vmax.f32 %v2515_v59, 0.0  ;;  %v2501_v16 = vadd.f32 %v2490_v20, %v2251_v39 }
 0x1a2   : > { %v2476_v11 = vpop.f32.mrf.mxu0  ;;  %v2492_v21 = vpop.f32.mrf.mxu1 }
 0x1a3   : > { %v3089_v12 = vpack.c.bf16 %v2519_v58, %v2519_v58  ;;  %v2512_v9 = vadd.f32 %v4170_v45, %v2497_v60  ;;  %v3093_v13 = vpack.c.bf16 %v2523_v57, %v2523_v57  ;;  %v2516_v63 = vadd.f32 %v4170_v45, %v2501_v16 }
 0x1a5   : > { %2560 = vst.msk [vmem:[%s4181_s6 + $0x8] sm:$0xf] %vm2557_vm7, %v3089_v12  ;;  %v2520_v22 = vmax.f32 %v2512_v9, 0.0  ;;  %2564 = vst.msk [vmem:[%s4181_s6 + $0x18] sm:$0xf] %vm2557_vm7, %v3093_v13  ;;  %v2524_v47 = vmax.f32 %v2516_v63, 0.0 }
 0x1a7   : > { %v3090_v23 = vpack.c.bf16 %v2520_v22, %v2520_v22  ;;  %v3094_v25 = vpack.c.bf16 %v2524_v47, %v2524_v47 }
 0x1a9   : > { %2561 = vst.msk [vmem:[%s4181_s6 + $0xc] sm:$0xf] %vm2557_vm7, %v3090_v23  ;;  %2565 = vst.msk [vmem:[%s4181_s6 + $0x1c] sm:$0xf] %vm2557_vm7, %v3094_v25 }
 0x1aa PF: > { %s13_s12 = sadd.s32 1, %s3245_s12  }
 0x1ab   : > { %p10_p4 = scmp.ge.s32.totalorder %s13_s12, 4  }
 0x1ad   :  { %12 = sbr.rel (!%p10_p4) target bundleno = 1 (0x1), region = 72 }

// kernel: tile.33
= control target key start
LH: loop header
LB: loop body
LE: loop exit
PB: predicated region body
PF: predicated region fallthrough
CT: control target
= control target key end

     0   :  { %s22_s0 = inlined_call_operand.vmem [shape: f32[16], index: 0, kind: input, shape index: {}]   ;;  %s23_s1 = inlined_call_operand.vmem [shape: f32[8,16], index: 1, kind: output, shape index: {}]  }
   0x1   :  { %v4_v0 = vld [vmem:[%s22_s0] ss:$0 sm:$0xff] }
   0x2   :  { %5 = vst [vmem:[%s23_s1] sm:$0xff] %v4_v0 }

// kernel: tile.34
= control target key start
LH: loop header
LB: loop body
LE: loop exit
PB: predicated region body
PF: predicated region fallthrough
CT: control target
= control target key end

     0   :  { %s69_s10 = smov 112   ;;  %s70_s11 = smov 80   ;;  %vm3_vm0 = vcmask 130048   ;;  %vm9_vm1 = vcmask 1048448   ;;  %vm15_vm2 = vcmask 917248   ;;  %vm21_vm3 = vcmask 786048   ;;  %s113_s0 = inlined_call_operand.vmem [shape: f32[8,16], index: 0, kind: input, shape index: {}]   ;;  %s114_s1 = inlined_call_operand.vmem [shape: f32[1,128], index: 1, kind: output, shape index: {}]  }
   0x1   :  { %v55_v0 = vld [vmem:[%s113_s0 + $0x7] sm:$0x1]   ;;  %v57_v1 = vld [vmem:[%s113_s0 + $0x5] sm:$0x1]   ;;  %v56_v2 = vld [vmem:[%s113_s0 + $0x6] sm:$0x1]  }
   0x2   :  { %7 = vrot.lane.b32.xlu0 %v55_v0, %s69_s10  ;;  %19 = vrot.lane.b32.xlu1 %v57_v1, %s70_s11  ;;  %v58_v3 = vld [vmem:[%s113_s0 + $0x4] sm:$0x1]   ;;  %v2_v4 = vld [vmem:[%s113_s0] sm:$0x1]   ;;  %s71_s18 = smov 96   ;;  %s72_s19 = smov 64  }
   0x3   :  { %4 = vst.msk [vmem:[#allocation0] sm:$0x1] %vm3_vm0, %v2_v4   ;;  %v59_v5 = vld [vmem:[%s113_s0 + $0x3] sm:$0x1]   ;;  %v60_v6 = vld [vmem:[%s113_s0 + $0x2] sm:$0x1]  }
   0x4   :  { %s73_s24 = smov 48   ;;  %s74_s25 = smov 32   ;;  %v61_v7 = vld [vmem:[%s113_s0 + $0x1] sm:$0x1]   ;;  %vm27_vm4 = vcmask 654848   ;;  %vm33_vm5 = vcmask 523648  }
   0x5   :  { %s75_s0 = smov 16   ;;  %vm39_vm6 = vcmask 392448   ;;  %vm45_vm7 = vcmask 261248  }
   0x6   :  { %13 = vrot.lane.b32.xlu0 %v56_v2, %s71_s18  ;;  %25 = vrot.lane.b32.xlu1 %v58_v3, %s72_s19 }
   0xa   :  { %31 = vrot.lane.b32.xlu0 %v59_v5, %s73_s24  ;;  %37 = vrot.lane.b32.xlu1 %v60_v6, %s74_s25 }
   0xe   :  { %43 = vrot.lane.b32.xlu0 %v61_v7, %s75_s0 }
  0x74   :  { %v8_v8 = vpop.permute.xlu0 %7   ;;  %v20_v9 = vpop.permute.xlu1 %19  }
  0x75   :  { %10 = vst.msk [vmem:[#allocation0] sm:$0x1] %vm9_vm1, %v8_v8  }
  0x78   :  { %v14_v10 = vpop.permute.xlu0 %13   ;;  %v26_v11 = vpop.permute.xlu1 %25  }
  0x79   :  { %16 = vst.msk [vmem:[#allocation0] sm:$0x1] %vm15_vm2, %v14_v10  }
  0x7a   :  { %22 = vst.msk [vmem:[#allocation0] sm:$0x1] %vm21_vm3, %v20_v9  }
  0x7b   :  { %28 = vst.msk [vmem:[#allocation0] sm:$0x1] %vm27_vm4, %v26_v11  }
  0x7c   :  { %v32_v12 = vpop.permute.xlu0 %31   ;;  %v38_v13 = vpop.permute.xlu1 %37  }
  0x7d   :  { %34 = vst.msk [vmem:[#allocation0] sm:$0x1] %vm33_vm5, %v32_v12  }
  0x7e   :  { %40 = vst.msk [vmem:[#allocation0] sm:$0x1] %vm39_vm6, %v38_v13  }
  0x80   :  { %v44_v14 = vpop.permute.xlu0 %43  }
  0x81   :  { %46 = vst.msk [vmem:[#allocation0] sm:$0x1] %vm45_vm7, %v44_v14  }
  0x88   :  { %v51_v15 = vld [vmem:[#allocation0] sm:$0x1] }
  0x89   :  { %54 = vst [vmem:[%s114_s1] sm:$0x1] %v51_v15 }

// kernel: autoencoder_forward.6
= control target key start
LH: loop header
LB: loop body
LE: loop exit
PB: predicated region body
PF: predicated region fallthrough
CT: control target
= control target key end

     0   :  { %s2808_s12 = smov 0   ;;  %s3250_s0 = inlined_call_operand.vmem [shape: bf16[2,9,9,60], index: 0, kind: input, shape index: {}]   ;;  %s3251_s1 = inlined_call_operand.vmem [shape: bf16[9,60,128], index: 1, kind: input, shape index: {}]   ;;  %s3252_s2 = inlined_call_operand.vmem [shape: f32[1,128], index: 2, kind: input, shape index: {}]   ;;  %s3253_s3 = inlined_call_operand.vmem [shape: bf16[2,4,64,128], index: 3, kind: output, shape index: {}]  }
   0x1 LB: > { %s2075_s13 = sadd.s32 4294967295, %s2786_s12   ;;  %p2079_p0 = scmp.ge.s32.totalorder %s2786_s12, 1  ;;  %s2786_s12 = sphi %s2808_s12, %s13_s12  }
   0x2   : > { %p137_p1 = scmp.lt.s32.totalorder %s2786_s12, 3 }
   0x4   : > { %p138_p2 = pnand %p2079_p0, %p137_p1 }
   0x5   : > { %p161_p3 = scmp.lt.s32.totalorder (!%p138_p2), %s2075_s13, 1 }
   0x6   : > { %141 = sbr.rel (%p138_p2) target bundleno = 312 (0x138), region = 32 }
   0xb   : > { %v2720_v0 = vld [vmem:[%s3251_s1 + $0x98] sm:$0x3f]   ;;  %vm252_vm0 = vcmask 1045504   ;;  %v2722_v1 = vld [vmem:[%s3251_s1 + $0x90] sm:$0xff]   ;;  %v2724_v6 = vld [vmem:[%s3251_s1 + $0x88] sm:$0xff]   ;;  %s3257_s13 = smov (!%p161_p3, %s2075_s13), 1 }
   0xc   : > { %2701 = vmatprep.subr.msk.bf16.mxu0 %vm252_vm0, %v2720_v0  ;;  %v2721_v2 = vld [vmem:[%s3251_s1 + $0x78] sm:$0x3f]   ;;  %v254_v3 = vsel %vm252_vm0, %v2720_v0, 0  ;;  %v2723_v4 = vld [vmem:[%s3251_s1 + $0x70] sm:$0xff]   ;;  %v2725_v7 = vld [vmem:[%s3251_s1 + $0x68] sm:$0xff]   ;;  %s2711_s30 = smul.u32 72, %s3257_s13 }
   0xd   : > { %2550 = vmatpush3.bf16.msra.mxu0 %v254_v3  ;;  %2702 = vmatprep.subr.msk.bf16.mxu1 %vm252_vm0, %v2721_v2  ;;  %v566_v5 = vsel %vm252_vm0, %v2721_v2, 0  ;;  %v2726_v8 = vld [vmem:[%s3251_s1 + $0x80] sm:$0xff]   ;;  %vm394_vm1 = vsmask.f32 3328  ;;  %v2730_v10 = vld [vmem:[%s3251_s1 + $0xb8] sm:$0x3f]  }
   0xe   : > { %2551 = vmatprep.subr.bf16.mxu0 %v2722_v1  ;;  %2566 = vmatpush3.bf16.msra.mxu1 %v566_v5  ;;  %v2727_v9 = vld [vmem:[%s3251_s1 + $0x60] sm:$0xff]   ;;  %vm395_vm2 = vsmask.f32 7440  ;;  %s2853_s8 = scalar_lea.vmem %s3250_s0, %s2711_s30  ;;  %vm239_vm3 = vcmask 490496   ;;  %v689_v11 = vsel %vm252_vm0, %v2730_v10, 0  ;;  %v2732_v18 = vld [vmem:[%s3251_s1 + $0xb0] sm:$0xff]  }
   0xf   : > { %2567 = vmatprep.subr.bf16.mxu1 %v2723_v4  ;;  %v2728_v12 = vld [vmem:[%s2853_s8] ss:$8 sps:$4 sm:$0xff]   ;;  %v2731_v13 = vld [vmem:[%s3251_s1 + $0x38] sm:$0x3f]   ;;  %v386_v17 = vld [vmem:[%s2853_s8 + $0x4] sm:$0x1] }
  0x10   : > { %v2729_v14 = vld [vmem:[%s2853_s8 + $0x10] ss:$8 sps:$4 sm:$0xff]   ;;  %2557 = vmatprep.mubr.msk.bf16.mxu0 %vm239_vm3, %v2728_v12  ;;  %v2863_v15 = vld [vmem:[%s2853_s8] sm:$0xf]  ;;  %v2866_v16 = vld [vmem:[%s2853_s8 + $0x8] sm:$0xf] }
  0x11   : > { %2552 = vmatpush3.bf16.msra.mxu0 %v2722_v1  ;;  %v387_v19 = vld [vmem:[%s2853_s8 + $0xc] sm:$0x1]  ;;  %v398_v20 = vshrl.u32 %v2863_v15, 16  ;;  %v401_v21 = vshll.u32 %v2863_v15, 16  ;;  %v407_v22 = vshll.u32 %v386_v17, 16  ;;  %v412_v23 = vshrl.u32 %v2866_v16, 16  ;;  %vm2894_vm4 = vmor %vm394_vm1, %vm395_vm2 }
  0x12   : > { %2553 = vmatprep.subr.bf16.mxu0 %v2724_v6  ;;  %2568 = vmatpush3.bf16.msra.mxu1 %v2723_v4  ;;  %v415_v24 = vshll.u32 %v2866_v16, 16  ;;  %v421_v25 = vshll.u32 %v387_v19, 16  ;;  %v2879_v26 = vld [vmem:[%s2853_s8 + $0x10] sm:$0xf]  ;;  %v2882_v27 = vld [vmem:[%s2853_s8 + $0x18] sm:$0xf]  ;;  %v2140_v0 = vcombine.low %v2863_v15, %v2866_v16 }
  0x13   : > { %2569 = vmatprep.subr.bf16.mxu1 %v2725_v7  ;;  %v400_v28 = vrot.slane %v398_v20, 4  ;;  %v403_v29 = vrot.slane %v401_v21, 5  ;;  %v409_v30 = vrot.slane %v407_v22, 5  ;;  %v414_v31 = vrot.slane %v412_v23, 4  ;;  %v388_v32 = vld [vmem:[%s2853_s8 + $0x14] sm:$0x1] }
  0x14   : > { %v417_v33 = vrot.slane %v415_v24, 5  ;;  %v423_v34 = vrot.slane %v421_v25, 5  ;;  %v389_v35 = vld [vmem:[%s2853_s8 + $0x1c] sm:$0x1]  ;;  %v426_v36 = vshrl.u32 %v2879_v26, 16  ;;  %v429_v37 = vshll.u32 %v2879_v26, 16 }
  0x15   : > { %2554 = vmatpush3.bf16.msra.mxu0 %v2724_v6  ;;  %v404_v38 = vor.u32 %v403_v29, %v400_v28  ;;  %v435_v39 = vshll.u32 %v388_v32, 16  ;;  %v440_v40 = vshrl.u32 %v2882_v27, 16  ;;  %v443_v41 = vshll.u32 %v2882_v27, 16  ;;  %v2736_v47 = vld [vmem:[%s3251_s1 + $0xa8] sm:$0xff]   ;;  %v2735_v61 = vld [vmem:[%s2853_s8 + $0x30] ss:$8 sps:$4 sm:$0xff]  }
  0x16   : > { %2555 = vmatprep.subr.bf16.mxu0 %v2726_v8  ;;  %2570 = vmatpush3.bf16.msra.mxu1 %v2725_v7  ;;  %v418_v43 = vor.u32 %v417_v33, %v414_v31  ;;  %v428_v44 = vrot.slane %v426_v36, 4  ;;  %v431_v45 = vrot.slane %v429_v37, 5  ;;  %v449_v46 = vshll.u32 %v389_v35, 16  ;;  %v2734_v58 = vld [vmem:[%s2853_s8 + $0x20] ss:$8 sps:$4 sm:$0xff]   ;;  %v2733_v16 = vld [vmem:[%s3251_s1 + $0x30] sm:$0xff]  }
  0x17   : > { %2571 = vmatprep.subr.bf16.mxu1 %v2727_v9  ;;  %v405_v48 = vrot.slane %v404_v38, 4  ;;  %v437_v49 = vrot.slane %v435_v39, 5  ;;  %v442_v50 = vrot.slane %v440_v40, 4  ;;  %v445_v51 = vrot.slane %v443_v41, 5  ;;  %v2909_v62 = vld [vmem:[%s2853_s8 + $0x20] sm:$0xf] }
  0x18   : > { %v419_v52 = vrot.slane %v418_v43, 4  ;;  %v432_v53 = vor.u32 %v431_v45, %v428_v44  ;;  %v451_v54 = vrot.slane %v449_v46, 5  ;;  %v911_v55 = vsel %vm252_vm0, %v2731_v13, 0  ;;  %v2738_v63 = vld [vmem:[%s3251_s1 + $0xa0] sm:$0xff]   ;;  %v374_v3 = vld [vmem:[%s2853_s8 + $0x28] sm:$0xf] }
  0x19   : > { %2556 = vmatpush3.bf16.msra.mxu0 %v2726_v8  ;;  %v410_v56 = vsel %vm2894_vm4, %v405_v48, %v409_v30  ;;  %v446_v57 = vor.u32 %v445_v51, %v442_v50  ;;  %v390_v4 = vld [vmem:[%s2853_s8 + $0x24] sm:$0x1]  ;;  %v454_v5 = vshrl.u32 %v2909_v62, 16  ;;  %v391_v7 = vld [vmem:[%s2853_s8 + $0x2c] sm:$0x1]  ;;  %v457_v8 = vshll.u32 %v2909_v62, 16 }
  0x1a   : > { %2703 = vmatprep.subr.msk.bf16.mxu0 %vm252_vm0, %v2730_v10  ;;  %2572 = vmatpush3.bf16.msra.mxu1 %v2727_v9  ;;  %v424_v59 = vsel %vm2894_vm4, %v419_v52, %v423_v34  ;;  %v433_v60 = vrot.slane %v432_v53, 4  ;;  %v463_v9 = vshll.u32 %v390_v4, 16  ;;  %v468_v10 = vshrl.u32 %v374_v3, 16  ;;  %v375_v23 = vld [vmem:[%s2853_s8 + $0x30] sm:$0xf]  ;;  %v2737_v31 = vld [vmem:[%s3251_s1 + $0x28] sm:$0xff]  }
  0x1b   : > { %2704 = vmatprep.subr.msk.bf16.mxu1 %vm252_vm0, %v2731_v13  ;;  %v2128_v1 = vcombine.low %v410_v56, %v424_v59  ;;  %v447_v2 = vrot.slane %v446_v57, 4  ;;  %v456_v12 = vrot.slane %v454_v5, 4  ;;  %v471_v13 = vshll.u32 %v374_v3, 16  ;;  %v376_v24 = vld [vmem:[%s2853_s8 + $0x38] sm:$0xf]  ;;  %v2739_v51 = vld [vmem:[%s3251_s1 + $0x20] sm:$0xff]  }
  0x1c   : > { %2558 = vmatmul.mubr.msk.bf16.vlgmr.msra.gmra.mxu0 %vm239_vm3, %v2729_v14  ;;  %v438_v6 = vsel %vm2894_vm4, %v433_v60, %v437_v49  ;;  %v477_v14 = vshll.u32 %v391_v7, 16  ;;  %v459_v17 = vrot.slane %v457_v8, 5  ;;  %v470_v19 = vrot.slane %v468_v10, 4  ;;  %v392_v25 = vld [vmem:[%s2853_s8 + $0x34] sm:$0x1]  ;;  %s2349_s18 = sshll.u32 %s3257_s13, 7 }
  0x1d   : > { %2582 = vmatpush3.bf16.msra.mxu0 %v689_v11  ;;  %2561 = vmatprep.mubr.msk.bf16.mxu0 %vm239_vm3, %v2734_v58  ;;  %v452_v11 = vsel %vm2894_vm4, %v447_v2, %v451_v54  ;;  %v473_v20 = vrot.slane %v471_v13, 5  ;;  %v2141_v28 = vcombine.low %v2879_v26, %v2882_v27  ;;  %v2142_v29 = vcombine.low %v2909_v62, %v374_v3  ;;  %v393_v32 = vld [vmem:[%s2853_s8 + $0x3c] sm:$0x1]  ;;  %v2746_v56 = vld [vmem:[%s3251_s1 + $0xf0] sm:$0xff]   ;;  %v2745_v2 = vld [vmem:[%s2853_s8 + $0x18] ss:$8 sps:$4 sm:$0xff]   ;;  %s3201_s21 = scalar_lea.vmem %s3253_s3, %s2349_s18 }
  0x1e   : > { %2583 = vmatprep.subr.bf16.mxu0 %v2732_v18  ;;  %2573 = vmatprep.mubr.msk.bf16.mxu1 %vm239_vm3, %v2128_v1  ;;  %v2129_v15 = vcombine.low %v438_v6, %v452_v11  ;;  %v479_v21 = vrot.slane %v477_v14, 5  ;;  %v460_v22 = vor.u32 %v459_v17, %v456_v12  ;;  %v482_v33 = vshrl.u32 %v375_v23, 16  ;;  %v2743_v53 = vld [vmem:[%s3251_s1 + $0xf8] sm:$0x3f]   ;;  %v2754_v1 = vld [vmem:[%s3251_s1 + $0xe0] sm:$0xff]   ;;  %v2747_v3 = vld [vmem:[%s3251_s1 + $0xd0] sm:$0xff]  }
  0x1f   : > { %v474_v30 = vor.u32 %v473_v20, %v470_v19  ;;  %v485_v34 = vshll.u32 %v375_v23, 16  ;;  %v491_v35 = vshll.u32 %v392_v25, 16  ;;  %v496_v37 = vshrl.u32 %v376_v24, 16  ;;  %v2744_v59 = vld [vmem:[%s3251_s1 + $0xd8] sm:$0x3f]   ;;  %v2752_v17 = vld [vmem:[%s3251_s1 + $0xc8] sm:$0xff]  }
  0x20   : > { %2574 = vmatmul.mubr.msk.bf16.vlgmr.msra.gmra.mxu1 %vm239_vm3, %v2129_v15  ;;  %v461_v36 = vrot.slane %v460_v22, 4  ;;  %v499_v38 = vshll.u32 %v376_v24, 16  ;;  %v505_v39 = vshll.u32 %v393_v32, 16  ;;  %v484_v26 = vrot.slane %v482_v33, 4  ;;  %v2756_v4 = vld [vmem:[%s2853_s8] ss:$8 sps:$4 sm:$0xff]  }
  0x21   : > { %2584 = vmatpush3.bf16.msra.mxu0 %v2732_v18  ;;  %v465_v18 = vrot.slane %v463_v9, 5  ;;  %2598 = vmatpush3.bf16.msra.mxu1 %v911_v55  ;;  %v475_v40 = vrot.slane %v474_v30, 4  ;;  %v487_v27 = vrot.slane %v485_v34, 5  ;;  %v493_v43 = vrot.slane %v491_v35, 5  ;;  %v2742_v55 = vld [vmem:[%s2853_s8 + $0x8] ss:$8 sps:$4 sm:$0xff]  }
  0x22   : > { %2585 = vmatprep.subr.bf16.mxu0 %v2736_v47  ;;  %2599 = vmatprep.subr.bf16.mxu1 %v2733_v16  ;;  %v498_v44 = vrot.slane %v496_v37, 4  ;;  %v501_v45 = vrot.slane %v499_v38, 5  ;;  %v507_v50 = vrot.slane %v505_v39, 5  ;;  %v2143_v57 = vcombine.low %v375_v23, %v376_v24  ;;  %v2750_v5 = vld [vmem:[%s2853_s8 + $0x28] ss:$8 sps:$4 sm:$0xff]  }
  0x23   : > { %v466_v41 = vsel %vm2894_vm4, %v461_v36, %v465_v18  ;;  %v480_v46 = vsel %vm2894_vm4, %v475_v40, %v479_v21  ;;  %v2987_v6 = vld [vmem:[%s2853_s8] sm:$0xf]  ;;  %v2990_v7 = vld [vmem:[%s2853_s8 + $0x8] sm:$0xf]  ;;  %v1182_v8 = vld [vmem:[%s2853_s8 + $0x4] sm:$0x1] }
  0x24   : > { %2562 = vmatmul.mubr.msk.bf16.gmra.mxu0 %vm239_vm3, %v2735_v61  ;;  %v2130_v48 = vcombine.low %v466_v41, %v480_v46  ;;  %v502_v49 = vor.u32 %v501_v45, %v498_v44  ;;  %v1034_v61 = vsel %vm252_vm0, %v2743_v53, 0  ;;  %v1183_v9 = vld [vmem:[%s2853_s8 + $0xc] sm:$0x1]  ;;  %v1191_v10 = vshrl.u32 %v2987_v6, 16  ;;  %v2757_v12 = vld [vmem:[%s2853_s8 + $0x10] ss:$8 sps:$4 sm:$0xff]  }
  0x25   : > { %2586 = vmatpush3.bf16.msra.mxu0 %v2736_v47  ;;  %2589 = vmatprep.mubr.msk.bf16.mxu0 %vm239_vm3, %v2140_v0  ;;  %v488_v47 = vor.u32 %v487_v27, %v484_v26  ;;  %v1359_v0 = vsel %vm252_vm0, %v2744_v59, 0  ;;  %v1194_v11 = vshll.u32 %v2987_v6, 16  ;;  %v1200_v13 = vshll.u32 %v1182_v8, 16  ;;  %v2758_v20 = vld [vmem:[%s3251_s1 + $0x118] sm:$0x3f]   ;;  %v2755_v41 = vld [vmem:[%s3251_s1 + $0xc0] sm:$0xff]  }
  0x26   : > { %2587 = vmatprep.subr.bf16.mxu0 %v2738_v63  ;;  %2600 = vmatpush3.bf16.msra.mxu1 %v2733_v16  ;;  %v503_v54 = vrot.slane %v502_v49, 4  ;;  %v1205_v14 = vshrl.u32 %v2990_v7, 16  ;;  %v1208_v15 = vshll.u32 %v2990_v7, 16  ;;  %v1214_v16 = vshll.u32 %v1183_v9, 16  ;;  %v2753_v25 = vld [vmem:[%s2853_s8 + $0x38] ss:$8 sps:$4 sm:$0xff]  }
  0x27   : > { %2601 = vmatprep.subr.bf16.mxu1 %v2737_v31  ;;  %v489_v52 = vrot.slane %v488_v47, 4  ;;  %2577 = vmatprep.mubr.msk.bf16.mxu1 %vm239_vm3, %v2130_v48  ;;  %v1193_v18 = vrot.slane %v1191_v10, 4  ;;  %v1196_v19 = vrot.slane %v1194_v11, 5  ;;  %v1202_v21 = vrot.slane %v1200_v13, 5  ;;  %v3013_v30 = vld [vmem:[%s2853_s8 + $0x10] sm:$0xf] }
  0x28   : > { %v508_v60 = vsel %vm2894_vm4, %v503_v54, %v507_v50  ;;  %v1207_v22 = vrot.slane %v1205_v14, 4  ;;  %v1210_v23 = vrot.slane %v1208_v15, 5  ;;  %v1216_v24 = vrot.slane %v1214_v16, 5  ;;  %v3017_v32 = vld [vmem:[%s2853_s8 + $0x18] sm:$0xf]  ;;  %v2761_v11 = vld [vmem:[%s3251_s1 + $0x50] sm:$0xff]  }
  0x29   : > { %2588 = vmatpush3.bf16.msra.mxu0 %v2738_v63  ;;  %v494_v58 = vsel %vm2894_vm4, %v489_v52, %v493_v43  ;;  %v2751_v63 = vld [vmem:[%s3251_s1 + $0xe8] sm:$0xff]   ;;  %v1184_v33 = vld [vmem:[%s2853_s8 + $0x14] sm:$0x1]  ;;  %v1185_v34 = vld [vmem:[%s2853_s8 + $0x1c] sm:$0x1]  ;;  %v1219_v36 = vshrl.u32 %v3013_v30, 16 }
  0x2a   : > { %2602 = vmatpush3.bf16.msra.mxu1 %v2737_v31  ;;  %2705 = vmatprep.subr.msk.bf16.mxu0 %vm252_vm0, %v2743_v53  ;;  %v2131_v62 = vcombine.low %v494_v58, %v508_v60  ;;  %v1211_v31 = vor.u32 %v1210_v23, %v1207_v22  ;;  %v1222_v37 = vshll.u32 %v3013_v30, 16  ;;  %v1228_v38 = vshll.u32 %v1184_v33, 16  ;;  %v3043_v60 = vld [vmem:[%s2853_s8 + $0x20] sm:$0xf]  ;;  %v3078_v22 = vld [vmem:[%s2853_s8 + $0x38] sm:$0xf] }
  0x2b   : > { %2603 = vmatprep.subr.bf16.mxu1 %v2739_v51  ;;  %v1233_v40 = vshrl.u32 %v3017_v32, 16  ;;  %v1236_v26 = vshll.u32 %v3017_v32, 16  ;;  %v1242_v27 = vshll.u32 %v1185_v34, 16  ;;  %v1221_v44 = vrot.slane %v1219_v36, 4  ;;  %v1188_v23 = vld [vmem:[%s2853_s8 + $0x34] sm:$0x1] }
  0x2c   : > { %2590 = vmatmul.mubr.msk.bf16.vlgmr.msra.gmra.mxu0 %vm239_vm3, %v2141_v28  ;;  %2578 = vmatmul.mubr.msk.bf16.gmra.mxu1 %vm239_vm3, %v2131_v62  ;;  %v1197_v28 = vor.u32 %v1196_v19, %v1193_v18  ;;  %v1212_v39 = vrot.slane %v1211_v31, 4  ;;  %v1224_v45 = vrot.slane %v1222_v37, 5  ;;  %v1230_v46 = vrot.slane %v1228_v38, 5 }
  0x2d   : > { %2593 = vmatprep.mubr.msk.bf16.mxu0 %vm239_vm3, %v2142_v29  ;;  %2614 = vmatpush3.bf16.msra.mxu0 %v1034_v61  ;;  %v2759_v29 = vld [vmem:[%s3251_s1 + $0x58] sm:$0x3f]   ;;  %v1235_v48 = vrot.slane %v1233_v40, 4  ;;  %v1238_v49 = vrot.slane %v1236_v26, 5  ;;  %v1244_v50 = vrot.slane %v1242_v27, 5  ;;  %v1482_v54 = vsel %vm252_vm0, %v2758_v20, 0 }
  0x2e   : > { %2615 = vmatprep.subr.bf16.mxu0 %v2746_v56  ;;  %2604 = vmatpush3.bf16.msra.mxu1 %v2739_v51  ;;  %v1198_v35 = vrot.slane %v1197_v28, 4  ;;  %v1217_v47 = vsel %vm2894_vm4, %v1212_v39, %v1216_v24  ;;  %v2760_v51 = vld [vmem:[%s3251_s1 + $0x110] sm:$0xff]   ;;  %v1225_v53 = vor.u32 %v1224_v45, %v1221_v44  ;;  %v2764_v61 = vld [vmem:[%s3251_s1 + $0x108] sm:$0xff]   ;;  %v1189_v28 = vld [vmem:[%s2853_s8 + $0x3c] sm:$0x1]  ;;  %v1284_v33 = vshll.u32 %v1188_v23, 16 }
  0x2f   : > { %2605 = vmatprep.mubr.msk.bf16.mxu1 %vm239_vm3, %v2742_v55  ;;  %2706 = vmatprep.subr.msk.bf16.mxu1 %vm252_vm0, %v2744_v59  ;;  %v1622_v55 = vsel %vm252_vm0, %v2759_v29, 0  ;;  %v2763_v59 = vld [vmem:[%s2853_s8 + $0x30] ss:$8 sps:$4 sm:$0xff]   ;;  %v1292_v36 = vshll.u32 %v3078_v22, 16  ;;  %v1298_v37 = vshll.u32 %v1189_v28, 16  ;;  %v2263_v26 = vcombine.low %v3013_v30, %v3017_v32  ;;  %v2767_v30 = vld [vmem:[%s3251_s1 + $0x40] sm:$0xff]  }
  0x30   : > { %v1203_v43 = vsel %vm2894_vm4, %v1198_v35, %v1202_v21  ;;  %v1226_v58 = vrot.slane %v1225_v53, 4  ;;  %v3075_v21 = vld [vmem:[%s2853_s8 + $0x30] sm:$0xf]  ;;  %v1289_v35 = vshrl.u32 %v3078_v22, 16 }
  0x31   : > { %2616 = vmatpush3.bf16.msra.mxu0 %v2746_v56  ;;  %v2250_v52 = vcombine.low %v1203_v43, %v1217_v47  ;;  %v1239_v56 = vor.u32 %v1238_v49, %v1235_v48  ;;  %v1278_v31 = vshll.u32 %v3075_v21, 16  ;;  %v1294_v44 = vrot.slane %v1292_v36, 5 }
  0x32   : > { %2617 = vmatprep.subr.bf16.mxu0 %v2751_v63  ;;  %v1291_v43 = vrot.slane %v1289_v35, 4  ;;  %v1300_v49 = vrot.slane %v1298_v37, 5 }
  0x33   : > { %v1240_v62 = vrot.slane %v1239_v56, 4  ;;  %v1280_v40 = vrot.slane %v1278_v31, 5 }
  0x34   : > { %2594 = vmatmul.mubr.msk.bf16.gmra.mxu0 %vm239_vm3, %v2143_v57  ;;  %2606 = vmatmul.mubr.msk.bf16.vlgmr.msra.gmra.mxu1 %vm239_vm3, %v2745_v2  ;;  %v2762_v57 = vld [vmem:[%s2853_s8 + $0x20] ss:$8 sps:$4 sm:$0xff]   ;;  %v2262_v2 = vcombine.low %v2987_v6, %v2990_v7  ;;  %v1295_v48 = vor.u32 %v1294_v44, %v1291_v43 }
  0x35   : > { %2618 = vmatpush3.bf16.msra.mxu0 %v2751_v63  ;;  %2621 = vmatprep.mubr.msk.bf16.mxu0 %vm239_vm3, %v2756_v4  ;;  %v3050_v63 = vld [vmem:[%s2853_s8 + $0x28] sm:$0xf]  ;;  %v1187_v4 = vld [vmem:[%s2853_s8 + $0x2c] sm:$0x1]  ;;  %v1245_v10 = vsel %vm2894_vm4, %v1240_v62, %v1244_v50  ;;  %v2771_v50 = vld [vmem:[%s3251_s1 + $0x18] sm:$0x3f]  }
  0x36   : > { %2619 = vmatprep.subr.bf16.mxu0 %v2754_v1  ;;  %2630 = vmatpush3.bf16.msra.mxu1 %v1359_v0  ;;  %v1186_v0 = vld [vmem:[%s2853_s8 + $0x24] sm:$0x1]  ;;  %v1261_v9 = vshrl.u32 %v3050_v63, 16  ;;  %v1264_v6 = vshll.u32 %v3050_v63, 16  ;;  %v1270_v7 = vshll.u32 %v1187_v4, 16  ;;  %v1296_v53 = vrot.slane %v1295_v48, 4 }
  0x37   : > { %2609 = vmatprep.mubr.msk.bf16.mxu1 %vm239_vm3, %v2750_v5  ;;  %2631 = vmatprep.subr.bf16.mxu1 %v2747_v3  ;;  %v1250_v5 = vshll.u32 %v3043_v60, 16  ;;  %v1256_v8 = vshll.u32 %v1186_v0, 16  ;;  %v2303_v62 = vld [vmem:[%s2853_s8 + $0xc] sm:$0x1]  ;;  %v2304_v0 = vld [vmem:[%s2853_s8 + $0x10] sm:$0xf] }
  0x38   : > { %v1263_v16 = vrot.slane %v1261_v9, 4  ;;  %v1266_v18 = vrot.slane %v1264_v6, 5  ;;  %v1272_v19 = vrot.slane %v1270_v7, 5  ;;  %v1301_v56 = vsel %vm2894_vm4, %v1296_v53, %v1300_v49  ;;  %v2772_v4 = vld [vmem:[%s2853_s8 + $0x18] ss:$8 sps:$4 sm:$0xff]  }
  0x39   : > { %2620 = vmatpush3.bf16.msra.mxu0 %v2754_v1  ;;  %v1247_v1 = vshrl.u32 %v3043_v60, 16  ;;  %v1252_v14 = vrot.slane %v1250_v5, 5  ;;  %v1258_v15 = vrot.slane %v1256_v8, 5  ;;  %v1723_v5 = vshll.u32 %v2303_v62, 16  ;;  %v2313_v48 = vld [vmem:[%s2853_s8 + $0x34] sm:$0x1] }
  0x3a   : > { %2707 = vmatprep.subr.msk.bf16.mxu0 %vm252_vm0, %v2758_v20  ;;  %2632 = vmatpush3.bf16.msra.mxu1 %v2747_v3  ;;  %v1231_v3 = vsel %vm2894_vm4, %v1226_v58, %v1230_v46  ;;  %v1267_v24 = vor.u32 %v1266_v18, %v1263_v16  ;;  %v1728_v8 = vshrl.u32 %v2304_v0, 16  ;;  %v1731_v9 = vshll.u32 %v2304_v0, 16 }
  0x3b   : > { %2633 = vmatprep.subr.bf16.mxu1 %v2752_v17  ;;  %v2251_v13 = vcombine.low %v1231_v3, %v1245_v10  ;;  %v1793_v0 = vshll.u32 %v2313_v48, 16 }
  0x3c   : > { %2622 = vmatmul.mubr.msk.bf16.vlgmr.msra.gmra.mxu0 %vm239_vm3, %v2757_v12  ;;  %2610 = vmatmul.mubr.msk.bf16.gmra.mxu1 %vm239_vm3, %v2753_v25  ;;  %v1249_v12 = vrot.slane %v1247_v1, 4  ;;  %v2765_v25 = vld [vmem:[%s3251_s1 + $0x48] sm:$0xff]   ;;  %v1268_v38 = vrot.slane %v1267_v24, 4  ;;  %v2305_v1 = vld [vmem:[%s2853_s8 + $0x14] sm:$0x1]  ;;  %v1730_v16 = vrot.slane %v1728_v8, 4 }
  0x3d   : > { %2646 = vmatpush3.bf16.msra.mxu0 %v1482_v54  ;;  %2637 = vmatprep.mubr.msk.bf16.mxu1 %vm239_vm3, %v2250_v52  ;;  %v2264_v52 = vcombine.low %v3043_v60, %v3050_v63  ;;  %v3124_v60 = vld [vmem:[%s3251_s1 + $0x8] sm:$0xff]   ;;  %v3133_v63 = vld [vmem:[%s3251_s1] sm:$0xff]   ;;  %v1737_v10 = vshll.u32 %v2305_v1, 16 }
  0x3e   : > { %2634 = vmatpush3.bf16.msra.mxu1 %v2752_v17  ;;  %2647 = vmatprep.subr.bf16.mxu0 %v2760_v51  ;;  %v2766_v17 = vld [vmem:[%s3251_s1 + $0x100] sm:$0xff]   ;;  %v1253_v20 = vor.u32 %v1252_v14, %v1249_v12  ;;  %v1273_v45 = vsel %vm2894_vm4, %v1268_v38, %v1272_v19  ;;  %v2776_v12 = vld [vmem:[%s2853_s8 + $0x28] ss:$8 sps:$4 sm:$0xff]  }
  0x3f   : > { %2635 = vmatprep.subr.bf16.mxu1 %v2755_v41  ;;  %2625 = vmatprep.mubr.msk.bf16.mxu0 %vm239_vm3, %v2762_v57  ;;  %v2770_v57 = vld [vmem:[%s2853_s8 + $0x8] ss:$8 sps:$4 sm:$0xff]   ;;  %v2308_v14 = vld [vmem:[%s2853_s8 + $0x20] sm:$0xf]  ;;  %v1739_v18 = vrot.slane %v1737_v10, 5 }
  0x40   : > { %v1254_v34 = vrot.slane %v1253_v20, 4  ;;  %v2309_v19 = vld [vmem:[%s2853_s8 + $0x24] sm:$0x1]  ;;  %v2310_v24 = vld [vmem:[%s2853_s8 + $0x28] sm:$0xf]  ;;  %v1756_v28 = vshrl.u32 %v2308_v14, 16 }
  0x41   : > { %2648 = vmatpush3.bf16.msra.mxu0 %v2760_v51  ;;  %v3104_v51 = vld [vmem:[%s3251_s1 + $0x10] sm:$0xff]   ;;  %v1765_v31 = vshll.u32 %v2309_v19, 16  ;;  %v1770_v44 = vshrl.u32 %v2310_v24, 16  ;;  %v2316_v1 = vld [vmem:[%s2853_s8 + $0x40] sm:$0xf] }
  0x42   : > { %2636 = vmatpush3.bf16.msra.mxu1 %v2755_v41  ;;  %2649 = vmatprep.subr.bf16.mxu0 %v2764_v61  ;;  %v1259_v27 = vsel %vm2894_vm4, %v1254_v34, %v1258_v15  ;;  %v1286_v41 = vrot.slane %v1284_v33, 5  ;;  %v1725_v15 = vrot.slane %v1723_v5, 5  ;;  %v2311_v33 = vld [vmem:[%s2853_s8 + $0x2c] sm:$0x1]  ;;  %v2312_v38 = vld [vmem:[%s2853_s8 + $0x30] sm:$0xf] }
  0x43   : > { %2708 = vmatprep.subr.msk.bf16.mxu1 %vm252_vm0, %v2759_v29  ;;  %v1275_v29 = vshrl.u32 %v3075_v21, 16  ;;  %v2252_v47 = vcombine.low %v1259_v27, %v1273_v45  ;;  %v1767_v27 = vrot.slane %v1765_v31, 5  ;;  %v1773_v45 = vshll.u32 %v2310_v24, 16  ;;  %v2317_v8 = vld [vmem:[%s2853_s8 + $0x44] sm:$0x1] }
  0x44   : > { %2626 = vmatmul.mubr.msk.bf16.gmra.mxu0 %vm239_vm3, %v2763_v59  ;;  %v2265_v59 = vcombine.low %v3075_v21, %v3078_v22  ;;  %v1779_v49 = vshll.u32 %v2311_v33, 16 }
  0x45   : > { %2653 = vmatprep.mubr.msk.bf16.mxu0 %vm239_vm3, %v2262_v2  ;;  %2638 = vmatmul.mubr.msk.bf16.vlgmr.msra.gmra.mxu1 %vm239_vm3, %v2251_v13  ;;  %v1277_v39 = vrot.slane %v1275_v29, 4  ;;  %v2307_v13 = vld [vmem:[%s2853_s8 + $0x1c] sm:$0x1]  ;;  %v1759_v29 = vshll.u32 %v2308_v14, 16  ;;  %v1812_v14 = vshrl.u32 %v2316_v1, 16 }
  0x46   : > { %2662 = vmatpush3.bf16.msra.mxu1 %v1622_v55  ;;  %2650 = vmatpush3.bf16.msra.mxu0 %v2764_v61  ;;  %v1881_v55 = vsel %vm252_vm0, %v2771_v50, 0  ;;  %v2302_v61 = vld [vmem:[%s2853_s8 + $0x8] sm:$0xf]  ;;  %v1751_v23 = vshll.u32 %v2307_v13, 16 }
  0x47   : > { %2663 = vmatprep.subr.bf16.mxu1 %v2761_v11  ;;  %2651 = vmatprep.subr.bf16.mxu0 %v2766_v17  ;;  %v1281_v46 = vor.u32 %v1280_v40, %v1277_v39  ;;  %v1714_v2 = vshrl.u32 %v2302_v61, 16  ;;  %v1717_v3 = vshll.u32 %v2302_v61, 16  ;;  %v1758_v40 = vrot.slane %v1756_v28, 4 }
  0x48   : > { %2641 = vmatprep.mubr.msk.bf16.mxu1 %vm239_vm3, %v2252_v47  ;;  %v1753_v37 = vrot.slane %v1751_v23, 5 }
  0x49   : > { %v1282_v32 = vrot.slane %v1281_v46, 4  ;;  %v1716_v6 = vrot.slane %v1714_v2, 4  ;;  %v1719_v7 = vrot.slane %v1717_v3, 5 }
  0x4a   : > { %2664 = vmatpush3.bf16.msra.mxu1 %v2761_v11  ;;  %2652 = vmatpush3.bf16.msra.mxu0 %v2766_v17  ;;  %v2306_v11 = vld [vmem:[%s2853_s8 + $0x18] sm:$0xf]  ;;  %v1733_v17 = vrot.slane %v1731_v9, 5 }
  0x4b   : > { %2665 = vmatprep.subr.bf16.mxu1 %v2765_v25  ;;  %v1287_v54 = vsel %vm2894_vm4, %v1282_v32, %v1286_v41  ;;  %2709 = vmatprep.subr.msk.bf16.mxu0 %vm252_vm0, %v2771_v50  ;;  %v1720_v20 = vor.u32 %v1719_v7, %v1716_v6  ;;  %v1742_v21 = vshrl.u32 %v2306_v11, 16  ;;  %v1745_v22 = vshll.u32 %v2306_v11, 16  ;;  %v2314_v32 = vld [vmem:[%s2853_s8 + $0x38] sm:$0xf] }
  0x4c   : > { %v2253_v58 = vcombine.low %v1287_v54, %v1301_v56  ;;  %v1772_v54 = vrot.slane %v1770_v44, 4  ;;  %v1798_v2 = vshrl.u32 %v2314_v32, 16  ;;  %v1801_v9 = vshll.u32 %v2314_v32, 16 }
  0x4d   : > { %2654 = vmatmul.mubr.msk.bf16.vlgmr.msra.gmra.mxu0 %vm239_vm3, %v2263_v26  ;;  %v1721_v34 = vrot.slane %v1720_v20, 4  ;;  %v1744_v35 = vrot.slane %v1742_v21, 4  ;;  %v1747_v36 = vrot.slane %v1745_v22, 5  ;;  %v1761_v26 = vrot.slane %v1759_v29, 5 }
  0x4e   : > { %2666 = vmatpush3.bf16.msra.mxu1 %v2765_v25  ;;  %2678 = vmatpush3.bf16.msra.mxu0 %v1881_v55  ;;  %v1734_v25 = vor.u32 %v1733_v17, %v1730_v16  ;;  %v1800_v11 = vrot.slane %v1798_v2, 4  ;;  %v1795_v7 = vrot.slane %v1793_v0, 5  ;;  %v1803_v13 = vrot.slane %v1801_v9, 5 }
  0x4f   : > { %2667 = vmatprep.subr.bf16.mxu1 %v2767_v30  ;;  %2679 = vmatprep.subr.bf16.mxu0 %v3104_v51  ;;  %v1726_v41 = vsel %vm2894_vm4, %v1721_v34, %v1725_v15  ;;  %v1748_v43 = vor.u32 %v1747_v36, %v1744_v35  ;;  %v1762_v47 = vor.u32 %v1761_v26, %v1758_v40  ;;  %v1815_v15 = vshll.u32 %v2316_v1, 16 }
  0x50   : > { %2657 = vmatprep.mubr.msk.bf16.mxu0 %vm239_vm3, %v2264_v52  ;;  %2642 = vmatmul.mubr.msk.bf16.gmra.mxu1 %vm239_vm3, %v2253_v58  ;;  %v1735_v39 = vrot.slane %v1734_v25, 4  ;;  %v1787_v58 = vshll.u32 %v2312_v38, 16  ;;  %v1821_v16 = vshll.u32 %v2317_v8, 16  ;;  %v1804_v19 = vor.u32 %v1803_v13, %v1800_v11 }
  0x51   : > { %2669 = vmatprep.mubr.msk.bf16.mxu1 %vm239_vm3, %v2770_v57  ;;  %v1749_v53 = vrot.slane %v1748_v43, 4  ;;  %v1763_v56 = vrot.slane %v1762_v47, 4  ;;  %v1814_v20 = vrot.slane %v1812_v14, 4  ;;  %v1817_v22 = vrot.slane %v1815_v15, 5 }
  0x52   : > { %2668 = vmatpush3.bf16.msra.mxu1 %v2767_v30  ;;  %2680 = vmatpush3.bf16.msra.mxu0 %v3104_v51  ;;  %v1740_v46 = vsel %vm2894_vm4, %v1735_v39, %v1739_v18  ;;  %v1784_v30 = vshrl.u32 %v2312_v38, 16  ;;  %v1789_v5 = vrot.slane %v1787_v58, 5  ;;  %v1805_v24 = vrot.slane %v1804_v19, 4 }
  0x53   : > { %2710 = vmatprep.subr.msk.bf16.mxu1 %vm252_vm0, %v2771_v50  ;;  %2681 = vmatprep.subr.bf16.mxu0 %v3124_v60  ;;  %v2778_v50 = vld [vmem:[%s2853_s8 + $0x38] ss:$8 sps:$4 sm:$0xff]   ;;  %v2318_v52 = vcombine.low %v1726_v41, %v1740_v46  ;;  %v1754_v61 = vsel %vm2894_vm4, %v1749_v53, %v1753_v37  ;;  %v1768_v3 = vsel %vm2894_vm4, %v1763_v56, %v1767_v27  ;;  %v1823_v28 = vrot.slane %v1821_v16, 5 }
  0x54   : > { %v1786_v57 = vrot.slane %v1784_v30, 4  ;;  %v2319_v10 = vcombine.low %v1754_v61, %v1768_v3  ;;  %v1818_v25 = vor.u32 %v1817_v22, %v1814_v20 }
  0x55   : > { %2658 = vmatmul.mubr.msk.bf16.gmra.mxu0 %vm239_vm3, %v2265_v59  ;;  %v2315_v59 = vld [vmem:[%s2853_s8 + $0x3c] sm:$0x1] }
  0x56   : > { %2682 = vmatpush3.bf16.msra.mxu0 %v3124_v60  ;;  %2685 = vmatprep.mubr.msk.bf16.mxu0 %vm239_vm3, %v2318_v52  ;;  %v1790_v6 = vor.u32 %v1789_v5, %v1786_v57  ;;  %v1819_v31 = vrot.slane %v1818_v25, 4 }
  0x57   : > { %2683 = vmatprep.subr.bf16.mxu0 %v3133_v63 }
  0x58   : > { %2670 = vmatmul.mubr.msk.bf16.vlgmr.msra.gmra.mxu1 %vm239_vm3, %v2772_v4  ;;  %v1781_v4 = vrot.slane %v1779_v49, 5  ;;  %v1791_v18 = vrot.slane %v1790_v6, 4  ;;  %v1824_v33 = vsel %vm2894_vm4, %v1819_v31, %v1823_v28 }
  0x59   : > { %2697 = vmatpush3.bf16.msra.mxu1 %v1881_v55  ;;  %2673 = vmatprep.mubr.msk.bf16.mxu1 %vm239_vm3, %v2776_v12  ;;  %v1775_v55 = vrot.slane %v1773_v45, 5  ;;  %v1807_v12 = vshll.u32 %v2315_v59, 16 }
  0x5a   : > { %2694 = vmatprep.subr.bf16.mxu1 %v3104_v51  ;;  %2684 = vmatpush3.bf16.msra.mxu0 %v3133_v63  ;;  %v1796_v23 = vsel %vm2894_vm4, %v1791_v18, %v1795_v7 }
  0x5b   : > { %v1776_v62 = vor.u32 %v1775_v55, %v1772_v54  ;;  %v1809_v21 = vrot.slane %v1807_v12, 5 }
  0x5d   : > { %2698 = vmatpush3.bf16.msra.mxu1 %v3104_v51  ;;  %v1777_v51 = vrot.slane %v1776_v62, 4  ;;  %2686 = vmatmul.mubr.msk.bf16.vlgmr.msra.gmra.mxu0 %vm239_vm3, %v2319_v10  ;;  %v1810_v29 = vsel %vm2894_vm4, %v1805_v24, %v1809_v21 }
  0x5e   : > { %2695 = vmatprep.subr.bf16.mxu1 %v3124_v60  ;;  %v2321_v34 = vcombine.low %v1810_v29, %v1824_v33 }
  0x5f   : > { %v1782_v17 = vsel %vm2894_vm4, %v1777_v51, %v1781_v4 }
  0x60   : > { %2674 = vmatmul.mubr.msk.bf16.gmra.mxu1 %vm239_vm3, %v2778_v50 }
  0x61   : > { %2699 = vmatpush3.bf16.msra.mxu1 %v3124_v60  ;;  %v2320_v60 = vcombine.low %v1782_v17, %v1796_v23 }
  0x62   : > { %2696 = vmatprep.subr.bf16.mxu1 %v3133_v63 }
  0x63   : > { %2689 = vmatprep.mubr.msk.bf16.mxu1 %vm239_vm3, %v2320_v60 }
  0x65   : > { %2700 = vmatpush3.bf16.msra.mxu1 %v3133_v63  ;;  %v3191_v63 = vld [vmem:[%s3252_s2] ss:$0 sm:$0xff] }
  0x68   : > { %2690 = vmatmul.mubr.msk.bf16.vlgmr.msra.gmra.mxu1 %vm239_vm3, %v2321_v34 }
  0xdc   : > { %v2559_v35 = vpop.f32.mrf.mxu0 }
  0xdd   : > { %v299_v37 = vadd.f32 %v2559_v35, %v3191_v63 }
  0xde   : > { %v290_v36 = vpop.f32.mrf.mxu0 }
  0xdf   : > { %v291_v39 = vadd.f32 %v3191_v63, %v290_v36  ;;  %v323_v26 = vmax.f32 %v299_v37, 0.0 }
  0xe0   : > { %v2560_v38 = vpop.f32.mrf.mxu0  ;;  %v2575_v30 = vpop.f32.mrf.mxu1 }
  0xe1   : > { %v302_v40 = vadd.f32 %v2560_v38, %v3191_v63  ;;  %v321_v44 = vmax.f32 %v291_v39, 0.0 }
  0xe2   : > { %v293_v42 = vpop.f32.mrf.mxu0  ;;  %v602_v53 = vpop.f32.mrf.mxu1 }
  0xe3   : > { %v324_v27 = vmax.f32 %v302_v40, 0.0  ;;  %v294_v41 = vadd.f32 %v3191_v63, %v293_v42 }
  0xe4   : > { %v2563_v43 = vpop.f32.mrf.mxu0  ;;  %v2576_v59 = vpop.f32.mrf.mxu1 }
  0xe5   : > { %v2390_v45 = vpack.c.bf16 %v324_v27, %v323_v26  ;;  %v322_v46 = vmax.f32 %v294_v41, 0.0  ;;  %v315_v49 = vadd.f32 %v2563_v43, %v3191_v63 }
  0xe6   : > { %v306_v47 = vpop.f32.mrf.mxu0  ;;  %v605_v8 = vpop.f32.mrf.mxu1 }
  0xe7   : > { %2462 = vst [vmem:[%s3201_s21 + $0x8] sm:$0xff] %v2390_v45   ;;  %v2385_v48 = vpack.c.bf16 %v322_v46, %v321_v44  ;;  %v307_v50 = vadd.f32 %v3191_v63, %v306_v47  ;;  %v327_v55 = vmax.f32 %v315_v49, 0.0 }
  0xe8   : > { %v2564_v32 = vpop.f32.mrf.mxu0 }
  0xe9   : > { %2386 = vst [vmem:[%s3201_s21] sm:$0xff] %v2385_v48   ;;  %v318_v52 = vadd.f32 %v2564_v32, %v3191_v63  ;;  %v325_v61 = vmax.f32 %v307_v50, 0.0 }
  0xea   : > { %v309_v54 = vpop.f32.mrf.mxu0 }
  0xeb   : > { %v328_v56 = vmax.f32 %v318_v52, 0.0  ;;  %v310_v57 = vadd.f32 %v3191_v63, %v309_v54 }
  0xec   : > { %v2591_v58 = vpop.f32.mrf.mxu0  ;;  %v2579_v13 = vpop.f32.mrf.mxu1 }
  0xed   : > { %v2400_v62 = vpack.c.bf16 %v328_v56, %v327_v55  ;;  %v326_v0 = vmax.f32 %v310_v57, 0.0  ;;  %v734_v1 = vadd.f32 %v2591_v58, %v2575_v30 }
  0xee   : > { %v725_v2 = vpop.f32.mrf.mxu0  ;;  %v618_v19 = vpop.f32.mrf.mxu1 }
  0xef   : > { %2464 = vst [vmem:[%s3201_s21 + $0x18] sm:$0xff] %v2400_v62   ;;  %v2395_v3 = vpack.c.bf16 %v326_v0, %v325_v61  ;;  %v726_v4 = vadd.f32 %v725_v2, %v602_v53  ;;  %v765_v9 = vadd.f32 %v3191_v63, %v734_v1 }
  0xf0   : > { %v2592_v5 = vpop.f32.mrf.mxu0  ;;  %v2580_v60 = vpop.f32.mrf.mxu1 }
  0xf1   : > { %2463 = vst [vmem:[%s3201_s21 + $0x10] sm:$0xff] %v2395_v3   ;;  %v737_v10 = vadd.f32 %v2592_v5, %v2576_v59  ;;  %v763_v11 = vadd.f32 %v3191_v63, %v726_v4  ;;  %v773_v14 = vmax.f32 %v765_v9, 0.0 }
  0xf2   : > { %v728_v51 = vpop.f32.mrf.mxu0  ;;  %v621_v33 = vpop.f32.mrf.mxu1 }
  0xf3   : > { %v766_v12 = vadd.f32 %v3191_v63, %v737_v10  ;;  %v729_v6 = vadd.f32 %v728_v51, %v605_v8  ;;  %v771_v20 = vmax.f32 %v763_v11, 0.0 }
  0xf4   : > { %v2595_v7 = vpop.f32.mrf.mxu0  ;;  %v2607_v37 = vpop.f32.mrf.mxu1 }
  0xf5   : > { %v774_v15 = vmax.f32 %v766_v12, 0.0  ;;  %v764_v16 = vadd.f32 %v3191_v63, %v729_v6  ;;  %v750_v17 = vadd.f32 %v2595_v7, %v2579_v13 }
  0xf6   : > { %v741_v18 = vpop.f32.mrf.mxu0  ;;  %v947_v42 = vpop.f32.mrf.mxu1 }
  0xf7   : > { %v2410_v21 = vpack.c.bf16 %v774_v15, %v773_v14  ;;  %v772_v22 = vmax.f32 %v764_v16, 0.0  ;;  %v742_v23 = vadd.f32 %v741_v18, %v618_v19  ;;  %v769_v28 = vadd.f32 %v3191_v63, %v750_v17 }
  0xf8   : > { %v2596_v24 = vpop.f32.mrf.mxu0  ;;  %v2608_v43 = vpop.f32.mrf.mxu1 }
  0xf9   : > { %2466 = vst [vmem:[%s3201_s21 + $0x28] sm:$0xff] %v2410_v21   ;;  %v2405_v25 = vpack.c.bf16 %v772_v22, %v771_v20  ;;  %v753_v29 = vadd.f32 %v2596_v24, %v2580_v60  ;;  %v767_v34 = vadd.f32 %v3191_v63, %v742_v23  ;;  %v777_v38 = vmax.f32 %v769_v28, 0.0 }
  0xfa   : > { %v744_v31 = vpop.f32.mrf.mxu0  ;;  %v950_v46 = vpop.f32.mrf.mxu1 }
  0xfb   : > { %2465 = vst [vmem:[%s3201_s21 + $0x20] sm:$0xff] %v2405_v25   ;;  %v770_v35 = vadd.f32 %v3191_v63, %v753_v29  ;;  %v745_v36 = vadd.f32 %v744_v31, %v621_v33  ;;  %v775_v26 = vmax.f32 %v767_v34, 0.0 }
  0xfc   : > { %v2623_v45 = vpop.f32.mrf.mxu0  ;;  %v2611_v49 = vpop.f32.mrf.mxu1 }
  0xfd   : > { %v778_v39 = vmax.f32 %v770_v35, 0.0  ;;  %v768_v40 = vadd.f32 %v3191_v63, %v745_v36  ;;  %v1079_v47 = vadd.f32 %v2623_v45, %v2607_v37 }
  0xfe   : > { %v1070_v48 = vpop.f32.mrf.mxu0  ;;  %v963_v50 = vpop.f32.mrf.mxu1 }
  0xff   : > { %v2420_v27 = vpack.c.bf16 %v778_v39, %v777_v38  ;;  %v776_v41 = vmax.f32 %v768_v40, 0.0  ;;  %v1071_v30 = vadd.f32 %v1070_v48, %v947_v42  ;;  %v1110_v52 = vadd.f32 %v3191_v63, %v1079_v47 }
 0x100   : > { %v2624_v32 = vpop.f32.mrf.mxu0  ;;  %v2612_v55 = vpop.f32.mrf.mxu1 }
 0x101   : > { %2468 = vst [vmem:[%s3201_s21 + $0x38] sm:$0xff] %v2420_v27   ;;  %v2415_v44 = vpack.c.bf16 %v776_v41, %v775_v26  ;;  %v1082_v53 = vadd.f32 %v2624_v32, %v2608_v43  ;;  %v1108_v56 = vadd.f32 %v3191_v63, %v1071_v30  ;;  %v1118_v61 = vmax.f32 %v1110_v52, 0.0 }
 0x102   : > { %v1073_v54 = vpop.f32.mrf.mxu0  ;;  %v966_v59 = vpop.f32.mrf.mxu1 }
 0x103   : > { %2467 = vst [vmem:[%s3201_s21 + $0x30] sm:$0xff] %v2415_v44   ;;  %v1111_v57 = vadd.f32 %v3191_v63, %v1082_v53  ;;  %v1074_v58 = vadd.f32 %v1073_v54, %v950_v46  ;;  %v1116_v4 = vmax.f32 %v1108_v56, 0.0 }
 0x104   : > { %v2627_v1 = vpop.f32.mrf.mxu0 }
 0x105   : > { %v1119_v62 = vmax.f32 %v1111_v57, 0.0  ;;  %v1109_v0 = vadd.f32 %v3191_v63, %v1074_v58  ;;  %v1095_v2 = vadd.f32 %v2627_v1, %v2611_v49  ;;  %v2639_v3 = vpop.f32.mrf.mxu1 }
 0x106   : > { %v1086_v9 = vpop.f32.mrf.mxu0 }
 0x107   : > { %v2430_v5 = vpack.c.bf16 %v1119_v62, %v1118_v61  ;;  %v1117_v8 = vmax.f32 %v1109_v0, 0.0  ;;  %v1087_v10 = vadd.f32 %v1086_v9, %v963_v50  ;;  %v1395_v51 = vpop.f32.mrf.mxu1  ;;  %v1114_v6 = vadd.f32 %v3191_v63, %v1095_v2 }
 0x108   : > { %v2628_v12 = vpop.f32.mrf.mxu0 }
 0x109   : > { %2470 = vst [vmem:[%s3201_s21 + $0x48] sm:$0xff] %v2430_v5   ;;  %v2425_v11 = vpack.c.bf16 %v1117_v8, %v1116_v4  ;;  %v1098_v7 = vadd.f32 %v2628_v12, %v2612_v55  ;;  %v2640_v14 = vpop.f32.mrf.mxu1  ;;  %v1112_v15 = vadd.f32 %v3191_v63, %v1087_v10  ;;  %v1122_v18 = vmax.f32 %v1114_v6, 0.0 }
 0x10a   : > { %v1089_v13 = vpop.f32.mrf.mxu0 }
 0x10b   : > { %2469 = vst [vmem:[%s3201_s21 + $0x40] sm:$0xff] %v2425_v11   ;;  %v1115_v16 = vadd.f32 %v3191_v63, %v1098_v7  ;;  %v1090_v17 = vadd.f32 %v1089_v13, %v966_v59  ;;  %v1398_v22 = vpop.f32.mrf.mxu1  ;;  %v1120_v23 = vmax.f32 %v1112_v15, 0.0 }
 0x10d   : > { %v1123_v19 = vmax.f32 %v1115_v16, 0.0  ;;  %v1113_v20 = vadd.f32 %v3191_v63, %v1090_v17  ;;  %v2655_v21 = vpop.f32.mrf.mxu0 }
 0x10e   : > { %v1527_v26 = vadd.f32 %v2655_v21, %v2639_v3 }
 0x10f   : > { %v2440_v24 = vpack.c.bf16 %v1123_v19, %v1122_v18  ;;  %v1121_v60 = vmax.f32 %v1113_v20, 0.0  ;;  %v1518_v25 = vpop.f32.mrf.mxu0 }
 0x110   : > { %v2643_v31 = vpop.f32.mrf.mxu1  ;;  %v1519_v43 = vadd.f32 %v1518_v25, %v1395_v51 }
 0x111   : > { %2472 = vst [vmem:[%s3201_s21 + $0x58] sm:$0xff] %v2440_v24   ;;  %v2435_v28 = vpack.c.bf16 %v1121_v60, %v1120_v23  ;;  %v2656_v29 = vpop.f32.mrf.mxu0 }
 0x112   : > { %v1411_v34 = vpop.f32.mrf.mxu1  ;;  %v1530_v46 = vadd.f32 %v2656_v29, %v2640_v14 }
 0x113   : > { %2471 = vst [vmem:[%s3201_s21 + $0x50] sm:$0xff] %v2435_v28   ;;  %v1521_v33 = vpop.f32.mrf.mxu0 }
 0x114   : > { %v2644_v36 = vpop.f32.mrf.mxu1  ;;  %v1522_v30 = vadd.f32 %v1521_v33, %v1398_v22 }
 0x115   : > { %v2659_v35 = vpop.f32.mrf.mxu0 }
 0x116   : > { %v1414_v38 = vpop.f32.mrf.mxu1  ;;  %v1543_v61 = vadd.f32 %v2659_v35, %v2643_v31 }
 0x117   : > { %v1534_v37 = vpop.f32.mrf.mxu0 }
 0x118   : > { %v2671_v39 = vpop.f32.mrf.mxu1  ;;  %v1535_v4 = vadd.f32 %v1534_v37, %v1411_v34 }
 0x119   : > { %v2660_v40 = vpop.f32.mrf.mxu0  ;;  %v1691_v45 = vadd.f32 %v2671_v39, %v1527_v26 }
 0x11a   : > { %v1658_v42 = vpop.f32.mrf.mxu1  ;;  %v1546_v51 = vadd.f32 %v2660_v40, %v2644_v36 }
 0x11b   : > { %v1537_v41 = vpop.f32.mrf.mxu0  ;;  %v1689_v49 = vadd.f32 %v1658_v42, %v1519_v43 }
 0x11c   : > { %v2672_v27 = vpop.f32.mrf.mxu1  ;;  %v1538_v14 = vadd.f32 %v1537_v41, %v1414_v38 }
 0x11d   : > { %v2687_v48 = vpop.f32.mrf.mxu0  ;;  %v1692_v53 = vadd.f32 %v2672_v27, %v1530_v46 }
 0x11e   : > { %v1661_v44 = vpop.f32.mrf.mxu1  ;;  %v1950_v50 = vadd.f32 %v2687_v48, %v1691_v45 }
 0x11f   : > { %v1917_v52 = vpop.f32.mrf.mxu0  ;;  %v1690_v57 = vadd.f32 %v1661_v44, %v1522_v30 }
 0x120   : > { %v2675_v47 = vpop.f32.mrf.mxu1  ;;  %v1948_v55 = vadd.f32 %v1917_v52, %v1689_v49  ;;  %v1965_v58 = vadd.f32 %v3191_v63, %v1950_v50 }
 0x121   : > { %v2688_v56 = vpop.f32.mrf.mxu0  ;;  %v1695_v10 = vadd.f32 %v2675_v47, %v1543_v61 }
 0x122   : > { %v1674_v32 = vpop.f32.mrf.mxu1  ;;  %v1951_v59 = vadd.f32 %v2688_v56, %v1692_v53  ;;  %v1963_v1 = vadd.f32 %v3191_v63, %v1948_v55  ;;  %v1973_v5 = vmax.f32 %v1965_v58, 0.0 }
 0x123   : > { %v1920_v62 = vpop.f32.mrf.mxu0  ;;  %v1693_v13 = vadd.f32 %v1674_v32, %v1535_v4 }
 0x124   : > { %v2676_v54 = vpop.f32.mrf.mxu1  ;;  %v1966_v2 = vadd.f32 %v3191_v63, %v1951_v59  ;;  %v1949_v3 = vadd.f32 %v1920_v62, %v1690_v57  ;;  %v1971_v12 = vmax.f32 %v1963_v1, 0.0 }
 0x125   : > { %v1696_v18 = vadd.f32 %v2676_v54, %v1546_v51 }
 0x126   : > { %v1677_v0 = vpop.f32.mrf.mxu1  ;;  %v1974_v8 = vmax.f32 %v1966_v2, 0.0  ;;  %v1964_v9 = vadd.f32 %v3191_v63, %v1949_v3 }
 0x127   : > { %v1694_v21 = vadd.f32 %v1677_v0, %v1538_v14 }
 0x128   : > { %v2691_v11 = vpop.f32.mrf.mxu1  ;;  %v2450_v6 = vpack.c.bf16 %v1974_v8, %v1973_v5  ;;  %v1972_v7 = vmax.f32 %v1964_v9, 0.0 }
 0x129   : > { %v1954_v15 = vadd.f32 %v2691_v11, %v1695_v10 }
 0x12a   : > { %v1933_v16 = vpop.f32.mrf.mxu1  ;;  %2474 = vst [vmem:[%s3201_s21 + $0x68] sm:$0xff] %v2450_v6   ;;  %v2445_v17 = vpack.c.bf16 %v1972_v7, %v1971_v12 }
 0x12b   : > { %v1952_v19 = vadd.f32 %v1933_v16, %v1693_v13  ;;  %v1969_v22 = vadd.f32 %v3191_v63, %v1954_v15 }
 0x12c   : > { %v2692_v20 = vpop.f32.mrf.mxu1  ;;  %2473 = vst [vmem:[%s3201_s21 + $0x60] sm:$0xff] %v2445_v17  }
 0x12d   : > { %v1955_v23 = vadd.f32 %v2692_v20, %v1696_v18  ;;  %v1967_v60 = vadd.f32 %v3191_v63, %v1952_v19  ;;  %v1977_v29 = vmax.f32 %v1969_v22, 0.0 }
 0x12e   : > { %v1936_v24 = vpop.f32.mrf.mxu1 }
 0x12f   : > { %v1970_v25 = vadd.f32 %v3191_v63, %v1955_v23  ;;  %v1953_v28 = vadd.f32 %v1936_v24, %v1694_v21  ;;  %v1975_v34 = vmax.f32 %v1967_v60, 0.0 }
 0x131   : > { %v1978_v31 = vmax.f32 %v1970_v25, 0.0  ;;  %v1968_v33 = vadd.f32 %v3191_v63, %v1953_v28 }
 0x133   : > { %v2460_v35 = vpack.c.bf16 %v1978_v31, %v1977_v29  ;;  %v1976_v36 = vmax.f32 %v1968_v33, 0.0 }
 0x135   : > { %2476 = vst [vmem:[%s3201_s21 + $0x78] sm:$0xff] %v2460_v35   ;;  %v2455_v37 = vpack.c.bf16 %v1976_v36, %v1975_v34 }
 0x137   : > { %2475 = vst [vmem:[%s3201_s21 + $0x70] sm:$0xff] %v2455_v37  }
 0x138 PF: > { %s13_s12 = sadd.s32 1, %s2786_s12  }
 0x139   : > { %p10_p4 = scmp.ge.s32.totalorder %s13_s12, 4  }
 0x13b   :  { %12 = sbr.rel (!%p10_p4) target bundleno = 1 (0x1), region = 74 }

// kernel: autoencoder_forward.7
= control target key start
LH: loop header
LB: loop body
LE: loop exit
PB: predicated region body
PF: predicated region fallthrough
CT: control target
= control target key end

     0   :  { %s3318_s12 = smov 0   ;;  %s4207_s0 = inlined_call_operand.vmem [shape: bf16[2,9,9,144], index: 0, kind: input, shape index: {}]   ;;  %s4208_s1 = inlined_call_operand.vmem [shape: bf16[9,144,16], index: 1, kind: input, shape index: {}]   ;;  %s4209_s2 = inlined_call_operand.vmem [shape: f32[1,16], index: 2, kind: input, shape index: {}]   ;;  %s4210_s3 = inlined_call_operand.vmem [shape: f32[2,4,64,16], index: 3, kind: output, shape index: {}]  }
   0x1 LB: > { %s2592_s13 = sadd.s32 4294967295, %s3295_s12   ;;  %p2596_p0 = scmp.ge.s32.totalorder %s3295_s12, 1  ;;  %s3295_s12 = sphi %s3318_s12, %s13_s12  }
   0x2   : > { %p137_p1 = scmp.lt.s32.totalorder %s3295_s12, 3 }
   0x4   : > { %p138_p2 = pnand %p2596_p0, %p137_p1 }
   0x5   : > { %p161_p3 = scmp.lt.s32.totalorder (!%p138_p2), %s2592_s13, 1 }
   0x6   : > { %141 = sbr.rel (%p138_p2) target bundleno = 435 (0x1b3), region = 32 }
   0xb   : > { %v3056_v0 = vld [vmem:[%s4208_s1 + $0x158] sm:$0xff]   ;;  %v3297_v1 = vmov 0   ;;  %v3057_v2 = vld [vmem:[%s4208_s1 + $0x110] sm:$0xff]   ;;  %v3059_v4 = vld [vmem:[%s4208_s1 + $0x108] sm:$0xff]   ;;  %s4214_s13 = smov (!%p161_p3, %s2592_s13), 1  ;;  %vm296_vm0 = vcmask 130048  }
   0xc   : > { %309 = vmatprep.subr.bf16.mxu0 %v3297_v1  ;;  %693 = vmatprep.subr.bf16.mxu1 %v3297_v1  ;;  %v3058_v3 = vld [vmem:[%s4208_s1 + $0x150] sm:$0xff]   ;;  %v3060_v5 = vld [vmem:[%s4208_s1 + $0x148] sm:$0xff]   ;;  %v3061_v6 = vld [vmem:[%s4208_s1 + $0x100] sm:$0xff]   ;;  %s3046_s30 = smul.u32 144, %s4214_s13  ;;  %vm465_vm1 = vsmask.f32 3328 }
   0xd   : > { %310 = vmatpush1.bf16.msra.mxu0 %v3056_v0  ;;  %694 = vmatpush1.bf16.msra.mxu1 %v3057_v2  ;;  %v3062_v7 = vld [vmem:[%s4208_s1 + $0x140] sm:$0xff]   ;;  %v3063_v8 = vld [vmem:[%s4208_s1 + $0xf8] sm:$0xff]   ;;  %v3065_v10 = vld [vmem:[%s4208_s1 + $0xf0] sm:$0xff]   ;;  %vm466_vm2 = vsmask.f32 7440  ;;  %s3027_s9 = sshll.u32 %s4214_s13, 8 }
   0xe   : > { %311 = vmatprep.subr.bf16.mxu0 %v3297_v1  ;;  %695 = vmatprep.subr.bf16.mxu1 %v3297_v1  ;;  %v3064_v9 = vld [vmem:[%s4208_s1 + $0x138] sm:$0xff]   ;;  %s3371_s10 = scalar_lea.vmem %s4207_s0, %s3046_s30  ;;  %v3066_v11 = vld [vmem:[%s4208_s1 + $0x130] sm:$0xff]   ;;  %v3067_v15 = vld [vmem:[%s4208_s1 + $0xe8] sm:$0xff]   ;;  %s4052_s15 = scalar_lea.vmem %s4210_s3, %s3027_s9 }
   0xf   : > { %v172_v12 = vld [vmem:[%s3371_s10] sm:$0xff]  ;;  %v3379_v13 = vld [vmem:[%s3371_s10 + $0x10] sm:$0xff]  ;;  %v457_v14 = vld [vmem:[%s3371_s10 + $0x8] sm:$0x11] }
  0x10   : > { %v3387_v16 = vcombine.high %v172_v12, %v3379_v13  ;;  %v458_v17 = vld [vmem:[%s3371_s10 + $0x18] sm:$0x11]  ;;  %v469_v18 = vshrl.u32 %v172_v12, 16  ;;  %v472_v19 = vshll.u32 %v172_v12, 16  ;;  %v478_v20 = vshll.u32 %v457_v14, 16  ;;  %v3068_v26 = vld [vmem:[%s4208_s1 + $0x128] sm:$0xff]   ;;  %vm3414_vm3 = vmor %vm465_vm1, %vm466_vm2 }
  0x11   : > { %312 = vmatpush1.bf16.msra.mxu0 %v3058_v3  ;;  %696 = vmatpush1.bf16.msra.mxu1 %v3059_v4  ;;  %v483_v21 = vshrl.u32 %v3379_v13, 16  ;;  %v486_v22 = vshll.u32 %v3379_v13, 16  ;;  %v492_v24 = vshll.u32 %v458_v17, 16  ;;  %v3396_v25 = vcombine.low %v172_v12, %v3379_v13  ;;  %v3069_v30 = vld [vmem:[%s4208_s1 + $0xe0] sm:$0xff]   ;;  %v3071_v36 = vld [vmem:[%s4208_s1 + $0xd8] sm:$0xff]   ;;  %v3422_v39 = vld [vmem:[%s3371_s10 + $0x30] sm:$0xff] }
  0x12   : > { %313 = vmatprep.subr.bf16.mxu0 %v3297_v1  ;;  %697 = vmatprep.subr.bf16.mxu1 %v3297_v1  ;;  %v471_v23 = vrot.slane %v469_v18, 4  ;;  %v474_v27 = vrot.slane %v472_v19, 5  ;;  %v3070_v31 = vld [vmem:[%s4208_s1 + $0x120] sm:$0xff]   ;;  %v480_v33 = vrot.slane %v478_v20, 5  ;;  %v459_v42 = vld [vmem:[%s3371_s10 + $0x28] sm:$0x11] }
  0x13   : > { %2636 = vmatprep.mubr.msk.bf16.mxu0 %vm296_vm0, %v3387_v16  ;;  %v485_v28 = vrot.slane %v483_v21, 4  ;;  %v488_v29 = vrot.slane %v486_v22, 5  ;;  %v494_v35 = vrot.slane %v492_v24, 5  ;;  %v3419_v38 = vld [vmem:[%s3371_s10 + $0x20] sm:$0xff]  ;;  %v460_v43 = vld [vmem:[%s3371_s10 + $0x38] sm:$0x11] }
  0x14   : > { %v475_v32 = vor.u32 %v474_v27, %v471_v23  ;;  %v497_v44 = vshrl.u32 %v3419_v38, 16  ;;  %v500_v45 = vshll.u32 %v3419_v38, 16  ;;  %v506_v46 = vshll.u32 %v459_v42, 16  ;;  %v3072_v55 = vld [vmem:[%s4208_s1 + $0x160] sm:$0xff]   ;;  %v3073_v58 = vld [vmem:[%s4208_s1 + $0x118] sm:$0xff]   ;;  %v3465_v4 = vld [vmem:[%s3371_s10 + $0x50] sm:$0xff] }
  0x15   : > { %314 = vmatpush1.bf16.msra.mxu0 %v3060_v5  ;;  %698 = vmatpush1.bf16.msra.mxu1 %v3061_v6  ;;  %v489_v34 = vor.u32 %v488_v29, %v485_v28  ;;  %v511_v47 = vshrl.u32 %v3422_v39, 16  ;;  %v514_v50 = vshll.u32 %v3422_v39, 16  ;;  %v520_v51 = vshll.u32 %v460_v43, 16  ;;  %v3452_v63 = vld [vmem:[%s3371_s10 + $0x40] sm:$0xff]  ;;  %v461_v5 = vld [vmem:[%s3371_s10 + $0x48] sm:$0x11] }
  0x16   : > { %315 = vmatprep.subr.bf16.mxu0 %v3297_v1  ;;  %699 = vmatprep.subr.bf16.mxu1 %v3297_v1  ;;  %v3424_v40 = vrot.slane %v475_v32, 4  ;;  %v499_v53 = vrot.slane %v497_v44, 4  ;;  %v502_v54 = vrot.slane %v500_v45, 5  ;;  %v508_v60 = vrot.slane %v506_v46, 5  ;;  %v462_v6 = vld [vmem:[%s3371_s10 + $0x58] sm:$0x11] }
  0x17   : > { %v3426_v41 = vrot.slane %v489_v34, 4  ;;  %v513_v56 = vrot.slane %v511_v47, 4  ;;  %v516_v57 = vrot.slane %v514_v50, 5  ;;  %v522_v62 = vrot.slane %v520_v51, 5  ;;  %v3077_v12 = vld [vmem:[%s4208_s1 + $0x80] sm:$0xff]   ;;  %v3078_v23 = vld [vmem:[%s4208_s1 + $0x198] sm:$0xff]  }
  0x18   : > { %v481_v48 = vsel %vm3414_vm3, %v3424_v40, %v480_v33  ;;  %v503_v59 = vor.u32 %v502_v54, %v499_v53  ;;  %v3456_v0 = vcombine.high %v3419_v38, %v3422_v39  ;;  %v3460_v2 = vcombine.low %v3419_v38, %v3422_v39  ;;  %v3498_v32 = vld [vmem:[%s3371_s10 + $0x60] sm:$0xff]  ;;  %v464_v42 = vld [vmem:[%s3371_s10 + $0x78] sm:$0x11]  ;;  %v3082_v47 = vld [vmem:[%s4208_s1 + $0x190] sm:$0xff]  }
  0x19   : > { %316 = vmatpush1.bf16.msra.mxu0 %v3062_v7  ;;  %700 = vmatpush1.bf16.msra.mxu1 %v3063_v8  ;;  %v495_v49 = vsel %vm3414_vm3, %v3426_v41, %v494_v35  ;;  %v517_v61 = vor.u32 %v516_v57, %v513_v56  ;;  %v3076_v8 = vld [vmem:[%s4208_s1 + $0x1a0] sm:$0xff]   ;;  %v539_v17 = vshrl.u32 %v3465_v4, 16  ;;  %v542_v18 = vshll.u32 %v3465_v4, 16  ;;  %v3506_v35 = vld [vmem:[%s3371_s10 + $0x70] sm:$0xff] }
  0x1a   : > { %317 = vmatprep.subr.bf16.mxu0 %v3297_v1  ;;  %701 = vmatprep.subr.bf16.mxu1 %v3297_v1  ;;  %v2685_v52 = vcombine.high %v481_v48, %v495_v49  ;;  %v3462_v3 = vrot.slane %v503_v59, 4  ;;  %v2684_v7 = vcombine.low %v481_v48, %v495_v49  ;;  %v548_v22 = vshll.u32 %v462_v6, 16  ;;  %v4022_v37 = vld [vmem:[%s4209_s2] ss:$0 sm:$0xff] }
  0x1b   : > { %v544_v29 = vrot.slane %v542_v18, 5  ;;  %v553_v44 = vshrl.u32 %v3498_v32, 16  ;;  %v556_v45 = vshll.u32 %v3498_v32, 16  ;;  %v567_v50 = vshrl.u32 %v3506_v35, 16 }
  0x1c   : > { %2701 = vmatprep.mubr.msk.bf16.mxu1 %vm296_vm0, %v2685_v52  ;;  %v509_v14 = vsel %vm3414_vm3, %v3462_v3, %v508_v60  ;;  %v570_v51 = vshll.u32 %v3506_v35, 16  ;;  %v3083_v52 = vld [vmem:[%s4208_s1 + $0x70] sm:$0xff]   ;;  %v3530_v56 = vcombine.high %v3452_v63, %v3465_v4  ;;  %v3084_v60 = vld [vmem:[%s4208_s1 + $0x188] sm:$0xff]  }
  0x1d   : > { %318 = vmatpush1.bf16.msra.mxu0 %v3064_v9  ;;  %702 = vmatpush1.bf16.msra.mxu1 %v3065_v10  ;;  %v3472_v9 = vrot.slane %v517_v61, 4  ;;  %v525_v10 = vshrl.u32 %v3452_v63, 16  ;;  %v555_v53 = vrot.slane %v553_v44, 4  ;;  %v558_v54 = vrot.slane %v556_v45, 5 }
  0x1e   : > { %319 = vmatprep.subr.bf16.mxu0 %v3297_v1  ;;  %703 = vmatprep.subr.bf16.mxu1 %v3297_v1  ;;  %v572_v59 = vrot.slane %v570_v51, 5 }
  0x1f   : > { %v523_v19 = vsel %vm3414_vm3, %v3472_v9, %v522_v62  ;;  %v527_v20 = vrot.slane %v525_v10, 4  ;;  %v559_v62 = vor.u32 %v558_v54, %v555_v53  ;;  %v1488_v53 = vld [vmem:[%s3371_s10 + $0x38] sm:$0x11] }
  0x20   : > { %v2687_v24 = vcombine.high %v509_v14, %v523_v19  ;;  %v2686_v43 = vcombine.low %v509_v14, %v523_v19  ;;  %v3089_v19 = vld [vmem:[%s4208_s1 + $0x60] sm:$0xff]  }
  0x21   : > { %320 = vmatpush1.bf16.msra.mxu0 %v3066_v11  ;;  %704 = vmatpush1.bf16.msra.mxu1 %v3067_v15  ;;  %v528_v11 = vshll.u32 %v3452_v63, 16  ;;  %v534_v15 = vshll.u32 %v461_v5, 16  ;;  %v3543_v10 = vrot.slane %v559_v62, 4 }
  0x22   : > { %321 = vmatprep.subr.bf16.mxu0 %v3297_v1  ;;  %705 = vmatprep.subr.bf16.mxu1 %v3297_v1 }
  0x23   : > { %v530_v21 = vrot.slane %v528_v11, 5  ;;  %v536_v28 = vrot.slane %v534_v15, 5  ;;  %v3088_v15 = vld [vmem:[%s4208_s1 + $0x180] sm:$0xff]  }
  0x25   : > { %322 = vmatpush1.bf16.msra.mxu0 %v3068_v26  ;;  %706 = vmatpush1.bf16.msra.mxu1 %v3069_v30  ;;  %v541_v26 = vrot.slane %v539_v17, 4  ;;  %v531_v27 = vor.u32 %v530_v21, %v527_v20  ;;  %v3079_v30 = vld [vmem:[%s4208_s1 + $0x78] sm:$0xff]   ;;  %v3571_v20 = vcombine.high %v3498_v32, %v3506_v35 }
  0x26   : > { %323 = vmatprep.subr.bf16.mxu0 %v3297_v1  ;;  %707 = vmatprep.subr.bf16.mxu1 %v3297_v1 }
  0x27   : > { %v3503_v33 = vrot.slane %v531_v27, 4  ;;  %v545_v34 = vor.u32 %v544_v29, %v541_v26  ;;  %v3094_v27 = vld [vmem:[%s4208_s1 + $0x170] sm:$0xff]   ;;  %v2788_v29 = vcombine.high %v3379_v13, %v3419_v38 }
  0x29   : > { %324 = vmatpush1.bf16.msra.mxu0 %v3070_v31  ;;  %708 = vmatpush1.bf16.msra.mxu1 %v3071_v36  ;;  %v550_v31 = vrot.slane %v548_v22, 5  ;;  %v463_v36 = vld [vmem:[%s3371_s10 + $0x68] sm:$0x11]  ;;  %v537_v48 = vsel %vm3414_vm3, %v3503_v33, %v536_v28  ;;  %v3519_v49 = vrot.slane %v545_v34, 4  ;;  %v3090_v22 = vld [vmem:[%s4208_s1 + $0x178] sm:$0xff]   ;;  %v3095_v28 = vld [vmem:[%s4208_s1 + $0x50] sm:$0xff]  }
  0x2a   : > { %339 = vmatprep.subr.bf16.mxu0 %v3297_v1  ;;  %723 = vmatprep.subr.bf16.mxu1 %v3297_v1  ;;  %v562_v46 = vshll.u32 %v463_v36, 16  ;;  %v3098_v34 = vld [vmem:[%s4208_s1 + $0x1a8] sm:$0xff]  }
  0x2b   : > { %v551_v57 = vsel %vm3414_vm3, %v3519_v49, %v550_v31  ;;  %v3097_v31 = vld [vmem:[%s4208_s1 + $0x48] sm:$0xff]  }
  0x2c   : > { %v2689_v61 = vcombine.high %v537_v48, %v551_v57  ;;  %v564_v5 = vrot.slane %v562_v46, 5  ;;  %v2688_v14 = vcombine.low %v537_v48, %v551_v57  ;;  %v3099_v36 = vld [vmem:[%s4208_s1 + $0x88] sm:$0xff]   ;;  %v2787_v46 = vcombine.low %v3379_v13, %v3419_v38 }
  0x2d   : > { %340 = vmatpush2.bf16.msra.mxu0 %v3072_v55  ;;  %724 = vmatpush2.bf16.msra.mxu1 %v3073_v58  ;;  %v576_v55 = vshll.u32 %v464_v42, 16  ;;  %v569_v58 = vrot.slane %v567_v50, 4  ;;  %v1485_v42 = vld [vmem:[%s3371_s10 + $0x8] sm:$0x11] }
  0x2e   : > { %860 = vmatprep.subr.bf16.mxu0 %v3297_v1  ;;  %1154 = vmatprep.subr.bf16.mxu1 %v3297_v1  ;;  %v565_v17 = vsel %vm3414_vm3, %v3543_v10, %v564_v5  ;;  %v1503_v44 = vshll.u32 %v1485_v42, 16  ;;  %v3103_v48 = vld [vmem:[%s4208_s1 + $0x1e8] sm:$0xff]  }
  0x2f   : > { %v573_v6 = vor.u32 %v572_v59, %v569_v58  ;;  %v1545_v58 = vshll.u32 %v1488_v53, 16  ;;  %v1489_v5 = vld [vmem:[%s3371_s10 + $0x48] sm:$0x11]  ;;  %v3123_v53 = vld [vmem:[%s4208_s1 + $0x1b0] sm:$0xff]  }
  0x30   : > { %342 = vmatmul.mubr.bf16.vlgmr.msra.gmra.mxu0 %v3396_v25  ;;  %726 = vmatmul.mubr.bf16.vlgmr.msra.gmra.mxu1 %v2684_v7  ;;  %v578_v7 = vrot.slane %v576_v55, 5  ;;  %v1505_v50 = vrot.slane %v1503_v44, 5  ;;  %v2790_v55 = vcombine.high %v3422_v39, %v3452_v63  ;;  %v3728_v44 = vld [vmem:[%s3371_s10 + $0x80] sm:$0xff] }
  0x31   : > { %861 = vmatpush1.bf16.msra.mxu0 %v3076_v8  ;;  %1155 = vmatpush1.bf16.msra.mxu1 %v3077_v12  ;;  %v3085_v8 = vld [vmem:[%s4208_s1 + $0x68] sm:$0xff]   ;;  %v3548_v11 = vrot.slane %v573_v6, 4  ;;  %v3553_v12 = vcombine.low %v3452_v63, %v3465_v4  ;;  %v1490_v6 = vld [vmem:[%s3371_s10 + $0x58] sm:$0x11] }
  0x32   : > { %862 = vmatprep.subr.bf16.mxu0 %v3297_v1  ;;  %1156 = vmatprep.subr.bf16.mxu1 %v3297_v1  ;;  %v3635_v13 = vsel %vm3414_vm3, %v3424_v40, %v1505_v50  ;;  %v3769_v50 = vcombine.low %v3506_v35, %v3728_v44 }
  0x33   : > { %2637 = vmatprep.mubr.msk.bf16.mxu0 %vm296_vm0, %v3456_v0  ;;  %2702 = vmatprep.mubr.msk.bf16.mxu1 %vm296_vm0, %v2687_v24  ;;  %v579_v18 = vsel %vm3414_vm3, %v3548_v11, %v578_v7  ;;  %v3587_v24 = vcombine.low %v3498_v32, %v3506_v35 }
  0x34   : > { %v2691_v21 = vcombine.high %v565_v17, %v579_v18  ;;  %v2690_v26 = vcombine.low %v565_v17, %v579_v18 }
  0x35   : > { %863 = vmatpush1.bf16.msra.mxu0 %v3078_v23  ;;  %1157 = vmatpush1.bf16.msra.mxu1 %v3079_v30  ;;  %v3091_v23 = vld [vmem:[%s4208_s1 + $0x58] sm:$0xff]   ;;  %v3096_v30 = vld [vmem:[%s4208_s1 + $0x168] sm:$0xff]  }
  0x36   : > { %864 = vmatprep.subr.bf16.mxu0 %v3297_v1  ;;  %1158 = vmatprep.subr.bf16.mxu1 %v3297_v1 }
  0x38   : > { %350 = vmatmul.mubr.bf16.gmra.mxu0 %v3460_v2  ;;  %734 = vmatmul.mubr.bf16.gmra.mxu1 %v2686_v43  ;;  %v1486_v43 = vld [vmem:[%s3371_s10 + $0x18] sm:$0x11] }
  0x39   : > { %865 = vmatpush1.bf16.msra.mxu0 %v3082_v47  ;;  %1159 = vmatpush1.bf16.msra.mxu1 %v3083_v52  ;;  %v1517_v45 = vshll.u32 %v1486_v43, 16  ;;  %v3102_v47 = vld [vmem:[%s4208_s1 + $0x230] sm:$0xff]   ;;  %v1487_v52 = vld [vmem:[%s3371_s10 + $0x28] sm:$0x11]  ;;  %v3725_v43 = vcombine.low %v3465_v4, %v3498_v32 }
  0x3a   : > { %866 = vmatprep.subr.bf16.mxu0 %v3297_v1  ;;  %1160 = vmatprep.subr.bf16.mxu1 %v3297_v1  ;;  %v1531_v54 = vshll.u32 %v1487_v52, 16  ;;  %v3121_v52 = vld [vmem:[%s4208_s1 + $0x1b8] sm:$0xff]  }
  0x3b   : > { %2638 = vmatprep.mubr.msk.bf16.mxu0 %vm296_vm0, %v3530_v56  ;;  %2703 = vmatprep.mubr.msk.bf16.mxu1 %vm296_vm0, %v2689_v61  ;;  %v1519_v51 = vrot.slane %v1517_v45, 5  ;;  %v1547_v61 = vrot.slane %v1545_v58, 5  ;;  %v3126_v58 = vld [vmem:[%s4208_s1 + $0x278] sm:$0xff]  }
  0x3c   : > { %v1533_v59 = vrot.slane %v1531_v54, 5  ;;  %v3124_v54 = vld [vmem:[%s4208_s1 + $0x238] sm:$0xff]  }
  0x3d   : > { %867 = vmatpush1.bf16.msra.mxu0 %v3084_v60  ;;  %1161 = vmatpush1.bf16.msra.mxu1 %v3085_v8  ;;  %v3640_v38 = vsel %vm3414_vm3, %v3426_v41, %v1519_v51  ;;  %v3104_v41 = vld [vmem:[%s4208_s1 + $0x228] sm:$0xff]   ;;  %v3105_v60 = vld [vmem:[%s4208_s1 + $0x1e0] sm:$0xff]   ;;  %v3671_v7 = vsel %vm3414_vm3, %v3472_v9, %v1547_v61  ;;  %v1559_v8 = vshll.u32 %v1489_v5, 16  ;;  %v3109_v9 = vld [vmem:[%s4208_s1 + $0x1d8] sm:$0xff]  }
  0x3e   : > { %868 = vmatprep.subr.bf16.mxu0 %v3297_v1  ;;  %1162 = vmatprep.subr.bf16.mxu1 %v3297_v1  ;;  %v2882_v57 = vcombine.low %v3635_v13, %v3640_v38  ;;  %v2883_v40 = vcombine.high %v3635_v13, %v3640_v38  ;;  %v3663_v62 = vsel %vm3414_vm3, %v3462_v3, %v1533_v59  ;;  %v3108_v3 = vld [vmem:[%s4208_s1 + $0x220] sm:$0xff]   ;;  %v3130_v13 = vld [vmem:[%s4208_s1 + $0x268] sm:$0xff]   ;;  %v3131_v38 = vld [vmem:[%s4208_s1 + $0xb8] sm:$0xff]  }
  0x3f   : > { %v2885_v17 = vcombine.high %v3663_v62, %v3671_v7  ;;  %v2884_v18 = vcombine.low %v3663_v62, %v3671_v7  ;;  %v3120_v51 = vld [vmem:[%s4208_s1 + $0x200] sm:$0xff]   ;;  %v3134_v61 = vld [vmem:[%s4208_s1 + $0x258] sm:$0xff]   ;;  %v3135_v62 = vld [vmem:[%s4208_s1 + $0xa8] sm:$0xff]  }
  0x40   : > { %358 = vmatmul.mubr.bf16.gmra.mxu0 %v3553_v12  ;;  %742 = vmatmul.mubr.bf16.gmra.mxu1 %v2688_v14  ;;  %v1573_v14 = vshll.u32 %v1490_v6, 16  ;;  %v3129_v59 = vld [vmem:[%s4208_s1 + $0xc0] sm:$0xff]   ;;  %v3136_v5 = vld [vmem:[%s4208_s1 + $0x250] sm:$0xff]   ;;  %v3138_v7 = vld [vmem:[%s4208_s1 + $0x248] sm:$0xff]  }
  0x41   : > { %869 = vmatpush1.bf16.msra.mxu0 %v3088_v15  ;;  %1163 = vmatpush1.bf16.msra.mxu1 %v3089_v19  ;;  %v2789_v15 = vcombine.low %v3422_v39, %v3452_v63  ;;  %v1561_v19 = vrot.slane %v1559_v8, 5  ;;  %v3137_v6 = vld [vmem:[%s4208_s1 + $0xa0] sm:$0xff]   ;;  %v2924_v8 = vld [vmem:[%s3371_s10 + $0x10] sm:$0xff] }
  0x42   : > { %870 = vmatprep.subr.bf16.mxu0 %v3297_v1  ;;  %1164 = vmatprep.subr.bf16.mxu1 %v3297_v1  ;;  %v1575_v39 = vrot.slane %v1573_v14, 5  ;;  %v2925_v14 = vld [vmem:[%s3371_s10 + $0x20] sm:$0xff] }
  0x43   : > { %2639 = vmatprep.mubr.msk.bf16.mxu0 %vm296_vm0, %v3571_v20  ;;  %2704 = vmatprep.mubr.msk.bf16.mxu1 %vm296_vm0, %v2691_v21  ;;  %v3110_v21 = vld [vmem:[%s4208_s1 + $0x218] sm:$0xff]  }
  0x45   : > { %871 = vmatpush1.bf16.msra.mxu0 %v3090_v22  ;;  %1165 = vmatpush1.bf16.msra.mxu1 %v3091_v23  ;;  %v3693_v22 = vcombine.high %v3465_v4, %v3498_v32  ;;  %v3698_v23 = vsel %vm3414_vm3, %v3503_v33, %v1561_v19  ;;  %v3111_v33 = vld [vmem:[%s4208_s1 + $0x1d0] sm:$0xff]   ;;  %v3115_v4 = vld [vmem:[%s4208_s1 + $0x1c8] sm:$0xff]  }
  0x46   : > { %872 = vmatprep.subr.bf16.mxu0 %v3297_v1  ;;  %1166 = vmatprep.subr.bf16.mxu1 %v3297_v1  ;;  %v3143_v19 = vld [vmem:[%s4208_s1 + $0xd0] sm:$0xff]  }
  0x48   : > { %366 = vmatmul.mubr.bf16.gmra.mxu0 %v3587_v24  ;;  %750 = vmatmul.mubr.bf16.gmra.mxu1 %v2690_v26  ;;  %v3703_v26 = vsel %vm3414_vm3, %v3519_v49, %v1575_v39  ;;  %v3114_v49 = vld [vmem:[%s4208_s1 + $0x210] sm:$0xff]   ;;  %v3148_v39 = vld [vmem:[%s4208_s1 + $0x38] sm:$0xff]  }
  0x49   : > { %873 = vmatpush1.bf16.msra.mxu0 %v3094_v27  ;;  %1167 = vmatpush1.bf16.msra.mxu1 %v3095_v28  ;;  %v1491_v27 = vld [vmem:[%s3371_s10 + $0x68] sm:$0x11]  ;;  %v1492_v28 = vld [vmem:[%s3371_s10 + $0x78] sm:$0x11] }
  0x4a   : > { %874 = vmatprep.subr.bf16.mxu0 %v3297_v1  ;;  %1168 = vmatprep.subr.bf16.mxu1 %v3297_v1 }
  0x4b   : > { %2722 = vmatprep.mubr.msk.bf16.mxu0 %vm296_vm0, %v3387_v16  ;;  %2804 = vmatprep.mubr.msk.bf16.mxu1 %vm296_vm0, %v2788_v29  ;;  %v2887_v29 = vcombine.high %v3698_v23, %v3703_v26 }
  0x4d   : > { %875 = vmatpush1.bf16.msra.mxu0 %v3096_v30  ;;  %1169 = vmatpush1.bf16.msra.mxu1 %v3097_v31  ;;  %v2886_v30 = vcombine.low %v3698_v23, %v3703_v26  ;;  %v1587_v31 = vshll.u32 %v1491_v27, 16  ;;  %v3149_v26 = vld [vmem:[%s4208_s1 + $0x30] sm:$0xff]  }
  0x4e   : > { %890 = vmatprep.subr.bf16.mxu0 %v3297_v1  ;;  %1184 = vmatprep.subr.bf16.mxu1 %v3297_v1  ;;  %v2979_v27 = vld [vmem:[%s3371_s10 + $0x50] sm:$0xff] }
  0x51   : > { %891 = vmatpush2.bf16.msra.mxu0 %v3098_v34  ;;  %1185 = vmatpush2.bf16.msra.mxu1 %v3099_v36  ;;  %v1601_v34 = vshll.u32 %v1492_v28, 16  ;;  %v1589_v36 = vrot.slane %v1587_v31, 5  ;;  %v2981_v28 = vld [vmem:[%s3371_s10 + $0x60] sm:$0xff]  ;;  %v2183_v31 = vshrl.u32 %v2925_v14, 16 }
  0x52   : > { %1321 = vmatprep.subr.bf16.mxu0 %v3297_v1  ;;  %1718 = vmatprep.subr.bf16.mxu1 %v3297_v1 }
  0x53   : > { %v1603_v42 = vrot.slane %v1601_v34, 5  ;;  %v3733_v45 = vsel %vm3414_vm3, %v3543_v10, %v1589_v36  ;;  %v3752_v10 = vcombine.high %v3506_v35, %v3728_v44  ;;  %v3122_v35 = vld [vmem:[%s4208_s1 + $0x1f8] sm:$0xff]   ;;  %v2186_v34 = vshll.u32 %v2925_v14, 16 }
  0x54   : > { %893 = vmatmul.mubr.bf16.vlgmr.msra.gmra.mxu0 %v3396_v25  ;;  %1187 = vmatmul.mubr.bf16.vlgmr.msra.gmra.mxu1 %v2787_v46  ;;  %v2228_v36 = vshll.u32 %v2979_v27, 16 }
  0x55   : > { %1322 = vmatpush1.bf16.msra.mxu0 %v3102_v47  ;;  %1719 = vmatpush1.bf16.msra.mxu1 %v3103_v48  ;;  %v3738_v46 = vsel %vm3414_vm3, %v3548_v11, %v1603_v42  ;;  %v3116_v11 = vld [vmem:[%s4208_s1 + $0x208] sm:$0xff]   ;;  %v3117_v48 = vld [vmem:[%s4208_s1 + $0x1c0] sm:$0xff]   ;;  %v2239_v42 = vshrl.u32 %v2981_v28, 16 }
  0x56   : > { %1323 = vmatprep.subr.bf16.mxu0 %v3297_v1  ;;  %1720 = vmatprep.subr.bf16.mxu1 %v3297_v1  ;;  %v2889_v32 = vcombine.high %v3733_v45, %v3738_v46  ;;  %v2888_v47 = vcombine.low %v3733_v45, %v3738_v46  ;;  %v3155_v45 = vld [vmem:[%s4208_s1 + $0x20] sm:$0xff]   ;;  %v2972_v46 = vld [vmem:[%s3371_s10 + $0x18] sm:$0x11] }
  0x57   : > { %2723 = vmatprep.mubr.msk.bf16.mxu0 %vm296_vm0, %v3456_v0  ;;  %2805 = vmatprep.mubr.msk.bf16.mxu1 %vm296_vm0, %v2790_v55  ;;  %v3125_v55 = vld [vmem:[%s4208_s1 + $0x1f0] sm:$0xff]  }
  0x59   : > { %1324 = vmatpush1.bf16.msra.mxu0 %v3104_v41  ;;  %1721 = vmatpush1.bf16.msra.mxu1 %v3105_v60  ;;  %v3128_v41 = vld [vmem:[%s4208_s1 + $0x270] sm:$0xff]  }
  0x5a   : > { %1325 = vmatprep.subr.bf16.mxu0 %v3297_v1  ;;  %1722 = vmatprep.subr.bf16.mxu1 %v3297_v1  ;;  %v3133_v60 = vld [vmem:[%s4208_s1 + $0xb0] sm:$0xff]  }
  0x5c   : > { %901 = vmatmul.mubr.bf16.gmra.mxu0 %v3460_v2  ;;  %1195 = vmatmul.mubr.bf16.gmra.mxu1 %v2789_v15  ;;  %v3139_v15 = vld [vmem:[%s4208_s1 + $0x98] sm:$0xff]  }
  0x5d   : > { %1326 = vmatpush1.bf16.msra.mxu0 %v3108_v3  ;;  %1723 = vmatpush1.bf16.msra.mxu1 %v3109_v9  ;;  %v2951_v3 = vcombine.high %v2924_v8, %v2925_v14  ;;  %v3142_v9 = vld [vmem:[%s4208_s1 + $0x280] sm:$0xff]  }
  0x5e   : > { %1327 = vmatprep.subr.bf16.mxu0 %v3297_v1  ;;  %1724 = vmatprep.subr.bf16.mxu1 %v3297_v1 }
  0x5f   : > { %2724 = vmatprep.mubr.msk.bf16.mxu0 %vm296_vm0, %v3530_v56  ;;  %2806 = vmatprep.mubr.msk.bf16.mxu1 %vm296_vm0, %v3693_v22 }
  0x61   : > { %1328 = vmatpush1.bf16.msra.mxu0 %v3110_v21  ;;  %1725 = vmatpush1.bf16.msra.mxu1 %v3111_v33  ;;  %v3918_v21 = vld [vmem:[%s3371_s10 + $0x30] sm:$0xff]  ;;  %v3154_v33 = vld [vmem:[%s4208_s1 + $0x28] sm:$0xff]  }
  0x62   : > { %1329 = vmatprep.subr.bf16.mxu0 %v3297_v1  ;;  %1726 = vmatprep.subr.bf16.mxu1 %v3297_v1  ;;  %v2953_v23 = vcombine.high %v3918_v21, %v3452_v63 }
  0x64   : > { %909 = vmatmul.mubr.bf16.gmra.mxu0 %v3553_v12  ;;  %1203 = vmatmul.mubr.bf16.gmra.mxu1 %v3725_v43 }
  0x65   : > { %1330 = vmatpush1.bf16.msra.mxu0 %v3114_v49  ;;  %1727 = vmatpush1.bf16.msra.mxu1 %v3115_v4  ;;  %v2225_v49 = vshrl.u32 %v2979_v27, 16 }
  0x66   : > { %1331 = vmatprep.subr.bf16.mxu0 %v3297_v1  ;;  %1728 = vmatprep.subr.bf16.mxu1 %v3297_v1 }
  0x67   : > { %2725 = vmatprep.mubr.msk.bf16.mxu0 %vm296_vm0, %v3571_v20  ;;  %2807 = vmatprep.mubr.msk.bf16.mxu1 %vm296_vm0, %v3752_v10 }
  0x69   : > { %1332 = vmatpush1.bf16.msra.mxu0 %v3116_v11  ;;  %1729 = vmatpush1.bf16.msra.mxu1 %v3117_v48  ;;  %v2974_v11 = vld [vmem:[%s3371_s10 + $0x28] sm:$0x11]  ;;  %v2227_v48 = vrot.slane %v2225_v49, 4 }
  0x6a   : > { %1333 = vmatprep.subr.bf16.mxu0 %v3297_v1  ;;  %1730 = vmatprep.subr.bf16.mxu1 %v3297_v1  ;;  %v2986_v49 = vld [vmem:[%s3371_s10 + $0x88] sm:$0x11] }
  0x6c   : > { %917 = vmatmul.mubr.bf16.gmra.mxu0 %v3587_v24  ;;  %1211 = vmatmul.mubr.bf16.gmra.mxu1 %v3769_v50 }
  0x6d   : > { %1334 = vmatpush1.bf16.msra.mxu0 %v3120_v51  ;;  %1731 = vmatpush1.bf16.msra.mxu1 %v3121_v52  ;;  %v2230_v51 = vrot.slane %v2228_v36, 5  ;;  %v2241_v52 = vrot.slane %v2239_v42, 4 }
  0x6e   : > { %1335 = vmatprep.subr.bf16.mxu0 %v3297_v1  ;;  %1732 = vmatprep.subr.bf16.mxu1 %v3297_v1 }
  0x6f   : > { %2825 = vmatprep.mubr.msk.bf16.mxu0 %vm296_vm0, %v3387_v16  ;;  %2899 = vmatprep.mubr.msk.bf16.mxu1 %vm296_vm0, %v2883_v40  ;;  %v3127_v40 = vld [vmem:[%s4208_s1 + $0xc8] sm:$0xff]  }
  0x71   : > { %1336 = vmatpush1.bf16.msra.mxu0 %v3122_v35  ;;  %1733 = vmatpush1.bf16.msra.mxu1 %v3123_v53  ;;  %v2982_v53 = vld [vmem:[%s3371_s10 + $0x68] sm:$0x11] }
  0x72   : > { %1351 = vmatprep.subr.bf16.mxu0 %v3297_v1  ;;  %1748 = vmatprep.subr.bf16.mxu1 %v3297_v1 }
  0x75   : > { %1352 = vmatpush2.bf16.msra.mxu0 %v3124_v54  ;;  %1749 = vmatpush2.bf16.msra.mxu1 %v3125_v55  ;;  %v2977_v54 = vld [vmem:[%s3371_s10 + $0x40] sm:$0xff]  ;;  %v2267_v55 = vshrl.u32 %v3728_v44, 16 }
  0x76   : > { %1885 = vmatprep.subr.bf16.mxu0 %v3297_v1  ;;  %2079 = vmatprep.subr.bf16.mxu1 %v3297_v1 }
  0x78   : > { %1354 = vmatmul.mubr.bf16.vlgmr.msra.gmra.mxu0 %v3396_v25  ;;  %1751 = vmatmul.mubr.bf16.vlgmr.msra.gmra.mxu1 %v2882_v57  ;;  %v3132_v57 = vld [vmem:[%s4208_s1 + $0x260] sm:$0xff]  }
  0x79   : > { %1886 = vmatpush1.bf16.msra.mxu0 %v3126_v58  ;;  %2080 = vmatpush1.bf16.msra.mxu1 %v3127_v40  ;;  %v2270_v58 = vshll.u32 %v3728_v44, 16  ;;  %v2197_v44 = vshrl.u32 %v3918_v21, 16 }
  0x7a   : > { %1887 = vmatprep.subr.bf16.mxu0 %v3297_v1  ;;  %2081 = vmatprep.subr.bf16.mxu1 %v3297_v1 }
  0x7b   : > { %2826 = vmatprep.mubr.msk.bf16.mxu0 %vm296_vm0, %v3456_v0  ;;  %2900 = vmatprep.mubr.msk.bf16.mxu1 %vm296_vm0, %v2885_v17  ;;  %v3140_v17 = vld [vmem:[%s4208_s1 + $0x240] sm:$0xff]  }
  0x7d   : > { %1888 = vmatpush1.bf16.msra.mxu0 %v3128_v41  ;;  %2082 = vmatpush1.bf16.msra.mxu1 %v3129_v59  ;;  %v2178_v41 = vshll.u32 %v2972_v46, 16 }
  0x7e   : > { %1889 = vmatprep.subr.bf16.mxu0 %v3297_v1  ;;  %2083 = vmatprep.subr.bf16.mxu1 %v3297_v1 }
  0x80   : > { %1362 = vmatmul.mubr.bf16.gmra.mxu0 %v3460_v2  ;;  %1759 = vmatmul.mubr.bf16.gmra.mxu1 %v2884_v18  ;;  %v3141_v18 = vld [vmem:[%s4208_s1 + $0x90] sm:$0xff]  }
  0x81   : > { %1890 = vmatpush1.bf16.msra.mxu0 %v3130_v13  ;;  %2084 = vmatpush1.bf16.msra.mxu1 %v3131_v38  ;;  %v2192_v13 = vshll.u32 %v2974_v11, 16  ;;  %v2983_v38 = vld [vmem:[%s3371_s10 + $0x70] sm:$0xff]  ;;  %v2276_v11 = vshll.u32 %v2986_v49, 16 }
  0x82   : > { %1891 = vmatprep.subr.bf16.mxu0 %v3297_v1  ;;  %2085 = vmatprep.subr.bf16.mxu1 %v3297_v1 }
  0x83   : > { %2827 = vmatprep.mubr.msk.bf16.mxu0 %vm296_vm0, %v3530_v56  ;;  %2901 = vmatprep.mubr.msk.bf16.mxu1 %vm296_vm0, %v2887_v29  ;;  %v2952_v29 = vcombine.low %v3918_v21, %v3452_v63 }
  0x85   : > { %1892 = vmatpush1.bf16.msra.mxu0 %v3132_v57  ;;  %2086 = vmatpush1.bf16.msra.mxu1 %v3133_v60  ;;  %v3156_v57 = vld [vmem:[%s4208_s1 + $0x18] sm:$0xff]   ;;  %v2231_v60 = vor.u32 %v2230_v51, %v2227_v48  ;;  %v3159_v51 = vld [vmem:[%s4208_s1] sm:$0xff]  }
  0x86   : > { %1893 = vmatprep.subr.bf16.mxu0 %v3297_v1  ;;  %2087 = vmatprep.subr.bf16.mxu1 %v3297_v1 }
  0x88   : > { %1370 = vmatmul.mubr.bf16.gmra.mxu0 %v3553_v12  ;;  %1767 = vmatmul.mubr.bf16.gmra.mxu1 %v2886_v30  ;;  %v2172_v30 = vshll.u32 %v2924_v8, 16 }
  0x89   : > { %1894 = vmatpush1.bf16.msra.mxu0 %v3134_v61  ;;  %2088 = vmatpush1.bf16.msra.mxu1 %v3135_v62  ;;  %v2248_v62 = vshll.u32 %v2982_v53, 16 }
  0x8a   : > { %1895 = vmatprep.subr.bf16.mxu0 %v3297_v1  ;;  %2089 = vmatprep.subr.bf16.mxu1 %v3297_v1  ;;  %v2174_v4 = vrot.slane %v2172_v30, 5 }
  0x8b   : > { %2828 = vmatprep.mubr.msk.bf16.mxu0 %vm296_vm0, %v3571_v20  ;;  %2902 = vmatprep.mubr.msk.bf16.mxu1 %vm296_vm0, %v2889_v32  ;;  %v2185_v32 = vrot.slane %v2183_v31, 4 }
  0x8d   : > { %1896 = vmatpush1.bf16.msra.mxu0 %v3136_v5  ;;  %2090 = vmatpush1.bf16.msra.mxu1 %v3137_v6  ;;  %v2211_v5 = vshrl.u32 %v2977_v54, 16  ;;  %v2214_v6 = vshll.u32 %v2977_v54, 16 }
  0x8e   : > { %1897 = vmatprep.subr.bf16.mxu0 %v3297_v1  ;;  %2091 = vmatprep.subr.bf16.mxu1 %v3297_v1 }
  0x8f   : > { %v2213_v27 = vrot.slane %v2211_v5, 4 }
  0x90   : > { %1378 = vmatmul.mubr.bf16.gmra.mxu0 %v3587_v24  ;;  %1775 = vmatmul.mubr.bf16.gmra.mxu1 %v2888_v47  ;;  %v2188_v47 = vrot.slane %v2186_v34, 5 }
  0x91   : > { %1898 = vmatpush1.bf16.msra.mxu0 %v3138_v7  ;;  %2092 = vmatpush1.bf16.msra.mxu1 %v3139_v15  ;;  %v2253_v7 = vshrl.u32 %v2983_v38, 16  ;;  %v2272_v15 = vrot.slane %v2270_v58, 5  ;;  %v3160_v58 = vld [vmem:[%s4208_s1 + $0x40] sm:$0xff]  }
  0x92   : > { %1899 = vmatprep.subr.bf16.mxu0 %v3297_v1  ;;  %2093 = vmatprep.subr.bf16.mxu1 %v3297_v1  ;;  %v2189_v59 = vor.u32 %v2188_v47, %v2185_v32 }
  0x93   : > { %2920 = vmatprep.mubr.msk.bf16.mxu0 %vm296_vm0, %v3387_v16  ;;  %2967 = vmatprep.mubr.msk.bf16.mxu1 %vm296_vm0, %v2951_v3  ;;  %v2950_v16 = vcombine.low %v2924_v8, %v2925_v14  ;;  %v2269_v14 = vrot.slane %v2267_v55, 4 }
  0x95   : > { %1900 = vmatpush1.bf16.msra.mxu0 %v3140_v17  ;;  %2094 = vmatpush1.bf16.msra.mxu1 %v3141_v18  ;;  %v2180_v17 = vrot.slane %v2178_v41, 5  ;;  %v2190_v18 = vrot.slane %v2189_v59, 4 }
  0x96   : > { %1915 = vmatprep.subr.bf16.mxu0 %v3297_v1  ;;  %2109 = vmatprep.subr.bf16.mxu1 %v3297_v1 }
  0x99   : > { %1916 = vmatpush2.bf16.msra.mxu0 %v3142_v9  ;;  %2110 = vmatpush2.bf16.msra.mxu1 %v3143_v19  ;;  %v2194_v9 = vrot.slane %v2192_v13, 5  ;;  %v3157_v19 = vld [vmem:[%s4208_s1 + $0x10] sm:$0xff]  }
  0x9a   : > { %2392 = vmatprep.subr.bf16.mxu0 %v3297_v1  ;;  %3028 = vmatprep.subr.bf16.mxu1 %v3297_v1 }
  0x9b   : > { %v2195_v34 = vsel %vm3414_vm3, %v2190_v18, %v2194_v9 }
  0x9c   : > { %1918 = vmatmul.mubr.bf16.vlgmr.msra.gmra.mxu0 %v3396_v25  ;;  %2112 = vmatmul.mubr.bf16.vlgmr.msra.gmra.mxu1 %v2950_v16  ;;  %v2169_v25 = vshrl.u32 %v2924_v8, 16  ;;  %v2256_v8 = vshll.u32 %v2983_v38, 16  ;;  %v2232_v16 = vrot.slane %v2231_v60, 4 }
  0x9d   : > { %2393 = vmatpush1.bf16.msra.mxu0 %v3148_v39  ;;  %3037 = vmatpush1.bf16.msra.mxu1 %v3148_v39 }
  0x9e   : > { %2394 = vmatprep.subr.bf16.mxu0 %v3297_v1  ;;  %3029 = vmatprep.subr.bf16.mxu1 %v3297_v1  ;;  %v2171_v63 = vrot.slane %v2169_v25, 4  ;;  %v2978_v25 = vld [vmem:[%s3371_s10 + $0x48] sm:$0x11]  ;;  %v2258_v30 = vrot.slane %v2256_v8, 5 }
  0x9f   : > { %2921 = vmatprep.mubr.msk.bf16.mxu0 %vm296_vm0, %v3456_v0  ;;  %2968 = vmatprep.mubr.msk.bf16.mxu1 %vm296_vm0, %v2953_v23  ;;  %v2242_v0 = vshll.u32 %v2981_v28, 16  ;;  %v2250_v23 = vrot.slane %v2248_v62, 5  ;;  %v2216_v28 = vrot.slane %v2214_v6, 5  ;;  %v2220_v46 = vshll.u32 %v2978_v25, 16 }
  0xa0   : > { %v2175_v40 = vor.u32 %v2174_v4, %v2171_v63 }
  0xa1   : > { %2395 = vmatpush1.bf16.msra.mxu0 %v3149_v26  ;;  %3038 = vmatpush1.bf16.msra.mxu1 %v3149_v26  ;;  %v2244_v35 = vrot.slane %v2242_v0, 5  ;;  %v2222_v53 = vrot.slane %v2220_v46, 5 }
  0xa2   : > { %2396 = vmatprep.subr.bf16.mxu0 %v3297_v1  ;;  %3030 = vmatprep.subr.bf16.mxu1 %v3297_v1  ;;  %v2176_v3 = vrot.slane %v2175_v40, 4 }
  0xa3   : > { %v2245_v61 = vor.u32 %v2244_v35, %v2241_v52 }
  0xa4   : > { %1926 = vmatmul.mubr.bf16.gmra.mxu0 %v3460_v2  ;;  %2120 = vmatmul.mubr.bf16.gmra.mxu1 %v2952_v29  ;;  %v2980_v2 = vld [vmem:[%s3371_s10 + $0x58] sm:$0x11]  ;;  %v2255_v29 = vrot.slane %v2253_v7, 4  ;;  %v2181_v31 = vsel %vm3414_vm3, %v2176_v3, %v2180_v17 }
  0xa5   : > { %2397 = vmatpush1.bf16.msra.mxu0 %v3154_v33  ;;  %3039 = vmatpush1.bf16.msra.mxu1 %v3154_v33  ;;  %v2984_v33 = vld [vmem:[%s3371_s10 + $0x78] sm:$0x11]  ;;  %v2988_v4 = vcombine.high %v2181_v31, %v2195_v34  ;;  %v2987_v38 = vcombine.low %v2181_v31, %v2195_v34 }
  0xa6   : > { %2398 = vmatprep.subr.bf16.mxu0 %v3297_v1  ;;  %3031 = vmatprep.subr.bf16.mxu1 %v3297_v1  ;;  %v2259_v32 = vor.u32 %v2258_v30, %v2255_v29  ;;  %v2262_v47 = vshll.u32 %v2984_v33, 16 }
  0xa7   : > { %2922 = vmatprep.mubr.msk.bf16.mxu0 %vm296_vm0, %v3530_v56  ;;  %2969 = vmatprep.mubr.msk.bf16.mxu1 %vm296_vm0, %v3693_v22  ;;  %v2234_v56 = vshll.u32 %v2980_v2, 16  ;;  %v2200_v22 = vshll.u32 %v3918_v21, 16  ;;  %v2246_v21 = vrot.slane %v2245_v61, 4 }
  0xa8   : > { %v2264_v54 = vrot.slane %v2262_v47, 5 }
  0xa9   : > { %2399 = vmatpush1.bf16.msra.mxu0 %v3155_v45  ;;  %3040 = vmatpush1.bf16.msra.mxu1 %v3155_v45  ;;  %v2236_v39 = vrot.slane %v2234_v56, 5  ;;  %v2202_v26 = vrot.slane %v2200_v22, 5  ;;  %v2251_v42 = vsel %vm3414_vm3, %v2246_v21, %v2250_v23  ;;  %v2217_v45 = vor.u32 %v2216_v28, %v2213_v27 }
  0xaa   : > { %2400 = vmatprep.subr.bf16.mxu0 %v3297_v1  ;;  %3032 = vmatprep.subr.bf16.mxu1 %v3297_v1 }
  0xab   : > { %v2237_v36 = vsel %vm3414_vm3, %v2232_v16, %v2236_v39  ;;  %v2218_v2 = vrot.slane %v2217_v45, 4 }
  0xac   : > { %1934 = vmatmul.mubr.bf16.gmra.mxu0 %v3553_v12  ;;  %2128 = vmatmul.mubr.bf16.gmra.mxu1 %v3725_v43  ;;  %v2199_v12 = vrot.slane %v2197_v44, 4  ;;  %v2976_v43 = vld [vmem:[%s3371_s10 + $0x38] sm:$0x11]  ;;  %v2992_v48 = vcombine.high %v2237_v36, %v2251_v42 }
  0xad   : > { %2401 = vmatpush1.bf16.msra.mxu0 %v3156_v57  ;;  %3041 = vmatpush1.bf16.msra.mxu1 %v3156_v57  ;;  %v2206_v63 = vshll.u32 %v2976_v43, 16  ;;  %v2223_v41 = vsel %vm3414_vm3, %v2218_v2, %v2222_v53  ;;  %v2991_v57 = vcombine.low %v2237_v36, %v2251_v42 }
  0xae   : > { %2402 = vmatprep.subr.bf16.mxu0 %v3297_v1  ;;  %3033 = vmatprep.subr.bf16.mxu1 %v3297_v1  ;;  %v2203_v0 = vor.u32 %v2202_v26, %v2199_v12 }
  0xaf   : > { %2923 = vmatprep.mubr.msk.bf16.mxu0 %vm296_vm0, %v3571_v20  ;;  %2970 = vmatprep.mubr.msk.bf16.mxu1 %vm296_vm0, %v3752_v10  ;;  %v3158_v20 = vld [vmem:[%s4208_s1 + $0x8] sm:$0xff]   ;;  %v2273_v10 = vor.u32 %v2272_v15, %v2269_v14  ;;  %v2208_v35 = vrot.slane %v2206_v63, 5 }
  0xb0   : > { %v2204_v52 = vrot.slane %v2203_v0, 4 }
  0xb1   : > { %2403 = vmatpush1.bf16.msra.mxu0 %v3157_v19  ;;  %3042 = vmatpush1.bf16.msra.mxu1 %v3157_v19  ;;  %v2274_v55 = vrot.slane %v2273_v10, 4 }
  0xb2   : > { %2404 = vmatprep.subr.bf16.mxu0 %v3297_v1  ;;  %3034 = vmatprep.subr.bf16.mxu1 %v3297_v1  ;;  %v2209_v40 = vsel %vm3414_vm3, %v2204_v52, %v2208_v35 }
  0xb3   : > { %v2990_v60 = vcombine.high %v2209_v40, %v2223_v41  ;;  %v2989_v61 = vcombine.low %v2209_v40, %v2223_v41 }
  0xb4   : > { %1942 = vmatmul.mubr.bf16.gmra.mxu0 %v3587_v24  ;;  %2136 = vmatmul.mubr.bf16.gmra.mxu1 %v3769_v50  ;;  %v2260_v24 = vrot.slane %v2259_v32, 4  ;;  %v2278_v50 = vrot.slane %v2276_v11, 5 }
  0xb5   : > { %2405 = vmatpush1.bf16.msra.mxu0 %v3158_v20  ;;  %3043 = vmatpush1.bf16.msra.mxu1 %v3158_v20 }
  0xb6   : > { %2406 = vmatprep.subr.bf16.mxu0 %v3297_v1  ;;  %3035 = vmatprep.subr.bf16.mxu1 %v3297_v1  ;;  %v2265_v59 = vsel %vm3414_vm3, %v2260_v24, %v2264_v54  ;;  %v2279_v13 = vsel %vm3414_vm3, %v2274_v55, %v2278_v50 }
  0xb7   : > { %3004 = vmatprep.mubr.msk.bf16.mxu0 %vm296_vm0, %v2988_v4  ;;  %3006 = vmatprep.mubr.msk.bf16.mxu1 %vm296_vm0, %v2992_v48  ;;  %v2994_v56 = vcombine.high %v2265_v59, %v2279_v13 }
  0xb9   : > { %2407 = vmatpush1.bf16.msra.mxu0 %v3159_v51  ;;  %3044 = vmatpush1.bf16.msra.mxu1 %v3159_v51 }
  0xba   : > { %2422 = vmatprep.subr.bf16.mxu0 %v3297_v1  ;;  %3036 = vmatprep.subr.bf16.mxu1 %v3297_v1  ;;  %v2993_v1 = vcombine.low %v2265_v59, %v2279_v13 }
  0xbd   : > { %2423 = vmatpush2.bf16.msra.mxu0 %v3160_v58  ;;  %3045 = vmatpush2.bf16.msra.mxu1 %v3160_v58 }
  0xc0   : > { %2425 = vmatmul.mubr.bf16.vlgmr.msra.gmra.mxu0 %v2987_v38  ;;  %2441 = vmatmul.mubr.bf16.vlgmr.msra.gmra.mxu1 %v2991_v57 }
  0xc1   : > { %3005 = vmatprep.mubr.msk.bf16.mxu0 %vm296_vm0, %v2990_v60  ;;  %3007 = vmatprep.mubr.msk.bf16.mxu1 %vm296_vm0, %v2994_v56 }
  0xc8   : > { %2433 = vmatmul.mubr.bf16.gmra.mxu0 %v2989_v61  ;;  %2449 = vmatmul.mubr.bf16.gmra.mxu1 %v2993_v1 }
  0xf0   : > { %v343_v62 = vpop.f32.mrf.mxu0  ;;  %v4025_v22 = vpop.f32.mrf.mxu1 }
  0xf1   : > { %v344_v44 = vadd.f32 %v4022_v37, %v343_v62 }
  0xf2   : > { %v345_v5 = vpop.f32.mrf.mxu0  ;;  %v729_v7 = vpop.f32.mrf.mxu1 }
  0xf3   : > { %v2640_v6 = vmul.f32 -1.442695, %v344_v44 }
  0xf4   : > { %v346_v8 = vpop.f32.mrf.mxu0  ;;  %v4028_v15 = vpop.f32.mrf.mxu1 }
  0xf5   : > { %3161 = vpow2.f32 %v2640_v6  ;;  %v347_v14 = vadd.f32 %v4022_v37, %v346_v8 }
  0xf6   : > { %v348_v3 = vpop.f32.mrf.mxu0  ;;  %v732_v18 = vpop.f32.mrf.mxu1 }
  0xf7   : > { %v2641_v17 = vmul.f32 -1.442695, %v347_v14 }
  0xf8   : > { %v351_v9 = vpop.f32.mrf.mxu0  ;;  %v4031_v16 = vpop.f32.mrf.mxu1 }
  0xf9   : > { %3163 = vpow2.f32 %v2641_v17  ;;  %v352_v19 = vadd.f32 %v4022_v37, %v351_v9 }
  0xfa   : > { %v353_v39 = vpop.f32.mrf.mxu0  ;;  %v737_v23 = vpop.f32.mrf.mxu1 }
  0xfb   : > { %v2642_v21 = vmul.f32 -1.442695, %v352_v19 }
  0xfc   : > { %v354_v12 = vpop.f32.mrf.mxu0  ;;  %v4034_v27 = vpop.f32.mrf.mxu1 }
  0xfd   : > { %3165 = vpow2.f32 %v2642_v21  ;;  %v355_v26 = vadd.f32 %v4022_v37, %v354_v12 }
  0xfe   : > { %v356_v28 = vpop.f32.mrf.mxu0  ;;  %v740_v25 = vpop.f32.mrf.mxu1 }
  0xff   : > { %v2643_v43 = vmul.f32 -1.442695, %v355_v26 }
 0x100   : > { %v359_v29 = vpop.f32.mrf.mxu0  ;;  %v4037_v31 = vpop.f32.mrf.mxu1 }
 0x101   : > { %3167 = vpow2.f32 %v2643_v43  ;;  %v360_v30 = vadd.f32 %v4022_v37, %v359_v29 }
 0x102   : > { %v3162_v34 = vpop.eup %3161  ;;  %v361_v33 = vpop.f32.mrf.mxu0 }
 0x103   : > { %v398_v49 = vadd.f32 1.0, %v3162_v34  ;;  %v2644_v20 = vmul.f32 -1.442695, %v360_v30  ;;  %v745_v36 = vpop.f32.mrf.mxu1 }
 0x104   : > { %v362_v42 = vpop.f32.mrf.mxu0 }
 0x105   : > { %3169 = vrcp.f32 %v398_v49  ;;  %v363_v10 = vadd.f32 %v4022_v37, %v362_v42  ;;  %v4040_v0 = vpop.f32.mrf.mxu1 }
 0x106   : > { %v3164_v63 = vpop.eup %3163  ;;  %3171 = vpow2.f32 %v2644_v20  ;;  %v364_v45 = vpop.f32.mrf.mxu0 }
 0x107   : > { %v399_v46 = vadd.f32 1.0, %v3164_v63  ;;  %v2645_v4 = vmul.f32 -1.442695, %v363_v10  ;;  %v748_v32 = vpop.f32.mrf.mxu1 }
 0x108   : > { %v367_v47 = vpop.f32.mrf.mxu0 }
 0x109   : > { %3173 = vrcp.f32 %v399_v46  ;;  %v368_v11 = vadd.f32 %v4022_v37, %v367_v47  ;;  %v4043_v48 = vpop.f32.mrf.mxu1 }
 0x10a   : > { %v3166_v51 = vpop.eup %3165  ;;  %3175 = vpow2.f32 %v2645_v4  ;;  %v369_v52 = vpop.f32.mrf.mxu0 }
 0x10b   : > { %v400_v35 = vadd.f32 1.0, %v3166_v51  ;;  %v2646_v2 = vmul.f32 -1.442695, %v368_v11  ;;  %v753_v53 = vpop.f32.mrf.mxu1 }
 0x10c   : > { %v370_v24 = vpop.f32.mrf.mxu0 }
 0x10d   : > { %3177 = vrcp.f32 %v400_v35  ;;  %v371_v54 = vadd.f32 %v4022_v37, %v370_v24  ;;  %v4047_v55 = vpop.f32.mrf.mxu1 }
 0x10e   : > { %v3168_v50 = vpop.eup %3167  ;;  %3179 = vpow2.f32 %v2646_v2  ;;  %v372_v58 = vpop.f32.mrf.mxu0 }
 0x10f   : > { %v401_v40 = vadd.f32 1.0, %v3168_v50  ;;  %v2647_v41 = vmul.f32 -1.442695, %v371_v54  ;;  %v756_v59 = vpop.f32.mrf.mxu1 }
 0x111   : > { %3181 = vrcp.f32 %v401_v40 }
 0x112   : > { %v3170_v13 = vpop.eup %3169  ;;  %3183 = vpow2.f32 %v2647_v41 }
 0x113   : > { %v3172_v38 = vpop.eup %3171  ;;  %422 = vst.msk [vmem:[%s4052_s15] sm:$0xff] %vm296_vm0, %v3170_v13 }
 0x114   : > { %v402_v57 = vadd.f32 1.0, %v3172_v38  ;;  %v894_v60 = vpop.f32.mrf.mxu0  ;;  %v4057_v61 = vpop.f32.mrf.mxu1 }
 0x115   : > { %v895_v56 = vadd.f32 %v894_v60, %v4025_v22 }
 0x116   : > { %v3174_v1 = vpop.eup %3173  ;;  %3185 = vrcp.f32 %v402_v57  ;;  %v896_v62 = vpop.f32.mrf.mxu0 }
 0x117   : > { %v3176_v44 = vpop.eup %3175  ;;  %423 = vst.msk [vmem:[%s4052_s15 + $0x8] sm:$0xff] %vm296_vm0, %v3174_v1  ;;  %v932_v5 = vadd.f32 %v4022_v37, %v895_v56  ;;  %v1190_v6 = vpop.f32.mrf.mxu1 }
 0x118   : > { %v403_v7 = vadd.f32 1.0, %v3176_v44  ;;  %v897_v8 = vpop.f32.mrf.mxu0 }
 0x119   : > { %v2727_v14 = vmul.f32 -1.442695, %v932_v5  ;;  %v898_v3 = vadd.f32 %v897_v8, %v4028_v15  ;;  %v4063_v17 = vpop.f32.mrf.mxu1 }
 0x11a   : > { %v3178_v22 = vpop.eup %3177  ;;  %3187 = vrcp.f32 %v403_v7  ;;  %v899_v18 = vpop.f32.mrf.mxu0 }
 0x11b   : > { %v3180_v9 = vpop.eup %3179  ;;  %424 = vst.msk [vmem:[%s4052_s15 + $0x10] sm:$0xff] %vm296_vm0, %v3178_v22  ;;  %3189 = vpow2.f32 %v2727_v14  ;;  %v933_v19 = vadd.f32 %v4022_v37, %v898_v3  ;;  %v1193_v39 = vpop.f32.mrf.mxu1 }
 0x11c   : > { %v404_v21 = vadd.f32 1.0, %v3180_v9  ;;  %v902_v23 = vpop.f32.mrf.mxu0 }
 0x11d   : > { %v2728_v12 = vmul.f32 -1.442695, %v933_v19  ;;  %v903_v26 = vadd.f32 %v902_v23, %v4031_v16  ;;  %v4069_v28 = vpop.f32.mrf.mxu1 }
 0x11e   : > { %v3182_v15 = vpop.eup %3181  ;;  %3191 = vrcp.f32 %v404_v21  ;;  %v904_v43 = vpop.f32.mrf.mxu0 }
 0x11f   : > { %v3184_v25 = vpop.eup %3183  ;;  %425 = vst.msk [vmem:[%s4052_s15 + $0x18] sm:$0xff] %vm296_vm0, %v3182_v15  ;;  %3193 = vpow2.f32 %v2728_v12  ;;  %v934_v29 = vadd.f32 %v4022_v37, %v903_v26  ;;  %v1198_v30 = vpop.f32.mrf.mxu1 }
 0x120   : > { %v405_v34 = vadd.f32 1.0, %v3184_v25  ;;  %v905_v33 = vpop.f32.mrf.mxu0 }
 0x121   : > { %v2729_v49 = vmul.f32 -1.442695, %v934_v29  ;;  %v906_v20 = vadd.f32 %v905_v33, %v4034_v27  ;;  %v4075_v36 = vpop.f32.mrf.mxu1 }
 0x122   : > { %3195 = vrcp.f32 %v405_v34  ;;  %v907_v16 = vpop.f32.mrf.mxu0 }
 0x123   : > { %v3186_v42 = vpop.eup %3185  ;;  %3197 = vpow2.f32 %v2729_v49  ;;  %v935_v10 = vadd.f32 %v4022_v37, %v906_v20  ;;  %v1201_v63 = vpop.f32.mrf.mxu1 }
 0x124   : > { %426 = vst.msk [vmem:[%s4052_s15 + $0x20] sm:$0xff] %vm296_vm0, %v3186_v42  ;;  %v910_v45 = vpop.f32.mrf.mxu0 }
 0x125   : > { %v2730_v46 = vmul.f32 -1.442695, %v935_v10  ;;  %v911_v4 = vadd.f32 %v910_v45, %v4037_v31  ;;  %v4081_v32 = vpop.f32.mrf.mxu1 }
 0x126   : > { %v912_v47 = vpop.f32.mrf.mxu0 }
 0x127   : > { %v3188_v27 = vpop.eup %3187  ;;  %3199 = vpow2.f32 %v2730_v46  ;;  %v936_v11 = vadd.f32 %v4022_v37, %v911_v4  ;;  %v1206_v51 = vpop.f32.mrf.mxu1 }
 0x128   : > { %v3190_v52 = vpop.eup %3189  ;;  %427 = vst.msk [vmem:[%s4052_s15 + $0x28] sm:$0xff] %vm296_vm0, %v3188_v27  ;;  %v913_v35 = vpop.f32.mrf.mxu0 }
 0x129   : > { %v964_v2 = vadd.f32 1.0, %v3190_v52  ;;  %v2731_v53 = vmul.f32 -1.442695, %v936_v11  ;;  %v914_v24 = vadd.f32 %v913_v35, %v4040_v0  ;;  %v4087_v54 = vpop.f32.mrf.mxu1 }
 0x12a   : > { %v915_v31 = vpop.f32.mrf.mxu0 }
 0x12b   : > { %v3192_v50 = vpop.eup %3191  ;;  %3201 = vrcp.f32 %v964_v2  ;;  %v937_v58 = vadd.f32 %v4022_v37, %v914_v24  ;;  %v1209_v40 = vpop.f32.mrf.mxu1 }
 0x12c   : > { %v3194_v41 = vpop.eup %3193  ;;  %428 = vst.msk [vmem:[%s4052_s15 + $0x30] sm:$0xff] %vm296_vm0, %v3192_v50  ;;  %3203 = vpow2.f32 %v2731_v53  ;;  %v918_v59 = vpop.f32.mrf.mxu0 }
 0x12d   : > { %v965_v13 = vadd.f32 1.0, %v3194_v41  ;;  %v2732_v38 = vmul.f32 -1.442695, %v937_v58  ;;  %v919_v57 = vadd.f32 %v918_v59, %v4043_v48  ;;  %v4093_v60 = vpop.f32.mrf.mxu1 }
 0x12e   : > { %v920_v0 = vpop.f32.mrf.mxu0 }
 0x12f   : > { %v3196_v56 = vpop.eup %3195  ;;  %3205 = vrcp.f32 %v965_v13  ;;  %v938_v1 = vadd.f32 %v4022_v37, %v919_v57  ;;  %v1214_v62 = vpop.f32.mrf.mxu1 }
 0x130   : > { %v3198_v44 = vpop.eup %3197  ;;  %429 = vst.msk [vmem:[%s4052_s15 + $0x38] sm:$0xff] %vm296_vm0, %v3196_v56  ;;  %3207 = vpow2.f32 %v2732_v38  ;;  %v921_v5 = vpop.f32.mrf.mxu0 }
 0x131   : > { %v966_v6 = vadd.f32 1.0, %v3198_v44  ;;  %v2733_v7 = vmul.f32 -1.442695, %v938_v1  ;;  %v922_v8 = vadd.f32 %v921_v5, %v4047_v55  ;;  %v4099_v14 = vpop.f32.mrf.mxu1 }
 0x132   : > { %v923_v48 = vpop.f32.mrf.mxu0 }
 0x133   : > { %3209 = vrcp.f32 %v966_v6  ;;  %v939_v3 = vadd.f32 %v4022_v37, %v922_v8  ;;  %v1217_v22 = vpop.f32.mrf.mxu1 }
 0x134   : > { %v3200_v18 = vpop.eup %3199  ;;  %3211 = vpow2.f32 %v2733_v7 }
 0x135   : > { %v967_v9 = vadd.f32 1.0, %v3200_v18  ;;  %v2734_v19 = vmul.f32 -1.442695, %v939_v3 }
 0x137   : > { %3213 = vrcp.f32 %v967_v9 }
 0x138   : > { %v3202_v39 = vpop.eup %3201  ;;  %3215 = vpow2.f32 %v2734_v19  ;;  %v1355_v21 = vpop.f32.mrf.mxu0 }
 0x139   : > { %v3204_v23 = vpop.eup %3203  ;;  %2735 = vst.msk [vmem:[%s4052_s15 + $0x40] sm:$0xff] %vm296_vm0, %v3202_v39  ;;  %v1356_v55 = vadd.f32 %v1355_v21, %v4057_v61  ;;  %v4105_v12 = vpop.f32.mrf.mxu1 }
 0x13a   : > { %v968_v26 = vadd.f32 1.0, %v3204_v23  ;;  %v1357_v15 = vpop.f32.mrf.mxu0 }
 0x13b   : > { %v1393_v43 = vadd.f32 %v4022_v37, %v1356_v55  ;;  %v1754_v25 = vpop.f32.mrf.mxu1 }
 0x13c   : > { %v3206_v29 = vpop.eup %3205  ;;  %3217 = vrcp.f32 %v968_v26  ;;  %v1358_v30 = vpop.f32.mrf.mxu0 }
 0x13d   : > { %v3208_v34 = vpop.eup %3207  ;;  %2736 = vst.msk [vmem:[%s4052_s15 + $0x48] sm:$0xff] %vm296_vm0, %v3206_v29  ;;  %v2830_v33 = vmul.f32 -1.442695, %v1393_v43  ;;  %v1359_v49 = vadd.f32 %v1358_v30, %v4063_v17  ;;  %v4111_v20 = vpop.f32.mrf.mxu1 }
 0x13e   : > { %v969_v61 = vadd.f32 1.0, %v3208_v34  ;;  %v1360_v16 = vpop.f32.mrf.mxu0 }
 0x13f   : > { %3219 = vpow2.f32 %v2830_v33  ;;  %v1394_v42 = vadd.f32 %v4022_v37, %v1359_v49  ;;  %v1757_v10 = vpop.f32.mrf.mxu1 }
 0x140   : > { %v3210_v63 = vpop.eup %3209  ;;  %3221 = vrcp.f32 %v969_v61  ;;  %v1363_v45 = vpop.f32.mrf.mxu0 }
 0x141   : > { %v3212_v46 = vpop.eup %3211  ;;  %2737 = vst.msk [vmem:[%s4052_s15 + $0x50] sm:$0xff] %vm296_vm0, %v3210_v63  ;;  %v2831_v4 = vmul.f32 -1.442695, %v1394_v42  ;;  %v1364_v47 = vadd.f32 %v1363_v45, %v4069_v28  ;;  %v4117_v27 = vpop.f32.mrf.mxu1 }
 0x142   : > { %v970_v17 = vadd.f32 1.0, %v3212_v46  ;;  %v1365_v11 = vpop.f32.mrf.mxu0 }
 0x143   : > { %3223 = vpow2.f32 %v2831_v4  ;;  %v1395_v51 = vadd.f32 %v4022_v37, %v1364_v47  ;;  %v1762_v52 = vpop.f32.mrf.mxu1 }
 0x144   : > { %v3214_v35 = vpop.eup %3213  ;;  %3225 = vrcp.f32 %v970_v17  ;;  %v1366_v2 = vpop.f32.mrf.mxu0 }
 0x145   : > { %v3216_v53 = vpop.eup %3215  ;;  %2738 = vst.msk [vmem:[%s4052_s15 + $0x58] sm:$0xff] %vm296_vm0, %v3214_v35  ;;  %v2832_v24 = vmul.f32 -1.442695, %v1395_v51  ;;  %v1367_v31 = vadd.f32 %v1366_v2, %v4075_v36  ;;  %v4123_v50 = vpop.f32.mrf.mxu1 }
 0x146   : > { %v971_v28 = vadd.f32 1.0, %v3216_v53  ;;  %v1368_v58 = vpop.f32.mrf.mxu0 }
 0x147   : > { %3227 = vpow2.f32 %v2832_v24  ;;  %v1396_v40 = vadd.f32 %v4022_v37, %v1367_v31  ;;  %v1765_v41 = vpop.f32.mrf.mxu1 }
 0x148   : > { %3229 = vrcp.f32 %v971_v28  ;;  %v1371_v59 = vpop.f32.mrf.mxu0 }
 0x149   : > { %v3218_v13 = vpop.eup %3217  ;;  %v2833_v38 = vmul.f32 -1.442695, %v1396_v40  ;;  %v1372_v57 = vadd.f32 %v1371_v59, %v4081_v32  ;;  %v4127_v0 = vpop.f32.mrf.mxu1 }
 0x14a   : > { %2739 = vst.msk [vmem:[%s4052_s15 + $0x60] sm:$0xff] %vm296_vm0, %v3218_v13  ;;  %v1373_v36 = vpop.f32.mrf.mxu0 }
 0x14b   : > { %3231 = vpow2.f32 %v2833_v38  ;;  %v1397_v56 = vadd.f32 %v4022_v37, %v1372_v57  ;;  %v1770_v1 = vpop.f32.mrf.mxu1 }
 0x14c   : > { %v3220_v62 = vpop.eup %3219  ;;  %v1374_v44 = vpop.f32.mrf.mxu0 }
 0x14d   : > { %v3222_v5 = vpop.eup %3221  ;;  %v1425_v6 = vadd.f32 1.0, %v3220_v62  ;;  %v2834_v7 = vmul.f32 -1.442695, %v1397_v56  ;;  %v1375_v8 = vadd.f32 %v1374_v44, %v4087_v54  ;;  %v4133_v48 = vpop.f32.mrf.mxu1 }
 0x14e   : > { %2740 = vst.msk [vmem:[%s4052_s15 + $0x68] sm:$0xff] %vm296_vm0, %v3222_v5  ;;  %v1376_v32 = vpop.f32.mrf.mxu0 }
 0x14f   : > { %3233 = vrcp.f32 %v1425_v6  ;;  %v1398_v3 = vadd.f32 %v4022_v37, %v1375_v8  ;;  %v1773_v22 = vpop.f32.mrf.mxu1 }
 0x150   : > { %v3224_v18 = vpop.eup %3223  ;;  %3235 = vpow2.f32 %v2834_v7  ;;  %v1379_v9 = vpop.f32.mrf.mxu0 }
 0x151   : > { %v3226_v19 = vpop.eup %3225  ;;  %v1426_v39 = vadd.f32 1.0, %v3224_v18  ;;  %v2835_v21 = vmul.f32 -1.442695, %v1398_v3  ;;  %v1380_v23 = vadd.f32 %v1379_v9, %v4093_v60  ;;  %v4139_v55 = vpop.f32.mrf.mxu1 }
 0x152   : > { %2741 = vst.msk [vmem:[%s4052_s15 + $0x70] sm:$0xff] %vm296_vm0, %v3226_v19  ;;  %v1381_v54 = vpop.f32.mrf.mxu0 }
 0x153   : > { %3237 = vrcp.f32 %v1426_v39  ;;  %v1399_v26 = vadd.f32 %v4022_v37, %v1380_v23  ;;  %v1778_v15 = vpop.f32.mrf.mxu1 }
 0x154   : > { %v3228_v43 = vpop.eup %3227  ;;  %3239 = vpow2.f32 %v2835_v21  ;;  %v1382_v25 = vpop.f32.mrf.mxu0 }
 0x155   : > { %v3230_v29 = vpop.eup %3229  ;;  %v1427_v30 = vadd.f32 1.0, %v3228_v43  ;;  %v2836_v34 = vmul.f32 -1.442695, %v1399_v26  ;;  %v1383_v33 = vadd.f32 %v1382_v25, %v4099_v14  ;;  %v4145_v49 = vpop.f32.mrf.mxu1 }
 0x156   : > { %2742 = vst.msk [vmem:[%s4052_s15 + $0x78] sm:$0xff] %vm296_vm0, %v3230_v29  ;;  %v1384_v60 = vpop.f32.mrf.mxu0 }
 0x157   : > { %3241 = vrcp.f32 %v1427_v30  ;;  %v1400_v61 = vadd.f32 %v4022_v37, %v1383_v33  ;;  %v1781_v16 = vpop.f32.mrf.mxu1 }
 0x158   : > { %v3232_v42 = vpop.eup %3231  ;;  %3243 = vpow2.f32 %v2836_v34 }
 0x159   : > { %v1428_v10 = vadd.f32 1.0, %v3232_v42  ;;  %v2837_v63 = vmul.f32 -1.442695, %v1400_v61 }
 0x15b   : > { %3245 = vrcp.f32 %v1428_v10 }
 0x15c   : > { %v3234_v45 = vpop.eup %3233  ;;  %3247 = vpow2.f32 %v2837_v63  ;;  %v1919_v46 = vpop.f32.mrf.mxu0 }
 0x15d   : > { %v3236_v14 = vpop.eup %3235  ;;  %2838 = vst.msk [vmem:[%s4052_s15 + $0x80] sm:$0xff] %vm296_vm0, %v3234_v45  ;;  %v2113_v4 = vpop.f32.mrf.mxu1  ;;  %v1920_v34 = vadd.f32 %v1919_v46, %v4105_v12 }
 0x15e   : > { %v1429_v47 = vadd.f32 1.0, %v3236_v14  ;;  %v1921_v17 = vpop.f32.mrf.mxu0 }
 0x15f   : > { %v2115_v11 = vpop.f32.mrf.mxu1  ;;  %v2144_v61 = vadd.f32 %v2113_v4, %v1920_v34 }
 0x160   : > { %v3238_v51 = vpop.eup %3237  ;;  %3249 = vrcp.f32 %v1429_v47  ;;  %v1922_v52 = vpop.f32.mrf.mxu0 }
 0x161   : > { %v3240_v35 = vpop.eup %3239  ;;  %2839 = vst.msk [vmem:[%s4052_s15 + $0x88] sm:$0xff] %vm296_vm0, %v3238_v51  ;;  %v2116_v2 = vpop.f32.mrf.mxu1  ;;  %v1923_v16 = vadd.f32 %v1922_v52, %v4111_v20 }
 0x162   : > { %v1430_v53 = vadd.f32 1.0, %v3240_v35  ;;  %v1924_v24 = vpop.f32.mrf.mxu0 }
 0x163   : > { %v2118_v31 = vpop.f32.mrf.mxu1  ;;  %v2145_v11 = vadd.f32 %v2116_v2, %v1923_v16 }
 0x164   : > { %v3242_v28 = vpop.eup %3241  ;;  %3251 = vrcp.f32 %v1430_v53  ;;  %v1927_v58 = vpop.f32.mrf.mxu0 }
 0x165   : > { %v3244_v40 = vpop.eup %3243  ;;  %2840 = vst.msk [vmem:[%s4052_s15 + $0x90] sm:$0xff] %vm296_vm0, %v3242_v28  ;;  %v4156_v41 = vpop.f32.mrf.mxu1  ;;  %v1928_v51 = vadd.f32 %v1927_v58, %v4117_v27 }
 0x166   : > { %v1431_v59 = vadd.f32 1.0, %v3244_v40  ;;  %v1929_v13 = vpop.f32.mrf.mxu0 }
 0x167   : > { %v2123_v38 = vpop.f32.mrf.mxu1  ;;  %v2146_v40 = vadd.f32 %v4156_v41, %v1928_v51 }
 0x168   : > { %v3246_v57 = vpop.eup %3245  ;;  %3253 = vrcp.f32 %v1431_v59  ;;  %v1930_v36 = vpop.f32.mrf.mxu0 }
 0x169   : > { %v3248_v56 = vpop.eup %3247  ;;  %2841 = vst.msk [vmem:[%s4052_s15 + $0x98] sm:$0xff] %vm296_vm0, %v3246_v57  ;;  %v4160_v1 = vpop.f32.mrf.mxu1  ;;  %v1931_v2 = vadd.f32 %v1930_v36, %v4123_v50 }
 0x16a   : > { %v1432_v62 = vadd.f32 1.0, %v3248_v56  ;;  %v1932_v44 = vpop.f32.mrf.mxu0 }
 0x16b   : > { %v2126_v5 = vpop.f32.mrf.mxu1  ;;  %v2147_v41 = vadd.f32 %v4160_v1, %v1931_v2 }
 0x16c   : > { %3255 = vrcp.f32 %v1432_v62  ;;  %v1935_v6 = vpop.f32.mrf.mxu0 }
 0x16d   : > { %v3250_v7 = vpop.eup %3249  ;;  %v2129_v8 = vpop.f32.mrf.mxu1  ;;  %v1936_v60 = vadd.f32 %v1935_v6, %v4127_v0 }
 0x16e   : > { %2842 = vst.msk [vmem:[%s4052_s15 + $0xa0] sm:$0xff] %vm296_vm0, %v3250_v7  ;;  %v1937_v32 = vpop.f32.mrf.mxu0 }
 0x16f   : > { %v2131_v3 = vpop.f32.mrf.mxu1  ;;  %v2148_v42 = vadd.f32 %v2129_v8, %v1936_v60 }
 0x170   : > { %v1938_v22 = vpop.f32.mrf.mxu0 }
 0x171   : > { %v3252_v18 = vpop.eup %3251  ;;  %v2132_v9 = vpop.f32.mrf.mxu1  ;;  %v1939_v10 = vadd.f32 %v1938_v22, %v4133_v48 }
 0x172   : > { %2843 = vst.msk [vmem:[%s4052_s15 + $0xa8] sm:$0xff] %vm296_vm0, %v3252_v18  ;;  %v1940_v19 = vpop.f32.mrf.mxu0 }
 0x173   : > { %v2134_v39 = vpop.f32.mrf.mxu1  ;;  %v2149_v46 = vadd.f32 %v2132_v9, %v1939_v10 }
 0x174   : > { %v1943_v21 = vpop.f32.mrf.mxu0 }
 0x175   : > { %v3254_v23 = vpop.eup %3253  ;;  %v2137_v54 = vpop.f32.mrf.mxu1  ;;  %v1944_v0 = vadd.f32 %v1943_v21, %v4139_v55 }
 0x176   : > { %2844 = vst.msk [vmem:[%s4052_s15 + $0xb0] sm:$0xff] %vm296_vm0, %v3254_v23  ;;  %v1945_v26 = vpop.f32.mrf.mxu0 }
 0x177   : > { %v2139_v15 = vpop.f32.mrf.mxu1  ;;  %v2150_v59 = vadd.f32 %v2137_v54, %v1944_v0 }
 0x178   : > { %v1946_v43 = vpop.f32.mrf.mxu0 }
 0x179   : > { %v3256_v25 = vpop.eup %3255  ;;  %v2140_v29 = vpop.f32.mrf.mxu1  ;;  %v1947_v55 = vadd.f32 %v1946_v43, %v4145_v49 }
 0x17a   : > { %2845 = vst.msk [vmem:[%s4052_s15 + $0xb8] sm:$0xff] %vm296_vm0, %v3256_v25  ;;  %v1948_v30 = vpop.f32.mrf.mxu0 }
 0x17b   : > { %v2142_v33 = vpop.f32.mrf.mxu1  ;;  %v2151_v7 = vadd.f32 %v2140_v29, %v1947_v55 }
 0x180   : > { %v2426_v63 = vpop.f32.mrf.mxu0  ;;  %v2442_v14 = vpop.f32.mrf.mxu1 }
 0x181   : > { %v2457_v45 = vadd.f32 %v2426_v63, %v2144_v61  ;;  %v2461_v47 = vadd.f32 %v2442_v14, %v2148_v42 }
 0x182   : > { %v2428_v17 = vpop.f32.mrf.mxu0  ;;  %v2444_v12 = vpop.f32.mrf.mxu1 }
 0x183   : > { %v2472_v35 = vadd.f32 %v4022_v37, %v2457_v45  ;;  %v2476_v4 = vadd.f32 %v4022_v37, %v2461_v47 }
 0x184   : > { %v2429_v20 = vpop.f32.mrf.mxu0  ;;  %v2445_v48 = vpop.f32.mrf.mxu1 }
 0x185   : > { %v3009_v52 = vmul.f32 -1.442695, %v2472_v35  ;;  %v2458_v53 = vadd.f32 %v2429_v20, %v2145_v11  ;;  %v3013_v24 = vmul.f32 -1.442695, %v2476_v4  ;;  %v2462_v31 = vadd.f32 %v2445_v48, %v2149_v46 }
 0x186   : > { %v2431_v28 = vpop.f32.mrf.mxu0  ;;  %v2447_v58 = vpop.f32.mrf.mxu1 }
 0x187   : > { %3257 = vpow2.f32 %v3009_v52  ;;  %v2473_v27 = vadd.f32 %v4022_v37, %v2458_v53  ;;  %v2477_v13 = vadd.f32 %v4022_v37, %v2462_v31 }
 0x188   : > { %3259 = vpow2.f32 %v3013_v24  ;;  %v2434_v38 = vpop.f32.mrf.mxu0  ;;  %v2450_v62 = vpop.f32.mrf.mxu1 }
 0x189   : > { %v3010_v57 = vmul.f32 -1.442695, %v2473_v27  ;;  %v2459_v56 = vadd.f32 %v2434_v38, %v2146_v40  ;;  %v3014_v44 = vmul.f32 -1.442695, %v2477_v13  ;;  %v2463_v5 = vadd.f32 %v2450_v62, %v2150_v59 }
 0x18a   : > { %v2436_v6 = vpop.f32.mrf.mxu0  ;;  %v2452_v36 = vpop.f32.mrf.mxu1 }
 0x18b   : > { %3261 = vpow2.f32 %v3010_v57  ;;  %v2474_v50 = vadd.f32 %v4022_v37, %v2459_v56  ;;  %v2478_v49 = vadd.f32 %v4022_v37, %v2463_v5 }
 0x18c   : > { %3263 = vpow2.f32 %v3014_v44  ;;  %v2437_v8 = vpop.f32.mrf.mxu0  ;;  %v2453_v22 = vpop.f32.mrf.mxu1 }
 0x18d   : > { %v3011_v32 = vmul.f32 -1.442695, %v2474_v50  ;;  %v2460_v3 = vadd.f32 %v2437_v8, %v2147_v41  ;;  %v3015_v18 = vmul.f32 -1.442695, %v2478_v49  ;;  %v2464_v9 = vadd.f32 %v2453_v22, %v2151_v7 }
 0x18e   : > { %v2439_v19 = vpop.f32.mrf.mxu0  ;;  %v2455_v21 = vpop.f32.mrf.mxu1 }
 0x18f   : > { %3265 = vpow2.f32 %v3011_v32  ;;  %v2475_v39 = vadd.f32 %v4022_v37, %v2460_v3  ;;  %v2479_v1 = vadd.f32 %v4022_v37, %v2464_v9 }
 0x190   : > { %3267 = vpow2.f32 %v3015_v18 }
 0x191   : > { %v3012_v23 = vmul.f32 -1.442695, %v2475_v39  ;;  %v3016_v54 = vmul.f32 -1.442695, %v2479_v1 }
 0x193   : > { %3269 = vpow2.f32 %v3012_v23 }
 0x194   : > { %v3258_v26 = vpop.eup %3257  ;;  %3271 = vpow2.f32 %v3016_v54 }
 0x195   : > { %v3260_v15 = vpop.eup %3259  ;;  %v2504_v43 = vadd.f32 1.0, %v3258_v26 }
 0x196   : > { %v2508_v25 = vadd.f32 1.0, %v3260_v15 }
 0x197   : > { %3273 = vrcp.f32 %v2504_v43 }
 0x198   : > { %v3262_v29 = vpop.eup %3261  ;;  %3275 = vrcp.f32 %v2508_v25 }
 0x199   : > { %v3264_v30 = vpop.eup %3263  ;;  %v2505_v34 = vadd.f32 1.0, %v3262_v29 }
 0x19a   : > { %v2509_v33 = vadd.f32 1.0, %v3264_v30 }
 0x19b   : > { %3277 = vrcp.f32 %v2505_v34 }
 0x19c   : > { %v3266_v60 = vpop.eup %3265  ;;  %3279 = vrcp.f32 %v2509_v33 }
 0x19d   : > { %v3268_v37 = vpop.eup %3267  ;;  %v2506_v61 = vadd.f32 1.0, %v3266_v60 }
 0x19e   : > { %v2510_v16 = vadd.f32 1.0, %v3268_v37 }
 0x19f   : > { %3281 = vrcp.f32 %v2506_v61 }
 0x1a0   : > { %v3270_v42 = vpop.eup %3269  ;;  %3283 = vrcp.f32 %v2510_v16 }
 0x1a1   : > { %v3272_v10 = vpop.eup %3271  ;;  %v2507_v63 = vadd.f32 1.0, %v3270_v42 }
 0x1a2   : > { %v2511_v45 = vadd.f32 1.0, %v3272_v10 }
 0x1a3   : > { %3285 = vrcp.f32 %v2507_v63 }
 0x1a4   : > { %v3274_v14 = vpop.eup %3273  ;;  %3287 = vrcp.f32 %v2511_v45 }
 0x1a5   : > { %v3276_v47 = vpop.eup %3275  ;;  %3017 = vst.msk [vmem:[%s4052_s15 + $0xc0] sm:$0xff] %vm296_vm0, %v3274_v14 }
 0x1a6   : > { %3021 = vst.msk [vmem:[%s4052_s15 + $0xe0] sm:$0xff] %vm296_vm0, %v3276_v47 }
 0x1a8   : > { %v3278_v17 = vpop.eup %3277 }
 0x1a9   : > { %v3280_v11 = vpop.eup %3279  ;;  %3018 = vst.msk [vmem:[%s4052_s15 + $0xc8] sm:$0xff] %vm296_vm0, %v3278_v17 }
 0x1aa   : > { %3022 = vst.msk [vmem:[%s4052_s15 + $0xe8] sm:$0xff] %vm296_vm0, %v3280_v11 }
 0x1ac   : > { %v3282_v51 = vpop.eup %3281 }
 0x1ad   : > { %v3284_v35 = vpop.eup %3283  ;;  %3019 = vst.msk [vmem:[%s4052_s15 + $0xd0] sm:$0xff] %vm296_vm0, %v3282_v51 }
 0x1ae   : > { %3023 = vst.msk [vmem:[%s4052_s15 + $0xf0] sm:$0xff] %vm296_vm0, %v3284_v35 }
 0x1b0   : > { %v3286_v12 = vpop.eup %3285 }
 0x1b1   : > { %v3288_v46 = vpop.eup %3287  ;;  %3020 = vst.msk [vmem:[%s4052_s15 + $0xd8] sm:$0xff] %vm296_vm0, %v3286_v12 }
 0x1b2   : > { %3024 = vst.msk [vmem:[%s4052_s15 + $0xf8] sm:$0xff] %vm296_vm0, %v3288_v46 }
 0x1b3 PF: > { %s13_s12 = sadd.s32 1, %s3295_s12  }
 0x1b4   : > { %p10_p4 = scmp.ge.s32.totalorder %s13_s12, 4  }
 0x1b6   :  { %12 = sbr.rel (!%p10_p4) target bundleno = 1 (0x1), region = 74 }

</bundles_post_ra>
